<compile_context>
chip_gen: v7x
topology: tpu7x:2x2x1
jax: 0.10.0
libtpu: 0.0.40
codegen_flags: <defaults>
</compile_context>

<pallas_src>
import math

import jax
import jax.numpy as jnp
from jax.experimental import pallas as pl
from jax.experimental.pallas import tpu as pltpu

# ---- hyper-parameters implied by the PyTorch script ------------------------
D_MODEL = 4          # input_size == d_model
N_HEADS = 4          # num_heads
N_LAYERS = 2         # num_layers (encoder and decoder)
D_FF = 2048          # nn.TransformerEncoderLayer default dim_feedforward
OUT_SIZE = 4         # output_size
LN_EPS = 1e-5
BN_EPS = 1e-5

HEAD_DIM = D_MODEL // N_HEADS
assert D_MODEL % N_HEADS == 0
# The fused-head attention path below relies on head_dim == 1 (true for this
# module: d_model=4, nhead=4).
assert HEAD_DIM == 1

# ---- small test shapes ------------------------------------------------------
SEQ = 8
BATCH = 2

# ---- packed-operand layout ---------------------------------------------------
# misc slab: (MISC_TILES, 8, 128) f32
#   tiles 0..5  : attention params, tile = attn_kind * N_LAYERS + layer
#                 (attn_kind: 0 = enc self, 1 = dec self, 2 = dec cross)
#                   rows 0..3, lanes 0..11  : W_in^T  (D, 3D)
#                   rows 0..3, lanes 12..15 : W_out^T (D, D)
#                   row 4,     lanes 0..11  : b_in
#                   row 4,     lanes 12..15 : b_out
#   tile 6      : LayerNorm params, row 0, lanes [(kind*L+l)*8 : +4] = weight,
#                 [+4 : +8] = bias (ln kinds: enc1, enc2, dec1, dec2, dec3)
#   tile 7      : head: rows 0..3 lanes 0..3 = fc_w^T; row 4 lanes 0..3 fc_b,
#                 4..7 bn_w, 8..11 bn_b, 12..15 bn_rm, 16..19 bn_rv
MISC_TILES = 8
LN_TILE = 6
HEAD_TILE = 7

# ff slab: (2, N_LAYERS, 16, D_FF), kind 0 = encoder FFN, 1 = decoder FFN
#   rows 0..3 : W1^T (D, F), rows 4..7 : W2^T (D, F),
#   row  8    : b1 (F,),      row  9   : b2 in lanes 0..D-1
FF_SLAB_ROWS = 16
FF_CHUNKS = 4
FF_CHUNK = D_FF // FF_CHUNKS

# Set to jnp.bfloat16 to halve the dominant FFN-weight DMA (accuracy caveat vs
# the f32 PyTorch reference); f32 keeps bit-faithful eval semantics.
FF_WEIGHT_DTYPE = jnp.float32


# ---- the fused kernel -------------------------------------------------------
def transformer_kernel(x_ref, misc_ref, ff_ref, out_ref):
    B, S, D = x_ref.shape
    N = B * S
    D3 = 3 * D
    H = N_HEADS

    xf = x_ref[...].reshape(N, D)                  # (B*S, D), row order b*S+s

    def layer_norm(x, ln_kind, l):
        off = (ln_kind * N_LAYERS + l) * 2 * D
        w = misc_ref[LN_TILE, 0:1, off:off + D]            # (1, D)
        b = misc_ref[LN_TILE, 0:1, off + D:off + 2 * D]    # (1, D)
        mu = jnp.mean(x, axis=-1, keepdims=True)
        var = jnp.mean((x - mu) ** 2, axis=-1, keepdims=True)
        return (x - mu) * jax.lax.rsqrt(var + LN_EPS) * w + b

    def mha(q_src, kv_src, attn_kind, l, *, self_attn):
        """PyTorch nn.MultiheadAttention (eval).  q_src/kv_src: (N, D) rows b*S+s."""
        t = attn_kind * N_LAYERS + l
        w_in = misc_ref[t, 0:D, 0:D3]              # (D, 3D)  pre-transposed in_proj
        w_out = misc_ref[t, 0:D, D3:D3 + D]        # (D, D)   pre-transposed out_proj
        b_in = misc_ref[t, D:D + 1, 0:D3]          # (1, 3D)
        b_out = misc_ref[t, D:D + 1, D3:D3 + D]    # (1, D)

        qkv_q = jnp.dot(q_src, w_in, preferred_element_type=jnp.float32) + b_in
        if self_attn:                              # self-attention: one fused QKV matmul
            qkv_kv = qkv_q
        else:                                      # cross-attention
            qkv_kv = jnp.dot(kv_src, w_in, preferred_element_type=jnp.float32) + b_in
        q = qkv_q[:, 0:D]
        k = qkv_kv[:, D:2 * D]
        v = qkv_kv[:, 2 * D:3 * D]

        scale = 1.0 / math.sqrt(D // H)            # == 1.0 here (head_dim == 1)
        if scale != 1.0:
            q = q * scale

        # head_dim == 1: scores for each (batch, head) are outer products of
        # scalars -> pure VPU broadcasting, softmax over the sublane (key) axis.
        q4 = q.reshape(B, S, H)
        k4 = k.reshape(B, S, H)
        v4 = v.reshape(B, S, H)
        s4 = q4[:, :, None, :] * k4[:, None, :, :]             # (B, Sq, Sk, H)
        s4 = s4 - jnp.max(s4, axis=2, keepdims=True)
        p4 = jnp.exp(s4)
        p4 = p4 / jnp.sum(p4, axis=2, keepdims=True)
        attn = jnp.sum(p4 * v4[:, None, :, :], axis=2)          # (B, Sq, H)
        attn = attn.reshape(N, D)
        return jnp.dot(attn, w_out, preferred_element_type=jnp.float32) + b_out

    def ffn(x, ff_kind, l):
        """Chunked over F: relu(x@W1_c + b1_c) consumed immediately by its FF2
        contribution (caps the live activation at 8 vregs per chunk)."""
        wdt = ff_ref.dtype
        xin = x.astype(wdt)
        acc = jnp.zeros((N, D), jnp.float32)
        for c in range(FF_CHUNKS):
            lo = c * FF_CHUNK
            hi = lo + FF_CHUNK
            w1c = ff_ref[ff_kind, l, 0:D, lo:hi]                 # (D, FC)
            w2tc = ff_ref[ff_kind, l, D:2 * D, lo:hi]            # (D, FC) == W2^T chunk
            b1c = ff_ref[ff_kind, l, 2 * D:2 * D + 1, lo:hi]     # (1, FC)
            h = jnp.dot(xin, w1c, preferred_element_type=jnp.float32)
            h = jnp.maximum(h + b1c.astype(jnp.float32), 0.0)    # relu (PyTorch default)
            acc = acc + jax.lax.dot_general(                      # contract the F axis of both
                h.astype(wdt), w2tc,
                dimension_numbers=(((1,), (1,)), ((), ())),
                preferred_element_type=jnp.float32)
        b2 = ff_ref[ff_kind, l, 2 * D + 1:2 * D + 2, 0:D]        # (1, D)
        return acc + b2.astype(jnp.float32)

    # ---------------- encoder (post-norm) ----------------
    mem = xf
    for l in range(N_LAYERS):
        mem = layer_norm(mem + mha(mem, mem, 0, l, self_attn=True), 0, l)
        mem = layer_norm(mem + ffn(mem, 0, l), 1, l)

    # ---------------- decoder (post-norm) ----------------
    y = xf
    for l in range(N_LAYERS):
        y = layer_norm(y + mha(y, y, 1, l, self_attn=True), 2, l)
        y = layer_norm(y + mha(y, mem, 2, l, self_attn=False), 3, l)
        y = layer_norm(y + ffn(y, 1, l), 4, l)

    # ------ head: fc on last time-step, eval-mode BatchNorm1d ------
    O = OUT_SIZE
    fc_w = misc_ref[HEAD_TILE, 0:D, 0:O]                    # (D, O)
    fc_b = misc_ref[HEAD_TILE, D:D + 1, 0:O]                # (1, O)
    bn_w = misc_ref[HEAD_TILE, D:D + 1, O:2 * O]
    bn_b = misc_ref[HEAD_TILE, D:D + 1, 2 * O:3 * O]
    bn_rm = misc_ref[HEAD_TILE, D:D + 1, 3 * O:4 * O]
    bn_rv = misc_ref[HEAD_TILE, D:D + 1, 4 * O:5 * O]

    last = y.reshape(B, S, D)[:, S - 1, :]                  # (B, D) == decoder_output[-1]
    z = jnp.dot(last, fc_w, preferred_element_type=jnp.float32) + fc_b
    out_ref[...] = (z - bn_rm) * jax.lax.rsqrt(bn_rv + BN_EPS) * bn_w + bn_b


# ---- wrapper ----------------------------------------------------------------
def transformer_forward(x, packed):
    """x: (S, B, D) (PyTorch batch_first=False). Returns (B, OUT_SIZE)."""
    xb = jnp.transpose(x.astype(jnp.float32), (1, 0, 2))   # (B, S, D): layout plumbing
    # TODO(synk): on v5e, if the up-front ff-slab DMA is still exposed after the
    # repack, move it to memory_space=pl.ANY and double-buffer per-layer 128 KiB
    # copies with pltpu.make_async_copy behind the first encoder layer.
    return pl.pallas_call(
        transformer_kernel,
        out_shape=jax.ShapeDtypeStruct((x.shape[1], OUT_SIZE), jnp.float32),
        in_specs=[pl.BlockSpec(memory_space=pltpu.MemorySpace.VMEM)] * 3,
        out_specs=pl.BlockSpec(memory_space=pltpu.MemorySpace.VMEM),
    )(xb, packed["misc"], packed["ff"])


# ---- parameter construction & packing ---------------------------------------
def init_params(key):
    """Deterministic synthetic parameters (shapes from the module __init__).

    Linear / projection matrices are stored pre-transposed to (in, out);
    the second FFN weight is stored as W2^T with shape (L, D, F) (lane-dense),
    which equals PyTorch's linear2.weight layout."""
    L, D, F, O = N_LAYERS, D_MODEL, D_FF, OUT_SIZE
    keys = iter(jax.random.split(key, 40))

    def nrm(shape, scale=0.1):
        return scale * jax.random.normal(next(keys), shape, dtype=jnp.float32)

    return dict(
        # encoder layers (stacked over L)
        enc_in_w=nrm((L, D, 3 * D)), enc_in_b=nrm((L, 3 * D)),
        enc_out_w=nrm((L, D, D)), enc_out_b=nrm((L, D)),
        enc_ln1_w=jnp.ones((L, D), jnp.float32), enc_ln1_b=jnp.zeros((L, D), jnp.float32),
        enc_ff1_w=nrm((L, D, F)), enc_ff1_b=nrm((L, F)),
        enc_ff2_wT=nrm((L, D, F)), enc_ff2_b=nrm((L, D)),
        enc_ln2_w=jnp.ones((L, D), jnp.float32), enc_ln2_b=jnp.zeros((L, D), jnp.float32),
        # decoder layers (stacked over L)
        dec_sa_in_w=nrm((L, D, 3 * D)), dec_sa_in_b=nrm((L, 3 * D)),
        dec_sa_out_w=nrm((L, D, D)), dec_sa_out_b=nrm((L, D)),
        dec_ca_in_w=nrm((L, D, 3 * D)), dec_ca_in_b=nrm((L, 3 * D)),
        dec_ca_out_w=nrm((L, D, D)), dec_ca_out_b=nrm((L, D)),
        dec_ln1_w=jnp.ones((L, D), jnp.float32), dec_ln1_b=jnp.zeros((L, D), jnp.float32),
        dec_ln2_w=jnp.ones((L, D), jnp.float32), dec_ln2_b=jnp.zeros((L, D), jnp.float32),
        dec_ln3_w=jnp.ones((L, D), jnp.float32), dec_ln3_b=jnp.zeros((L, D), jnp.float32),
        dec_ff1_w=nrm((L, D, F)), dec_ff1_b=nrm((L, F)),
        dec_ff2_wT=nrm((L, D, F)), dec_ff2_b=nrm((L, D)),
        # final Linear(input_size, output_size) + BatchNorm1d(output_size)
        fc_w=nrm((D, O)), fc_b=nrm((1, O)),
        bn_w=jnp.ones((1, O), jnp.float32), bn_b=jnp.zeros((1, O), jnp.float32),
        bn_rm=jnp.zeros((1, O), jnp.float32), bn_rv=jnp.ones((1, O), jnp.float32),
    )


def pack_params(p):
    """Pack the 36 parameter arrays into 2 operands:
       misc (8, 8, 128) f32  : all attention / LN / head params, sublane-dense
       ff   (2, L, 16, 2048) : W1 | W2^T | b1 | b2 per FFN, sublane-dense."""
    L, D, F, O = N_LAYERS, D_MODEL, D_FF, OUT_SIZE
    D3 = 3 * D

    misc = jnp.zeros((MISC_TILES, 8, 128), jnp.float32)
    attn_sets = [
        (p["enc_in_w"], p["enc_in_b"], p["enc_out_w"], p["enc_out_b"]),
        (p["dec_sa_in_w"], p["dec_sa_in_b"], p["dec_sa_out_w"], p["dec_sa_out_b"]),
        (p["dec_ca_in_w"], p["dec_ca_in_b"], p["dec_ca_out_w"], p["dec_ca_out_b"]),
    ]
    for kind, (in_w, in_b, out_w, out_b) in enumerate(attn_sets):
        for l in range(L):
            t = kind * L + l
            misc = misc.at[t, 0:D, 0:D3].set(in_w[l])
            misc = misc.at[t, 0:D, D3:D3 + D].set(out_w[l])
            misc = misc.at[t, D, 0:D3].set(in_b[l])
            misc = misc.at[t, D, D3:D3 + D].set(out_b[l])

    ln_sets = [
        (p["enc_ln1_w"], p["enc_ln1_b"]), (p["enc_ln2_w"], p["enc_ln2_b"]),
        (p["dec_ln1_w"], p["dec_ln1_b"]), (p["dec_ln2_w"], p["dec_ln2_b"]),
        (p["dec_ln3_w"], p["dec_ln3_b"]),
    ]
    for kind, (w, b) in enumerate(ln_sets):
        for l in range(L):
            off = (kind * L + l) * 2 * D
            misc = misc.at[LN_TILE, 0, off:off + D].set(w[l])
            misc = misc.at[LN_TILE, 0, off + D:off + 2 * D].set(b[l])

    misc = misc.at[HEAD_TILE, 0:D, 0:O].set(p["fc_w"])
    misc = misc.at[HEAD_TILE, D, 0:O].set(p["fc_b"][0])
    misc = misc.at[HEAD_TILE, D, O:2 * O].set(p["bn_w"][0])
    misc = misc.at[HEAD_TILE, D, 2 * O:3 * O].set(p["bn_b"][0])
    misc = misc.at[HEAD_TILE, D, 3 * O:4 * O].set(p["bn_rm"][0])
    misc = misc.at[HEAD_TILE, D, 4 * O:5 * O].set(p["bn_rv"][0])

    ff = jnp.zeros((2, L, FF_SLAB_ROWS, F), jnp.float32)
    ff_sets = [
        (p["enc_ff1_w"], p["enc_ff1_b"], p["enc_ff2_wT"], p["enc_ff2_b"]),
        (p["dec_ff1_w"], p["dec_ff1_b"], p["dec_ff2_wT"], p["dec_ff2_b"]),
    ]
    for kind, (w1, b1, w2t, b2) in enumerate(ff_sets):
        for l in range(L):
            ff = ff.at[kind, l, 0:D, :].set(w1[l])
            ff = ff.at[kind, l, D:2 * D, :].set(w2t[l])
            ff = ff.at[kind, l, 2 * D, :].set(b1[l])
            ff = ff.at[kind, l, 2 * D + 1, 0:D].set(b2[l])
    ff = ff.astype(FF_WEIGHT_DTYPE)

    return dict(misc=misc, ff=ff)


if __name__ == "__main__":
    key = jax.random.PRNGKey(0)
    kx, kp = jax.random.split(key)
    # x is (seq, batch, d_model) — PyTorch batch_first=False convention.
    x = jax.random.normal(kx, (SEQ, BATCH, D_MODEL), dtype=jnp.float32)
    params = init_params(kp)
    packed = pack_params(params)          # done once, outside the jitted forward

    out = jax.jit(transformer_forward)(x, packed)
    out = jax.block_until_ready(out)

    assert out.shape == (BATCH, OUT_SIZE), out.shape
    assert bool(jnp.all(jnp.isfinite(out)))
    # TODO(synk): train-mode dropout / batch-statistics BatchNorm are not
    # reproduced (inference semantics implemented); kernel stays grid-less on a
    # single TensorCore (optimal on v5e/v6e and on v7x at this batch size).
    print("KERNEL_OK")
</pallas_src>

<mosaic_0001>
module attributes {stable_mosaic.version = 11 : i64} {
  func.func @transformer_kernel(%arg0: memref<2x8x4xf32, #tpu.memory_space<vmem>>, %arg1: memref<8x8x128xf32, #tpu.memory_space<vmem>>, %arg2: memref<2x2x16x2048xf32, #tpu.memory_space<vmem>>, %arg3: memref<2x4xf32, #tpu.memory_space<vmem>>) attributes {dimension_semantics = [], scalar_prefetch = 0 : i64, scratch_operands = 0 : i64, tpu.core_type = #tpu.core_type<tc>} {
    %c0 = arith.constant 0 : index
    %c0_0 = arith.constant 0 : index
    %c0_1 = arith.constant 0 : index
    %0 = vector.load %arg0[%c0, %c0_0, %c0_1] : memref<2x8x4xf32, #tpu.memory_space<vmem>>, vector<2x8x4xf32>
    %1 = vector.shape_cast %0 : vector<2x8x4xf32> to vector<16x4xf32>
    %c0_2 = arith.constant 0 : index
    %c0_3 = arith.constant 0 : index
    %c0_4 = arith.constant 0 : index
    %2 = vector.load %arg1[%c0_2, %c0_3, %c0_4] : memref<8x8x128xf32, #tpu.memory_space<vmem>>, vector<1x4x12xf32>
    %3 = vector.shape_cast %2 : vector<1x4x12xf32> to vector<4x12xf32>
    %c0_5 = arith.constant 0 : index
    %c0_6 = arith.constant 0 : index
    %c12 = arith.constant 12 : index
    %4 = vector.load %arg1[%c0_5, %c0_6, %c12] : memref<8x8x128xf32, #tpu.memory_space<vmem>>, vector<1x4x4xf32>
    %5 = vector.shape_cast %4 : vector<1x4x4xf32> to vector<4x4xf32>
    %c0_7 = arith.constant 0 : index
    %c4 = arith.constant 4 : index
    %c0_8 = arith.constant 0 : index
    %6 = vector.load %arg1[%c0_7, %c4, %c0_8] : memref<8x8x128xf32, #tpu.memory_space<vmem>>, vector<1x1x12xf32>
    %7 = vector.shape_cast %6 : vector<1x1x12xf32> to vector<1x12xf32>
    %c0_9 = arith.constant 0 : index
    %c4_10 = arith.constant 4 : index
    %c12_11 = arith.constant 12 : index
    %8 = vector.load %arg1[%c0_9, %c4_10, %c12_11] : memref<8x8x128xf32, #tpu.memory_space<vmem>>, vector<1x1x4xf32>
    %9 = vector.shape_cast %8 : vector<1x1x4xf32> to vector<1x4xf32>
    %cst = arith.constant dense<0.000000e+00> : vector<16x12xf32>
    %10 = tpu.matmul %1, %3, %cst {dimension_numbers = #tpu.dot_dimension_numbers<[1], [0], [0], [1], [0, 0, 1, 1], [], []>} : vector<16x4xf32>, vector<4x12xf32>, vector<16x12xf32> -> vector<16x12xf32>
    %11 = vector.broadcast %7 : vector<1x12xf32> to vector<16x12xf32>
    %12 = arith.addf %10, %11 : vector<16x12xf32>
    %13 = vector.extract_strided_slice %12 {offsets = [0, 0], sizes = [16, 4], strides = [1, 1]} : vector<16x12xf32> to vector<16x4xf32>
    %14 = vector.extract_strided_slice %12 {offsets = [0, 4], sizes = [16, 4], strides = [1, 1]} : vector<16x12xf32> to vector<16x4xf32>
    %15 = vector.extract_strided_slice %12 {offsets = [0, 8], sizes = [16, 4], strides = [1, 1]} : vector<16x12xf32> to vector<16x4xf32>
    %16 = vector.shape_cast %13 : vector<16x4xf32> to vector<2x8x4xf32>
    %17 = vector.shape_cast %14 : vector<16x4xf32> to vector<2x8x4xf32>
    %18 = vector.shape_cast %15 : vector<16x4xf32> to vector<2x8x4xf32>
    %19 = vector.shape_cast %16 : vector<2x8x4xf32> to vector<2x8x1x4xf32>
    %20 = vector.shape_cast %17 : vector<2x8x4xf32> to vector<2x1x8x4xf32>
    %21 = vector.broadcast %19 : vector<2x8x1x4xf32> to vector<2x8x8x4xf32>
    %22 = vector.broadcast %20 : vector<2x1x8x4xf32> to vector<2x8x8x4xf32>
    %23 = arith.mulf %21, %22 : vector<2x8x8x4xf32>
    %cst_12 = arith.constant dense<0xFF800000> : vector<2x8x4xf32>
    %24 = vector.multi_reduction <maximumf>, %23, %cst_12 [2] : vector<2x8x8x4xf32> to vector<2x8x4xf32>
    %25 = vector.shape_cast %24 : vector<2x8x4xf32> to vector<2x8x1x4xf32>
    %26 = vector.broadcast %25 : vector<2x8x1x4xf32> to vector<2x8x8x4xf32>
    %27 = arith.subf %23, %26 : vector<2x8x8x4xf32>
    %28 = math.exp %27 : vector<2x8x8x4xf32>
    %cst_13 = arith.constant dense<0.000000e+00> : vector<2x8x4xf32>
    %29 = vector.multi_reduction <add>, %28, %cst_13 [2] : vector<2x8x8x4xf32> to vector<2x8x4xf32>
    %30 = vector.shape_cast %29 : vector<2x8x4xf32> to vector<2x8x1x4xf32>
    %31 = vector.broadcast %30 : vector<2x8x1x4xf32> to vector<2x8x8x4xf32>
    %32 = arith.divf %28, %31 : vector<2x8x8x4xf32>
    %33 = vector.shape_cast %18 : vector<2x8x4xf32> to vector<2x1x8x4xf32>
    %34 = vector.broadcast %33 : vector<2x1x8x4xf32> to vector<2x8x8x4xf32>
    %35 = arith.mulf %32, %34 : vector<2x8x8x4xf32>
    %cst_14 = arith.constant dense<0.000000e+00> : vector<2x8x4xf32>
    %36 = vector.multi_reduction <add>, %35, %cst_14 [2] : vector<2x8x8x4xf32> to vector<2x8x4xf32>
    %37 = vector.shape_cast %36 : vector<2x8x4xf32> to vector<16x4xf32>
    %cst_15 = arith.constant dense<0.000000e+00> : vector<16x4xf32>
    %38 = tpu.matmul %37, %5, %cst_15 {dimension_numbers = #tpu.dot_dimension_numbers<[1], [0], [0], [1], [0, 0, 1, 1], [], []>} : vector<16x4xf32>, vector<4x4xf32>, vector<16x4xf32> -> vector<16x4xf32>
    %39 = vector.broadcast %9 : vector<1x4xf32> to vector<16x4xf32>
    %40 = arith.addf %38, %39 : vector<16x4xf32>
    %41 = arith.addf %1, %40 : vector<16x4xf32>
    %c6 = arith.constant 6 : index
    %c0_16 = arith.constant 0 : index
    %c0_17 = arith.constant 0 : index
    %42 = vector.load %arg1[%c6, %c0_16, %c0_17] : memref<8x8x128xf32, #tpu.memory_space<vmem>>, vector<1x1x4xf32>
    %43 = vector.shape_cast %42 : vector<1x1x4xf32> to vector<1x4xf32>
    %c6_18 = arith.constant 6 : index
    %c0_19 = arith.constant 0 : index
    %c4_20 = arith.constant 4 : index
    %44 = vector.load %arg1[%c6_18, %c0_19, %c4_20] : memref<8x8x128xf32, #tpu.memory_space<vmem>>, vector<1x1x4xf32>
    %45 = vector.shape_cast %44 : vector<1x1x4xf32> to vector<1x4xf32>
    %cst_21 = arith.constant dense<0.000000e+00> : vector<16xf32>
    %46 = vector.multi_reduction <add>, %41, %cst_21 [1] : vector<16x4xf32> to vector<16xf32>
    %47 = vector.shape_cast %46 : vector<16xf32> to vector<16x1xf32>
    %cst_22 = arith.constant 4.000000e+00 : f32
    %48 = vector.broadcast %cst_22 : f32 to vector<16x1xf32>
    %49 = arith.divf %47, %48 : vector<16x1xf32>
    %50 = vector.broadcast %49 : vector<16x1xf32> to vector<16x4xf32>
    %51 = arith.subf %41, %50 : vector<16x4xf32>
    %52 = arith.mulf %51, %51 : vector<16x4xf32>
    %cst_23 = arith.constant dense<0.000000e+00> : vector<16xf32>
    %53 = vector.multi_reduction <add>, %52, %cst_23 [1] : vector<16x4xf32> to vector<16xf32>
    %54 = vector.shape_cast %53 : vector<16xf32> to vector<16x1xf32>
    %cst_24 = arith.constant 4.000000e+00 : f32
    %55 = vector.broadcast %cst_24 : f32 to vector<16x1xf32>
    %56 = arith.divf %54, %55 : vector<16x1xf32>
    %57 = vector.broadcast %49 : vector<16x1xf32> to vector<16x4xf32>
    %58 = arith.subf %41, %57 : vector<16x4xf32>
    %cst_25 = arith.constant 9.99999974E-6 : f32
    %59 = vector.broadcast %cst_25 : f32 to vector<16x1xf32>
    %60 = arith.addf %56, %59 : vector<16x1xf32>
    %61 = math.rsqrt %60 : vector<16x1xf32>
    %62 = vector.broadcast %61 : vector<16x1xf32> to vector<16x4xf32>
    %63 = arith.mulf %58, %62 : vector<16x4xf32>
    %64 = vector.broadcast %43 : vector<1x4xf32> to vector<16x4xf32>
    %65 = arith.mulf %63, %64 : vector<16x4xf32>
    %66 = vector.broadcast %45 : vector<1x4xf32> to vector<16x4xf32>
    %67 = arith.addf %65, %66 : vector<16x4xf32>
    %cst_26 = arith.constant 0.000000e+00 : f32
    %68 = vector.broadcast %cst_26 : f32 to vector<16x4xf32>
    %c0_27 = arith.constant 0 : index
    %c0_28 = arith.constant 0 : index
    %c0_29 = arith.constant 0 : index
    %c0_30 = arith.constant 0 : index
    %69 = vector.load %arg2[%c0_27, %c0_28, %c0_29, %c0_30] : memref<2x2x16x2048xf32, #tpu.memory_space<vmem>>, vector<1x1x4x512xf32>
    %70 = vector.shape_cast %69 : vector<1x1x4x512xf32> to vector<4x512xf32>
    %c0_31 = arith.constant 0 : index
    %c0_32 = arith.constant 0 : index
    %c4_33 = arith.constant 4 : index
    %c0_34 = arith.constant 0 : index
    %71 = vector.load %arg2[%c0_31, %c0_32, %c4_33, %c0_34] : memref<2x2x16x2048xf32, #tpu.memory_space<vmem>>, vector<1x1x4x512xf32>
    %72 = vector.shape_cast %71 : vector<1x1x4x512xf32> to vector<4x512xf32>
    %c0_35 = arith.constant 0 : index
    %c0_36 = arith.constant 0 : index
    %c8 = arith.constant 8 : index
    %c0_37 = arith.constant 0 : index
    %73 = vector.load %arg2[%c0_35, %c0_36, %c8, %c0_37] : memref<2x2x16x2048xf32, #tpu.memory_space<vmem>>, vector<1x1x1x512xf32>
    %74 = vector.shape_cast %73 : vector<1x1x1x512xf32> to vector<1x512xf32>
    %cst_38 = arith.constant dense<0.000000e+00> : vector<16x512xf32>
    %75 = tpu.matmul %67, %70, %cst_38 {dimension_numbers = #tpu.dot_dimension_numbers<[1], [0], [0], [1], [0, 0, 1, 1], [], []>} : vector<16x4xf32>, vector<4x512xf32>, vector<16x512xf32> -> vector<16x512xf32>
    %76 = vector.broadcast %74 : vector<1x512xf32> to vector<16x512xf32>
    %77 = arith.addf %75, %76 : vector<16x512xf32>
    %cst_39 = arith.constant 0.000000e+00 : f32
    %78 = vector.broadcast %cst_39 : f32 to vector<16x512xf32>
    %79 = arith.maximumf %77, %78 : vector<16x512xf32>
    %cst_40 = arith.constant dense<0.000000e+00> : vector<16x4xf32>
    %80 = tpu.matmul %79, %72, %cst_40 {dimension_numbers = #tpu.dot_dimension_numbers<[1], [1], [0], [0], [0, 0, 1, 0], [], []>} : vector<16x512xf32>, vector<4x512xf32>, vector<16x4xf32> -> vector<16x4xf32>
    %81 = arith.addf %68, %80 : vector<16x4xf32>
    %c0_41 = arith.constant 0 : index
    %c0_42 = arith.constant 0 : index
    %c0_43 = arith.constant 0 : index
    %c512 = arith.constant 512 : index
    %82 = vector.load %arg2[%c0_41, %c0_42, %c0_43, %c512] : memref<2x2x16x2048xf32, #tpu.memory_space<vmem>>, vector<1x1x4x512xf32>
    %83 = vector.shape_cast %82 : vector<1x1x4x512xf32> to vector<4x512xf32>
    %c0_44 = arith.constant 0 : index
    %c0_45 = arith.constant 0 : index
    %c4_46 = arith.constant 4 : index
    %c512_47 = arith.constant 512 : index
    %84 = vector.load %arg2[%c0_44, %c0_45, %c4_46, %c512_47] : memref<2x2x16x2048xf32, #tpu.memory_space<vmem>>, vector<1x1x4x512xf32>
    %85 = vector.shape_cast %84 : vector<1x1x4x512xf32> to vector<4x512xf32>
    %c0_48 = arith.constant 0 : index
    %c0_49 = arith.constant 0 : index
    %c8_50 = arith.constant 8 : index
    %c512_51 = arith.constant 512 : index
    %86 = vector.load %arg2[%c0_48, %c0_49, %c8_50, %c512_51] : memref<2x2x16x2048xf32, #tpu.memory_space<vmem>>, vector<1x1x1x512xf32>
    %87 = vector.shape_cast %86 : vector<1x1x1x512xf32> to vector<1x512xf32>
    %cst_52 = arith.constant dense<0.000000e+00> : vector<16x512xf32>
    %88 = tpu.matmul %67, %83, %cst_52 {dimension_numbers = #tpu.dot_dimension_numbers<[1], [0], [0], [1], [0, 0, 1, 1], [], []>} : vector<16x4xf32>, vector<4x512xf32>, vector<16x512xf32> -> vector<16x512xf32>
    %89 = vector.broadcast %87 : vector<1x512xf32> to vector<16x512xf32>
    %90 = arith.addf %88, %89 : vector<16x512xf32>
    %cst_53 = arith.constant 0.000000e+00 : f32
    %91 = vector.broadcast %cst_53 : f32 to vector<16x512xf32>
    %92 = arith.maximumf %90, %91 : vector<16x512xf32>
    %cst_54 = arith.constant dense<0.000000e+00> : vector<16x4xf32>
    %93 = tpu.matmul %92, %85, %cst_54 {dimension_numbers = #tpu.dot_dimension_numbers<[1], [1], [0], [0], [0, 0, 1, 0], [], []>} : vector<16x512xf32>, vector<4x512xf32>, vector<16x4xf32> -> vector<16x4xf32>
    %94 = arith.addf %81, %93 : vector<16x4xf32>
    %c0_55 = arith.constant 0 : index
    %c0_56 = arith.constant 0 : index
    %c0_57 = arith.constant 0 : index
    %c1024 = arith.constant 1024 : index
    %95 = vector.load %arg2[%c0_55, %c0_56, %c0_57, %c1024] : memref<2x2x16x2048xf32, #tpu.memory_space<vmem>>, vector<1x1x4x512xf32>
    %96 = vector.shape_cast %95 : vector<1x1x4x512xf32> to vector<4x512xf32>
    %c0_58 = arith.constant 0 : index
    %c0_59 = arith.constant 0 : index
    %c4_60 = arith.constant 4 : index
    %c1024_61 = arith.constant 1024 : index
    %97 = vector.load %arg2[%c0_58, %c0_59, %c4_60, %c1024_61] : memref<2x2x16x2048xf32, #tpu.memory_space<vmem>>, vector<1x1x4x512xf32>
    %98 = vector.shape_cast %97 : vector<1x1x4x512xf32> to vector<4x512xf32>
    %c0_62 = arith.constant 0 : index
    %c0_63 = arith.constant 0 : index
    %c8_64 = arith.constant 8 : index
    %c1024_65 = arith.constant 1024 : index
    %99 = vector.load %arg2[%c0_62, %c0_63, %c8_64, %c1024_65] : memref<2x2x16x2048xf32, #tpu.memory_space<vmem>>, vector<1x1x1x512xf32>
    %100 = vector.shape_cast %99 : vector<1x1x1x512xf32> to vector<1x512xf32>
    %cst_66 = arith.constant dense<0.000000e+00> : vector<16x512xf32>
    %101 = tpu.matmul %67, %96, %cst_66 {dimension_numbers = #tpu.dot_dimension_numbers<[1], [0], [0], [1], [0, 0, 1, 1], [], []>} : vector<16x4xf32>, vector<4x512xf32>, vector<16x512xf32> -> vector<16x512xf32>
    %102 = vector.broadcast %100 : vector<1x512xf32> to vector<16x512xf32>
    %103 = arith.addf %101, %102 : vector<16x512xf32>
    %cst_67 = arith.constant 0.000000e+00 : f32
    %104 = vector.broadcast %cst_67 : f32 to vector<16x512xf32>
    %105 = arith.maximumf %103, %104 : vector<16x512xf32>
    %cst_68 = arith.constant dense<0.000000e+00> : vector<16x4xf32>
    %106 = tpu.matmul %105, %98, %cst_68 {dimension_numbers = #tpu.dot_dimension_numbers<[1], [1], [0], [0], [0, 0, 1, 0], [], []>} : vector<16x512xf32>, vector<4x512xf32>, vector<16x4xf32> -> vector<16x4xf32>
    %107 = arith.addf %94, %106 : vector<16x4xf32>
    %c0_69 = arith.constant 0 : index
    %c0_70 = arith.constant 0 : index
    %c0_71 = arith.constant 0 : index
    %c1536 = arith.constant 1536 : index
    %108 = vector.load %arg2[%c0_69, %c0_70, %c0_71, %c1536] : memref<2x2x16x2048xf32, #tpu.memory_space<vmem>>, vector<1x1x4x512xf32>
    %109 = vector.shape_cast %108 : vector<1x1x4x512xf32> to vector<4x512xf32>
    %c0_72 = arith.constant 0 : index
    %c0_73 = arith.constant 0 : index
    %c4_74 = arith.constant 4 : index
    %c1536_75 = arith.constant 1536 : index
    %110 = vector.load %arg2[%c0_72, %c0_73, %c4_74, %c1536_75] : memref<2x2x16x2048xf32, #tpu.memory_space<vmem>>, vector<1x1x4x512xf32>
    %111 = vector.shape_cast %110 : vector<1x1x4x512xf32> to vector<4x512xf32>
    %c0_76 = arith.constant 0 : index
    %c0_77 = arith.constant 0 : index
    %c8_78 = arith.constant 8 : index
    %c1536_79 = arith.constant 1536 : index
    %112 = vector.load %arg2[%c0_76, %c0_77, %c8_78, %c1536_79] : memref<2x2x16x2048xf32, #tpu.memory_space<vmem>>, vector<1x1x1x512xf32>
    %113 = vector.shape_cast %112 : vector<1x1x1x512xf32> to vector<1x512xf32>
    %cst_80 = arith.constant dense<0.000000e+00> : vector<16x512xf32>
    %114 = tpu.matmul %67, %109, %cst_80 {dimension_numbers = #tpu.dot_dimension_numbers<[1], [0], [0], [1], [0, 0, 1, 1], [], []>} : vector<16x4xf32>, vector<4x512xf32>, vector<16x512xf32> -> vector<16x512xf32>
    %115 = vector.broadcast %113 : vector<1x512xf32> to vector<16x512xf32>
    %116 = arith.addf %114, %115 : vector<16x512xf32>
    %cst_81 = arith.constant 0.000000e+00 : f32
    %117 = vector.broadcast %cst_81 : f32 to vector<16x512xf32>
    %118 = arith.maximumf %116, %117 : vector<16x512xf32>
    %cst_82 = arith.constant dense<0.000000e+00> : vector<16x4xf32>
    %119 = tpu.matmul %118, %111, %cst_82 {dimension_numbers = #tpu.dot_dimension_numbers<[1], [1], [0], [0], [0, 0, 1, 0], [], []>} : vector<16x512xf32>, vector<4x512xf32>, vector<16x4xf32> -> vector<16x4xf32>
    %120 = arith.addf %107, %119 : vector<16x4xf32>
    %c0_83 = arith.constant 0 : index
    %c0_84 = arith.constant 0 : index
    %c9 = arith.constant 9 : index
    %c0_85 = arith.constant 0 : index
    %121 = vector.load %arg2[%c0_83, %c0_84, %c9, %c0_85] : memref<2x2x16x2048xf32, #tpu.memory_space<vmem>>, vector<1x1x1x4xf32>
    %122 = vector.shape_cast %121 : vector<1x1x1x4xf32> to vector<1x4xf32>
    %123 = vector.broadcast %122 : vector<1x4xf32> to vector<16x4xf32>
    %124 = arith.addf %120, %123 : vector<16x4xf32>
    %125 = arith.addf %67, %124 : vector<16x4xf32>
    %c6_86 = arith.constant 6 : index
    %c0_87 = arith.constant 0 : index
    %c16 = arith.constant 16 : index
    %126 = vector.load %arg1[%c6_86, %c0_87, %c16] : memref<8x8x128xf32, #tpu.memory_space<vmem>>, vector<1x1x4xf32>
    %127 = vector.shape_cast %126 : vector<1x1x4xf32> to vector<1x4xf32>
    %c6_88 = arith.constant 6 : index
    %c0_89 = arith.constant 0 : index
    %c20 = arith.constant 20 : index
    %128 = vector.load %arg1[%c6_88, %c0_89, %c20] : memref<8x8x128xf32, #tpu.memory_space<vmem>>, vector<1x1x4xf32>
    %129 = vector.shape_cast %128 : vector<1x1x4xf32> to vector<1x4xf32>
    %cst_90 = arith.constant dense<0.000000e+00> : vector<16xf32>
    %130 = vector.multi_reduction <add>, %125, %cst_90 [1] : vector<16x4xf32> to vector<16xf32>
    %131 = vector.shape_cast %130 : vector<16xf32> to vector<16x1xf32>
    %cst_91 = arith.constant 4.000000e+00 : f32
    %132 = vector.broadcast %cst_91 : f32 to vector<16x1xf32>
    %133 = arith.divf %131, %132 : vector<16x1xf32>
    %134 = vector.broadcast %133 : vector<16x1xf32> to vector<16x4xf32>
    %135 = arith.subf %125, %134 : vector<16x4xf32>
    %136 = arith.mulf %135, %135 : vector<16x4xf32>
    %cst_92 = arith.constant dense<0.000000e+00> : vector<16xf32>
    %137 = vector.multi_reduction <add>, %136, %cst_92 [1] : vector<16x4xf32> to vector<16xf32>
    %138 = vector.shape_cast %137 : vector<16xf32> to vector<16x1xf32>
    %cst_93 = arith.constant 4.000000e+00 : f32
    %139 = vector.broadcast %cst_93 : f32 to vector<16x1xf32>
    %140 = arith.divf %138, %139 : vector<16x1xf32>
    %141 = vector.broadcast %133 : vector<16x1xf32> to vector<16x4xf32>
    %142 = arith.subf %125, %141 : vector<16x4xf32>
    %cst_94 = arith.constant 9.99999974E-6 : f32
    %143 = vector.broadcast %cst_94 : f32 to vector<16x1xf32>
    %144 = arith.addf %140, %143 : vector<16x1xf32>
    %145 = math.rsqrt %144 : vector<16x1xf32>
    %146 = vector.broadcast %145 : vector<16x1xf32> to vector<16x4xf32>
    %147 = arith.mulf %142, %146 : vector<16x4xf32>
    %148 = vector.broadcast %127 : vector<1x4xf32> to vector<16x4xf32>
    %149 = arith.mulf %147, %148 : vector<16x4xf32>
    %150 = vector.broadcast %129 : vector<1x4xf32> to vector<16x4xf32>
    %151 = arith.addf %149, %150 : vector<16x4xf32>
    %c1 = arith.constant 1 : index
    %c0_95 = arith.constant 0 : index
    %c0_96 = arith.constant 0 : index
    %152 = vector.load %arg1[%c1, %c0_95, %c0_96] : memref<8x8x128xf32, #tpu.memory_space<vmem>>, vector<1x4x12xf32>
    %153 = vector.shape_cast %152 : vector<1x4x12xf32> to vector<4x12xf32>
    %c1_97 = arith.constant 1 : index
    %c0_98 = arith.constant 0 : index
    %c12_99 = arith.constant 12 : index
    %154 = vector.load %arg1[%c1_97, %c0_98, %c12_99] : memref<8x8x128xf32, #tpu.memory_space<vmem>>, vector<1x4x4xf32>
    %155 = vector.shape_cast %154 : vector<1x4x4xf32> to vector<4x4xf32>
    %c1_100 = arith.constant 1 : index
    %c4_101 = arith.constant 4 : index
    %c0_102 = arith.constant 0 : index
    %156 = vector.load %arg1[%c1_100, %c4_101, %c0_102] : memref<8x8x128xf32, #tpu.memory_space<vmem>>, vector<1x1x12xf32>
    %157 = vector.shape_cast %156 : vector<1x1x12xf32> to vector<1x12xf32>
    %c1_103 = arith.constant 1 : index
    %c4_104 = arith.constant 4 : index
    %c12_105 = arith.constant 12 : index
    %158 = vector.load %arg1[%c1_103, %c4_104, %c12_105] : memref<8x8x128xf32, #tpu.memory_space<vmem>>, vector<1x1x4xf32>
    %159 = vector.shape_cast %158 : vector<1x1x4xf32> to vector<1x4xf32>
    %cst_106 = arith.constant dense<0.000000e+00> : vector<16x12xf32>
    %160 = tpu.matmul %151, %153, %cst_106 {dimension_numbers = #tpu.dot_dimension_numbers<[1], [0], [0], [1], [0, 0, 1, 1], [], []>} : vector<16x4xf32>, vector<4x12xf32>, vector<16x12xf32> -> vector<16x12xf32>
    %161 = vector.broadcast %157 : vector<1x12xf32> to vector<16x12xf32>
    %162 = arith.addf %160, %161 : vector<16x12xf32>
    %163 = vector.extract_strided_slice %162 {offsets = [0, 0], sizes = [16, 4], strides = [1, 1]} : vector<16x12xf32> to vector<16x4xf32>
    %164 = vector.extract_strided_slice %162 {offsets = [0, 4], sizes = [16, 4], strides = [1, 1]} : vector<16x12xf32> to vector<16x4xf32>
    %165 = vector.extract_strided_slice %162 {offsets = [0, 8], sizes = [16, 4], strides = [1, 1]} : vector<16x12xf32> to vector<16x4xf32>
    %166 = vector.shape_cast %163 : vector<16x4xf32> to vector<2x8x4xf32>
    %167 = vector.shape_cast %164 : vector<16x4xf32> to vector<2x8x4xf32>
    %168 = vector.shape_cast %165 : vector<16x4xf32> to vector<2x8x4xf32>
    %169 = vector.shape_cast %166 : vector<2x8x4xf32> to vector<2x8x1x4xf32>
    %170 = vector.shape_cast %167 : vector<2x8x4xf32> to vector<2x1x8x4xf32>
    %171 = vector.broadcast %169 : vector<2x8x1x4xf32> to vector<2x8x8x4xf32>
    %172 = vector.broadcast %170 : vector<2x1x8x4xf32> to vector<2x8x8x4xf32>
    %173 = arith.mulf %171, %172 : vector<2x8x8x4xf32>
    %cst_107 = arith.constant dense<0xFF800000> : vector<2x8x4xf32>
    %174 = vector.multi_reduction <maximumf>, %173, %cst_107 [2] : vector<2x8x8x4xf32> to vector<2x8x4xf32>
    %175 = vector.shape_cast %174 : vector<2x8x4xf32> to vector<2x8x1x4xf32>
    %176 = vector.broadcast %175 : vector<2x8x1x4xf32> to vector<2x8x8x4xf32>
    %177 = arith.subf %173, %176 : vector<2x8x8x4xf32>
    %178 = math.exp %177 : vector<2x8x8x4xf32>
    %cst_108 = arith.constant dense<0.000000e+00> : vector<2x8x4xf32>
    %179 = vector.multi_reduction <add>, %178, %cst_108 [2] : vector<2x8x8x4xf32> to vector<2x8x4xf32>
    %180 = vector.shape_cast %179 : vector<2x8x4xf32> to vector<2x8x1x4xf32>
    %181 = vector.broadcast %180 : vector<2x8x1x4xf32> to vector<2x8x8x4xf32>
    %182 = arith.divf %178, %181 : vector<2x8x8x4xf32>
    %183 = vector.shape_cast %168 : vector<2x8x4xf32> to vector<2x1x8x4xf32>
    %184 = vector.broadcast %183 : vector<2x1x8x4xf32> to vector<2x8x8x4xf32>
    %185 = arith.mulf %182, %184 : vector<2x8x8x4xf32>
    %cst_109 = arith.constant dense<0.000000e+00> : vector<2x8x4xf32>
    %186 = vector.multi_reduction <add>, %185, %cst_109 [2] : vector<2x8x8x4xf32> to vector<2x8x4xf32>
    %187 = vector.shape_cast %186 : vector<2x8x4xf32> to vector<16x4xf32>
    %cst_110 = arith.constant dense<0.000000e+00> : vector<16x4xf32>
    %188 = tpu.matmul %187, %155, %cst_110 {dimension_numbers = #tpu.dot_dimension_numbers<[1], [0], [0], [1], [0, 0, 1, 1], [], []>} : vector<16x4xf32>, vector<4x4xf32>, vector<16x4xf32> -> vector<16x4xf32>
    %189 = vector.broadcast %159 : vector<1x4xf32> to vector<16x4xf32>
    %190 = arith.addf %188, %189 : vector<16x4xf32>
    %191 = arith.addf %151, %190 : vector<16x4xf32>
    %c6_111 = arith.constant 6 : index
    %c0_112 = arith.constant 0 : index
    %c8_113 = arith.constant 8 : index
    %192 = vector.load %arg1[%c6_111, %c0_112, %c8_113] : memref<8x8x128xf32, #tpu.memory_space<vmem>>, vector<1x1x4xf32>
    %193 = vector.shape_cast %192 : vector<1x1x4xf32> to vector<1x4xf32>
    %c6_114 = arith.constant 6 : index
    %c0_115 = arith.constant 0 : index
    %c12_116 = arith.constant 12 : index
    %194 = vector.load %arg1[%c6_114, %c0_115, %c12_116] : memref<8x8x128xf32, #tpu.memory_space<vmem>>, vector<1x1x4xf32>
    %195 = vector.shape_cast %194 : vector<1x1x4xf32> to vector<1x4xf32>
    %cst_117 = arith.constant dense<0.000000e+00> : vector<16xf32>
    %196 = vector.multi_reduction <add>, %191, %cst_117 [1] : vector<16x4xf32> to vector<16xf32>
    %197 = vector.shape_cast %196 : vector<16xf32> to vector<16x1xf32>
    %cst_118 = arith.constant 4.000000e+00 : f32
    %198 = vector.broadcast %cst_118 : f32 to vector<16x1xf32>
    %199 = arith.divf %197, %198 : vector<16x1xf32>
    %200 = vector.broadcast %199 : vector<16x1xf32> to vector<16x4xf32>
    %201 = arith.subf %191, %200 : vector<16x4xf32>
    %202 = arith.mulf %201, %201 : vector<16x4xf32>
    %cst_119 = arith.constant dense<0.000000e+00> : vector<16xf32>
    %203 = vector.multi_reduction <add>, %202, %cst_119 [1] : vector<16x4xf32> to vector<16xf32>
    %204 = vector.shape_cast %203 : vector<16xf32> to vector<16x1xf32>
    %cst_120 = arith.constant 4.000000e+00 : f32
    %205 = vector.broadcast %cst_120 : f32 to vector<16x1xf32>
    %206 = arith.divf %204, %205 : vector<16x1xf32>
    %207 = vector.broadcast %199 : vector<16x1xf32> to vector<16x4xf32>
    %208 = arith.subf %191, %207 : vector<16x4xf32>
    %cst_121 = arith.constant 9.99999974E-6 : f32
    %209 = vector.broadcast %cst_121 : f32 to vector<16x1xf32>
    %210 = arith.addf %206, %209 : vector<16x1xf32>
    %211 = math.rsqrt %210 : vector<16x1xf32>
    %212 = vector.broadcast %211 : vector<16x1xf32> to vector<16x4xf32>
    %213 = arith.mulf %208, %212 : vector<16x4xf32>
    %214 = vector.broadcast %193 : vector<1x4xf32> to vector<16x4xf32>
    %215 = arith.mulf %213, %214 : vector<16x4xf32>
    %216 = vector.broadcast %195 : vector<1x4xf32> to vector<16x4xf32>
    %217 = arith.addf %215, %216 : vector<16x4xf32>
    %cst_122 = arith.constant 0.000000e+00 : f32
    %218 = vector.broadcast %cst_122 : f32 to vector<16x4xf32>
    %c0_123 = arith.constant 0 : index
    %c1_124 = arith.constant 1 : index
    %c0_125 = arith.constant 0 : index
    %c0_126 = arith.constant 0 : index
    %219 = vector.load %arg2[%c0_123, %c1_124, %c0_125, %c0_126] : memref<2x2x16x2048xf32, #tpu.memory_space<vmem>>, vector<1x1x4x512xf32>
    %220 = vector.shape_cast %219 : vector<1x1x4x512xf32> to vector<4x512xf32>
    %c0_127 = arith.constant 0 : index
    %c1_128 = arith.constant 1 : index
    %c4_129 = arith.constant 4 : index
    %c0_130 = arith.constant 0 : index
    %221 = vector.load %arg2[%c0_127, %c1_128, %c4_129, %c0_130] : memref<2x2x16x2048xf32, #tpu.memory_space<vmem>>, vector<1x1x4x512xf32>
    %222 = vector.shape_cast %221 : vector<1x1x4x512xf32> to vector<4x512xf32>
    %c0_131 = arith.constant 0 : index
    %c1_132 = arith.constant 1 : index
    %c8_133 = arith.constant 8 : index
    %c0_134 = arith.constant 0 : index
    %223 = vector.load %arg2[%c0_131, %c1_132, %c8_133, %c0_134] : memref<2x2x16x2048xf32, #tpu.memory_space<vmem>>, vector<1x1x1x512xf32>
    %224 = vector.shape_cast %223 : vector<1x1x1x512xf32> to vector<1x512xf32>
    %cst_135 = arith.constant dense<0.000000e+00> : vector<16x512xf32>
    %225 = tpu.matmul %217, %220, %cst_135 {dimension_numbers = #tpu.dot_dimension_numbers<[1], [0], [0], [1], [0, 0, 1, 1], [], []>} : vector<16x4xf32>, vector<4x512xf32>, vector<16x512xf32> -> vector<16x512xf32>
    %226 = vector.broadcast %224 : vector<1x512xf32> to vector<16x512xf32>
    %227 = arith.addf %225, %226 : vector<16x512xf32>
    %cst_136 = arith.constant 0.000000e+00 : f32
    %228 = vector.broadcast %cst_136 : f32 to vector<16x512xf32>
    %229 = arith.maximumf %227, %228 : vector<16x512xf32>
    %cst_137 = arith.constant dense<0.000000e+00> : vector<16x4xf32>
    %230 = tpu.matmul %229, %222, %cst_137 {dimension_numbers = #tpu.dot_dimension_numbers<[1], [1], [0], [0], [0, 0, 1, 0], [], []>} : vector<16x512xf32>, vector<4x512xf32>, vector<16x4xf32> -> vector<16x4xf32>
    %231 = arith.addf %218, %230 : vector<16x4xf32>
    %c0_138 = arith.constant 0 : index
    %c1_139 = arith.constant 1 : index
    %c0_140 = arith.constant 0 : index
    %c512_141 = arith.constant 512 : index
    %232 = vector.load %arg2[%c0_138, %c1_139, %c0_140, %c512_141] : memref<2x2x16x2048xf32, #tpu.memory_space<vmem>>, vector<1x1x4x512xf32>
    %233 = vector.shape_cast %232 : vector<1x1x4x512xf32> to vector<4x512xf32>
    %c0_142 = arith.constant 0 : index
    %c1_143 = arith.constant 1 : index
    %c4_144 = arith.constant 4 : index
    %c512_145 = arith.constant 512 : index
    %234 = vector.load %arg2[%c0_142, %c1_143, %c4_144, %c512_145] : memref<2x2x16x2048xf32, #tpu.memory_space<vmem>>, vector<1x1x4x512xf32>
    %235 = vector.shape_cast %234 : vector<1x1x4x512xf32> to vector<4x512xf32>
    %c0_146 = arith.constant 0 : index
    %c1_147 = arith.constant 1 : index
    %c8_148 = arith.constant 8 : index
    %c512_149 = arith.constant 512 : index
    %236 = vector.load %arg2[%c0_146, %c1_147, %c8_148, %c512_149] : memref<2x2x16x2048xf32, #tpu.memory_space<vmem>>, vector<1x1x1x512xf32>
    %237 = vector.shape_cast %236 : vector<1x1x1x512xf32> to vector<1x512xf32>
    %cst_150 = arith.constant dense<0.000000e+00> : vector<16x512xf32>
    %238 = tpu.matmul %217, %233, %cst_150 {dimension_numbers = #tpu.dot_dimension_numbers<[1], [0], [0], [1], [0, 0, 1, 1], [], []>} : vector<16x4xf32>, vector<4x512xf32>, vector<16x512xf32> -> vector<16x512xf32>
    %239 = vector.broadcast %237 : vector<1x512xf32> to vector<16x512xf32>
    %240 = arith.addf %238, %239 : vector<16x512xf32>
    %cst_151 = arith.constant 0.000000e+00 : f32
    %241 = vector.broadcast %cst_151 : f32 to vector<16x512xf32>
    %242 = arith.maximumf %240, %241 : vector<16x512xf32>
    %cst_152 = arith.constant dense<0.000000e+00> : vector<16x4xf32>
    %243 = tpu.matmul %242, %235, %cst_152 {dimension_numbers = #tpu.dot_dimension_numbers<[1], [1], [0], [0], [0, 0, 1, 0], [], []>} : vector<16x512xf32>, vector<4x512xf32>, vector<16x4xf32> -> vector<16x4xf32>
    %244 = arith.addf %231, %243 : vector<16x4xf32>
    %c0_153 = arith.constant 0 : index
    %c1_154 = arith.constant 1 : index
    %c0_155 = arith.constant 0 : index
    %c1024_156 = arith.constant 1024 : index
    %245 = vector.load %arg2[%c0_153, %c1_154, %c0_155, %c1024_156] : memref<2x2x16x2048xf32, #tpu.memory_space<vmem>>, vector<1x1x4x512xf32>
    %246 = vector.shape_cast %245 : vector<1x1x4x512xf32> to vector<4x512xf32>
    %c0_157 = arith.constant 0 : index
    %c1_158 = arith.constant 1 : index
    %c4_159 = arith.constant 4 : index
    %c1024_160 = arith.constant 1024 : index
    %247 = vector.load %arg2[%c0_157, %c1_158, %c4_159, %c1024_160] : memref<2x2x16x2048xf32, #tpu.memory_space<vmem>>, vector<1x1x4x512xf32>
    %248 = vector.shape_cast %247 : vector<1x1x4x512xf32> to vector<4x512xf32>
    %c0_161 = arith.constant 0 : index
    %c1_162 = arith.constant 1 : index
    %c8_163 = arith.constant 8 : index
    %c1024_164 = arith.constant 1024 : index
    %249 = vector.load %arg2[%c0_161, %c1_162, %c8_163, %c1024_164] : memref<2x2x16x2048xf32, #tpu.memory_space<vmem>>, vector<1x1x1x512xf32>
    %250 = vector.shape_cast %249 : vector<1x1x1x512xf32> to vector<1x512xf32>
    %cst_165 = arith.constant dense<0.000000e+00> : vector<16x512xf32>
    %251 = tpu.matmul %217, %246, %cst_165 {dimension_numbers = #tpu.dot_dimension_numbers<[1], [0], [0], [1], [0, 0, 1, 1], [], []>} : vector<16x4xf32>, vector<4x512xf32>, vector<16x512xf32> -> vector<16x512xf32>
    %252 = vector.broadcast %250 : vector<1x512xf32> to vector<16x512xf32>
    %253 = arith.addf %251, %252 : vector<16x512xf32>
    %cst_166 = arith.constant 0.000000e+00 : f32
    %254 = vector.broadcast %cst_166 : f32 to vector<16x512xf32>
    %255 = arith.maximumf %253, %254 : vector<16x512xf32>
    %cst_167 = arith.constant dense<0.000000e+00> : vector<16x4xf32>
    %256 = tpu.matmul %255, %248, %cst_167 {dimension_numbers = #tpu.dot_dimension_numbers<[1], [1], [0], [0], [0, 0, 1, 0], [], []>} : vector<16x512xf32>, vector<4x512xf32>, vector<16x4xf32> -> vector<16x4xf32>
    %257 = arith.addf %244, %256 : vector<16x4xf32>
    %c0_168 = arith.constant 0 : index
    %c1_169 = arith.constant 1 : index
    %c0_170 = arith.constant 0 : index
    %c1536_171 = arith.constant 1536 : index
    %258 = vector.load %arg2[%c0_168, %c1_169, %c0_170, %c1536_171] : memref<2x2x16x2048xf32, #tpu.memory_space<vmem>>, vector<1x1x4x512xf32>
    %259 = vector.shape_cast %258 : vector<1x1x4x512xf32> to vector<4x512xf32>
    %c0_172 = arith.constant 0 : index
    %c1_173 = arith.constant 1 : index
    %c4_174 = arith.constant 4 : index
    %c1536_175 = arith.constant 1536 : index
    %260 = vector.load %arg2[%c0_172, %c1_173, %c4_174, %c1536_175] : memref<2x2x16x2048xf32, #tpu.memory_space<vmem>>, vector<1x1x4x512xf32>
    %261 = vector.shape_cast %260 : vector<1x1x4x512xf32> to vector<4x512xf32>
    %c0_176 = arith.constant 0 : index
    %c1_177 = arith.constant 1 : index
    %c8_178 = arith.constant 8 : index
    %c1536_179 = arith.constant 1536 : index
    %262 = vector.load %arg2[%c0_176, %c1_177, %c8_178, %c1536_179] : memref<2x2x16x2048xf32, #tpu.memory_space<vmem>>, vector<1x1x1x512xf32>
    %263 = vector.shape_cast %262 : vector<1x1x1x512xf32> to vector<1x512xf32>
    %cst_180 = arith.constant dense<0.000000e+00> : vector<16x512xf32>
    %264 = tpu.matmul %217, %259, %cst_180 {dimension_numbers = #tpu.dot_dimension_numbers<[1], [0], [0], [1], [0, 0, 1, 1], [], []>} : vector<16x4xf32>, vector<4x512xf32>, vector<16x512xf32> -> vector<16x512xf32>
    %265 = vector.broadcast %263 : vector<1x512xf32> to vector<16x512xf32>
    %266 = arith.addf %264, %265 : vector<16x512xf32>
    %cst_181 = arith.constant 0.000000e+00 : f32
    %267 = vector.broadcast %cst_181 : f32 to vector<16x512xf32>
    %268 = arith.maximumf %266, %267 : vector<16x512xf32>
    %cst_182 = arith.constant dense<0.000000e+00> : vector<16x4xf32>
    %269 = tpu.matmul %268, %261, %cst_182 {dimension_numbers = #tpu.dot_dimension_numbers<[1], [1], [0], [0], [0, 0, 1, 0], [], []>} : vector<16x512xf32>, vector<4x512xf32>, vector<16x4xf32> -> vector<16x4xf32>
    %270 = arith.addf %257, %269 : vector<16x4xf32>
    %c0_183 = arith.constant 0 : index
    %c1_184 = arith.constant 1 : index
    %c9_185 = arith.constant 9 : index
    %c0_186 = arith.constant 0 : index
    %271 = vector.load %arg2[%c0_183, %c1_184, %c9_185, %c0_186] : memref<2x2x16x2048xf32, #tpu.memory_space<vmem>>, vector<1x1x1x4xf32>
    %272 = vector.shape_cast %271 : vector<1x1x1x4xf32> to vector<1x4xf32>
    %273 = vector.broadcast %272 : vector<1x4xf32> to vector<16x4xf32>
    %274 = arith.addf %270, %273 : vector<16x4xf32>
    %275 = arith.addf %217, %274 : vector<16x4xf32>
    %c6_187 = arith.constant 6 : index
    %c0_188 = arith.constant 0 : index
    %c24 = arith.constant 24 : index
    %276 = vector.load %arg1[%c6_187, %c0_188, %c24] : memref<8x8x128xf32, #tpu.memory_space<vmem>>, vector<1x1x4xf32>
    %277 = vector.shape_cast %276 : vector<1x1x4xf32> to vector<1x4xf32>
    %c6_189 = arith.constant 6 : index
    %c0_190 = arith.constant 0 : index
    %c28 = arith.constant 28 : index
    %278 = vector.load %arg1[%c6_189, %c0_190, %c28] : memref<8x8x128xf32, #tpu.memory_space<vmem>>, vector<1x1x4xf32>
    %279 = vector.shape_cast %278 : vector<1x1x4xf32> to vector<1x4xf32>
    %cst_191 = arith.constant dense<0.000000e+00> : vector<16xf32>
    %280 = vector.multi_reduction <add>, %275, %cst_191 [1] : vector<16x4xf32> to vector<16xf32>
    %281 = vector.shape_cast %280 : vector<16xf32> to vector<16x1xf32>
    %cst_192 = arith.constant 4.000000e+00 : f32
    %282 = vector.broadcast %cst_192 : f32 to vector<16x1xf32>
    %283 = arith.divf %281, %282 : vector<16x1xf32>
    %284 = vector.broadcast %283 : vector<16x1xf32> to vector<16x4xf32>
    %285 = arith.subf %275, %284 : vector<16x4xf32>
    %286 = arith.mulf %285, %285 : vector<16x4xf32>
    %cst_193 = arith.constant dense<0.000000e+00> : vector<16xf32>
    %287 = vector.multi_reduction <add>, %286, %cst_193 [1] : vector<16x4xf32> to vector<16xf32>
    %288 = vector.shape_cast %287 : vector<16xf32> to vector<16x1xf32>
    %cst_194 = arith.constant 4.000000e+00 : f32
    %289 = vector.broadcast %cst_194 : f32 to vector<16x1xf32>
    %290 = arith.divf %288, %289 : vector<16x1xf32>
    %291 = vector.broadcast %283 : vector<16x1xf32> to vector<16x4xf32>
    %292 = arith.subf %275, %291 : vector<16x4xf32>
    %cst_195 = arith.constant 9.99999974E-6 : f32
    %293 = vector.broadcast %cst_195 : f32 to vector<16x1xf32>
    %294 = arith.addf %290, %293 : vector<16x1xf32>
    %295 = math.rsqrt %294 : vector<16x1xf32>
    %296 = vector.broadcast %295 : vector<16x1xf32> to vector<16x4xf32>
    %297 = arith.mulf %292, %296 : vector<16x4xf32>
    %298 = vector.broadcast %277 : vector<1x4xf32> to vector<16x4xf32>
    %299 = arith.mulf %297, %298 : vector<16x4xf32>
    %300 = vector.broadcast %279 : vector<1x4xf32> to vector<16x4xf32>
    %301 = arith.addf %299, %300 : vector<16x4xf32>
    %c2 = arith.constant 2 : index
    %c0_196 = arith.constant 0 : index
    %c0_197 = arith.constant 0 : index
    %302 = vector.load %arg1[%c2, %c0_196, %c0_197] : memref<8x8x128xf32, #tpu.memory_space<vmem>>, vector<1x4x12xf32>
    %303 = vector.shape_cast %302 : vector<1x4x12xf32> to vector<4x12xf32>
    %c2_198 = arith.constant 2 : index
    %c0_199 = arith.constant 0 : index
    %c12_200 = arith.constant 12 : index
    %304 = vector.load %arg1[%c2_198, %c0_199, %c12_200] : memref<8x8x128xf32, #tpu.memory_space<vmem>>, vector<1x4x4xf32>
    %305 = vector.shape_cast %304 : vector<1x4x4xf32> to vector<4x4xf32>
    %c2_201 = arith.constant 2 : index
    %c4_202 = arith.constant 4 : index
    %c0_203 = arith.constant 0 : index
    %306 = vector.load %arg1[%c2_201, %c4_202, %c0_203] : memref<8x8x128xf32, #tpu.memory_space<vmem>>, vector<1x1x12xf32>
    %307 = vector.shape_cast %306 : vector<1x1x12xf32> to vector<1x12xf32>
    %c2_204 = arith.constant 2 : index
    %c4_205 = arith.constant 4 : index
    %c12_206 = arith.constant 12 : index
    %308 = vector.load %arg1[%c2_204, %c4_205, %c12_206] : memref<8x8x128xf32, #tpu.memory_space<vmem>>, vector<1x1x4xf32>
    %309 = vector.shape_cast %308 : vector<1x1x4xf32> to vector<1x4xf32>
    %cst_207 = arith.constant dense<0.000000e+00> : vector<16x12xf32>
    %310 = tpu.matmul %1, %303, %cst_207 {dimension_numbers = #tpu.dot_dimension_numbers<[1], [0], [0], [1], [0, 0, 1, 1], [], []>} : vector<16x4xf32>, vector<4x12xf32>, vector<16x12xf32> -> vector<16x12xf32>
    %311 = vector.broadcast %307 : vector<1x12xf32> to vector<16x12xf32>
    %312 = arith.addf %310, %311 : vector<16x12xf32>
    %313 = vector.extract_strided_slice %312 {offsets = [0, 0], sizes = [16, 4], strides = [1, 1]} : vector<16x12xf32> to vector<16x4xf32>
    %314 = vector.extract_strided_slice %312 {offsets = [0, 4], sizes = [16, 4], strides = [1, 1]} : vector<16x12xf32> to vector<16x4xf32>
    %315 = vector.extract_strided_slice %312 {offsets = [0, 8], sizes = [16, 4], strides = [1, 1]} : vector<16x12xf32> to vector<16x4xf32>
    %316 = vector.shape_cast %313 : vector<16x4xf32> to vector<2x8x4xf32>
    %317 = vector.shape_cast %314 : vector<16x4xf32> to vector<2x8x4xf32>
    %318 = vector.shape_cast %315 : vector<16x4xf32> to vector<2x8x4xf32>
    %319 = vector.shape_cast %316 : vector<2x8x4xf32> to vector<2x8x1x4xf32>
    %320 = vector.shape_cast %317 : vector<2x8x4xf32> to vector<2x1x8x4xf32>
    %321 = vector.broadcast %319 : vector<2x8x1x4xf32> to vector<2x8x8x4xf32>
    %322 = vector.broadcast %320 : vector<2x1x8x4xf32> to vector<2x8x8x4xf32>
    %323 = arith.mulf %321, %322 : vector<2x8x8x4xf32>
    %cst_208 = arith.constant dense<0xFF800000> : vector<2x8x4xf32>
    %324 = vector.multi_reduction <maximumf>, %323, %cst_208 [2] : vector<2x8x8x4xf32> to vector<2x8x4xf32>
    %325 = vector.shape_cast %324 : vector<2x8x4xf32> to vector<2x8x1x4xf32>
    %326 = vector.broadcast %325 : vector<2x8x1x4xf32> to vector<2x8x8x4xf32>
    %327 = arith.subf %323, %326 : vector<2x8x8x4xf32>
    %328 = math.exp %327 : vector<2x8x8x4xf32>
    %cst_209 = arith.constant dense<0.000000e+00> : vector<2x8x4xf32>
    %329 = vector.multi_reduction <add>, %328, %cst_209 [2] : vector<2x8x8x4xf32> to vector<2x8x4xf32>
    %330 = vector.shape_cast %329 : vector<2x8x4xf32> to vector<2x8x1x4xf32>
    %331 = vector.broadcast %330 : vector<2x8x1x4xf32> to vector<2x8x8x4xf32>
    %332 = arith.divf %328, %331 : vector<2x8x8x4xf32>
    %333 = vector.shape_cast %318 : vector<2x8x4xf32> to vector<2x1x8x4xf32>
    %334 = vector.broadcast %333 : vector<2x1x8x4xf32> to vector<2x8x8x4xf32>
    %335 = arith.mulf %332, %334 : vector<2x8x8x4xf32>
    %cst_210 = arith.constant dense<0.000000e+00> : vector<2x8x4xf32>
    %336 = vector.multi_reduction <add>, %335, %cst_210 [2] : vector<2x8x8x4xf32> to vector<2x8x4xf32>
    %337 = vector.shape_cast %336 : vector<2x8x4xf32> to vector<16x4xf32>
    %cst_211 = arith.constant dense<0.000000e+00> : vector<16x4xf32>
    %338 = tpu.matmul %337, %305, %cst_211 {dimension_numbers = #tpu.dot_dimension_numbers<[1], [0], [0], [1], [0, 0, 1, 1], [], []>} : vector<16x4xf32>, vector<4x4xf32>, vector<16x4xf32> -> vector<16x4xf32>
    %339 = vector.broadcast %309 : vector<1x4xf32> to vector<16x4xf32>
    %340 = arith.addf %338, %339 : vector<16x4xf32>
    %341 = arith.addf %1, %340 : vector<16x4xf32>
    %c6_212 = arith.constant 6 : index
    %c0_213 = arith.constant 0 : index
    %c32 = arith.constant 32 : index
    %342 = vector.load %arg1[%c6_212, %c0_213, %c32] : memref<8x8x128xf32, #tpu.memory_space<vmem>>, vector<1x1x4xf32>
    %343 = vector.shape_cast %342 : vector<1x1x4xf32> to vector<1x4xf32>
    %c6_214 = arith.constant 6 : index
    %c0_215 = arith.constant 0 : index
    %c36 = arith.constant 36 : index
    %344 = vector.load %arg1[%c6_214, %c0_215, %c36] : memref<8x8x128xf32, #tpu.memory_space<vmem>>, vector<1x1x4xf32>
    %345 = vector.shape_cast %344 : vector<1x1x4xf32> to vector<1x4xf32>
    %cst_216 = arith.constant dense<0.000000e+00> : vector<16xf32>
    %346 = vector.multi_reduction <add>, %341, %cst_216 [1] : vector<16x4xf32> to vector<16xf32>
    %347 = vector.shape_cast %346 : vector<16xf32> to vector<16x1xf32>
    %cst_217 = arith.constant 4.000000e+00 : f32
    %348 = vector.broadcast %cst_217 : f32 to vector<16x1xf32>
    %349 = arith.divf %347, %348 : vector<16x1xf32>
    %350 = vector.broadcast %349 : vector<16x1xf32> to vector<16x4xf32>
    %351 = arith.subf %341, %350 : vector<16x4xf32>
    %352 = arith.mulf %351, %351 : vector<16x4xf32>
    %cst_218 = arith.constant dense<0.000000e+00> : vector<16xf32>
    %353 = vector.multi_reduction <add>, %352, %cst_218 [1] : vector<16x4xf32> to vector<16xf32>
    %354 = vector.shape_cast %353 : vector<16xf32> to vector<16x1xf32>
    %cst_219 = arith.constant 4.000000e+00 : f32
    %355 = vector.broadcast %cst_219 : f32 to vector<16x1xf32>
    %356 = arith.divf %354, %355 : vector<16x1xf32>
    %357 = vector.broadcast %349 : vector<16x1xf32> to vector<16x4xf32>
    %358 = arith.subf %341, %357 : vector<16x4xf32>
    %cst_220 = arith.constant 9.99999974E-6 : f32
    %359 = vector.broadcast %cst_220 : f32 to vector<16x1xf32>
    %360 = arith.addf %356, %359 : vector<16x1xf32>
    %361 = math.rsqrt %360 : vector<16x1xf32>
    %362 = vector.broadcast %361 : vector<16x1xf32> to vector<16x4xf32>
    %363 = arith.mulf %358, %362 : vector<16x4xf32>
    %364 = vector.broadcast %343 : vector<1x4xf32> to vector<16x4xf32>
    %365 = arith.mulf %363, %364 : vector<16x4xf32>
    %366 = vector.broadcast %345 : vector<1x4xf32> to vector<16x4xf32>
    %367 = arith.addf %365, %366 : vector<16x4xf32>
    %c4_221 = arith.constant 4 : index
    %c0_222 = arith.constant 0 : index
    %c0_223 = arith.constant 0 : index
    %368 = vector.load %arg1[%c4_221, %c0_222, %c0_223] : memref<8x8x128xf32, #tpu.memory_space<vmem>>, vector<1x4x12xf32>
    %369 = vector.shape_cast %368 : vector<1x4x12xf32> to vector<4x12xf32>
    %c4_224 = arith.constant 4 : index
    %c0_225 = arith.constant 0 : index
    %c12_226 = arith.constant 12 : index
    %370 = vector.load %arg1[%c4_224, %c0_225, %c12_226] : memref<8x8x128xf32, #tpu.memory_space<vmem>>, vector<1x4x4xf32>
    %371 = vector.shape_cast %370 : vector<1x4x4xf32> to vector<4x4xf32>
    %c4_227 = arith.constant 4 : index
    %c4_228 = arith.constant 4 : index
    %c0_229 = arith.constant 0 : index
    %372 = vector.load %arg1[%c4_227, %c4_228, %c0_229] : memref<8x8x128xf32, #tpu.memory_space<vmem>>, vector<1x1x12xf32>
    %373 = vector.shape_cast %372 : vector<1x1x12xf32> to vector<1x12xf32>
    %c4_230 = arith.constant 4 : index
    %c4_231 = arith.constant 4 : index
    %c12_232 = arith.constant 12 : index
    %374 = vector.load %arg1[%c4_230, %c4_231, %c12_232] : memref<8x8x128xf32, #tpu.memory_space<vmem>>, vector<1x1x4xf32>
    %375 = vector.shape_cast %374 : vector<1x1x4xf32> to vector<1x4xf32>
    %cst_233 = arith.constant dense<0.000000e+00> : vector<16x12xf32>
    %376 = tpu.matmul %367, %369, %cst_233 {dimension_numbers = #tpu.dot_dimension_numbers<[1], [0], [0], [1], [0, 0, 1, 1], [], []>} : vector<16x4xf32>, vector<4x12xf32>, vector<16x12xf32> -> vector<16x12xf32>
    %377 = vector.broadcast %373 : vector<1x12xf32> to vector<16x12xf32>
    %378 = arith.addf %376, %377 : vector<16x12xf32>
    %cst_234 = arith.constant dense<0.000000e+00> : vector<16x12xf32>
    %379 = tpu.matmul %301, %369, %cst_234 {dimension_numbers = #tpu.dot_dimension_numbers<[1], [0], [0], [1], [0, 0, 1, 1], [], []>} : vector<16x4xf32>, vector<4x12xf32>, vector<16x12xf32> -> vector<16x12xf32>
    %380 = vector.broadcast %373 : vector<1x12xf32> to vector<16x12xf32>
    %381 = arith.addf %379, %380 : vector<16x12xf32>
    %382 = vector.extract_strided_slice %378 {offsets = [0, 0], sizes = [16, 4], strides = [1, 1]} : vector<16x12xf32> to vector<16x4xf32>
    %383 = vector.extract_strided_slice %381 {offsets = [0, 4], sizes = [16, 4], strides = [1, 1]} : vector<16x12xf32> to vector<16x4xf32>
    %384 = vector.extract_strided_slice %381 {offsets = [0, 8], sizes = [16, 4], strides = [1, 1]} : vector<16x12xf32> to vector<16x4xf32>
    %385 = vector.shape_cast %382 : vector<16x4xf32> to vector<2x8x4xf32>
    %386 = vector.shape_cast %383 : vector<16x4xf32> to vector<2x8x4xf32>
    %387 = vector.shape_cast %384 : vector<16x4xf32> to vector<2x8x4xf32>
    %388 = vector.shape_cast %385 : vector<2x8x4xf32> to vector<2x8x1x4xf32>
    %389 = vector.shape_cast %386 : vector<2x8x4xf32> to vector<2x1x8x4xf32>
    %390 = vector.broadcast %388 : vector<2x8x1x4xf32> to vector<2x8x8x4xf32>
    %391 = vector.broadcast %389 : vector<2x1x8x4xf32> to vector<2x8x8x4xf32>
    %392 = arith.mulf %390, %391 : vector<2x8x8x4xf32>
    %cst_235 = arith.constant dense<0xFF800000> : vector<2x8x4xf32>
    %393 = vector.multi_reduction <maximumf>, %392, %cst_235 [2] : vector<2x8x8x4xf32> to vector<2x8x4xf32>
    %394 = vector.shape_cast %393 : vector<2x8x4xf32> to vector<2x8x1x4xf32>
    %395 = vector.broadcast %394 : vector<2x8x1x4xf32> to vector<2x8x8x4xf32>
    %396 = arith.subf %392, %395 : vector<2x8x8x4xf32>
    %397 = math.exp %396 : vector<2x8x8x4xf32>
    %cst_236 = arith.constant dense<0.000000e+00> : vector<2x8x4xf32>
    %398 = vector.multi_reduction <add>, %397, %cst_236 [2] : vector<2x8x8x4xf32> to vector<2x8x4xf32>
    %399 = vector.shape_cast %398 : vector<2x8x4xf32> to vector<2x8x1x4xf32>
    %400 = vector.broadcast %399 : vector<2x8x1x4xf32> to vector<2x8x8x4xf32>
    %401 = arith.divf %397, %400 : vector<2x8x8x4xf32>
    %402 = vector.shape_cast %387 : vector<2x8x4xf32> to vector<2x1x8x4xf32>
    %403 = vector.broadcast %402 : vector<2x1x8x4xf32> to vector<2x8x8x4xf32>
    %404 = arith.mulf %401, %403 : vector<2x8x8x4xf32>
    %cst_237 = arith.constant dense<0.000000e+00> : vector<2x8x4xf32>
    %405 = vector.multi_reduction <add>, %404, %cst_237 [2] : vector<2x8x8x4xf32> to vector<2x8x4xf32>
    %406 = vector.shape_cast %405 : vector<2x8x4xf32> to vector<16x4xf32>
    %cst_238 = arith.constant dense<0.000000e+00> : vector<16x4xf32>
    %407 = tpu.matmul %406, %371, %cst_238 {dimension_numbers = #tpu.dot_dimension_numbers<[1], [0], [0], [1], [0, 0, 1, 1], [], []>} : vector<16x4xf32>, vector<4x4xf32>, vector<16x4xf32> -> vector<16x4xf32>
    %408 = vector.broadcast %375 : vector<1x4xf32> to vector<16x4xf32>
    %409 = arith.addf %407, %408 : vector<16x4xf32>
    %410 = arith.addf %367, %409 : vector<16x4xf32>
    %c6_239 = arith.constant 6 : index
    %c0_240 = arith.constant 0 : index
    %c48 = arith.constant 48 : index
    %411 = vector.load %arg1[%c6_239, %c0_240, %c48] : memref<8x8x128xf32, #tpu.memory_space<vmem>>, vector<1x1x4xf32>
    %412 = vector.shape_cast %411 : vector<1x1x4xf32> to vector<1x4xf32>
    %c6_241 = arith.constant 6 : index
    %c0_242 = arith.constant 0 : index
    %c52 = arith.constant 52 : index
    %413 = vector.load %arg1[%c6_241, %c0_242, %c52] : memref<8x8x128xf32, #tpu.memory_space<vmem>>, vector<1x1x4xf32>
    %414 = vector.shape_cast %413 : vector<1x1x4xf32> to vector<1x4xf32>
    %cst_243 = arith.constant dense<0.000000e+00> : vector<16xf32>
    %415 = vector.multi_reduction <add>, %410, %cst_243 [1] : vector<16x4xf32> to vector<16xf32>
    %416 = vector.shape_cast %415 : vector<16xf32> to vector<16x1xf32>
    %cst_244 = arith.constant 4.000000e+00 : f32
    %417 = vector.broadcast %cst_244 : f32 to vector<16x1xf32>
    %418 = arith.divf %416, %417 : vector<16x1xf32>
    %419 = vector.broadcast %418 : vector<16x1xf32> to vector<16x4xf32>
    %420 = arith.subf %410, %419 : vector<16x4xf32>
    %421 = arith.mulf %420, %420 : vector<16x4xf32>
    %cst_245 = arith.constant dense<0.000000e+00> : vector<16xf32>
    %422 = vector.multi_reduction <add>, %421, %cst_245 [1] : vector<16x4xf32> to vector<16xf32>
    %423 = vector.shape_cast %422 : vector<16xf32> to vector<16x1xf32>
    %cst_246 = arith.constant 4.000000e+00 : f32
    %424 = vector.broadcast %cst_246 : f32 to vector<16x1xf32>
    %425 = arith.divf %423, %424 : vector<16x1xf32>
    %426 = vector.broadcast %418 : vector<16x1xf32> to vector<16x4xf32>
    %427 = arith.subf %410, %426 : vector<16x4xf32>
    %cst_247 = arith.constant 9.99999974E-6 : f32
    %428 = vector.broadcast %cst_247 : f32 to vector<16x1xf32>
    %429 = arith.addf %425, %428 : vector<16x1xf32>
    %430 = math.rsqrt %429 : vector<16x1xf32>
    %431 = vector.broadcast %430 : vector<16x1xf32> to vector<16x4xf32>
    %432 = arith.mulf %427, %431 : vector<16x4xf32>
    %433 = vector.broadcast %412 : vector<1x4xf32> to vector<16x4xf32>
    %434 = arith.mulf %432, %433 : vector<16x4xf32>
    %435 = vector.broadcast %414 : vector<1x4xf32> to vector<16x4xf32>
    %436 = arith.addf %434, %435 : vector<16x4xf32>
    %cst_248 = arith.constant 0.000000e+00 : f32
    %437 = vector.broadcast %cst_248 : f32 to vector<16x4xf32>
    %c1_249 = arith.constant 1 : index
    %c0_250 = arith.constant 0 : index
    %c0_251 = arith.constant 0 : index
    %c0_252 = arith.constant 0 : index
    %438 = vector.load %arg2[%c1_249, %c0_250, %c0_251, %c0_252] : memref<2x2x16x2048xf32, #tpu.memory_space<vmem>>, vector<1x1x4x512xf32>
    %439 = vector.shape_cast %438 : vector<1x1x4x512xf32> to vector<4x512xf32>
    %c1_253 = arith.constant 1 : index
    %c0_254 = arith.constant 0 : index
    %c4_255 = arith.constant 4 : index
    %c0_256 = arith.constant 0 : index
    %440 = vector.load %arg2[%c1_253, %c0_254, %c4_255, %c0_256] : memref<2x2x16x2048xf32, #tpu.memory_space<vmem>>, vector<1x1x4x512xf32>
    %441 = vector.shape_cast %440 : vector<1x1x4x512xf32> to vector<4x512xf32>
    %c1_257 = arith.constant 1 : index
    %c0_258 = arith.constant 0 : index
    %c8_259 = arith.constant 8 : index
    %c0_260 = arith.constant 0 : index
    %442 = vector.load %arg2[%c1_257, %c0_258, %c8_259, %c0_260] : memref<2x2x16x2048xf32, #tpu.memory_space<vmem>>, vector<1x1x1x512xf32>
    %443 = vector.shape_cast %442 : vector<1x1x1x512xf32> to vector<1x512xf32>
    %cst_261 = arith.constant dense<0.000000e+00> : vector<16x512xf32>
    %444 = tpu.matmul %436, %439, %cst_261 {dimension_numbers = #tpu.dot_dimension_numbers<[1], [0], [0], [1], [0, 0, 1, 1], [], []>} : vector<16x4xf32>, vector<4x512xf32>, vector<16x512xf32> -> vector<16x512xf32>
    %445 = vector.broadcast %443 : vector<1x512xf32> to vector<16x512xf32>
    %446 = arith.addf %444, %445 : vector<16x512xf32>
    %cst_262 = arith.constant 0.000000e+00 : f32
    %447 = vector.broadcast %cst_262 : f32 to vector<16x512xf32>
    %448 = arith.maximumf %446, %447 : vector<16x512xf32>
    %cst_263 = arith.constant dense<0.000000e+00> : vector<16x4xf32>
    %449 = tpu.matmul %448, %441, %cst_263 {dimension_numbers = #tpu.dot_dimension_numbers<[1], [1], [0], [0], [0, 0, 1, 0], [], []>} : vector<16x512xf32>, vector<4x512xf32>, vector<16x4xf32> -> vector<16x4xf32>
    %450 = arith.addf %437, %449 : vector<16x4xf32>
    %c1_264 = arith.constant 1 : index
    %c0_265 = arith.constant 0 : index
    %c0_266 = arith.constant 0 : index
    %c512_267 = arith.constant 512 : index
    %451 = vector.load %arg2[%c1_264, %c0_265, %c0_266, %c512_267] : memref<2x2x16x2048xf32, #tpu.memory_space<vmem>>, vector<1x1x4x512xf32>
    %452 = vector.shape_cast %451 : vector<1x1x4x512xf32> to vector<4x512xf32>
    %c1_268 = arith.constant 1 : index
    %c0_269 = arith.constant 0 : index
    %c4_270 = arith.constant 4 : index
    %c512_271 = arith.constant 512 : index
    %453 = vector.load %arg2[%c1_268, %c0_269, %c4_270, %c512_271] : memref<2x2x16x2048xf32, #tpu.memory_space<vmem>>, vector<1x1x4x512xf32>
    %454 = vector.shape_cast %453 : vector<1x1x4x512xf32> to vector<4x512xf32>
    %c1_272 = arith.constant 1 : index
    %c0_273 = arith.constant 0 : index
    %c8_274 = arith.constant 8 : index
    %c512_275 = arith.constant 512 : index
    %455 = vector.load %arg2[%c1_272, %c0_273, %c8_274, %c512_275] : memref<2x2x16x2048xf32, #tpu.memory_space<vmem>>, vector<1x1x1x512xf32>
    %456 = vector.shape_cast %455 : vector<1x1x1x512xf32> to vector<1x512xf32>
    %cst_276 = arith.constant dense<0.000000e+00> : vector<16x512xf32>
    %457 = tpu.matmul %436, %452, %cst_276 {dimension_numbers = #tpu.dot_dimension_numbers<[1], [0], [0], [1], [0, 0, 1, 1], [], []>} : vector<16x4xf32>, vector<4x512xf32>, vector<16x512xf32> -> vector<16x512xf32>
    %458 = vector.broadcast %456 : vector<1x512xf32> to vector<16x512xf32>
    %459 = arith.addf %457, %458 : vector<16x512xf32>
    %cst_277 = arith.constant 0.000000e+00 : f32
    %460 = vector.broadcast %cst_277 : f32 to vector<16x512xf32>
    %461 = arith.maximumf %459, %460 : vector<16x512xf32>
    %cst_278 = arith.constant dense<0.000000e+00> : vector<16x4xf32>
    %462 = tpu.matmul %461, %454, %cst_278 {dimension_numbers = #tpu.dot_dimension_numbers<[1], [1], [0], [0], [0, 0, 1, 0], [], []>} : vector<16x512xf32>, vector<4x512xf32>, vector<16x4xf32> -> vector<16x4xf32>
    %463 = arith.addf %450, %462 : vector<16x4xf32>
    %c1_279 = arith.constant 1 : index
    %c0_280 = arith.constant 0 : index
    %c0_281 = arith.constant 0 : index
    %c1024_282 = arith.constant 1024 : index
    %464 = vector.load %arg2[%c1_279, %c0_280, %c0_281, %c1024_282] : memref<2x2x16x2048xf32, #tpu.memory_space<vmem>>, vector<1x1x4x512xf32>
    %465 = vector.shape_cast %464 : vector<1x1x4x512xf32> to vector<4x512xf32>
    %c1_283 = arith.constant 1 : index
    %c0_284 = arith.constant 0 : index
    %c4_285 = arith.constant 4 : index
    %c1024_286 = arith.constant 1024 : index
    %466 = vector.load %arg2[%c1_283, %c0_284, %c4_285, %c1024_286] : memref<2x2x16x2048xf32, #tpu.memory_space<vmem>>, vector<1x1x4x512xf32>
    %467 = vector.shape_cast %466 : vector<1x1x4x512xf32> to vector<4x512xf32>
    %c1_287 = arith.constant 1 : index
    %c0_288 = arith.constant 0 : index
    %c8_289 = arith.constant 8 : index
    %c1024_290 = arith.constant 1024 : index
    %468 = vector.load %arg2[%c1_287, %c0_288, %c8_289, %c1024_290] : memref<2x2x16x2048xf32, #tpu.memory_space<vmem>>, vector<1x1x1x512xf32>
    %469 = vector.shape_cast %468 : vector<1x1x1x512xf32> to vector<1x512xf32>
    %cst_291 = arith.constant dense<0.000000e+00> : vector<16x512xf32>
    %470 = tpu.matmul %436, %465, %cst_291 {dimension_numbers = #tpu.dot_dimension_numbers<[1], [0], [0], [1], [0, 0, 1, 1], [], []>} : vector<16x4xf32>, vector<4x512xf32>, vector<16x512xf32> -> vector<16x512xf32>
    %471 = vector.broadcast %469 : vector<1x512xf32> to vector<16x512xf32>
    %472 = arith.addf %470, %471 : vector<16x512xf32>
    %cst_292 = arith.constant 0.000000e+00 : f32
    %473 = vector.broadcast %cst_292 : f32 to vector<16x512xf32>
    %474 = arith.maximumf %472, %473 : vector<16x512xf32>
    %cst_293 = arith.constant dense<0.000000e+00> : vector<16x4xf32>
    %475 = tpu.matmul %474, %467, %cst_293 {dimension_numbers = #tpu.dot_dimension_numbers<[1], [1], [0], [0], [0, 0, 1, 0], [], []>} : vector<16x512xf32>, vector<4x512xf32>, vector<16x4xf32> -> vector<16x4xf32>
    %476 = arith.addf %463, %475 : vector<16x4xf32>
    %c1_294 = arith.constant 1 : index
    %c0_295 = arith.constant 0 : index
    %c0_296 = arith.constant 0 : index
    %c1536_297 = arith.constant 1536 : index
    %477 = vector.load %arg2[%c1_294, %c0_295, %c0_296, %c1536_297] : memref<2x2x16x2048xf32, #tpu.memory_space<vmem>>, vector<1x1x4x512xf32>
    %478 = vector.shape_cast %477 : vector<1x1x4x512xf32> to vector<4x512xf32>
    %c1_298 = arith.constant 1 : index
    %c0_299 = arith.constant 0 : index
    %c4_300 = arith.constant 4 : index
    %c1536_301 = arith.constant 1536 : index
    %479 = vector.load %arg2[%c1_298, %c0_299, %c4_300, %c1536_301] : memref<2x2x16x2048xf32, #tpu.memory_space<vmem>>, vector<1x1x4x512xf32>
    %480 = vector.shape_cast %479 : vector<1x1x4x512xf32> to vector<4x512xf32>
    %c1_302 = arith.constant 1 : index
    %c0_303 = arith.constant 0 : index
    %c8_304 = arith.constant 8 : index
    %c1536_305 = arith.constant 1536 : index
    %481 = vector.load %arg2[%c1_302, %c0_303, %c8_304, %c1536_305] : memref<2x2x16x2048xf32, #tpu.memory_space<vmem>>, vector<1x1x1x512xf32>
    %482 = vector.shape_cast %481 : vector<1x1x1x512xf32> to vector<1x512xf32>
    %cst_306 = arith.constant dense<0.000000e+00> : vector<16x512xf32>
    %483 = tpu.matmul %436, %478, %cst_306 {dimension_numbers = #tpu.dot_dimension_numbers<[1], [0], [0], [1], [0, 0, 1, 1], [], []>} : vector<16x4xf32>, vector<4x512xf32>, vector<16x512xf32> -> vector<16x512xf32>
    %484 = vector.broadcast %482 : vector<1x512xf32> to vector<16x512xf32>
    %485 = arith.addf %483, %484 : vector<16x512xf32>
    %cst_307 = arith.constant 0.000000e+00 : f32
    %486 = vector.broadcast %cst_307 : f32 to vector<16x512xf32>
    %487 = arith.maximumf %485, %486 : vector<16x512xf32>
    %cst_308 = arith.constant dense<0.000000e+00> : vector<16x4xf32>
    %488 = tpu.matmul %487, %480, %cst_308 {dimension_numbers = #tpu.dot_dimension_numbers<[1], [1], [0], [0], [0, 0, 1, 0], [], []>} : vector<16x512xf32>, vector<4x512xf32>, vector<16x4xf32> -> vector<16x4xf32>
    %489 = arith.addf %476, %488 : vector<16x4xf32>
    %c1_309 = arith.constant 1 : index
    %c0_310 = arith.constant 0 : index
    %c9_311 = arith.constant 9 : index
    %c0_312 = arith.constant 0 : index
    %490 = vector.load %arg2[%c1_309, %c0_310, %c9_311, %c0_312] : memref<2x2x16x2048xf32, #tpu.memory_space<vmem>>, vector<1x1x1x4xf32>
    %491 = vector.shape_cast %490 : vector<1x1x1x4xf32> to vector<1x4xf32>
    %492 = vector.broadcast %491 : vector<1x4xf32> to vector<16x4xf32>
    %493 = arith.addf %489, %492 : vector<16x4xf32>
    %494 = arith.addf %436, %493 : vector<16x4xf32>
    %c6_313 = arith.constant 6 : index
    %c0_314 = arith.constant 0 : index
    %c64 = arith.constant 64 : index
    %495 = vector.load %arg1[%c6_313, %c0_314, %c64] : memref<8x8x128xf32, #tpu.memory_space<vmem>>, vector<1x1x4xf32>
    %496 = vector.shape_cast %495 : vector<1x1x4xf32> to vector<1x4xf32>
    %c6_315 = arith.constant 6 : index
    %c0_316 = arith.constant 0 : index
    %c68 = arith.constant 68 : index
    %497 = vector.load %arg1[%c6_315, %c0_316, %c68] : memref<8x8x128xf32, #tpu.memory_space<vmem>>, vector<1x1x4xf32>
    %498 = vector.shape_cast %497 : vector<1x1x4xf32> to vector<1x4xf32>
    %cst_317 = arith.constant dense<0.000000e+00> : vector<16xf32>
    %499 = vector.multi_reduction <add>, %494, %cst_317 [1] : vector<16x4xf32> to vector<16xf32>
    %500 = vector.shape_cast %499 : vector<16xf32> to vector<16x1xf32>
    %cst_318 = arith.constant 4.000000e+00 : f32
    %501 = vector.broadcast %cst_318 : f32 to vector<16x1xf32>
    %502 = arith.divf %500, %501 : vector<16x1xf32>
    %503 = vector.broadcast %502 : vector<16x1xf32> to vector<16x4xf32>
    %504 = arith.subf %494, %503 : vector<16x4xf32>
    %505 = arith.mulf %504, %504 : vector<16x4xf32>
    %cst_319 = arith.constant dense<0.000000e+00> : vector<16xf32>
    %506 = vector.multi_reduction <add>, %505, %cst_319 [1] : vector<16x4xf32> to vector<16xf32>
    %507 = vector.shape_cast %506 : vector<16xf32> to vector<16x1xf32>
    %cst_320 = arith.constant 4.000000e+00 : f32
    %508 = vector.broadcast %cst_320 : f32 to vector<16x1xf32>
    %509 = arith.divf %507, %508 : vector<16x1xf32>
    %510 = vector.broadcast %502 : vector<16x1xf32> to vector<16x4xf32>
    %511 = arith.subf %494, %510 : vector<16x4xf32>
    %cst_321 = arith.constant 9.99999974E-6 : f32
    %512 = vector.broadcast %cst_321 : f32 to vector<16x1xf32>
    %513 = arith.addf %509, %512 : vector<16x1xf32>
    %514 = math.rsqrt %513 : vector<16x1xf32>
    %515 = vector.broadcast %514 : vector<16x1xf32> to vector<16x4xf32>
    %516 = arith.mulf %511, %515 : vector<16x4xf32>
    %517 = vector.broadcast %496 : vector<1x4xf32> to vector<16x4xf32>
    %518 = arith.mulf %516, %517 : vector<16x4xf32>
    %519 = vector.broadcast %498 : vector<1x4xf32> to vector<16x4xf32>
    %520 = arith.addf %518, %519 : vector<16x4xf32>
    %c3 = arith.constant 3 : index
    %c0_322 = arith.constant 0 : index
    %c0_323 = arith.constant 0 : index
    %521 = vector.load %arg1[%c3, %c0_322, %c0_323] : memref<8x8x128xf32, #tpu.memory_space<vmem>>, vector<1x4x12xf32>
    %522 = vector.shape_cast %521 : vector<1x4x12xf32> to vector<4x12xf32>
    %c3_324 = arith.constant 3 : index
    %c0_325 = arith.constant 0 : index
    %c12_326 = arith.constant 12 : index
    %523 = vector.load %arg1[%c3_324, %c0_325, %c12_326] : memref<8x8x128xf32, #tpu.memory_space<vmem>>, vector<1x4x4xf32>
    %524 = vector.shape_cast %523 : vector<1x4x4xf32> to vector<4x4xf32>
    %c3_327 = arith.constant 3 : index
    %c4_328 = arith.constant 4 : index
    %c0_329 = arith.constant 0 : index
    %525 = vector.load %arg1[%c3_327, %c4_328, %c0_329] : memref<8x8x128xf32, #tpu.memory_space<vmem>>, vector<1x1x12xf32>
    %526 = vector.shape_cast %525 : vector<1x1x12xf32> to vector<1x12xf32>
    %c3_330 = arith.constant 3 : index
    %c4_331 = arith.constant 4 : index
    %c12_332 = arith.constant 12 : index
    %527 = vector.load %arg1[%c3_330, %c4_331, %c12_332] : memref<8x8x128xf32, #tpu.memory_space<vmem>>, vector<1x1x4xf32>
    %528 = vector.shape_cast %527 : vector<1x1x4xf32> to vector<1x4xf32>
    %cst_333 = arith.constant dense<0.000000e+00> : vector<16x12xf32>
    %529 = tpu.matmul %520, %522, %cst_333 {dimension_numbers = #tpu.dot_dimension_numbers<[1], [0], [0], [1], [0, 0, 1, 1], [], []>} : vector<16x4xf32>, vector<4x12xf32>, vector<16x12xf32> -> vector<16x12xf32>
    %530 = vector.broadcast %526 : vector<1x12xf32> to vector<16x12xf32>
    %531 = arith.addf %529, %530 : vector<16x12xf32>
    %532 = vector.extract_strided_slice %531 {offsets = [0, 0], sizes = [16, 4], strides = [1, 1]} : vector<16x12xf32> to vector<16x4xf32>
    %533 = vector.extract_strided_slice %531 {offsets = [0, 4], sizes = [16, 4], strides = [1, 1]} : vector<16x12xf32> to vector<16x4xf32>
    %534 = vector.extract_strided_slice %531 {offsets = [0, 8], sizes = [16, 4], strides = [1, 1]} : vector<16x12xf32> to vector<16x4xf32>
    %535 = vector.shape_cast %532 : vector<16x4xf32> to vector<2x8x4xf32>
    %536 = vector.shape_cast %533 : vector<16x4xf32> to vector<2x8x4xf32>
    %537 = vector.shape_cast %534 : vector<16x4xf32> to vector<2x8x4xf32>
    %538 = vector.shape_cast %535 : vector<2x8x4xf32> to vector<2x8x1x4xf32>
    %539 = vector.shape_cast %536 : vector<2x8x4xf32> to vector<2x1x8x4xf32>
    %540 = vector.broadcast %538 : vector<2x8x1x4xf32> to vector<2x8x8x4xf32>
    %541 = vector.broadcast %539 : vector<2x1x8x4xf32> to vector<2x8x8x4xf32>
    %542 = arith.mulf %540, %541 : vector<2x8x8x4xf32>
    %cst_334 = arith.constant dense<0xFF800000> : vector<2x8x4xf32>
    %543 = vector.multi_reduction <maximumf>, %542, %cst_334 [2] : vector<2x8x8x4xf32> to vector<2x8x4xf32>
    %544 = vector.shape_cast %543 : vector<2x8x4xf32> to vector<2x8x1x4xf32>
    %545 = vector.broadcast %544 : vector<2x8x1x4xf32> to vector<2x8x8x4xf32>
    %546 = arith.subf %542, %545 : vector<2x8x8x4xf32>
    %547 = math.exp %546 : vector<2x8x8x4xf32>
    %cst_335 = arith.constant dense<0.000000e+00> : vector<2x8x4xf32>
    %548 = vector.multi_reduction <add>, %547, %cst_335 [2] : vector<2x8x8x4xf32> to vector<2x8x4xf32>
    %549 = vector.shape_cast %548 : vector<2x8x4xf32> to vector<2x8x1x4xf32>
    %550 = vector.broadcast %549 : vector<2x8x1x4xf32> to vector<2x8x8x4xf32>
    %551 = arith.divf %547, %550 : vector<2x8x8x4xf32>
    %552 = vector.shape_cast %537 : vector<2x8x4xf32> to vector<2x1x8x4xf32>
    %553 = vector.broadcast %552 : vector<2x1x8x4xf32> to vector<2x8x8x4xf32>
    %554 = arith.mulf %551, %553 : vector<2x8x8x4xf32>
    %cst_336 = arith.constant dense<0.000000e+00> : vector<2x8x4xf32>
    %555 = vector.multi_reduction <add>, %554, %cst_336 [2] : vector<2x8x8x4xf32> to vector<2x8x4xf32>
    %556 = vector.shape_cast %555 : vector<2x8x4xf32> to vector<16x4xf32>
    %cst_337 = arith.constant dense<0.000000e+00> : vector<16x4xf32>
    %557 = tpu.matmul %556, %524, %cst_337 {dimension_numbers = #tpu.dot_dimension_numbers<[1], [0], [0], [1], [0, 0, 1, 1], [], []>} : vector<16x4xf32>, vector<4x4xf32>, vector<16x4xf32> -> vector<16x4xf32>
    %558 = vector.broadcast %528 : vector<1x4xf32> to vector<16x4xf32>
    %559 = arith.addf %557, %558 : vector<16x4xf32>
    %560 = arith.addf %520, %559 : vector<16x4xf32>
    %c6_338 = arith.constant 6 : index
    %c0_339 = arith.constant 0 : index
    %c40 = arith.constant 40 : index
    %561 = vector.load %arg1[%c6_338, %c0_339, %c40] : memref<8x8x128xf32, #tpu.memory_space<vmem>>, vector<1x1x4xf32>
    %562 = vector.shape_cast %561 : vector<1x1x4xf32> to vector<1x4xf32>
    %c6_340 = arith.constant 6 : index
    %c0_341 = arith.constant 0 : index
    %c44 = arith.constant 44 : index
    %563 = vector.load %arg1[%c6_340, %c0_341, %c44] : memref<8x8x128xf32, #tpu.memory_space<vmem>>, vector<1x1x4xf32>
    %564 = vector.shape_cast %563 : vector<1x1x4xf32> to vector<1x4xf32>
    %cst_342 = arith.constant dense<0.000000e+00> : vector<16xf32>
    %565 = vector.multi_reduction <add>, %560, %cst_342 [1] : vector<16x4xf32> to vector<16xf32>
    %566 = vector.shape_cast %565 : vector<16xf32> to vector<16x1xf32>
    %cst_343 = arith.constant 4.000000e+00 : f32
    %567 = vector.broadcast %cst_343 : f32 to vector<16x1xf32>
    %568 = arith.divf %566, %567 : vector<16x1xf32>
    %569 = vector.broadcast %568 : vector<16x1xf32> to vector<16x4xf32>
    %570 = arith.subf %560, %569 : vector<16x4xf32>
    %571 = arith.mulf %570, %570 : vector<16x4xf32>
    %cst_344 = arith.constant dense<0.000000e+00> : vector<16xf32>
    %572 = vector.multi_reduction <add>, %571, %cst_344 [1] : vector<16x4xf32> to vector<16xf32>
    %573 = vector.shape_cast %572 : vector<16xf32> to vector<16x1xf32>
    %cst_345 = arith.constant 4.000000e+00 : f32
    %574 = vector.broadcast %cst_345 : f32 to vector<16x1xf32>
    %575 = arith.divf %573, %574 : vector<16x1xf32>
    %576 = vector.broadcast %568 : vector<16x1xf32> to vector<16x4xf32>
    %577 = arith.subf %560, %576 : vector<16x4xf32>
    %cst_346 = arith.constant 9.99999974E-6 : f32
    %578 = vector.broadcast %cst_346 : f32 to vector<16x1xf32>
    %579 = arith.addf %575, %578 : vector<16x1xf32>
    %580 = math.rsqrt %579 : vector<16x1xf32>
    %581 = vector.broadcast %580 : vector<16x1xf32> to vector<16x4xf32>
    %582 = arith.mulf %577, %581 : vector<16x4xf32>
    %583 = vector.broadcast %562 : vector<1x4xf32> to vector<16x4xf32>
    %584 = arith.mulf %582, %583 : vector<16x4xf32>
    %585 = vector.broadcast %564 : vector<1x4xf32> to vector<16x4xf32>
    %586 = arith.addf %584, %585 : vector<16x4xf32>
    %c5 = arith.constant 5 : index
    %c0_347 = arith.constant 0 : index
    %c0_348 = arith.constant 0 : index
    %587 = vector.load %arg1[%c5, %c0_347, %c0_348] : memref<8x8x128xf32, #tpu.memory_space<vmem>>, vector<1x4x12xf32>
    %588 = vector.shape_cast %587 : vector<1x4x12xf32> to vector<4x12xf32>
    %c5_349 = arith.constant 5 : index
    %c0_350 = arith.constant 0 : index
    %c12_351 = arith.constant 12 : index
    %589 = vector.load %arg1[%c5_349, %c0_350, %c12_351] : memref<8x8x128xf32, #tpu.memory_space<vmem>>, vector<1x4x4xf32>
    %590 = vector.shape_cast %589 : vector<1x4x4xf32> to vector<4x4xf32>
    %c5_352 = arith.constant 5 : index
    %c4_353 = arith.constant 4 : index
    %c0_354 = arith.constant 0 : index
    %591 = vector.load %arg1[%c5_352, %c4_353, %c0_354] : memref<8x8x128xf32, #tpu.memory_space<vmem>>, vector<1x1x12xf32>
    %592 = vector.shape_cast %591 : vector<1x1x12xf32> to vector<1x12xf32>
    %c5_355 = arith.constant 5 : index
    %c4_356 = arith.constant 4 : index
    %c12_357 = arith.constant 12 : index
    %593 = vector.load %arg1[%c5_355, %c4_356, %c12_357] : memref<8x8x128xf32, #tpu.memory_space<vmem>>, vector<1x1x4xf32>
    %594 = vector.shape_cast %593 : vector<1x1x4xf32> to vector<1x4xf32>
    %cst_358 = arith.constant dense<0.000000e+00> : vector<16x12xf32>
    %595 = tpu.matmul %586, %588, %cst_358 {dimension_numbers = #tpu.dot_dimension_numbers<[1], [0], [0], [1], [0, 0, 1, 1], [], []>} : vector<16x4xf32>, vector<4x12xf32>, vector<16x12xf32> -> vector<16x12xf32>
    %596 = vector.broadcast %592 : vector<1x12xf32> to vector<16x12xf32>
    %597 = arith.addf %595, %596 : vector<16x12xf32>
    %cst_359 = arith.constant dense<0.000000e+00> : vector<16x12xf32>
    %598 = tpu.matmul %301, %588, %cst_359 {dimension_numbers = #tpu.dot_dimension_numbers<[1], [0], [0], [1], [0, 0, 1, 1], [], []>} : vector<16x4xf32>, vector<4x12xf32>, vector<16x12xf32> -> vector<16x12xf32>
    %599 = vector.broadcast %592 : vector<1x12xf32> to vector<16x12xf32>
    %600 = arith.addf %598, %599 : vector<16x12xf32>
    %601 = vector.extract_strided_slice %597 {offsets = [0, 0], sizes = [16, 4], strides = [1, 1]} : vector<16x12xf32> to vector<16x4xf32>
    %602 = vector.extract_strided_slice %600 {offsets = [0, 4], sizes = [16, 4], strides = [1, 1]} : vector<16x12xf32> to vector<16x4xf32>
    %603 = vector.extract_strided_slice %600 {offsets = [0, 8], sizes = [16, 4], strides = [1, 1]} : vector<16x12xf32> to vector<16x4xf32>
    %604 = vector.shape_cast %601 : vector<16x4xf32> to vector<2x8x4xf32>
    %605 = vector.shape_cast %602 : vector<16x4xf32> to vector<2x8x4xf32>
    %606 = vector.shape_cast %603 : vector<16x4xf32> to vector<2x8x4xf32>
    %607 = vector.shape_cast %604 : vector<2x8x4xf32> to vector<2x8x1x4xf32>
    %608 = vector.shape_cast %605 : vector<2x8x4xf32> to vector<2x1x8x4xf32>
    %609 = vector.broadcast %607 : vector<2x8x1x4xf32> to vector<2x8x8x4xf32>
    %610 = vector.broadcast %608 : vector<2x1x8x4xf32> to vector<2x8x8x4xf32>
    %611 = arith.mulf %609, %610 : vector<2x8x8x4xf32>
    %cst_360 = arith.constant dense<0xFF800000> : vector<2x8x4xf32>
    %612 = vector.multi_reduction <maximumf>, %611, %cst_360 [2] : vector<2x8x8x4xf32> to vector<2x8x4xf32>
    %613 = vector.shape_cast %612 : vector<2x8x4xf32> to vector<2x8x1x4xf32>
    %614 = vector.broadcast %613 : vector<2x8x1x4xf32> to vector<2x8x8x4xf32>
    %615 = arith.subf %611, %614 : vector<2x8x8x4xf32>
    %616 = math.exp %615 : vector<2x8x8x4xf32>
    %cst_361 = arith.constant dense<0.000000e+00> : vector<2x8x4xf32>
    %617 = vector.multi_reduction <add>, %616, %cst_361 [2] : vector<2x8x8x4xf32> to vector<2x8x4xf32>
    %618 = vector.shape_cast %617 : vector<2x8x4xf32> to vector<2x8x1x4xf32>
    %619 = vector.broadcast %618 : vector<2x8x1x4xf32> to vector<2x8x8x4xf32>
    %620 = arith.divf %616, %619 : vector<2x8x8x4xf32>
    %621 = vector.shape_cast %606 : vector<2x8x4xf32> to vector<2x1x8x4xf32>
    %622 = vector.broadcast %621 : vector<2x1x8x4xf32> to vector<2x8x8x4xf32>
    %623 = arith.mulf %620, %622 : vector<2x8x8x4xf32>
    %cst_362 = arith.constant dense<0.000000e+00> : vector<2x8x4xf32>
    %624 = vector.multi_reduction <add>, %623, %cst_362 [2] : vector<2x8x8x4xf32> to vector<2x8x4xf32>
    %625 = vector.shape_cast %624 : vector<2x8x4xf32> to vector<16x4xf32>
    %cst_363 = arith.constant dense<0.000000e+00> : vector<16x4xf32>
    %626 = tpu.matmul %625, %590, %cst_363 {dimension_numbers = #tpu.dot_dimension_numbers<[1], [0], [0], [1], [0, 0, 1, 1], [], []>} : vector<16x4xf32>, vector<4x4xf32>, vector<16x4xf32> -> vector<16x4xf32>
    %627 = vector.broadcast %594 : vector<1x4xf32> to vector<16x4xf32>
    %628 = arith.addf %626, %627 : vector<16x4xf32>
    %629 = arith.addf %586, %628 : vector<16x4xf32>
    %c6_364 = arith.constant 6 : index
    %c0_365 = arith.constant 0 : index
    %c56 = arith.constant 56 : index
    %630 = vector.load %arg1[%c6_364, %c0_365, %c56] : memref<8x8x128xf32, #tpu.memory_space<vmem>>, vector<1x1x4xf32>
    %631 = vector.shape_cast %630 : vector<1x1x4xf32> to vector<1x4xf32>
    %c6_366 = arith.constant 6 : index
    %c0_367 = arith.constant 0 : index
    %c60 = arith.constant 60 : index
    %632 = vector.load %arg1[%c6_366, %c0_367, %c60] : memref<8x8x128xf32, #tpu.memory_space<vmem>>, vector<1x1x4xf32>
    %633 = vector.shape_cast %632 : vector<1x1x4xf32> to vector<1x4xf32>
    %cst_368 = arith.constant dense<0.000000e+00> : vector<16xf32>
    %634 = vector.multi_reduction <add>, %629, %cst_368 [1] : vector<16x4xf32> to vector<16xf32>
    %635 = vector.shape_cast %634 : vector<16xf32> to vector<16x1xf32>
    %cst_369 = arith.constant 4.000000e+00 : f32
    %636 = vector.broadcast %cst_369 : f32 to vector<16x1xf32>
    %637 = arith.divf %635, %636 : vector<16x1xf32>
    %638 = vector.broadcast %637 : vector<16x1xf32> to vector<16x4xf32>
    %639 = arith.subf %629, %638 : vector<16x4xf32>
    %640 = arith.mulf %639, %639 : vector<16x4xf32>
    %cst_370 = arith.constant dense<0.000000e+00> : vector<16xf32>
    %641 = vector.multi_reduction <add>, %640, %cst_370 [1] : vector<16x4xf32> to vector<16xf32>
    %642 = vector.shape_cast %641 : vector<16xf32> to vector<16x1xf32>
    %cst_371 = arith.constant 4.000000e+00 : f32
    %643 = vector.broadcast %cst_371 : f32 to vector<16x1xf32>
    %644 = arith.divf %642, %643 : vector<16x1xf32>
    %645 = vector.broadcast %637 : vector<16x1xf32> to vector<16x4xf32>
    %646 = arith.subf %629, %645 : vector<16x4xf32>
    %cst_372 = arith.constant 9.99999974E-6 : f32
    %647 = vector.broadcast %cst_372 : f32 to vector<16x1xf32>
    %648 = arith.addf %644, %647 : vector<16x1xf32>
    %649 = math.rsqrt %648 : vector<16x1xf32>
    %650 = vector.broadcast %649 : vector<16x1xf32> to vector<16x4xf32>
    %651 = arith.mulf %646, %650 : vector<16x4xf32>
    %652 = vector.broadcast %631 : vector<1x4xf32> to vector<16x4xf32>
    %653 = arith.mulf %651, %652 : vector<16x4xf32>
    %654 = vector.broadcast %633 : vector<1x4xf32> to vector<16x4xf32>
    %655 = arith.addf %653, %654 : vector<16x4xf32>
    %cst_373 = arith.constant 0.000000e+00 : f32
    %656 = vector.broadcast %cst_373 : f32 to vector<16x4xf32>
    %c1_374 = arith.constant 1 : index
    %c1_375 = arith.constant 1 : index
    %c0_376 = arith.constant 0 : index
    %c0_377 = arith.constant 0 : index
    %657 = vector.load %arg2[%c1_374, %c1_375, %c0_376, %c0_377] : memref<2x2x16x2048xf32, #tpu.memory_space<vmem>>, vector<1x1x4x512xf32>
    %658 = vector.shape_cast %657 : vector<1x1x4x512xf32> to vector<4x512xf32>
    %c1_378 = arith.constant 1 : index
    %c1_379 = arith.constant 1 : index
    %c4_380 = arith.constant 4 : index
    %c0_381 = arith.constant 0 : index
    %659 = vector.load %arg2[%c1_378, %c1_379, %c4_380, %c0_381] : memref<2x2x16x2048xf32, #tpu.memory_space<vmem>>, vector<1x1x4x512xf32>
    %660 = vector.shape_cast %659 : vector<1x1x4x512xf32> to vector<4x512xf32>
    %c1_382 = arith.constant 1 : index
    %c1_383 = arith.constant 1 : index
    %c8_384 = arith.constant 8 : index
    %c0_385 = arith.constant 0 : index
    %661 = vector.load %arg2[%c1_382, %c1_383, %c8_384, %c0_385] : memref<2x2x16x2048xf32, #tpu.memory_space<vmem>>, vector<1x1x1x512xf32>
    %662 = vector.shape_cast %661 : vector<1x1x1x512xf32> to vector<1x512xf32>
    %cst_386 = arith.constant dense<0.000000e+00> : vector<16x512xf32>
    %663 = tpu.matmul %655, %658, %cst_386 {dimension_numbers = #tpu.dot_dimension_numbers<[1], [0], [0], [1], [0, 0, 1, 1], [], []>} : vector<16x4xf32>, vector<4x512xf32>, vector<16x512xf32> -> vector<16x512xf32>
    %664 = vector.broadcast %662 : vector<1x512xf32> to vector<16x512xf32>
    %665 = arith.addf %663, %664 : vector<16x512xf32>
    %cst_387 = arith.constant 0.000000e+00 : f32
    %666 = vector.broadcast %cst_387 : f32 to vector<16x512xf32>
    %667 = arith.maximumf %665, %666 : vector<16x512xf32>
    %cst_388 = arith.constant dense<0.000000e+00> : vector<16x4xf32>
    %668 = tpu.matmul %667, %660, %cst_388 {dimension_numbers = #tpu.dot_dimension_numbers<[1], [1], [0], [0], [0, 0, 1, 0], [], []>} : vector<16x512xf32>, vector<4x512xf32>, vector<16x4xf32> -> vector<16x4xf32>
    %669 = arith.addf %656, %668 : vector<16x4xf32>
    %c1_389 = arith.constant 1 : index
    %c1_390 = arith.constant 1 : index
    %c0_391 = arith.constant 0 : index
    %c512_392 = arith.constant 512 : index
    %670 = vector.load %arg2[%c1_389, %c1_390, %c0_391, %c512_392] : memref<2x2x16x2048xf32, #tpu.memory_space<vmem>>, vector<1x1x4x512xf32>
    %671 = vector.shape_cast %670 : vector<1x1x4x512xf32> to vector<4x512xf32>
    %c1_393 = arith.constant 1 : index
    %c1_394 = arith.constant 1 : index
    %c4_395 = arith.constant 4 : index
    %c512_396 = arith.constant 512 : index
    %672 = vector.load %arg2[%c1_393, %c1_394, %c4_395, %c512_396] : memref<2x2x16x2048xf32, #tpu.memory_space<vmem>>, vector<1x1x4x512xf32>
    %673 = vector.shape_cast %672 : vector<1x1x4x512xf32> to vector<4x512xf32>
    %c1_397 = arith.constant 1 : index
    %c1_398 = arith.constant 1 : index
    %c8_399 = arith.constant 8 : index
    %c512_400 = arith.constant 512 : index
    %674 = vector.load %arg2[%c1_397, %c1_398, %c8_399, %c512_400] : memref<2x2x16x2048xf32, #tpu.memory_space<vmem>>, vector<1x1x1x512xf32>
    %675 = vector.shape_cast %674 : vector<1x1x1x512xf32> to vector<1x512xf32>
    %cst_401 = arith.constant dense<0.000000e+00> : vector<16x512xf32>
    %676 = tpu.matmul %655, %671, %cst_401 {dimension_numbers = #tpu.dot_dimension_numbers<[1], [0], [0], [1], [0, 0, 1, 1], [], []>} : vector<16x4xf32>, vector<4x512xf32>, vector<16x512xf32> -> vector<16x512xf32>
    %677 = vector.broadcast %675 : vector<1x512xf32> to vector<16x512xf32>
    %678 = arith.addf %676, %677 : vector<16x512xf32>
    %cst_402 = arith.constant 0.000000e+00 : f32
    %679 = vector.broadcast %cst_402 : f32 to vector<16x512xf32>
    %680 = arith.maximumf %678, %679 : vector<16x512xf32>
    %cst_403 = arith.constant dense<0.000000e+00> : vector<16x4xf32>
    %681 = tpu.matmul %680, %673, %cst_403 {dimension_numbers = #tpu.dot_dimension_numbers<[1], [1], [0], [0], [0, 0, 1, 0], [], []>} : vector<16x512xf32>, vector<4x512xf32>, vector<16x4xf32> -> vector<16x4xf32>
    %682 = arith.addf %669, %681 : vector<16x4xf32>
    %c1_404 = arith.constant 1 : index
    %c1_405 = arith.constant 1 : index
    %c0_406 = arith.constant 0 : index
    %c1024_407 = arith.constant 1024 : index
    %683 = vector.load %arg2[%c1_404, %c1_405, %c0_406, %c1024_407] : memref<2x2x16x2048xf32, #tpu.memory_space<vmem>>, vector<1x1x4x512xf32>
    %684 = vector.shape_cast %683 : vector<1x1x4x512xf32> to vector<4x512xf32>
    %c1_408 = arith.constant 1 : index
    %c1_409 = arith.constant 1 : index
    %c4_410 = arith.constant 4 : index
    %c1024_411 = arith.constant 1024 : index
    %685 = vector.load %arg2[%c1_408, %c1_409, %c4_410, %c1024_411] : memref<2x2x16x2048xf32, #tpu.memory_space<vmem>>, vector<1x1x4x512xf32>
    %686 = vector.shape_cast %685 : vector<1x1x4x512xf32> to vector<4x512xf32>
    %c1_412 = arith.constant 1 : index
    %c1_413 = arith.constant 1 : index
    %c8_414 = arith.constant 8 : index
    %c1024_415 = arith.constant 1024 : index
    %687 = vector.load %arg2[%c1_412, %c1_413, %c8_414, %c1024_415] : memref<2x2x16x2048xf32, #tpu.memory_space<vmem>>, vector<1x1x1x512xf32>
    %688 = vector.shape_cast %687 : vector<1x1x1x512xf32> to vector<1x512xf32>
    %cst_416 = arith.constant dense<0.000000e+00> : vector<16x512xf32>
    %689 = tpu.matmul %655, %684, %cst_416 {dimension_numbers = #tpu.dot_dimension_numbers<[1], [0], [0], [1], [0, 0, 1, 1], [], []>} : vector<16x4xf32>, vector<4x512xf32>, vector<16x512xf32> -> vector<16x512xf32>
    %690 = vector.broadcast %688 : vector<1x512xf32> to vector<16x512xf32>
    %691 = arith.addf %689, %690 : vector<16x512xf32>
    %cst_417 = arith.constant 0.000000e+00 : f32
    %692 = vector.broadcast %cst_417 : f32 to vector<16x512xf32>
    %693 = arith.maximumf %691, %692 : vector<16x512xf32>
    %cst_418 = arith.constant dense<0.000000e+00> : vector<16x4xf32>
    %694 = tpu.matmul %693, %686, %cst_418 {dimension_numbers = #tpu.dot_dimension_numbers<[1], [1], [0], [0], [0, 0, 1, 0], [], []>} : vector<16x512xf32>, vector<4x512xf32>, vector<16x4xf32> -> vector<16x4xf32>
    %695 = arith.addf %682, %694 : vector<16x4xf32>
    %c1_419 = arith.constant 1 : index
    %c1_420 = arith.constant 1 : index
    %c0_421 = arith.constant 0 : index
    %c1536_422 = arith.constant 1536 : index
    %696 = vector.load %arg2[%c1_419, %c1_420, %c0_421, %c1536_422] : memref<2x2x16x2048xf32, #tpu.memory_space<vmem>>, vector<1x1x4x512xf32>
    %697 = vector.shape_cast %696 : vector<1x1x4x512xf32> to vector<4x512xf32>
    %c1_423 = arith.constant 1 : index
    %c1_424 = arith.constant 1 : index
    %c4_425 = arith.constant 4 : index
    %c1536_426 = arith.constant 1536 : index
    %698 = vector.load %arg2[%c1_423, %c1_424, %c4_425, %c1536_426] : memref<2x2x16x2048xf32, #tpu.memory_space<vmem>>, vector<1x1x4x512xf32>
    %699 = vector.shape_cast %698 : vector<1x1x4x512xf32> to vector<4x512xf32>
    %c1_427 = arith.constant 1 : index
    %c1_428 = arith.constant 1 : index
    %c8_429 = arith.constant 8 : index
    %c1536_430 = arith.constant 1536 : index
    %700 = vector.load %arg2[%c1_427, %c1_428, %c8_429, %c1536_430] : memref<2x2x16x2048xf32, #tpu.memory_space<vmem>>, vector<1x1x1x512xf32>
    %701 = vector.shape_cast %700 : vector<1x1x1x512xf32> to vector<1x512xf32>
    %cst_431 = arith.constant dense<0.000000e+00> : vector<16x512xf32>
    %702 = tpu.matmul %655, %697, %cst_431 {dimension_numbers = #tpu.dot_dimension_numbers<[1], [0], [0], [1], [0, 0, 1, 1], [], []>} : vector<16x4xf32>, vector<4x512xf32>, vector<16x512xf32> -> vector<16x512xf32>
    %703 = vector.broadcast %701 : vector<1x512xf32> to vector<16x512xf32>
    %704 = arith.addf %702, %703 : vector<16x512xf32>
    %cst_432 = arith.constant 0.000000e+00 : f32
    %705 = vector.broadcast %cst_432 : f32 to vector<16x512xf32>
    %706 = arith.maximumf %704, %705 : vector<16x512xf32>
    %cst_433 = arith.constant dense<0.000000e+00> : vector<16x4xf32>
    %707 = tpu.matmul %706, %699, %cst_433 {dimension_numbers = #tpu.dot_dimension_numbers<[1], [1], [0], [0], [0, 0, 1, 0], [], []>} : vector<16x512xf32>, vector<4x512xf32>, vector<16x4xf32> -> vector<16x4xf32>
    %708 = arith.addf %695, %707 : vector<16x4xf32>
    %c1_434 = arith.constant 1 : index
    %c1_435 = arith.constant 1 : index
    %c9_436 = arith.constant 9 : index
    %c0_437 = arith.constant 0 : index
    %709 = vector.load %arg2[%c1_434, %c1_435, %c9_436, %c0_437] : memref<2x2x16x2048xf32, #tpu.memory_space<vmem>>, vector<1x1x1x4xf32>
    %710 = vector.shape_cast %709 : vector<1x1x1x4xf32> to vector<1x4xf32>
    %711 = vector.broadcast %710 : vector<1x4xf32> to vector<16x4xf32>
    %712 = arith.addf %708, %711 : vector<16x4xf32>
    %713 = arith.addf %655, %712 : vector<16x4xf32>
    %c6_438 = arith.constant 6 : index
    %c0_439 = arith.constant 0 : index
    %c72 = arith.constant 72 : index
    %714 = vector.load %arg1[%c6_438, %c0_439, %c72] : memref<8x8x128xf32, #tpu.memory_space<vmem>>, vector<1x1x4xf32>
    %715 = vector.shape_cast %714 : vector<1x1x4xf32> to vector<1x4xf32>
    %c6_440 = arith.constant 6 : index
    %c0_441 = arith.constant 0 : index
    %c76 = arith.constant 76 : index
    %716 = vector.load %arg1[%c6_440, %c0_441, %c76] : memref<8x8x128xf32, #tpu.memory_space<vmem>>, vector<1x1x4xf32>
    %717 = vector.shape_cast %716 : vector<1x1x4xf32> to vector<1x4xf32>
    %cst_442 = arith.constant dense<0.000000e+00> : vector<16xf32>
    %718 = vector.multi_reduction <add>, %713, %cst_442 [1] : vector<16x4xf32> to vector<16xf32>
    %719 = vector.shape_cast %718 : vector<16xf32> to vector<16x1xf32>
    %cst_443 = arith.constant 4.000000e+00 : f32
    %720 = vector.broadcast %cst_443 : f32 to vector<16x1xf32>
    %721 = arith.divf %719, %720 : vector<16x1xf32>
    %722 = vector.broadcast %721 : vector<16x1xf32> to vector<16x4xf32>
    %723 = arith.subf %713, %722 : vector<16x4xf32>
    %724 = arith.mulf %723, %723 : vector<16x4xf32>
    %cst_444 = arith.constant dense<0.000000e+00> : vector<16xf32>
    %725 = vector.multi_reduction <add>, %724, %cst_444 [1] : vector<16x4xf32> to vector<16xf32>
    %726 = vector.shape_cast %725 : vector<16xf32> to vector<16x1xf32>
    %cst_445 = arith.constant 4.000000e+00 : f32
    %727 = vector.broadcast %cst_445 : f32 to vector<16x1xf32>
    %728 = arith.divf %726, %727 : vector<16x1xf32>
    %729 = vector.broadcast %721 : vector<16x1xf32> to vector<16x4xf32>
    %730 = arith.subf %713, %729 : vector<16x4xf32>
    %cst_446 = arith.constant 9.99999974E-6 : f32
    %731 = vector.broadcast %cst_446 : f32 to vector<16x1xf32>
    %732 = arith.addf %728, %731 : vector<16x1xf32>
    %733 = math.rsqrt %732 : vector<16x1xf32>
    %734 = vector.broadcast %733 : vector<16x1xf32> to vector<16x4xf32>
    %735 = arith.mulf %730, %734 : vector<16x4xf32>
    %736 = vector.broadcast %715 : vector<1x4xf32> to vector<16x4xf32>
    %737 = arith.mulf %735, %736 : vector<16x4xf32>
    %738 = vector.broadcast %717 : vector<1x4xf32> to vector<16x4xf32>
    %739 = arith.addf %737, %738 : vector<16x4xf32>
    %c7 = arith.constant 7 : index
    %c0_447 = arith.constant 0 : index
    %c0_448 = arith.constant 0 : index
    %740 = vector.load %arg1[%c7, %c0_447, %c0_448] : memref<8x8x128xf32, #tpu.memory_space<vmem>>, vector<1x4x4xf32>
    %741 = vector.shape_cast %740 : vector<1x4x4xf32> to vector<4x4xf32>
    %c7_449 = arith.constant 7 : index
    %c4_450 = arith.constant 4 : index
    %c0_451 = arith.constant 0 : index
    %742 = vector.load %arg1[%c7_449, %c4_450, %c0_451] : memref<8x8x128xf32, #tpu.memory_space<vmem>>, vector<1x1x4xf32>
    %743 = vector.shape_cast %742 : vector<1x1x4xf32> to vector<1x4xf32>
    %c7_452 = arith.constant 7 : index
    %c4_453 = arith.constant 4 : index
    %c4_454 = arith.constant 4 : index
    %744 = vector.load %arg1[%c7_452, %c4_453, %c4_454] : memref<8x8x128xf32, #tpu.memory_space<vmem>>, vector<1x1x4xf32>
    %745 = vector.shape_cast %744 : vector<1x1x4xf32> to vector<1x4xf32>
    %c7_455 = arith.constant 7 : index
    %c4_456 = arith.constant 4 : index
    %c8_457 = arith.constant 8 : index
    %746 = vector.load %arg1[%c7_455, %c4_456, %c8_457] : memref<8x8x128xf32, #tpu.memory_space<vmem>>, vector<1x1x4xf32>
    %747 = vector.shape_cast %746 : vector<1x1x4xf32> to vector<1x4xf32>
    %c7_458 = arith.constant 7 : index
    %c4_459 = arith.constant 4 : index
    %c12_460 = arith.constant 12 : index
    %748 = vector.load %arg1[%c7_458, %c4_459, %c12_460] : memref<8x8x128xf32, #tpu.memory_space<vmem>>, vector<1x1x4xf32>
    %749 = vector.shape_cast %748 : vector<1x1x4xf32> to vector<1x4xf32>
    %c7_461 = arith.constant 7 : index
    %c4_462 = arith.constant 4 : index
    %c16_463 = arith.constant 16 : index
    %750 = vector.load %arg1[%c7_461, %c4_462, %c16_463] : memref<8x8x128xf32, #tpu.memory_space<vmem>>, vector<1x1x4xf32>
    %751 = vector.shape_cast %750 : vector<1x1x4xf32> to vector<1x4xf32>
    %752 = vector.shape_cast %739 : vector<16x4xf32> to vector<2x8x4xf32>
    %753 = vector.extract_strided_slice %752 {offsets = [0, 7, 0], sizes = [2, 1, 4], strides = [1, 1, 1]} : vector<2x8x4xf32> to vector<2x1x4xf32>
    %754 = vector.shape_cast %753 : vector<2x1x4xf32> to vector<2x4xf32>
    %cst_464 = arith.constant dense<0.000000e+00> : vector<2x4xf32>
    %755 = tpu.matmul %754, %741, %cst_464 {dimension_numbers = #tpu.dot_dimension_numbers<[1], [0], [0], [1], [0, 0, 1, 1], [], []>} : vector<2x4xf32>, vector<4x4xf32>, vector<2x4xf32> -> vector<2x4xf32>
    %756 = vector.broadcast %743 : vector<1x4xf32> to vector<2x4xf32>
    %757 = arith.addf %755, %756 : vector<2x4xf32>
    %758 = vector.broadcast %749 : vector<1x4xf32> to vector<2x4xf32>
    %759 = arith.subf %757, %758 : vector<2x4xf32>
    %cst_465 = arith.constant 9.99999974E-6 : f32
    %760 = vector.broadcast %cst_465 : f32 to vector<1x4xf32>
    %761 = arith.addf %751, %760 : vector<1x4xf32>
    %762 = math.rsqrt %761 : vector<1x4xf32>
    %763 = vector.broadcast %762 : vector<1x4xf32> to vector<2x4xf32>
    %764 = arith.mulf %759, %763 : vector<2x4xf32>
    %765 = vector.broadcast %745 : vector<1x4xf32> to vector<2x4xf32>
    %766 = arith.mulf %764, %765 : vector<2x4xf32>
    %767 = vector.broadcast %747 : vector<1x4xf32> to vector<2x4xf32>
    %768 = arith.addf %766, %767 : vector<2x4xf32>
    %c0_466 = arith.constant 0 : index
    %c0_467 = arith.constant 0 : index
    %769 = vector.load %arg3[%c0_466, %c0_467] : memref<2x4xf32, #tpu.memory_space<vmem>>, vector<2x4xf32>
    tpu.vector_store %arg3[%c0_466, %c0_467], %768 {strides = array<i32>} : memref<2x4xf32, #tpu.memory_space<vmem>>, vector<2x4xf32>,
    return
  }
}

</mosaic_0001>

<bundles_post_ra>
// kernel: transformer_forward.1
= control target key start
LH: loop header
LB: loop body
LE: loop exit
PB: predicated region body
PF: predicated region fallthrough
CT: control target
= control target key end

     0   :  { %8 = vsyncpa [#allocation3], 0  ;;  %s15262_s0 = inlined_call_operand.vmem [shape: f32[2,8,4], index: 0, kind: input, shape index: {}]   ;;  %s15263_s1 = inlined_call_operand.hbm [shape: f32[8,8,128], index: 1, kind: input, shape index: {}]   ;;  %s15264_s2 = inlined_call_operand.hbm [shape: f32[2,2,16,2048], index: 2, kind: input, shape index: {}]   ;;  %s15265_s3 = inlined_call_operand.hbm [shape: f32[2,4], index: 3, kind: output, shape index: {}]  }
   0x1   :  { %9 = vsyncpa [#allocation6], 0 }
   0x2   :  { %10 = vsyncpa [#allocation4], 0  ;;  %s12615_s12 = smov [#allocation2]   ;;  %s12543_s16 = scalar_lea.hbm %s15263_s1, 1024 }
   0x3   :  { %s18_s13 = sshll.u32 %s12615_s12, 4  ;;  %p12544_p0 = scmp.ne.s32.totalorder %s15263_s1, %s12543_s16  ;;  %s19_s13 = int_to_ptr.vmem [resolvable:$true] %s18_s13 }
   0x4   :  { %p12547_p1 = scmp.lt.u32.totalorder %s12543_s16, %s15263_s1 }
   0x6   :  { %p12549_p2 = pnand %p12547_p1, %p12544_p0 }
   0x8   :  { %12552 = shalt.err (!%p12549_p2)
}
   0x9   :  { %s12553_s21 = scalar_lea.vmem %s19_s13, 1024  ;;  %p12558_p4 = scmp.lt.s32.totalorder %s19_s13, %s19_s13 }
   0xa   :  { %p12554_p3 = scmp.ne.s32.totalorder %s19_s13, %s12553_s21  ;;  %p12559_p5 = scmp.lt.s32.totalorder %s12553_s21, %s12553_s21 }
   0xc   :  { %p12560_p6 = por %p12559_p5, %p12558_p4 }
   0xe   :  { %p12561_p7 = pnand %p12560_p6, %p12554_p3 }
  0x10   :  { %12564 = shalt.err (!%p12561_p7)
}
  0x11   :  { %s12616_s22 = smov 128   ;;  %s12617_s23 = smov 8  }
  0x12   :  { %24 = dma.hbm_to_vmem [thread:$0]  %s15263_s1, 1024, %s19_s13, [#allocation3], %s12616_s22, %s12616_s22, %s12617_s23  }
  0x13   :  { %s12618_s26 = smov [#allocation5]   ;;  %s12565_s30 = scalar_lea.hbm %s15264_s2, 16384 }
  0x14   :  { %s30_s27 = sshll.u32 %s12618_s26, 4  ;;  %p12566_p8 = scmp.ne.s32.totalorder %s15264_s2, %s12565_s30  ;;  %s31_s27 = int_to_ptr.vmem [resolvable:$true] %s30_s27 }
  0x15   :  { %p12569_p9 = scmp.lt.u32.totalorder %s12565_s30, %s15264_s2 }
  0x17   :  { %p12571_p10 = pnand %p12569_p9, %p12566_p8 }
  0x19   :  { %12574 = shalt.err (!%p12571_p10)
}
  0x1a   :  { %s12575_s8 = scalar_lea.vmem %s31_s27, 16384  ;;  %p12580_p12 = scmp.lt.s32.totalorder %s31_s27, %s31_s27 }
  0x1b   :  { %p12576_p11 = scmp.ne.s32.totalorder %s31_s27, %s12575_s8  ;;  %p12581_p13 = scmp.lt.s32.totalorder %s12575_s8, %s12575_s8 }
  0x1d   :  { %p12582_p0 = por %p12581_p13, %p12580_p12 }
  0x1f   :  { %p12583_p1 = pnand %p12582_p0, %p12576_p11 }
  0x21   :  { %12586 = shalt.err (!%p12583_p1)
}
  0x22   :  { %s12619_s1 = smov 2048  }
  0x23   :  { %36 = dma.hbm_to_vmem [thread:$0]  %s15264_s2, 16384, %s31_s27, [#allocation6], %s12619_s1, %s12619_s1, %s12616_s22  }
  0x24   :  { %12609 = dma.done.wait [#allocation3], 1024  }
  0x25   :  { %12610 = vsyncadd [#allocation3], 4294966272 }
  0x26   :  { %12611 = dma.done.wait [#allocation6], 16384  }
  0x27   :  { %12612 = vsyncadd [#allocation6], 4294950912  ;;  %vm58_vm0 = vcmask 1043456   ;;  %vm51_vm1 = vcmask 31744   ;;  %v45_v0 = vld [vmem:[#allocation2] sm:$0xf]  ;;  %v143_v10 = vlaneseq }
  0x28   :  { %v43_v1 = vld [vmem:[%s15262_s0] sm:$0xff]  ;;  %v44_v2 = vld [vmem:[%s15262_s0 + $0x8] sm:$0xff]  ;;  %12006 = vmatprep.subr.msk.mxu0 %vm58_vm0, %v45_v0  ;;  %s12620_s2 = smov 120   ;;  %s12621_s15 = smov 124   ;;  %v12623_v8 = vmov 1966171168  }
  0x29   :  { %12008 = vmatprep.mubr.msk.f32.mxu0 %vm51_vm1, %v43_v1  ;;  %12007 = vmatpush3.msk.msra.mxu0 %vm58_vm0, %v45_v0  ;;  %v11778_v3 = vld [vmem:[#allocation2 + $0x4] ss:$0 sm:$0xff]  ;;  %s12622_s16 = smov 116   ;;  %v141_v9 = vunpack.c.l.s4 %v12623_v8  ;;  %v12703_v12 = vshrl.u32 %v143_v10, 7  ;;  %vm793_vm2 = vcmask 1041409   ;;  %vm795_vm3 = vcmask 1042434  }
  0x2a   :  { %12009 = vmatmul.mubr.msk.f32.vlgmr.msra.gmra.mrb[0].mxu0 %vm51_vm1, %v44_v2  ;;  %vm797_vm4 = vcmask 1043459   ;;  %vm799_vm5 = vcmask 1044484   ;;  %vm801_vm6 = vcmask 1045509   ;;  %vm803_vm7 = vcmask 1046534   ;;  %s12625_s21 = smov 112   ;;  %s12626_s22 = smov 108  }
  0x2b   :  { %v142_v11 = vunpack.c.0.s8 %v141_v9  ;;  %v12731_v33 = vsub.s32 0, %v12703_v12  ;;  %vm805_vm8 = vcmask 1047559   ;;  %s12627_s4 = smov 100   ;;  %s12628_s5 = smov 104   ;;  %vm12641_vm9 = vmmov 0  }
  0x2c   :  { %s12630_s6 = smov 96   ;;  %s12631_s7 = smov 76   ;;  %vm11748_vm10 = vcmask 25600  }
  0x2d   :  { %v12706_v13 = vsub.s32 %v142_v11, %v12703_v12  ;;  %15293 = vst [vmem:[#allocation12_spill] sm:$0xff] %v12731_v33  ;;  %s12632_s8 = smov 80   ;;  %s12633_s1 = smov 60  }
  0x2e   :  { %s12634_s9 = smov 64   ;;  %s12635_s10 = smov 84  }
  0x2f   :  { %15292 = vst [vmem:[#allocation11_spill] sm:$0xff] %v12706_v13  ;;  %s12636_s11 = smov 88   ;;  %s12637_s12 = smov 68  }
  0x30   :  { %s12638_s13 = smov 72   ;;  %s12639_s14 = smov 52  }
  0x31   :  { %s12640_s17 = smov 56  }
  0xfd   :  { %v12010_v4 = vpop.f32.mrb[0].mxu0 }
  0xfe   :  { %v128_v5 = vpop.f32.mrb[1].mxu0  ;;  %v134_v7 = vadd.f32 %v12010_v4, %v11778_v3 }
  0xff   :  { %v129_v6 = vadd.f32 %v11778_v3, %v128_v5 }
 0x100   :  { %v188_v14 = vcombine.high %v134_v7, %v134_v7  ;;  %v195_v16 = vrot.slane %v134_v7, %v12706_v13 }
 0x101   :  { %643 = vrot.lane.b32.xlu1 %v129_v6, %s12620_s2  ;;  %317 = vrot.lane.b32.xlu0 %v129_v6, %s12621_s15  ;;  %v139_v15 = vcombine.high %v129_v6, %v129_v6  ;;  %v146_v18 = vrot.slane %v129_v6, %v12706_v13 }
 0x102   :  { %v202_v17 = vrot.slane %v188_v14, %v12706_v13  ;;  %v203_v20 = vcombine.high %v195_v16, %v195_v16  ;;  %v12713_v24 = vrot.slane %v195_v16, %v12706_v13 }
 0x103   :  { %v153_v19 = vrot.slane %v139_v15, %v12706_v13  ;;  %v154_v22 = vcombine.high %v146_v18, %v146_v18  ;;  %v162_v28 = vrot.slane %v146_v18, %v12706_v13 }
 0x104   :  { %v204_v21 = vcombine.high %v202_v17, %v202_v17  ;;  %v12716_v25 = vrot.slane %v202_v17, %v12706_v13  ;;  %v12719_v26 = vrot.slane %v203_v20, %v12706_v13  ;;  %v233_v32 = vcombine.high %v12713_v24, %v12713_v24 }
 0x105   :  { %645 = vrot.lane.b32.xlu1 %v134_v7, %s12620_s2  ;;  %319 = vrot.lane.b32.xlu0 %v134_v7, %s12621_s15  ;;  %v155_v23 = vcombine.high %v153_v19, %v153_v19  ;;  %v176_v29 = vrot.slane %v154_v22, %v12706_v13  ;;  %v169_v30 = vrot.slane %v153_v19, %v12706_v13 }
 0x106   :  { %v12722_v27 = vrot.slane %v204_v21, %v12706_v13  ;;  %v234_v34 = vcombine.high %v12716_v25, %v12716_v25  ;;  %v235_v35 = vcombine.high %v12719_v26, %v12719_v26  ;;  %v184_v37 = vcombine.high %v162_v28, %v162_v28 }
 0x107   :  { %v183_v31 = vrot.slane %v155_v23, %v12706_v13  ;;  %v186_v38 = vcombine.high %v176_v29, %v176_v29  ;;  %v185_v39 = vcombine.high %v169_v30, %v169_v30  ;;  %v272_v41 = vrot.slane %v12713_v24, %v12731_v33 }
 0x108   :  { %v236_v36 = vcombine.high %v12722_v27, %v12722_v27  ;;  %v276_v42 = vrot.slane %v12719_v26, %v12731_v33  ;;  %v12744_v43 = vrot.slane %v233_v32, %v12731_v33  ;;  %v288_v44 = vrot.slane %v12716_v25, %v12731_v33 }
 0x109   :  { %817 = vrot.lane.b32.xlu1 %v11778_v3, %s12622_s16  ;;  %814 = vrot.lane.b32.xlu0 %v45_v0, %s12622_s16  ;;  %v187_v40 = vcombine.high %v183_v31, %v183_v31  ;;  %v12749_v45 = vrot.slane %v235_v35, %v12731_v33  ;;  %v292_v46 = vrot.slane %v12722_v27, %v12731_v33 }
 0x10a   :  { %v12754_v47 = vrot.slane %v234_v34, %v12731_v33  ;;  %v240_v48 = vrot.slane %v162_v28, %v12731_v33  ;;  %v12758_v49 = vrot.slane %v236_v36, %v12731_v33  ;;  %v244_v50 = vrot.slane %v176_v29, %v12731_v33 }
 0x10b   :  { %v248_v51 = vrot.slane %v184_v37, %v12731_v33  ;;  %v252_v52 = vrot.slane %v186_v38, %v12731_v33  ;;  %v256_v53 = vrot.slane %v169_v30, %v12731_v33  ;;  %v260_v54 = vrot.slane %v183_v31, %v12731_v33 }
 0x10c   :  { %v264_v55 = vrot.slane %v185_v39, %v12731_v33  ;;  %v268_v56 = vrot.slane %v187_v40, %v12731_v33 }
 0x173   :  { %v318_v57 = vpop.permute.xlu0 %317 }
 0x174   :  { %v12767_v58 = vmul.f32 %v318_v57, %v240_v48  ;;  %v12769_v59 = vmul.f32 %v318_v57, %v244_v50  ;;  %v12771_v60 = vmul.f32 %v318_v57, %v248_v51  ;;  %v12773_v61 = vmul.f32 %v318_v57, %v252_v52 }
 0x175   :  { %v12775_v62 = vmul.f32 %v318_v57, %v256_v53  ;;  %v12777_v63 = vmul.f32 %v318_v57, %v260_v54  ;;  %v12779_v0 = vmul.f32 %v318_v57, %v264_v55  ;;  %v12781_v1 = vmul.f32 %v318_v57, %v268_v56 }
 0x176   :  { %v339_v2 = vsel %vm51_vm1, %v12767_v58, -inf  ;;  %v346_v3 = vsel %vm51_vm1, %v12769_v59, -inf  ;;  %v353_v4 = vsel %vm51_vm1, %v12771_v60, -inf  ;;  %v360_v5 = vsel %vm51_vm1, %v12773_v61, -inf }
 0x177   :  { %v340_v6 = vrot.slane %v339_v2, 4  ;;  %v347_v7 = vrot.slane %v346_v3, 4  ;;  %v354_v8 = vrot.slane %v353_v4, 4  ;;  %v361_v9 = vrot.slane %v360_v5, 4  ;;  %v12799_v16 = vpop.permute.xlu0 %319 }
 0x178   :  { %v367_v10 = vsel %vm51_vm1, %v12775_v62, -inf  ;;  %v374_v11 = vsel %vm51_vm1, %v12777_v63, -inf  ;;  %v381_v14 = vsel %vm51_vm1, %v12779_v0, -inf  ;;  %v388_v15 = vsel %vm51_vm1, %v12781_v1, -inf }
 0x179   :  { %v341_v17 = vmax.f32 %v339_v2, %v340_v6  ;;  %v348_v18 = vmax.f32 %v346_v3, %v347_v7  ;;  %v355_v19 = vmax.f32 %v353_v4, %v354_v8  ;;  %v362_v20 = vmax.f32 %v360_v5, %v361_v9 }
 0x17a   :  { %v368_v21 = vrot.slane %v367_v10, 4  ;;  %v375_v22 = vrot.slane %v374_v11, 4  ;;  %v382_v23 = vrot.slane %v381_v14, 4  ;;  %v389_v28 = vrot.slane %v388_v15, 4 }
 0x17b   :  { %v342_v29 = vrot.slane %v341_v17, 2  ;;  %v349_v30 = vrot.slane %v348_v18, 2  ;;  %v356_v31 = vrot.slane %v355_v19, 2  ;;  %v363_v32 = vrot.slane %v362_v20, 2  ;;  %v815_v38 = vpop.permute.xlu0 %814 }
 0x17c   :  { %v369_v34 = vmax.f32 %v367_v10, %v368_v21  ;;  %v376_v35 = vmax.f32 %v374_v11, %v375_v22  ;;  %v383_v36 = vmax.f32 %v381_v14, %v382_v23  ;;  %v390_v37 = vmax.f32 %v388_v15, %v389_v28  ;;  %12011 = vmatprep.subr.msk.mxu1 %vm58_vm0, %v815_v38 }
 0x17d   :  { %v343_v39 = vmax.f32 %v341_v17, %v342_v29  ;;  %v350_v40 = vmax.f32 %v348_v18, %v349_v30  ;;  %v357_v48 = vmax.f32 %v355_v19, %v356_v31  ;;  %v364_v50 = vmax.f32 %v362_v20, %v363_v32  ;;  %12012 = vmatpush3.msk.msra.mxu1 %vm58_vm0, %v815_v38 }
 0x17e   :  { %v370_v51 = vrot.slane %v369_v34, 2  ;;  %v377_v52 = vrot.slane %v376_v35, 2  ;;  %v384_v53 = vrot.slane %v383_v36, 2  ;;  %v391_v54 = vrot.slane %v390_v37, 2 }
 0x17f   :  { %v344_v55 = vrot.slane %v343_v39, 1  ;;  %v351_v56 = vrot.slane %v350_v40, 1  ;;  %v358_v57 = vrot.slane %v357_v48, 1  ;;  %v365_v2 = vrot.slane %v364_v50, 1 }
 0x180   :  { %v371_v3 = vmax.f32 %v369_v34, %v370_v51  ;;  %v378_v4 = vmax.f32 %v376_v35, %v377_v52  ;;  %v385_v5 = vmax.f32 %v383_v36, %v384_v53  ;;  %v12803_v6 = vmax.f32 %v390_v37, %v391_v54 }
 0x181   :  { %v345_v7 = vmax.f32 %v343_v39, %v344_v55  ;;  %v352_v8 = vmax.f32 %v350_v40, %v351_v56  ;;  %v359_v9 = vmax.f32 %v357_v48, %v358_v57  ;;  %v366_v10 = vmax.f32 %v364_v50, %v365_v2 }
 0x182   :  { %v372_v11 = vrot.slane %v371_v3, 1  ;;  %v379_v14 = vrot.slane %v378_v4, 1  ;;  %v386_v15 = vrot.slane %v385_v5, 1  ;;  %v12809_v17 = vmul.f32 %v12799_v16, %v272_v41 }
 0x183   :  { %v451_v18 = vsub.f32 %v12767_v58, %v345_v7  ;;  %v452_v19 = vsub.f32 %v12769_v59, %v352_v8  ;;  %v453_v20 = vsub.f32 %v12771_v60, %v359_v9  ;;  %v454_v21 = vsub.f32 %v12773_v61, %v366_v10 }
 0x184   :  { %v373_v22 = vmax.f32 %v371_v3, %v372_v11  ;;  %v380_v23 = vmax.f32 %v378_v4, %v379_v14  ;;  %v387_v28 = vmax.f32 %v385_v5, %v386_v15  ;;  %v12819_v29 = vmul.f32 %v12799_v16, %v276_v42 }
 0x185   :  { %v467_v24 = vmul.f32 1.442695, %v451_v18  ;;  %v469_v41 = vmul.f32 1.442695, %v452_v19  ;;  %v471_v30 = vmul.f32 1.442695, %v453_v20  ;;  %v12823_v58 = vmul.f32 %v12799_v16, %v12744_v43 }
 0x186   :  { %v455_v59 = vsub.f32 %v12775_v62, %v373_v22  ;;  %v456_v60 = vsub.f32 %v12777_v63, %v380_v23  ;;  %v457_v61 = vsub.f32 %v12779_v0, %v387_v28  ;;  %v473_v31 = vmul.f32 1.442695, %v454_v21 }
 0x187   :  { %12109 = vpow2.f32 %v467_v24  ;;  %v12830_v26 = vmul.f32 %v12799_v16, %v12749_v45  ;;  %v12836_v42 = vmul.f32 %v12799_v16, %v288_v44  ;;  %v12842_v43 = vmul.f32 %v12799_v16, %v292_v46 }
 0x188   :  { %12111 = vpow2.f32 %v469_v41  ;;  %v475_v62 = vmul.f32 1.442695, %v455_v59  ;;  %v477_v63 = vmul.f32 1.442695, %v456_v60  ;;  %v12844_v0 = vmul.f32 1.442695, %v457_v61 }
 0x189   :  { %12113 = vpow2.f32 %v471_v30  ;;  %v12848_v45 = vmul.f32 %v12799_v16, %v12754_v47  ;;  %v12852_v25 = vmul.f32 %v12799_v16, %v12758_v49  ;;  %v395_v27 = vsel %vm51_vm1, %v12809_v17, -inf }
 0x18a   :  { %12115 = vpow2.f32 %v473_v31  ;;  %v396_v44 = vrot.slane %v395_v27, 4  ;;  %v402_v46 = vsel %vm51_vm1, %v12819_v29, -inf  ;;  %v409_v32 = vsel %vm51_vm1, %v12823_v58, -inf }
 0x18b   :  { %12117 = vpow2.f32 %v475_v62  ;;  %v403_v34 = vrot.slane %v402_v46, 4  ;;  %v410_v35 = vrot.slane %v409_v32, 4  ;;  %v416_v47 = vsel %vm51_vm1, %v12830_v26, -inf }
 0x18c   :  { %12119 = vpow2.f32 %v477_v63  ;;  %v397_v49 = vmax.f32 %v395_v27, %v396_v44  ;;  %v417_v16 = vrot.slane %v416_v47, 4  ;;  %v423_v36 = vsel %vm51_vm1, %v12836_v42, -inf }
 0x18d   :  { %v404_v37 = vmax.f32 %v402_v46, %v403_v34  ;;  %v411_v38 = vmax.f32 %v409_v32, %v410_v35  ;;  %v424_v39 = vrot.slane %v423_v36, 4  ;;  %v430_v40 = vsel %vm51_vm1, %v12842_v43, -inf }
 0x18e   :  { %v398_v48 = vrot.slane %v397_v49, 2  ;;  %v418_v50 = vmax.f32 %v416_v47, %v417_v16  ;;  %v431_v51 = vrot.slane %v430_v40, 4  ;;  %v437_v52 = vsel %vm51_vm1, %v12848_v45, -inf }
 0x18f   :  { %v405_v53 = vrot.slane %v404_v37, 2  ;;  %v412_v54 = vrot.slane %v411_v38, 2  ;;  %v425_v55 = vmax.f32 %v423_v36, %v424_v39  ;;  %v438_v56 = vrot.slane %v437_v52, 4 }
 0x190   :  { %v399_v57 = vmax.f32 %v397_v49, %v398_v48  ;;  %v419_v2 = vrot.slane %v418_v50, 2  ;;  %v432_v3 = vmax.f32 %v430_v40, %v431_v51  ;;  %v444_v4 = vsel %vm51_vm1, %v12852_v25, -inf }
 0x191   :  { %v12870_v5 = vpop.eup %12109  ;;  %v406_v7 = vmax.f32 %v404_v37, %v405_v53  ;;  %v413_v8 = vmax.f32 %v411_v38, %v412_v54  ;;  %v426_v9 = vrot.slane %v425_v55, 2  ;;  %v439_v10 = vmax.f32 %v437_v52, %v438_v56 }
 0x192   :  { %v12872_v11 = vpop.eup %12111  ;;  %v499_v14 = vsel %vm51_vm1, %v12870_v5, 0.0  ;;  %v400_v15 = vrot.slane %v399_v57, 1  ;;  %v420_v18 = vmax.f32 %v418_v50, %v419_v2  ;;  %v433_v19 = vrot.slane %v432_v3, 2 }
 0x193   :  { %v12876_v20 = vpop.eup %12113  ;;  %v500_v21 = vrot.slane %v499_v14, 4  ;;  %v506_v22 = vsel %vm51_vm1, %v12872_v11, 0.0  ;;  %v407_v23 = vrot.slane %v406_v7, 1  ;;  %v414_v28 = vrot.slane %v413_v8, 1 }
 0x194   :  { %v12880_v24 = vpop.eup %12115  ;;  %v507_v41 = vrot.slane %v506_v22, 4  ;;  %v513_v30 = vsel %vm51_vm1, %v12876_v20, 0.0  ;;  %v401_v59 = vmax.f32 %v399_v57, %v400_v15  ;;  %v421_v60 = vrot.slane %v420_v18, 1 }
 0x195   :  { %v12884_v61 = vpop.eup %12117  ;;  %v501_v31 = vadd.f32 %v500_v21, %v499_v14  ;;  %v514_v62 = vrot.slane %v513_v30, 4  ;;  %v520_v63 = vsel %vm51_vm1, %v12880_v24, 0.0  ;;  %v408_v27 = vmax.f32 %v406_v7, %v407_v23 }
 0x196   :  { %v12888_v44 = vpop.eup %12119  ;;  %v508_v46 = vadd.f32 %v507_v41, %v506_v22  ;;  %v521_v32 = vrot.slane %v520_v63, 4  ;;  %v415_v34 = vmax.f32 %v413_v8, %v414_v28  ;;  %v422_v35 = vmax.f32 %v420_v18, %v421_v60 }
 0x197   :  { %v502_v47 = vrot.slane %v501_v31, 2  ;;  %v515_v49 = vadd.f32 %v514_v62, %v513_v30  ;;  %v427_v16 = vmax.f32 %v425_v55, %v426_v9  ;;  %v434_v36 = vmax.f32 %v432_v3, %v433_v19 }
 0x198   :  { %v509_v37 = vrot.slane %v508_v46, 2  ;;  %v440_v38 = vrot.slane %v439_v10, 2  ;;  %v445_v39 = vrot.slane %v444_v4, 4  ;;  %v459_v40 = vsub.f32 %v12809_v17, %v401_v59 }
 0x199   :  { %v428_v48 = vrot.slane %v427_v16, 1  ;;  %v435_v50 = vrot.slane %v434_v36, 1  ;;  %v460_v51 = vsub.f32 %v12819_v29, %v408_v27  ;;  %v461_v52 = vsub.f32 %v12823_v58, %v415_v34 }
 0x19a   :  { %v441_v53 = vmax.f32 %v439_v10, %v440_v38  ;;  %v446_v54 = vmax.f32 %v444_v4, %v445_v39  ;;  %v462_v56 = vsub.f32 %v12830_v26, %v422_v35  ;;  %v483_v57 = vmul.f32 1.442695, %v459_v40 }
 0x19b   :  { %v429_v2 = vmax.f32 %v427_v16, %v428_v48  ;;  %v436_v7 = vmax.f32 %v434_v36, %v435_v50  ;;  %v485_v55 = vmul.f32 1.442695, %v460_v51  ;;  %v487_v3 = vmul.f32 1.442695, %v461_v52 }
 0x19c   :  { %v442_v8 = vrot.slane %v441_v53, 1  ;;  %v447_v9 = vrot.slane %v446_v54, 2  ;;  %12121 = vpow2.f32 %v483_v57  ;;  %v489_v14 = vmul.f32 1.442695, %v462_v56 }
 0x19d   :  { %v463_v17 = vsub.f32 %v12836_v42, %v429_v2  ;;  %v464_v15 = vsub.f32 %v12842_v43, %v436_v7  ;;  %12123 = vpow2.f32 %v485_v55  ;;  %v393_v29 = vrot.slane %v12803_v6, 1 }
 0x19e   :  { %v443_v58 = vmax.f32 %v441_v53, %v442_v8  ;;  %v448_v4 = vmax.f32 %v446_v54, %v447_v9  ;;  %12125 = vpow2.f32 %v487_v3  ;;  %v503_v26 = vadd.f32 %v502_v47, %v501_v31 }
 0x19f   :  { %12127 = vpow2.f32 %v489_v14  ;;  %v491_v10 = vmul.f32 1.442695, %v463_v17  ;;  %v493_v18 = vmul.f32 1.442695, %v464_v15  ;;  %v394_v19 = vmax.f32 %v12803_v6, %v393_v29 }
 0x1a0   :  { %v449_v21 = vrot.slane %v448_v4, 1  ;;  %v465_v22 = vsub.f32 %v12848_v45, %v443_v58  ;;  %12129 = vpow2.f32 %v12844_v0  ;;  %v504_v42 = vrot.slane %v503_v26, 1 }
 0x1a1   :  { %12131 = vpow2.f32 %v491_v10  ;;  %v458_v43 = vsub.f32 %v12781_v1, %v394_v19  ;;  %v510_v23 = vadd.f32 %v509_v37, %v508_v46  ;;  %v516_v28 = vrot.slane %v515_v49, 2 }
 0x1a2   :  { %v450_v41 = vmax.f32 %v448_v4, %v449_v21  ;;  %12133 = vpow2.f32 %v493_v18  ;;  %v495_v30 = vmul.f32 1.442695, %v465_v22  ;;  %v505_v59 = vadd.f32 %v504_v42, %v503_v26 }
 0x1a3   :  { %v481_v60 = vmul.f32 1.442695, %v458_v43  ;;  %v511_v31 = vrot.slane %v510_v23, 1  ;;  %v517_v62 = vadd.f32 %v516_v28, %v515_v49  ;;  %v522_v27 = vadd.f32 %v521_v32, %v520_v63 }
 0x1a4   :  { %v466_v6 = vsub.f32 %v12852_v25, %v450_v41  ;;  %12135 = vpow2.f32 %v495_v30  ;;  %v527_v0 = vsel %vm51_vm1, %v12884_v61, 0.0  ;;  %v534_v45 = vsel %vm51_vm1, %v12888_v44, 0.0 }
 0x1a5   :  { %12137 = vpow2.f32 %v481_v60  ;;  %v512_v1 = vadd.f32 %v511_v31, %v510_v23  ;;  %v518_v46 = vrot.slane %v517_v62, 1  ;;  %v523_v34 = vrot.slane %v522_v27, 2 }
 0x1a6   :  { %v12906_v35 = vpop.eup %12121  ;;  %v497_v47 = vmul.f32 1.442695, %v466_v6  ;;  %v528_v16 = vrot.slane %v527_v0, 4  ;;  %v535_v36 = vrot.slane %v534_v45, 4  ;;  %12139 = vrcp.f32 %v505_v59 }
 0x1a7   :  { %v12908_v63 = vpop.eup %12123  ;;  %v555_v25 = vsel %vm51_vm1, %v12906_v35, 0.0  ;;  %v12912_v32 = vadd.f32 %v518_v46, %v517_v62  ;;  %v524_v49 = vadd.f32 %v523_v34, %v522_v27  ;;  %12141 = vrcp.f32 %v512_v1 }
 0x1a8   :  { %v12914_v37 = vpop.eup %12125  ;;  %12143 = vpow2.f32 %v497_v47  ;;  %v556_v38 = vrot.slane %v555_v25, 4  ;;  %v562_v39 = vsel %vm51_vm1, %v12908_v63, 0.0  ;;  %v529_v40 = vadd.f32 %v528_v16, %v527_v0 }
 0x1a9   :  { %v12918_v48 = vpop.eup %12127  ;;  %v563_v50 = vrot.slane %v562_v39, 4  ;;  %v569_v51 = vsel %vm51_vm1, %v12914_v37, 0.0  ;;  %v525_v52 = vrot.slane %v524_v49, 1  ;;  %v536_v53 = vadd.f32 %v535_v36, %v534_v45 }
 0x1aa   :  { %v12922_v54 = vpop.eup %12129  ;;  %v557_v56 = vadd.f32 %v556_v38, %v555_v25  ;;  %v570_v57 = vrot.slane %v569_v51, 4  ;;  %v576_v2 = vsel %vm51_vm1, %v12918_v48, 0.0  ;;  %v530_v7 = vrot.slane %v529_v40, 2 }
 0x1ab   :  { %v12926_v55 = vpop.eup %12131  ;;  %v564_v3 = vadd.f32 %v563_v50, %v562_v39  ;;  %v577_v8 = vrot.slane %v576_v2, 4  ;;  %v526_v9 = vadd.f32 %v525_v52, %v524_v49  ;;  %v537_v14 = vrot.slane %v536_v53, 2 }
 0x1ac   :  { %v12928_v17 = vpop.eup %12133  ;;  %v558_v15 = vrot.slane %v557_v56, 2  ;;  %v571_v29 = vadd.f32 %v570_v57, %v569_v51  ;;  %v583_v58 = vsel %vm51_vm1, %v12926_v55, 0.0  ;;  %v531_v4 = vadd.f32 %v530_v7, %v529_v40 }
 0x1ad   :  { %v565_v26 = vrot.slane %v564_v3, 2  ;;  %v578_v10 = vadd.f32 %v577_v8, %v576_v2  ;;  %v584_v18 = vrot.slane %v583_v58, 4  ;;  %v590_v19 = vsel %vm51_vm1, %v12928_v17, 0.0  ;;  %v12948_v8 = vpop.permute.xlu1 %643 }
 0x1ae   :  { %v12934_v21 = vpop.eup %12135  ;;  %v559_v22 = vadd.f32 %v558_v15, %v557_v56  ;;  %v572_v42 = vrot.slane %v571_v29, 2  ;;  %v591_v43 = vrot.slane %v590_v19, 4  ;;  %v532_v23 = vrot.slane %v531_v4, 1 }
 0x1af   :  { %v12936_v28 = vpop.eup %12137  ;;  %v566_v41 = vadd.f32 %v565_v26, %v564_v3  ;;  %v579_v30 = vrot.slane %v578_v10, 2  ;;  %v585_v59 = vadd.f32 %v584_v18, %v583_v58  ;;  %v597_v60 = vsel %vm51_vm1, %v12934_v21, 0.0 }
 0x1b0   :  { %v12140_v31 = vpop.eup %12139  ;;  %v560_v62 = vrot.slane %v559_v22, 1  ;;  %v573_v27 = vadd.f32 %v572_v42, %v571_v29  ;;  %v592_v6 = vadd.f32 %v591_v43, %v590_v19  ;;  %v598_v0 = vrot.slane %v597_v60, 4 }
 0x1b1   :  { %v12142_v45 = vpop.eup %12141  ;;  %v567_v1 = vrot.slane %v566_v41, 1  ;;  %v580_v46 = vadd.f32 %v579_v30, %v578_v10  ;;  %v586_v34 = vrot.slane %v585_v59, 2  ;;  %v533_v47 = vadd.f32 %v532_v23, %v531_v4 }
 0x1b2   :  { %v12940_v16 = vpop.eup %12143  ;;  %v561_v36 = vadd.f32 %v560_v62, %v559_v22  ;;  %v574_v25 = vrot.slane %v573_v27, 1  ;;  %v593_v49 = vrot.slane %v592_v6, 2  ;;  %v538_v38 = vadd.f32 %v537_v14, %v536_v53 }
 0x1b3   :  { %v568_v39 = vadd.f32 %v567_v1, %v566_v41  ;;  %v581_v40 = vrot.slane %v580_v46, 1  ;;  %v587_v50 = vadd.f32 %v586_v34, %v585_v59  ;;  %v541_v51 = vsel %vm51_vm1, %v12922_v54, 0.0 }
 0x1b4   :  { %v575_v52 = vadd.f32 %v574_v25, %v573_v27  ;;  %12145 = vrcp.f32 %v561_v36  ;;  %v539_v56 = vrot.slane %v538_v38, 1  ;;  %v542_v57 = vrot.slane %v541_v51, 4 }
 0x1b5   :  { %12147 = vrcp.f32 %v568_v39  ;;  %v548_v2 = vsel %vm51_vm1, %v12936_v28, 0.0  ;;  %v612_v7 = vmul.f32 %v12140_v31, %v12870_v5  ;;  %v614_v3 = vmul.f32 %v12142_v45, %v12872_v11 }
 0x1b6   :  { %v540_v53 = vadd.f32 %v539_v56, %v538_v38  ;;  %v543_v14 = vadd.f32 %v542_v57, %v541_v51  ;;  %v549_v15 = vrot.slane %v548_v2, 4  ;;  %12149 = vrcp.f32 %v12912_v32 }
 0x1b7   :  { %12151 = vrcp.f32 %v526_v9  ;;  %v649_v29 = vmul.f32 %v12948_v8, %v612_v7  ;;  %v650_v58 = vmul.f32 %v12948_v8, %v614_v3  ;;  %v582_v4 = vadd.f32 %v581_v40, %v580_v46 }
 0x1b8   :  { %v544_v26 = vrot.slane %v543_v14, 2  ;;  %v550_v10 = vadd.f32 %v549_v15, %v548_v2  ;;  %12153 = vrcp.f32 %v533_v47  ;;  %v588_v18 = vrot.slane %v587_v50, 1 }
 0x1b9   :  { %12155 = vrcp.f32 %v540_v53  ;;  %v665_v5 = vsel %vm51_vm1, %v649_v29, 0.0  ;;  %v672_v11 = vsel %vm51_vm1, %v650_v58, 0.0  ;;  %v594_v19 = vadd.f32 %v593_v49, %v592_v6 }
 0x1ba   :  { %v545_v22 = vadd.f32 %v544_v26, %v543_v14  ;;  %v551_v42 = vrot.slane %v550_v10, 2  ;;  %v666_v43 = vrot.slane %v665_v5, 4  ;;  %v673_v32 = vrot.slane %v672_v11, 4 }
 0x1bb   :  { %v589_v9 = vadd.f32 %v588_v18, %v587_v50  ;;  %v595_v23 = vrot.slane %v594_v19, 1  ;;  %v599_v41 = vadd.f32 %v598_v0, %v597_v60  ;;  %v604_v30 = vsel %vm51_vm1, %v12940_v16, 0.0 }
 0x1bc   :  { %v546_v59 = vrot.slane %v545_v22, 1  ;;  %v552_v31 = vadd.f32 %v551_v42, %v550_v10  ;;  %v667_v62 = vadd.f32 %v666_v43, %v665_v5  ;;  %v674_v27 = vadd.f32 %v673_v32, %v672_v11 }
 0x1bd   :  { %v596_v45 = vadd.f32 %v595_v23, %v594_v19  ;;  %v600_v1 = vrot.slane %v599_v41, 2  ;;  %v605_v46 = vrot.slane %v604_v30, 4  ;;  %12157 = vrcp.f32 %v575_v52 }
 0x1be   :  { %v12146_v6 = vpop.eup %12145  ;;  %v547_v34 = vadd.f32 %v546_v59, %v545_v22  ;;  %v553_v47 = vrot.slane %v552_v31, 1  ;;  %v668_v36 = vrot.slane %v667_v62, 2  ;;  %v675_v25 = vrot.slane %v674_v27, 2 }
 0x1bf   :  { %v12148_v49 = vpop.eup %12147  ;;  %v601_v38 = vadd.f32 %v600_v1, %v599_v41  ;;  %v606_v39 = vadd.f32 %v605_v46, %v604_v30  ;;  %v628_v60 = vmul.f32 %v12146_v6, %v12906_v35  ;;  %12159 = vrcp.f32 %v582_v4  ;;  %v12971_v41 = vpop.permute.xlu1 %645 }
 0x1c0   :  { %v12150_v0 = vpop.eup %12149  ;;  %v554_v40 = vadd.f32 %v553_v47, %v552_v31  ;;  %12161 = vrcp.f32 %v547_v34  ;;  %v669_v50 = vadd.f32 %v668_v36, %v667_v62  ;;  %v676_v51 = vadd.f32 %v675_v25, %v674_v27 }
 0x1c1   :  { %v12152_v56 = vpop.eup %12151  ;;  %v616_v57 = vmul.f32 %v12150_v0, %v12876_v20  ;;  %v602_v52 = vrot.slane %v601_v38, 1  ;;  %v607_v2 = vrot.slane %v606_v39, 2  ;;  %v630_v7 = vmul.f32 %v12148_v49, %v12908_v63 }
 0x1c2   :  { %v12154_v3 = vpop.eup %12153  ;;  %v618_v53 = vmul.f32 %v12152_v56, %v12880_v24  ;;  %12163 = vrcp.f32 %v554_v40  ;;  %v670_v14 = vrot.slane %v669_v50, 1  ;;  %v677_v15 = vrot.slane %v676_v51, 1 }
 0x1c3   :  { %v12156_v35 = vpop.eup %12155  ;;  %v620_v29 = vmul.f32 %v12154_v3, %v12884_v61  ;;  %v651_v58 = vmul.f32 %v12948_v8, %v616_v57  ;;  %v603_v4 = vadd.f32 %v602_v52, %v601_v38  ;;  %v608_v26 = vadd.f32 %v607_v2, %v606_v39 }
 0x1c4   :  { %v622_v10 = vmul.f32 %v12156_v35, %v12888_v44  ;;  %v652_v20 = vmul.f32 %v12948_v8, %v618_v53  ;;  %v671_v18 = vadd.f32 %v670_v14, %v669_v50  ;;  %v678_v5 = vadd.f32 %v677_v15, %v676_v51 }
 0x1c5   :  { %v653_v63 = vmul.f32 %v12948_v8, %v620_v29  ;;  %v679_v24 = vsel %vm51_vm1, %v651_v58, 0.0  ;;  %v609_v11 = vrot.slane %v608_v26, 1  ;;  %12165 = vrcp.f32 %v589_v9 }
 0x1c6   :  { %v654_v19 = vmul.f32 %v12948_v8, %v622_v10  ;;  %v680_v22 = vrot.slane %v679_v24, 4  ;;  %v686_v61 = vsel %vm51_vm1, %v652_v20, 0.0  ;;  %v794_v42 = vsel %vm793_vm2, %v678_v5, %v671_v18 }
 0x1c7   :  { %v12158_v43 = vpop.eup %12157  ;;  %v687_v32 = vrot.slane %v686_v61, 4  ;;  %v693_v44 = vsel %vm51_vm1, %v653_v63, 0.0  ;;  %v610_v23 = vadd.f32 %v609_v11, %v608_v26  ;;  %12167 = vrcp.f32 %v596_v45 }
 0x1c8   :  { %v681_v30 = vadd.f32 %v680_v22, %v679_v24  ;;  %v694_v59 = vrot.slane %v693_v44, 4  ;;  %v700_v9 = vsel %vm51_vm1, %v654_v19, 0.0  ;;  %v632_v31 = vmul.f32 %v12158_v43, %v12914_v37 }
 0x1c9   :  { %v12160_v62 = vpop.eup %12159  ;;  %v688_v27 = vadd.f32 %v687_v32, %v686_v61  ;;  %v701_v1 = vrot.slane %v700_v9, 4  ;;  %12169 = vrcp.f32 %v603_v4  ;;  %v657_v46 = vmul.f32 %v12971_v41, %v628_v60 }
 0x1ca   :  { %v12162_v6 = vpop.eup %12161  ;;  %v682_v34 = vrot.slane %v681_v30, 2  ;;  %v695_v47 = vadd.f32 %v694_v59, %v693_v44  ;;  %v634_v45 = vmul.f32 %v12160_v62, %v12918_v48  ;;  %12171 = vrcp.f32 %v610_v23 }
 0x1cb   :  { %v624_v36 = vmul.f32 %v12162_v6, %v12922_v54  ;;  %v689_v25 = vrot.slane %v688_v27, 2  ;;  %v702_v49 = vadd.f32 %v701_v1, %v700_v9  ;;  %v658_v37 = vmul.f32 %v12971_v41, %v630_v7 }
 0x1cc   :  { %v12164_v38 = vpop.eup %12163  ;;  %v683_v39 = vadd.f32 %v682_v34, %v681_v30  ;;  %v696_v0 = vrot.slane %v695_v47, 2  ;;  %v659_v40 = vmul.f32 %v12971_v41, %v632_v31  ;;  %v660_v60 = vmul.f32 %v12971_v41, %v634_v45 }
 0x1cd   :  { %v626_v50 = vmul.f32 %v12164_v38, %v12936_v28  ;;  %v655_v51 = vmul.f32 %v12948_v8, %v624_v36  ;;  %v690_v56 = vadd.f32 %v689_v25, %v688_v27  ;;  %v703_v48 = vrot.slane %v702_v49, 2 }
 0x1ce   :  { %v684_v57 = vrot.slane %v683_v39, 1  ;;  %v697_v52 = vadd.f32 %v696_v0, %v695_v47  ;;  %v721_v54 = vsel %vm51_vm1, %v657_v46, 0.0  ;;  %v728_v2 = vsel %vm51_vm1, %v658_v37, 0.0 }
 0x1cf   :  { %v12166_v7 = vpop.eup %12165  ;;  %v656_v3 = vmul.f32 %v12948_v8, %v626_v50  ;;  %v691_v53 = vrot.slane %v690_v56, 1  ;;  %v704_v14 = vadd.f32 %v703_v48, %v702_v49  ;;  %v707_v15 = vsel %vm51_vm1, %v655_v51, 0.0 }
 0x1d0   :  { %v685_v35 = vadd.f32 %v684_v57, %v683_v39  ;;  %v698_v29 = vrot.slane %v697_v52, 1  ;;  %v708_v28 = vrot.slane %v707_v15, 4  ;;  %v636_v58 = vmul.f32 %v12166_v7, %v12926_v55 }
 0x1d1   :  { %v12168_v4 = vpop.eup %12167  ;;  %v692_v26 = vadd.f32 %v691_v53, %v690_v56  ;;  %v705_v10 = vrot.slane %v704_v14, 1  ;;  %v714_v20 = vsel %vm51_vm1, %v656_v3, 0.0  ;;  %v722_v18 = vrot.slane %v721_v54, 4 }
 0x1d2   :  { %v699_v5 = vadd.f32 %v698_v29, %v697_v52  ;;  %v709_v63 = vadd.f32 %v708_v28, %v707_v15  ;;  %v715_v24 = vrot.slane %v714_v20, 4  ;;  %v796_v8 = vsel %vm795_vm3, %v685_v35, %v794_v42 }
 0x1d3   :  { %v12170_v11 = vpop.eup %12169  ;;  %v706_v19 = vadd.f32 %v705_v10, %v704_v14  ;;  %v798_v22 = vsel %vm797_vm4, %v692_v26, %v796_v8  ;;  %v638_v61 = vmul.f32 %v12168_v4, %v12928_v17  ;;  %v661_v55 = vmul.f32 %v12971_v41, %v636_v58 }
 0x1d4   :  { %v12172_v43 = vpop.eup %12171  ;;  %v710_v32 = vrot.slane %v709_v63, 2  ;;  %v716_v44 = vadd.f32 %v715_v24, %v714_v20  ;;  %v800_v23 = vsel %vm799_vm5, %v699_v5, %v798_v22  ;;  %v640_v30 = vmul.f32 %v12170_v11, %v12934_v21 }
 0x1d5   :  { %v802_v59 = vsel %vm801_vm6, %v706_v19, %v800_v23  ;;  %v642_v42 = vmul.f32 %v12172_v43, %v12940_v16  ;;  %v662_v9 = vmul.f32 %v12971_v41, %v638_v61  ;;  %v723_v31 = vadd.f32 %v722_v18, %v721_v54 }
 0x1d6   :  { %v711_v62 = vadd.f32 %v710_v32, %v709_v63  ;;  %v717_v27 = vrot.slane %v716_v44, 2  ;;  %v663_v17 = vmul.f32 %v12971_v41, %v640_v30  ;;  %v729_v1 = vrot.slane %v728_v2, 4 }
 0x1d7   :  { %v664_v46 = vmul.f32 %v12971_v41, %v642_v42  ;;  %v724_v6 = vrot.slane %v723_v31, 2  ;;  %v735_v34 = vsel %vm51_vm1, %v659_v40, 0.0  ;;  %v742_v47 = vsel %vm51_vm1, %v660_v60, 0.0 }
 0x1d8   :  { %v712_v21 = vrot.slane %v711_v62, 1  ;;  %v718_v45 = vadd.f32 %v717_v27, %v716_v44  ;;  %v730_v36 = vadd.f32 %v729_v1, %v728_v2  ;;  %v736_v25 = vrot.slane %v735_v34, 4 }
 0x1d9   :  { %v725_v16 = vadd.f32 %v724_v6, %v723_v31  ;;  %v743_v49 = vrot.slane %v742_v47, 4  ;;  %v749_v37 = vsel %vm51_vm1, %v661_v55, 0.0  ;;  %v756_v38 = vsel %vm51_vm1, %v662_v9, 0.0 }
 0x1da   :  { %v713_v39 = vadd.f32 %v712_v21, %v711_v62  ;;  %v719_v0 = vrot.slane %v718_v45, 1  ;;  %v731_v50 = vrot.slane %v730_v36, 2  ;;  %v737_v51 = vadd.f32 %v736_v25, %v735_v34 }
 0x1db   :  { %v726_v41 = vrot.slane %v725_v16, 1  ;;  %v744_v56 = vadd.f32 %v743_v49, %v742_v47  ;;  %v750_v48 = vrot.slane %v749_v37, 4  ;;  %v757_v40 = vrot.slane %v756_v38, 4 }
 0x1dc   :  { %v720_v57 = vadd.f32 %v719_v0, %v718_v45  ;;  %v804_v60 = vsel %vm803_vm7, %v713_v39, %v802_v59  ;;  %v732_v52 = vadd.f32 %v731_v50, %v730_v36  ;;  %v738_v54 = vrot.slane %v737_v51, 2  ;;  %v818_v45 = vpop.permute.xlu1 %817  ;;  %v12536_v39 = vld [vmem:[%s15262_s0] sm:$0xff] }
 0x1dd   :  { %v727_v2 = vadd.f32 %v726_v41, %v725_v16  ;;  %v745_v7 = vrot.slane %v744_v56, 2  ;;  %v751_v3 = vadd.f32 %v750_v48, %v749_v37  ;;  %v758_v53 = vadd.f32 %v757_v40, %v756_v38  ;;  %v12535_v37 = vld [vmem:[%s15262_s0 + $0x8] sm:$0xff]  ;;  %v13025_v41 = vld [vmem:[#allocation2 + $0x30] ss:$0 sm:$0xff] }
 0x1de   :  { %v806_v14 = vsel %vm805_vm8, %v720_v57, %v804_v60  ;;  %v733_v15 = vrot.slane %v732_v52, 1  ;;  %v739_v35 = vadd.f32 %v738_v54, %v737_v51  ;;  %v763_v29 = vsel %vm51_vm1, %v663_v17, 0.0 }
 0x1df   :  { %12013 = vmatprep.mubr.msk.f32.mxu1 %vm51_vm1, %v806_v14  ;;  %v746_v28 = vadd.f32 %v745_v7, %v744_v56  ;;  %v752_v58 = vrot.slane %v751_v3, 2  ;;  %v759_v4 = vrot.slane %v758_v53, 2  ;;  %v764_v26 = vrot.slane %v763_v29, 4  ;;  %v947_v14 = vld [vmem:[#allocation5 + $0x18] sm:$0xf] }
 0x1e0   :  { %v734_v10 = vadd.f32 %v733_v15, %v732_v52  ;;  %v740_v20 = vrot.slane %v739_v35, 1  ;;  %v770_v18 = vsel %vm51_vm1, %v664_v46, 0.0  ;;  %v944_v15 = vld [vmem:[#allocation5] sm:$0xf]  ;;  %11790 = vmatprep.subr.msk.mxu1 %vm58_vm0, %v947_v14 }
 0x1e1   :  { %v747_v5 = vrot.slane %v746_v28, 1  ;;  %v753_v63 = vadd.f32 %v752_v58, %v751_v3  ;;  %v760_v24 = vadd.f32 %v759_v4, %v758_v53  ;;  %v765_v8 = vadd.f32 %v764_v26, %v763_v29  ;;  %v945_v53 = vld [vmem:[#allocation5 + $0x8] sm:$0xf] }
 0x1e2   :  { %v741_v11 = vadd.f32 %v740_v20, %v739_v35  ;;  %v771_v19 = vrot.slane %v770_v18, 4  ;;  %v807_v22 = vsel %vm793_vm2, %v734_v10, %v727_v2  ;;  %11786 = vmatprep.subr.msk.mxu0 %vm58_vm0, %v945_v53  ;;  %v946_v35 = vld [vmem:[#allocation5 + $0x10] sm:$0xf]  ;;  %v1156_v29 = vld [vmem:[#allocation5 + $0x28] sm:$0xf]  ;;  %v15266_v58 = vmov 0.0  }
 0x1e3   :  { %v748_v61 = vadd.f32 %v747_v5, %v746_v28  ;;  %v754_v55 = vrot.slane %v753_v63, 1  ;;  %v761_v43 = vrot.slane %v760_v24, 1  ;;  %v766_v32 = vrot.slane %v765_v8, 2  ;;  %11787 = vmatpush1.msk.msra.mxu0 %vm58_vm0, %v944_v15  ;;  %v1158_v28 = vld [vmem:[#allocation5 + $0x38] sm:$0xf]  ;;  %1057 = vmatprep.mubr.f32.mxu0 %v15266_v58 }
 0x1e4   :  { %v772_v44 = vadd.f32 %v771_v19, %v770_v18  ;;  %v808_v23 = vsel %vm795_vm3, %v741_v11, %v807_v22  ;;  %11794 = vmatprep.subr.msk.mxu0 %vm58_vm0, %v1156_v29  ;;  %v950_v53 = vld [vmem:[#allocation5 + $0x10] sm:$0xf0] }
 0x1e5   :  { %v755_v30 = vadd.f32 %v754_v55, %v753_v63  ;;  %v767_v59 = vadd.f32 %v766_v32, %v765_v8  ;;  %v809_v42 = vsel %vm797_vm4, %v748_v61, %v808_v23  ;;  %v762_v9 = vadd.f32 %v761_v43, %v760_v24  ;;  %v1155_v55 = vld [vmem:[#allocation5 + $0x20] sm:$0xf]  ;;  %v1157_v43 = vld [vmem:[#allocation5 + $0x30] sm:$0xf]  ;;  %v1160_v23 = vld [vmem:[#allocation5 + $0x28] sm:$0xf0] }
 0x1e6   :  { %v773_v31 = vrot.slane %v772_v44, 2 }
 0x1e7   :  { %v768_v62 = vrot.slane %v767_v59, 1  ;;  %v810_v27 = vsel %vm799_vm5, %v755_v30, %v809_v42  ;;  %v1162_v30 = vld [vmem:[#allocation5 + $0x38] sm:$0xf0]  ;;  %v1365_v42 = vrot.slane %v1160_v23, 4 }
 0x1e8   :  { %v774_v17 = vadd.f32 %v773_v31, %v772_v44  ;;  %v811_v1 = vsel %vm801_vm6, %v762_v9, %v810_v27  ;;  %v1367_v9 = vrot.slane %v1162_v30, 4  ;;  %v1685_v30 = vld [vmem:[#allocation5 + $0x48] sm:$0xf] }
 0x1e9   :  { %v769_v46 = vadd.f32 %v768_v62, %v767_v59  ;;  %v1159_v59 = vld [vmem:[#allocation5 + $0x20] sm:$0xf0]  ;;  %v1161_v62 = vld [vmem:[#allocation5 + $0x30] sm:$0xf0] }
 0x1ea   :  { %v775_v6 = vrot.slane %v774_v17, 1  ;;  %v1364_v31 = vrot.slane %v1159_v59, 4  ;;  %v1366_v27 = vrot.slane %v1161_v62, 4  ;;  %v1687_v59 = vld [vmem:[#allocation5 + $0x58] sm:$0xf] }
 0x1eb   :  { %v812_v34 = vsel %vm803_vm7, %v769_v46, %v811_v1  ;;  %v951_v1 = vld [vmem:[#allocation5 + $0x18] sm:$0xf0] }
 0x1ec   :  { %v776_v47 = vadd.f32 %v775_v6, %v774_v17  ;;  %v949_v17 = vld [vmem:[#allocation5 + $0x8] sm:$0xf0]  ;;  %v1529_v6 = vrot.slane %v951_v1, 4 }
 0x1ed   :  { %v1527_v46 = vrot.slane %v949_v17, 4 }
 0x1ee   :  { %v813_v21 = vsel %vm805_vm8, %v776_v47, %v812_v34 }
 0x1ef   :  { %12014 = vmatmul.mubr.msk.f32.vlgmr.msra.gmra.mrb[0].mxu1 %vm51_vm1, %v813_v21 }
 0x1f0   :  { %11791 = vmatpush1.msk.msra.mxu1 %vm58_vm0, %v946_v35  ;;  %1134 = vmatprep.mubr.f32.mxu1 %v15266_v58 }
 0x1f1   :  { %11798 = vmatprep.subr.msk.mxu1 %vm58_vm0, %v1158_v28 }
 0x2c2   :  { %v12015_v36 = vpop.f32.mrb[0].mxu1 }
 0x2c3   :  { %v898_v25 = vadd.f32 %v12015_v36, %v818_v45  ;;  %v892_v16 = vpop.f32.mrb[1].mxu1  ;;  %v1164_v36 = vld [vmem:[#allocation5 + $0xa0] ss:$8 sm:$0xf] }
 0x2c4   :  { %v893_v49 = vadd.f32 %v892_v16, %v818_v45  ;;  %v13073_v16 = vsub.s32 1, %v12703_v12 }
 0x2c5   :  { %v902_v38 = vadd.f32 %v12535_v37, %v898_v25  ;;  %v13070_v25 = vsub.s32 2, %v12703_v12 }
 0x2c6   :  { %v901_v0 = vadd.f32 %v12536_v39, %v893_v49  ;;  %15295 = vst [vmem:[#allocation14_spill] sm:$0xff] %v13073_v16  ;;  %v13076_v49 = vsub.s32 3, %v12703_v12  ;;  %v953_v39 = vld [vmem:[#allocation5 + $0x80] ss:$8 sm:$0xf] }
 0x2c7   :  { %v908_v50 = vsel %vm51_vm1, %v902_v38, 0.0  ;;  %15294 = vst [vmem:[#allocation13_spill] sm:$0xff] %v13070_v25  ;;  %v958_v29 = vrot.slane %v953_v39, %v12731_v33  ;;  %v966_v28 = vrot.slane %v953_v39, %v13070_v25 }
 0x2c8   :  { %909 = vadd.xlane.f32.xlu1 %v908_v50  ;;  %v905_v51 = vsel %vm51_vm1, %v901_v0, 0.0  ;;  %15296 = vst [vmem:[#allocation15_spill] sm:$0xff] %v13076_v49  ;;  %v970_v14 = vrot.slane %v953_v39, %v13076_v49 }
 0x2c9   :  { %906 = vadd.xlane.f32.xlu0 %v905_v51  ;;  %v1169_v51 = vrot.slane %v1164_v36, %v12731_v33 }
 0x2d9   :  { %939 = vrot.lane.b32.xlu1 %v13025_v41, %s12621_s15 }
 0x2dd   :  { %2453 = vrot.lane.b32.xlu1 %v13025_v41, %s12625_s21 }
 0x355   :  { %v910_v56 = vpop.xlane.xlu1 %909 }
 0x356   :  { %v913_v48 = vmul.f32 0.25, %v910_v56  ;;  %v907_v40 = vpop.xlane.xlu0 %906  ;;  %v1177_v56 = vrot.slane %v1164_v36, %v13070_v25 }
 0x357   :  { %v912_v57 = vmul.f32 0.25, %v907_v40  ;;  %v1181_v40 = vrot.slane %v1164_v36, %v13076_v49 }
 0x358   :  { %v915_v60 = vsub.f32 %v902_v38, %v913_v48  ;;  %v1173_v48 = vrot.slane %v1164_v36, %v13073_v16 }
 0x359   :  { %v914_v52 = vsub.f32 %v901_v0, %v912_v57  ;;  %v940_v8 = vpop.permute.xlu1 %939  ;;  %v962_v57 = vrot.slane %v953_v39, %v13073_v16  ;;  %v1684_v39 = vld [vmem:[#allocation5 + $0x40] sm:$0xf] }
 0x35a   :  { %v917_v7 = vmul.f32 %v915_v60, %v915_v60 }
 0x35b   :  { %v916_v54 = vmul.f32 %v914_v52, %v914_v52 }
 0x35c   :  { %v921_v3 = vsel %vm51_vm1, %v917_v7, 0.0 }
 0x35d   :  { %v918_v2 = vsel %vm51_vm1, %v916_v54, 0.0 }
 0x35e   :  { %919 = vadd.xlane.f32.xlu0 %v918_v2 }
 0x362   :  { %922 = vadd.xlane.f32.xlu0 %v921_v3 }
 0x3eb   :  { %v920_v4 = vpop.xlane.xlu0 %919 }
 0x3ec   :  { %v924_v26 = vmul.f32 0.25, %v920_v4 }
 0x3ee   :  { %v926_v10 = vadd.f32 1e-05, %v924_v26 }
 0x3ef   :  { %v923_v20 = vpop.xlane.xlu0 %922 }
 0x3f0   :  { %12173 = vrsqrt.f32 %v926_v10  ;;  %v925_v18 = vmul.f32 0.25, %v923_v20 }
 0x3f2   :  { %v927_v5 = vadd.f32 1e-05, %v925_v18 }
 0x3f4   :  { %12175 = vrsqrt.f32 %v927_v5 }
 0x3fa   :  { %v12174_v63 = vpop.eup %12173 }
 0x3fb   :  { %v930_v24 = vmul.f32 %v12174_v63, %v914_v52  ;;  %v948_v52 = vld [vmem:[#allocation5] sm:$0xf0]  ;;  %v1528_v63 = vrot.slane %v950_v53, 4 }
 0x3fc   :  { %v1526_v4 = vrot.slane %v948_v52, 4  ;;  %v1690_v52 = vld [vmem:[#allocation5 + $0x50] sm:$0xf0] }
 0x3fd   :  { %v936_v11 = vmul.f32 %v13025_v41, %v930_v24 }
 0x3fe   :  { %v12176_v19 = vpop.eup %12175 }
 0x3ff   :  { %v931_v22 = vmul.f32 %v12176_v19, %v915_v60  ;;  %v13040_v61 = vadd.f32 %v940_v8, %v936_v11 }
 0x401   :  { %v937_v32 = vmul.f32 %v13025_v41, %v931_v22  ;;  %11788 = vmatmul.mubr.msk.f32.vlgmr.msra.gmra.mrb[2].mxu0 %vm51_vm1, %v13040_v61  ;;  %11792 = vmatmul.mubr.msk.f32.vlgmr.msra.gmra.mrb[2].mxu1 %vm51_vm1, %v13040_v61 }
 0x402   :  { %11795 = vmatpush1.msk.msra.mxu0 %vm58_vm0, %v1155_v55  ;;  %11799 = vmatpush1.msk.msra.mxu1 %vm58_vm0, %v1157_v43 }
 0x403   :  { %v13049_v44 = vadd.f32 %v940_v8, %v937_v32  ;;  %1063 = vmatprep.mubr.f32.mxu0 %v15266_v58  ;;  %1140 = vmatprep.mubr.f32.mxu1 %v15266_v58 }
 0x404   :  { %1372 = vmatprep.subr.mxu0 %v1365_v42  ;;  %1447 = vmatprep.subr.mxu1 %v1367_v9 }
 0x405   :  { %11789 = vmatmul.mubr.msk.f32.gmra.mrb[4].mxu0 %vm51_vm1, %v13049_v44  ;;  %11793 = vmatmul.mubr.msk.f32.gmra.mrb[4].mxu1 %vm51_vm1, %v13049_v44 }
 0x406   :  { %1262 = vmatprep.mubr.f32.mxu0 %v15266_v58  ;;  %1339 = vmatprep.mubr.f32.mxu1 %v15266_v58 }
 0x409   :  { %11796 = vmatmul.mubr.msk.f32.vlgmr.msra.gmra.mrb[6].mxu0 %vm51_vm1, %v13040_v61  ;;  %11800 = vmatmul.mubr.msk.f32.vlgmr.msra.gmra.mrb[6].mxu1 %vm51_vm1, %v13040_v61 }
 0x40a   :  { %1268 = vmatprep.mubr.f32.mxu0 %v15266_v58  ;;  %1345 = vmatprep.mubr.f32.mxu1 %v15266_v58 }
 0x40b   :  { %1373 = vmatpush1.xpose.msra.mxu0 %v1364_v31  ;;  %1448 = vmatpush1.xpose.msra.mxu1 %v1366_v27 }
 0x40c   :  { %1534 = vmatprep.subr.mxu0 %v1527_v46  ;;  %1609 = vmatprep.subr.mxu1 %v1529_v6 }
 0x40d   :  { %11797 = vmatmul.mubr.msk.f32.gmra.mrb[8].mxu0 %vm51_vm1, %v13049_v44  ;;  %11801 = vmatmul.mubr.msk.f32.gmra.mrb[8].mxu1 %vm51_vm1, %v13049_v44 }
 0x4d4   :  { %v1059_v34 = vpop.f32.mrb[2].mxu0  ;;  %v1136_v47 = vpop.f32.mrb[2].mxu1 }
 0x4d5   :  { %v1061_v21 = vpop.f32.mrb[3].mxu0  ;;  %v1138_v45 = vpop.f32.mrb[3].mxu1  ;;  %v1060_v31 = vadd.f32 %v1059_v34, %v958_v29  ;;  %v1137_v62 = vadd.f32 %v1136_v47, %v966_v28 }
 0x4d6   :  { %v1062_v26 = vadd.f32 %v1061_v21, %v962_v57  ;;  %v1139_v43 = vadd.f32 %v1138_v45, %v970_v14 }
 0x4d7   :  { %v1147_v45 = vmax.f32 %v1060_v31, 0.0  ;;  %v1149_v36 = vmax.f32 %v1137_v62, 0.0 }
 0x4d8   :  { %v13078_v37 = vpop.f32.mrb[4].mxu0  ;;  %v13080_v38 = vpop.f32.mrb[4].mxu1  ;;  %v1148_v1 = vmax.f32 %v1062_v26, 0.0  ;;  %v1150_v46 = vmax.f32 %v1139_v43, 0.0 }
 0x4d9   :  { %v1067_v0 = vpop.f32.mrb[5].mxu0  ;;  %v1144_v50 = vpop.f32.mrb[5].mxu1  ;;  %v1066_v34 = vadd.f32 %v13078_v37, %v958_v29  ;;  %v1143_v47 = vadd.f32 %v13080_v38, %v966_v28  ;;  %v1689_v37 = vld [vmem:[#allocation5 + $0x48] sm:$0xf0]  ;;  %v1691_v38 = vld [vmem:[#allocation5 + $0x58] sm:$0xf0] }
 0x4da   :  { %v1068_v6 = vadd.f32 %v1067_v0, %v962_v57  ;;  %v1145_v21 = vadd.f32 %v1144_v50, %v970_v14  ;;  %v1894_v57 = vrot.slane %v1689_v37, 4 }
 0x4db   :  { %v1151_v0 = vmax.f32 %v1066_v34, 0.0  ;;  %v1153_v50 = vmax.f32 %v1143_v47, 0.0 }
 0x4dc   :  { %v1264_v60 = vpop.f32.mrb[6].mxu0  ;;  %v1341_v12 = vpop.f32.mrb[6].mxu1 }
 0x4dd   :  { %v1265_v54 = vadd.f32 %v1264_v60, %v1169_v51  ;;  %v1342_v2 = vadd.f32 %v1341_v12, %v1177_v56  ;;  %v1266_v7 = vpop.f32.mrb[7].mxu0  ;;  %v1343_v3 = vpop.f32.mrb[7].mxu1  ;;  %v1896_v60 = vrot.slane %v1691_v38, 4  ;;  %v2055_v38 = vld [vmem:[#allocation5 + $0x70] sm:$0xf] }
 0x4de   :  { %v1267_v15 = vadd.f32 %v1266_v7, %v1173_v48  ;;  %v1344_v35 = vadd.f32 %v1343_v3, %v1181_v40  ;;  %v2056_v7 = vld [vmem:[#allocation5 + $0x78] sm:$0xf] }
 0x4df   :  { %v1352_v24 = vmax.f32 %v1265_v54, 0.0  ;;  %v1354_v8 = vmax.f32 %v1342_v2, 0.0  ;;  %v1895_v54 = vrot.slane %v1690_v52, 4  ;;  %v2054_v2 = vld [vmem:[#allocation5 + $0x68] sm:$0xf] }
 0x4e0   :  { %v1353_v10 = vmax.f32 %v1267_v15, 0.0  ;;  %v1355_v20 = vmax.f32 %v1344_v35, 0.0  ;;  %v1270_v18 = vpop.f32.mrb[8].mxu0  ;;  %v1347_v5 = vpop.f32.mrb[8].mxu1 }
 0x4e1   :  { %v1271_v11 = vadd.f32 %v1270_v18, %v1169_v51  ;;  %v1348_v19 = vadd.f32 %v1347_v5, %v1177_v56  ;;  %v1272_v22 = vpop.f32.mrb[9].mxu0  ;;  %v1349_v55 = vpop.f32.mrb[9].mxu1  ;;  %v1686_v51 = vld [vmem:[#allocation5 + $0x50] sm:$0xf]  ;;  %v1152_v56 = vmax.f32 %v1068_v6, 0.0 }
 0x4e2   :  { %v1273_v32 = vadd.f32 %v1272_v22, %v1173_v48  ;;  %v1350_v23 = vadd.f32 %v1349_v55, %v1181_v40  ;;  %1436 = vmatprep.mubr.f32.mxu0 %v1353_v10  ;;  %1511 = vmatprep.mubr.f32.mxu1 %v1355_v20  ;;  %v1154_v48 = vmax.f32 %v1145_v21, 0.0  ;;  %v1688_v40 = vld [vmem:[#allocation5 + $0x40] sm:$0xf0] }
 0x4e3   :  { %1437 = vmatmul.mubr.f32.vlgmr.msra.gmra.mrb[10].mxu0 %v1352_v24  ;;  %1512 = vmatmul.mubr.f32.vlgmr.msra.gmra.mrb[10].mxu1 %v1354_v8  ;;  %v1356_v27 = vmax.f32 %v1271_v11, 0.0  ;;  %v1358_v17 = vmax.f32 %v1348_v19, 0.0  ;;  %v1893_v12 = vrot.slane %v1688_v40, 4  ;;  %v1693_v8 = vld [vmem:[#allocation5 + $0xc0] ss:$8 sm:$0xf] }
 0x4e4   :  { %v1357_v42 = vmax.f32 %v1273_v32, 0.0  ;;  %v1359_v9 = vmax.f32 %v1350_v23, 0.0  ;;  %1535 = vmatpush1.xpose.msra.mxu0 %v1526_v4  ;;  %1610 = vmatpush1.xpose.msra.mxu1 %v1528_v63  ;;  %v1698_v23 = vrot.slane %v1693_v8, %v12731_v33 }
 0x4e5   :  { %11802 = vmatprep.subr.msk.mxu0 %vm58_vm0, %v1685_v30  ;;  %11806 = vmatprep.subr.msk.mxu1 %vm58_vm0, %v1687_v59  ;;  %v1706_v30 = vrot.slane %v1693_v8, %v13070_v25  ;;  %v1702_v59 = vrot.slane %v1693_v8, %v13073_v16 }
 0x4e6   :  { %1441 = vmatprep.mubr.f32.mxu0 %v1357_v42  ;;  %1516 = vmatprep.mubr.f32.mxu1 %v1359_v9  ;;  %v1710_v42 = vrot.slane %v1693_v8, %v13076_v49 }
 0x4e7   :  { %1442 = vmatmul.mubr.f32.gmra.mrb[12].mxu0 %v1356_v27  ;;  %1517 = vmatmul.mubr.f32.gmra.mrb[12].mxu1 %v1358_v17 }
 0x4e8   :  { %1598 = vmatprep.mubr.f32.mxu0 %v1148_v1  ;;  %1673 = vmatprep.mubr.f32.mxu1 %v1150_v46 }
 0x4eb   :  { %1599 = vmatmul.mubr.f32.vlgmr.msra.gmra.mrb[14].mxu0 %v1147_v45  ;;  %1674 = vmatmul.mubr.f32.vlgmr.msra.gmra.mrb[14].mxu1 %v1149_v36 }
 0x4ec   :  { %11803 = vmatpush1.msk.msra.mxu0 %vm58_vm0, %v1684_v39  ;;  %11807 = vmatpush1.msk.msra.mxu1 %vm58_vm0, %v1686_v51  ;;  %v2053_v39 = vld [vmem:[#allocation5 + $0x60] sm:$0xf] }
 0x4ed   :  { %1603 = vmatprep.mubr.f32.mxu0 %v1152_v56  ;;  %1678 = vmatprep.mubr.f32.mxu1 %v1154_v48 }
 0x4ee   :  { %1901 = vmatprep.subr.mxu0 %v1894_v57  ;;  %1976 = vmatprep.subr.mxu1 %v1896_v60 }
 0x4ef   :  { %1604 = vmatmul.mubr.f32.gmra.mrb[16].mxu0 %v1151_v0  ;;  %1679 = vmatmul.mubr.f32.gmra.mrb[16].mxu1 %v1153_v50 }
 0x4f0   :  { %1791 = vmatprep.mubr.f32.mxu0 %v15266_v58  ;;  %1868 = vmatprep.mubr.f32.mxu1 %v15266_v58 }
 0x4f3   :  { %11804 = vmatmul.mubr.msk.f32.vlgmr.msra.gmra.mrb[18].mxu0 %vm51_vm1, %v13040_v61  ;;  %11808 = vmatmul.mubr.msk.f32.vlgmr.msra.gmra.mrb[18].mxu1 %vm51_vm1, %v13040_v61 }
 0x4f4   :  { %1797 = vmatprep.mubr.f32.mxu0 %v15266_v58  ;;  %1874 = vmatprep.mubr.f32.mxu1 %v15266_v58 }
 0x4f5   :  { %1902 = vmatpush1.xpose.msra.mxu0 %v1893_v12  ;;  %1977 = vmatpush1.xpose.msra.mxu1 %v1895_v54 }
 0x4f6   :  { %11810 = vmatprep.subr.msk.mxu0 %vm58_vm0, %v2054_v2  ;;  %11814 = vmatprep.subr.msk.mxu1 %vm58_vm0, %v2056_v7  ;;  %v2058_v2 = vld [vmem:[#allocation5 + $0x68] sm:$0xf0]  ;;  %v2060_v7 = vld [vmem:[#allocation5 + $0x78] sm:$0xf0] }
 0x4f7   :  { %11805 = vmatmul.mubr.msk.f32.gmra.mrb[20].mxu0 %vm51_vm1, %v13049_v44  ;;  %11809 = vmatmul.mubr.msk.f32.gmra.mrb[20].mxu1 %vm51_vm1, %v13049_v44 }
 0x5b6   :  { %v1438_v3 = vpop.f32.mrb[10].mxu0  ;;  %v1513_v53 = vpop.f32.mrb[10].mxu1 }
 0x5b7   :  { %v1514_v14 = vadd.f32 %v1513_v53, %v1438_v3  ;;  %v1440_v15 = vpop.f32.mrb[11].mxu0  ;;  %v1515_v35 = vpop.f32.mrb[11].mxu1  ;;  %v2057_v3 = vld [vmem:[#allocation5 + $0x60] sm:$0xf0]  ;;  %v2263_v53 = vrot.slane %v2058_v2, 4 }
 0x5b8   :  { %v2262_v15 = vrot.slane %v2057_v3, 4  ;;  %v2059_v35 = vld [vmem:[#allocation5 + $0x70] sm:$0xf0] }
 0x5ba   :  { %v1443_v29 = vpop.f32.mrb[12].mxu0  ;;  %v1518_v28 = vpop.f32.mrb[12].mxu1 }
 0x5bb   :  { %v1519_v4 = vadd.f32 %v1518_v28, %v1443_v29  ;;  %v1445_v26 = vpop.f32.mrb[13].mxu0  ;;  %v1520_v10 = vpop.f32.mrb[13].mxu1  ;;  %v2264_v29 = vrot.slane %v2059_v35, 4 }
 0x5be   :  { %v1600_v20 = vpop.f32.mrb[14].mxu0  ;;  %v1675_v18 = vpop.f32.mrb[14].mxu1 }
 0x5bf   :  { %v1601_v5 = vadd.f32 %v1600_v20, %v1514_v14  ;;  %v1602_v63 = vpop.f32.mrb[15].mxu0  ;;  %v1677_v24 = vpop.f32.mrb[15].mxu1  ;;  %v2265_v14 = vrot.slane %v2060_v7, 4 }
 0x5c1   :  { %v13110_v11 = vadd.f32 %v1675_v18, %v1601_v5  ;;  %v2062_v18 = vld [vmem:[#allocation5 + $0xe0] ss:$8 sm:$0xf] }
 0x5c2   :  { %v1605_v19 = vpop.f32.mrb[16].mxu0  ;;  %v1680_v22 = vpop.f32.mrb[16].mxu1 }
 0x5c3   :  { %v1606_v55 = vadd.f32 %v1605_v19, %v1519_v4  ;;  %v1607_v43 = vpop.f32.mrb[17].mxu0  ;;  %v1682_v32 = vpop.f32.mrb[17].mxu1 }
 0x5c4   :  { %v2075_v43 = vrot.slane %v2062_v18, %v13070_v25  ;;  %v2071_v32 = vrot.slane %v2062_v18, %v13073_v16 }
 0x5c5   :  { %v13116_v9 = vadd.f32 %v1680_v22, %v1606_v55  ;;  %v2067_v55 = vrot.slane %v2062_v18, %v12731_v33 }
 0x5c6   :  { %v1793_v31 = vpop.f32.mrb[18].mxu0  ;;  %v1870_v62 = vpop.f32.mrb[18].mxu1 }
 0x5c7   :  { %v1794_v27 = vadd.f32 %v1793_v31, %v1698_v23  ;;  %v1871_v17 = vadd.f32 %v1870_v62, %v1706_v30  ;;  %v1795_v1 = vpop.f32.mrb[19].mxu0  ;;  %v1872_v46 = vpop.f32.mrb[19].mxu1 }
 0x5c8   :  { %v1796_v6 = vadd.f32 %v1795_v1, %v1702_v59  ;;  %v1873_v21 = vadd.f32 %v1872_v46, %v1710_v42 }
 0x5c9   :  { %v1881_v51 = vmax.f32 %v1794_v27, 0.0  ;;  %v1883_v56 = vmax.f32 %v1871_v17, 0.0 }
 0x5ca   :  { %v1882_v45 = vmax.f32 %v1796_v6, 0.0  ;;  %v1884_v36 = vmax.f32 %v1873_v21, 0.0  ;;  %v1799_v34 = vpop.f32.mrb[20].mxu0  ;;  %v1876_v47 = vpop.f32.mrb[20].mxu1 }
 0x5cb   :  { %v1800_v48 = vadd.f32 %v1799_v34, %v1698_v23  ;;  %v1877_v0 = vadd.f32 %v1876_v47, %v1706_v30  ;;  %v1801_v50 = vpop.f32.mrb[21].mxu0  ;;  %v1878_v37 = vpop.f32.mrb[21].mxu1  ;;  %v2079_v23 = vrot.slane %v2062_v18, %v13076_v49 }
 0x5cc   :  { %v1802_v40 = vadd.f32 %v1801_v50, %v1702_v59  ;;  %v1879_v57 = vadd.f32 %v1878_v37, %v1710_v42  ;;  %1965 = vmatprep.mubr.f32.mxu0 %v1882_v45  ;;  %2040 = vmatprep.mubr.f32.mxu1 %v1884_v36 }
 0x5cd   :  { %1966 = vmatmul.mubr.f32.vlgmr.msra.gmra.mrb[22].mxu0 %v1881_v51  ;;  %2041 = vmatmul.mubr.f32.vlgmr.msra.gmra.mrb[22].mxu1 %v1883_v56  ;;  %v1885_v52 = vmax.f32 %v1800_v48, 0.0  ;;  %v1887_v54 = vmax.f32 %v1877_v0, 0.0 }
 0x5ce   :  { %v1886_v60 = vmax.f32 %v1802_v40, 0.0  ;;  %v1888_v12 = vmax.f32 %v1879_v57, 0.0  ;;  %11811 = vmatpush1.msk.msra.mxu0 %vm58_vm0, %v2053_v39  ;;  %11815 = vmatpush1.msk.msra.mxu1 %vm58_vm0, %v2055_v38 }
 0x5cf   :  { %2270 = vmatprep.subr.mxu0 %v2263_v53  ;;  %2345 = vmatprep.subr.mxu1 %v2265_v14 }
 0x5d0   :  { %1970 = vmatprep.mubr.f32.mxu0 %v1886_v60  ;;  %2045 = vmatprep.mubr.f32.mxu1 %v1888_v12 }
 0x5d1   :  { %1971 = vmatmul.mubr.f32.gmra.mrb[24].mxu0 %v1885_v52  ;;  %2046 = vmatmul.mubr.f32.gmra.mrb[24].mxu1 %v1887_v54  ;;  %v2422_v54 = vld [vmem:[#allocation5 + $0x81] ss:$0 sm:$0xff] }
 0x5d2   :  { %2160 = vmatprep.mubr.f32.mxu0 %v15266_v58  ;;  %2237 = vmatprep.mubr.f32.mxu1 %v15266_v58 }
 0x5d5   :  { %11812 = vmatmul.mubr.msk.f32.vlgmr.msra.gmra.mrb[26].mxu0 %vm51_vm1, %v13040_v61  ;;  %11816 = vmatmul.mubr.msk.f32.vlgmr.msra.gmra.mrb[26].mxu1 %vm51_vm1, %v13040_v61 }
 0x5d6   :  { %2166 = vmatprep.mubr.f32.mxu0 %v15266_v58  ;;  %2243 = vmatprep.mubr.f32.mxu1 %v15266_v58 }
 0x5d7   :  { %2271 = vmatpush1.xpose.msra.mxu0 %v2262_v15  ;;  %2346 = vmatpush1.xpose.msra.mxu1 %v2264_v29 }
 0x5d9   :  { %11813 = vmatmul.mubr.msk.f32.gmra.mrb[28].mxu0 %vm51_vm1, %v13049_v44  ;;  %11817 = vmatmul.mubr.msk.f32.gmra.mrb[28].mxu1 %vm51_vm1, %v13049_v44 }
 0x6a0   :  { %v1967_v28 = vpop.f32.mrb[22].mxu0  ;;  %v2042_v4 = vpop.f32.mrb[22].mxu1 }
 0x6a1   :  { %v2043_v26 = vadd.f32 %v2042_v4, %v1967_v28  ;;  %v1969_v10 = vpop.f32.mrb[23].mxu0  ;;  %v2044_v20 = vpop.f32.mrb[23].mxu1 }
 0x6a3   :  { %v2051_v5 = vadd.f32 %v2043_v26, %v13110_v11 }
 0x6a4   :  { %v1972_v63 = vpop.f32.mrb[24].mxu0  ;;  %v2047_v24 = vpop.f32.mrb[24].mxu1 }
 0x6a5   :  { %v2048_v8 = vadd.f32 %v2047_v24, %v1972_v63  ;;  %v1974_v19 = vpop.f32.mrb[25].mxu0  ;;  %v2049_v22 = vpop.f32.mrb[25].mxu1 }
 0x6a7   :  { %v2052_v30 = vadd.f32 %v2048_v8, %v13116_v9 }
 0x6a8   :  { %v2162_v59 = vpop.f32.mrb[26].mxu0  ;;  %v2239_v42 = vpop.f32.mrb[26].mxu1 }
 0x6a9   :  { %v2163_v31 = vadd.f32 %v2162_v59, %v2067_v55  ;;  %v2240_v62 = vadd.f32 %v2239_v42, %v2075_v43  ;;  %v2164_v11 = vpop.f32.mrb[27].mxu0  ;;  %v2241_v27 = vpop.f32.mrb[27].mxu1 }
 0x6aa   :  { %v2165_v17 = vadd.f32 %v2164_v11, %v2071_v32  ;;  %v2242_v1 = vadd.f32 %v2241_v27, %v2079_v23  ;;  %v2454_v11 = vpop.permute.xlu1 %2453 }
 0x6ab   :  { %v2250_v36 = vmax.f32 %v2163_v31, 0.0  ;;  %v2252_v34 = vmax.f32 %v2240_v62, 0.0 }
 0x6ac   :  { %v2251_v46 = vmax.f32 %v2165_v17, 0.0  ;;  %v2253_v6 = vmax.f32 %v2242_v1, 0.0  ;;  %v2168_v21 = vpop.f32.mrb[28].mxu0  ;;  %v2245_v45 = vpop.f32.mrb[28].mxu1 }
 0x6ad   :  { %v2169_v47 = vadd.f32 %v2168_v21, %v2067_v55  ;;  %v2246_v39 = vadd.f32 %v2245_v45, %v2075_v43  ;;  %v2170_v51 = vpop.f32.mrb[29].mxu0  ;;  %v2247_v56 = vpop.f32.mrb[29].mxu1  ;;  %v2464_v43 = vld [vmem:[#allocation2 + $0x8] sm:$0xf] }
 0x6ae   :  { %v2171_v48 = vadd.f32 %v2170_v51, %v2071_v32  ;;  %v2248_v9 = vadd.f32 %v2247_v56, %v2079_v23  ;;  %2334 = vmatprep.mubr.f32.mxu0 %v2251_v46  ;;  %2409 = vmatprep.mubr.f32.mxu1 %v2253_v6 }
 0x6af   :  { %2335 = vmatmul.mubr.f32.vlgmr.msra.gmra.mrb[30].mxu0 %v2250_v36  ;;  %2410 = vmatmul.mubr.f32.vlgmr.msra.gmra.mrb[30].mxu1 %v2252_v34  ;;  %v2254_v37 = vmax.f32 %v2169_v47, 0.0  ;;  %v2256_v38 = vmax.f32 %v2246_v39, 0.0  ;;  %v11818_v36 = vld [vmem:[#allocation2 + $0xc] ss:$0 sm:$0xff] }
 0x6b0   :  { %v2255_v0 = vmax.f32 %v2171_v48, 0.0  ;;  %v2257_v50 = vmax.f32 %v2248_v9, 0.0  ;;  %12016 = vmatprep.subr.msk.mxu0 %vm58_vm0, %v2464_v43 }
 0x6b1   :  { %12017 = vmatpush3.msk.msra.mxu0 %vm58_vm0, %v2464_v43 }
 0x6b2   :  { %2339 = vmatprep.mubr.f32.mxu0 %v2255_v0  ;;  %2414 = vmatprep.mubr.f32.mxu1 %v2257_v50 }
 0x6b3   :  { %2340 = vmatmul.mubr.f32.gmra.mrb[32].mxu0 %v2254_v37  ;;  %2415 = vmatmul.mubr.f32.gmra.mrb[32].mxu1 %v2256_v38 }
 0x782   :  { %v2336_v40 = vpop.f32.mrb[30].mxu0  ;;  %v2411_v57 = vpop.f32.mrb[30].mxu1 }
 0x783   :  { %v2412_v60 = vadd.f32 %v2411_v57, %v2336_v40  ;;  %v2338_v12 = vpop.f32.mrb[31].mxu0  ;;  %v2413_v52 = vpop.f32.mrb[31].mxu1 }
 0x785   :  { %v2420_v2 = vadd.f32 %v2412_v60, %v2051_v5 }
 0x786   :  { %v2341_v7 = vpop.f32.mrb[32].mxu0  ;;  %v2416_v3 = vpop.f32.mrb[32].mxu1 }
 0x787   :  { %v2417_v53 = vadd.f32 %v2416_v3, %v2341_v7  ;;  %v2343_v14 = vpop.f32.mrb[33].mxu0  ;;  %v2418_v15 = vpop.f32.mrb[33].mxu1  ;;  %v2423_v35 = vadd.f32 %v2422_v54, %v2420_v2 }
 0x789   :  { %v2421_v29 = vadd.f32 %v2417_v53, %v2052_v30  ;;  %v2425_v28 = vadd.f32 %v2423_v35, %v13040_v61 }
 0x78b   :  { %v2427_v4 = vsel %vm51_vm1, %v2425_v28, 0.0  ;;  %v2424_v26 = vadd.f32 %v2422_v54, %v2421_v29 }
 0x78c   :  { %2428 = vadd.xlane.f32.xlu0 %v2427_v4 }
 0x78d   :  { %v2426_v10 = vadd.f32 %v2424_v26, %v13049_v44 }
 0x78f   :  { %v2430_v20 = vsel %vm51_vm1, %v2426_v10, 0.0 }
 0x790   :  { %2431 = vadd.xlane.f32.xlu0 %v2430_v20 }
 0x819   :  { %v2429_v18 = vpop.xlane.xlu0 %2428 }
 0x81a   :  { %v2433_v5 = vmul.f32 0.25, %v2429_v18 }
 0x81c   :  { %v2435_v63 = vsub.f32 %v2425_v28, %v2433_v5 }
 0x81d   :  { %v2432_v24 = vpop.xlane.xlu0 %2431 }
 0x81e   :  { %v2434_v8 = vmul.f32 0.25, %v2432_v24  ;;  %v2437_v19 = vmul.f32 %v2435_v63, %v2435_v63 }
 0x820   :  { %v2436_v61 = vsub.f32 %v2426_v10, %v2434_v8  ;;  %v2439_v22 = vsel %vm51_vm1, %v2437_v19, 0.0 }
 0x821   :  { %2440 = vadd.xlane.f32.xlu0 %v2439_v22 }
 0x822   :  { %v2438_v55 = vmul.f32 %v2436_v61, %v2436_v61 }
 0x824   :  { %v2442_v44 = vsel %vm51_vm1, %v2438_v55, 0.0 }
 0x825   :  { %2443 = vadd.xlane.f32.xlu0 %v2442_v44 }
 0x83b   :  { %2458 = vrot.lane.b32.xlu0 %v13025_v41, %s12626_s22 }
 0x83f   :  { %3227 = vrot.lane.b32.xlu0 %v11818_v36, %s12622_s16 }
 0x8ae   :  { %v2441_v32 = vpop.xlane.xlu0 %2440 }
 0x8af   :  { %v2445_v23 = vmul.f32 0.25, %v2441_v32 }
 0x8b1   :  { %v2447_v30 = vadd.f32 1e-05, %v2445_v23 }
 0x8b2   :  { %v2444_v59 = vpop.xlane.xlu0 %2443 }
 0x8b3   :  { %12177 = vrsqrt.f32 %v2447_v30  ;;  %v2446_v42 = vmul.f32 0.25, %v2444_v59 }
 0x8b5   :  { %v2448_v31 = vadd.f32 1e-05, %v2446_v42 }
 0x8b6   :  { %v2459_v17 = vpop.permute.xlu0 %2458 }
 0x8b7   :  { %12179 = vrsqrt.f32 %v2448_v31 }
 0x8bd   :  { %v12178_v62 = vpop.eup %12177 }
 0x8be   :  { %v2451_v27 = vmul.f32 %v12178_v62, %v2435_v63 }
 0x8c0   :  { %v2456_v1 = vmul.f32 %v2454_v11, %v2451_v27 }
 0x8c1   :  { %v12180_v46 = vpop.eup %12179 }
 0x8c2   :  { %v2452_v41 = vmul.f32 %v12180_v46, %v2436_v61  ;;  %v13149_v6 = vadd.f32 %v2459_v17, %v2456_v1 }
 0x8c4   :  { %v2457_v21 = vmul.f32 %v2454_v11, %v2452_v41  ;;  %12018 = vmatprep.mubr.msk.f32.mxu0 %vm51_vm1, %v13149_v6 }
 0x8c6   :  { %v13153_v45 = vadd.f32 %v2459_v17, %v2457_v21 }
 0x8c8   :  { %12019 = vmatmul.mubr.msk.f32.vlgmr.msra.gmra.mrb[34].mxu0 %vm51_vm1, %v13153_v45 }
 0x8c9   :  { %3469 = vmatprep.mubr.f32.mxu0 %v15266_v58 }
 0x99b   :  { %v12020_v34 = vpop.f32.mrb[34].mxu0 }
 0x99c   :  { %v2545_v47 = vpop.f32.mrb[35].mxu0  ;;  %v2551_v51 = vadd.f32 %v12020_v34, %v11818_v36 }
 0x99d   :  { %v2546_v39 = vadd.f32 %v11818_v36, %v2545_v47 }
 0x99e   :  { %v2605_v56 = vcombine.high %v2551_v51, %v2551_v51  ;;  %v2612_v9 = vrot.slane %v2551_v51, %v12706_v13 }
 0x99f   :  { %2734 = vrot.lane.b32.xlu1 %v2546_v39, %s12621_s15  ;;  %v2556_v48 = vcombine.high %v2546_v39, %v2546_v39  ;;  %v2563_v50 = vrot.slane %v2546_v39, %v12706_v13 }
 0x9a0   :  { %v2619_v0 = vrot.slane %v2605_v56, %v12706_v13  ;;  %v2620_v38 = vcombine.high %v2612_v9, %v2612_v9  ;;  %v13169_v12 = vrot.slane %v2612_v9, %v12706_v13 }
 0x9a1   :  { %v2570_v37 = vrot.slane %v2556_v48, %v12706_v13  ;;  %v2571_v57 = vcombine.high %v2563_v50, %v2563_v50  ;;  %v2579_v7 = vrot.slane %v2563_v50, %v12706_v13 }
 0x9a2   :  { %v2621_v40 = vcombine.high %v2619_v0, %v2619_v0  ;;  %v13172_v52 = vrot.slane %v2619_v0, %v12706_v13  ;;  %v13175_v54 = vrot.slane %v2620_v38, %v12706_v13  ;;  %v2650_v15 = vcombine.high %v13169_v12, %v13169_v12 }
 0x9a3   :  { %2736 = vrot.lane.b32.xlu1 %v2551_v51, %s12621_s15  ;;  %v2572_v60 = vcombine.high %v2570_v37, %v2570_v37  ;;  %v2593_v3 = vrot.slane %v2571_v57, %v12706_v13  ;;  %v2586_v53 = vrot.slane %v2570_v37, %v12706_v13  ;;  %v2601_v4 = vcombine.high %v2579_v7, %v2579_v7 }
 0x9a4   :  { %v13178_v2 = vrot.slane %v2621_v40, %v12706_v13  ;;  %v2651_v35 = vcombine.high %v13172_v52, %v13172_v52  ;;  %v2652_v29 = vcombine.high %v13175_v54, %v13175_v54  ;;  %v2689_v18 = vrot.slane %v13169_v12, %v12731_v33 }
 0x9a5   :  { %v2600_v14 = vrot.slane %v2572_v60, %v12706_v13  ;;  %v2603_v26 = vcombine.high %v2593_v3, %v2593_v3  ;;  %v2602_v10 = vcombine.high %v2586_v53, %v2586_v53  ;;  %v2693_v5 = vrot.slane %v13175_v54, %v12731_v33 }
 0x9a6   :  { %v2653_v28 = vcombine.high %v13178_v2, %v13178_v2  ;;  %v13197_v63 = vrot.slane %v2650_v15, %v12731_v33  ;;  %v2705_v24 = vrot.slane %v13172_v52, %v12731_v33  ;;  %v13202_v8 = vrot.slane %v2652_v29, %v12731_v33 }
 0x9a7   :  { %3060 = vrot.lane.b32.xlu1 %v2546_v39, %s12620_s2  ;;  %v2604_v20 = vcombine.high %v2600_v14, %v2600_v14  ;;  %v2709_v19 = vrot.slane %v13178_v2, %v12731_v33  ;;  %v13207_v61 = vrot.slane %v2651_v35, %v12731_v33  ;;  %v2657_v22 = vrot.slane %v2579_v7, %v12731_v33 }
 0x9a8   :  { %v13211_v55 = vrot.slane %v2653_v28, %v12731_v33  ;;  %v2661_v44 = vrot.slane %v2593_v3, %v12731_v33  ;;  %v2669_v32 = vrot.slane %v2603_v26, %v12731_v33  ;;  %v2673_v23 = vrot.slane %v2586_v53, %v12731_v33 }
 0x9a9   :  { %v2677_v30 = vrot.slane %v2600_v14, %v12731_v33  ;;  %v2681_v59 = vrot.slane %v2602_v10, %v12731_v33  ;;  %v2685_v42 = vrot.slane %v2604_v20, %v12731_v33 }
 0x9ab   :  { %3062 = vrot.lane.b32.xlu1 %v2551_v51, %s12620_s2 }
 0x9af   :  { %3224 = vrot.lane.b32.xlu1 %v2464_v43, %s12622_s16  ;;  %v2665_v43 = vrot.slane %v2601_v4, %v12731_v33 }
 0xa11   :  { %v2735_v31 = vpop.permute.xlu1 %2734 }
 0xa12   :  { %v13220_v62 = vmul.f32 %v2735_v31, %v2657_v22  ;;  %v13222_v11 = vmul.f32 %v2735_v31, %v2661_v44  ;;  %v13224_v27 = vmul.f32 %v2735_v31, %v2665_v43  ;;  %v13226_v17 = vmul.f32 %v2735_v31, %v2669_v32 }
 0xa13   :  { %v13228_v1 = vmul.f32 %v2735_v31, %v2673_v23  ;;  %v13230_v46 = vmul.f32 %v2735_v31, %v2677_v30  ;;  %v13232_v41 = vmul.f32 %v2735_v31, %v2681_v59  ;;  %v13234_v21 = vmul.f32 %v2735_v31, %v2685_v42 }
 0xa14   :  { %v2756_v36 = vsel %vm51_vm1, %v13220_v62, -inf  ;;  %v2763_v34 = vsel %vm51_vm1, %v13222_v11, -inf  ;;  %v2770_v47 = vsel %vm51_vm1, %v13224_v27, -inf  ;;  %v2777_v39 = vsel %vm51_vm1, %v13226_v17, -inf }
 0xa15   :  { %v2757_v51 = vrot.slane %v2756_v36, 4  ;;  %v2764_v56 = vrot.slane %v2763_v34, 4  ;;  %v2771_v48 = vrot.slane %v2770_v47, 4  ;;  %v2778_v9 = vrot.slane %v2777_v39, 4  ;;  %v13244_v0 = vpop.permute.xlu1 %2736 }
 0xa16   :  { %v2784_v50 = vsel %vm51_vm1, %v13228_v1, -inf  ;;  %v2791_v37 = vsel %vm51_vm1, %v13230_v46, -inf  ;;  %v2798_v38 = vsel %vm51_vm1, %v13232_v41, -inf  ;;  %v2805_v40 = vsel %vm51_vm1, %v13234_v21, -inf }
 0xa17   :  { %v2758_v57 = vmax.f32 %v2756_v36, %v2757_v51  ;;  %v2765_v60 = vmax.f32 %v2763_v34, %v2764_v56  ;;  %v2772_v7 = vmax.f32 %v2770_v47, %v2771_v48  ;;  %v2779_v3 = vmax.f32 %v2777_v39, %v2778_v9 }
 0xa18   :  { %v2785_v53 = vrot.slane %v2784_v50, 4  ;;  %v2792_v14 = vrot.slane %v2791_v37, 4  ;;  %v2799_v15 = vrot.slane %v2798_v38, 4  ;;  %v2806_v35 = vrot.slane %v2805_v40, 4 }
 0xa19   :  { %v2759_v29 = vrot.slane %v2758_v57, 2  ;;  %v2766_v28 = vrot.slane %v2765_v60, 2  ;;  %v2773_v4 = vrot.slane %v2772_v7, 2  ;;  %v2780_v26 = vrot.slane %v2779_v3, 2  ;;  %v13254_v10 = vpop.permute.xlu1 %3060 }
 0xa1a   :  { %v2786_v20 = vmax.f32 %v2784_v50, %v2785_v53  ;;  %v2793_v22 = vmax.f32 %v2791_v37, %v2792_v14  ;;  %v2800_v44 = vmax.f32 %v2798_v38, %v2799_v15  ;;  %v2807_v43 = vmax.f32 %v2805_v40, %v2806_v35 }
 0xa1b   :  { %v2760_v32 = vmax.f32 %v2758_v57, %v2759_v29  ;;  %v2767_v23 = vmax.f32 %v2765_v60, %v2766_v28  ;;  %v2774_v30 = vmax.f32 %v2772_v7, %v2773_v4  ;;  %v2781_v59 = vmax.f32 %v2779_v3, %v2780_v26 }
 0xa1c   :  { %v2787_v42 = vrot.slane %v2786_v20, 2  ;;  %v2794_v31 = vrot.slane %v2793_v22, 2  ;;  %v2801_v36 = vrot.slane %v2800_v44, 2  ;;  %v2808_v34 = vrot.slane %v2807_v43, 2 }
 0xa1d   :  { %v2761_v47 = vrot.slane %v2760_v32, 1  ;;  %v2768_v39 = vrot.slane %v2767_v23, 1  ;;  %v2775_v51 = vrot.slane %v2774_v30, 1  ;;  %v2782_v56 = vrot.slane %v2781_v59, 1  ;;  %v13256_v48 = vpop.permute.xlu1 %3062 }
 0xa1e   :  { %v2788_v9 = vmax.f32 %v2786_v20, %v2787_v42  ;;  %v2795_v58 = vmax.f32 %v2793_v22, %v2794_v31  ;;  %v2802_v50 = vmax.f32 %v2800_v44, %v2801_v36  ;;  %v2809_v37 = vmax.f32 %v2807_v43, %v2808_v34 }
 0xa1f   :  { %v2762_v38 = vmax.f32 %v2760_v32, %v2761_v47  ;;  %v2769_v40 = vmax.f32 %v2767_v23, %v2768_v39  ;;  %v2776_v57 = vmax.f32 %v2774_v30, %v2775_v51  ;;  %v2783_v60 = vmax.f32 %v2781_v59, %v2782_v56 }
 0xa20   :  { %v2789_v7 = vrot.slane %v2788_v9, 1  ;;  %v2796_v3 = vrot.slane %v2795_v58, 1  ;;  %v2803_v53 = vrot.slane %v2802_v50, 1  ;;  %v2810_v14 = vrot.slane %v2809_v37, 1 }
 0xa21   :  { %v2868_v15 = vsub.f32 %v13220_v62, %v2762_v38  ;;  %v2869_v35 = vsub.f32 %v13222_v11, %v2769_v40  ;;  %v2870_v29 = vsub.f32 %v13224_v27, %v2776_v57  ;;  %v2871_v28 = vsub.f32 %v13226_v17, %v2783_v60  ;;  %v3225_v4 = vpop.permute.xlu1 %3224 }
 0xa22   :  { %v2790_v26 = vmax.f32 %v2788_v9, %v2789_v7  ;;  %v2797_v20 = vmax.f32 %v2795_v58, %v2796_v3  ;;  %v2804_v22 = vmax.f32 %v2802_v50, %v2803_v53  ;;  %v2811_v44 = vmax.f32 %v2809_v37, %v2810_v14  ;;  %12021 = vmatprep.subr.msk.mxu1 %vm58_vm0, %v3225_v4 }
 0xa23   :  { %v2884_v43 = vmul.f32 1.442695, %v2868_v15  ;;  %v2886_v32 = vmul.f32 1.442695, %v2869_v35  ;;  %v2888_v23 = vmul.f32 1.442695, %v2870_v29  ;;  %v13267_v62 = vmul.f32 %v13244_v0, %v2689_v18  ;;  %12022 = vmatpush3.msk.msra.mxu1 %vm58_vm0, %v3225_v4 }
 0xa24   :  { %v2872_v11 = vsub.f32 %v13228_v1, %v2790_v26  ;;  %v2873_v27 = vsub.f32 %v13230_v46, %v2797_v20  ;;  %v2874_v58 = vsub.f32 %v13232_v41, %v2804_v22  ;;  %v2875_v17 = vsub.f32 %v13234_v21, %v2811_v44 }
 0xa25   :  { %12181 = vpow2.f32 %v2884_v43  ;;  %v2890_v30 = vmul.f32 1.442695, %v2871_v28  ;;  %v13278_v12 = vmul.f32 %v13244_v0, %v2693_v5  ;;  %v13282_v18 = vmul.f32 %v13244_v0, %v13197_v63 }
 0xa26   :  { %12183 = vpow2.f32 %v2886_v32  ;;  %v2892_v1 = vmul.f32 1.442695, %v2872_v11  ;;  %v2894_v59 = vmul.f32 1.442695, %v2873_v27  ;;  %v2896_v46 = vmul.f32 1.442695, %v2874_v58 }
 0xa27   :  { %12185 = vpow2.f32 %v2888_v23  ;;  %v2898_v41 = vmul.f32 1.442695, %v2875_v17  ;;  %v13286_v21 = vmul.f32 %v13244_v0, %v13202_v8  ;;  %v13292_v54 = vmul.f32 %v13244_v0, %v2705_v24 }
 0xa28   :  { %12187 = vpow2.f32 %v2890_v30  ;;  %v13298_v5 = vmul.f32 %v13244_v0, %v2709_v19  ;;  %v13302_v63 = vmul.f32 %v13244_v0, %v13207_v61  ;;  %v13306_v8 = vmul.f32 %v13244_v0, %v13211_v55 }
 0xa29   :  { %12189 = vpow2.f32 %v2892_v1  ;;  %v2812_v52 = vsel %vm51_vm1, %v13267_v62, -inf  ;;  %v2819_v24 = vsel %vm51_vm1, %v13278_v12, -inf  ;;  %v2826_v2 = vsel %vm51_vm1, %v13282_v18, -inf }
 0xa2a   :  { %12191 = vpow2.f32 %v2894_v59  ;;  %v2813_v19 = vrot.slane %v2812_v52, 4  ;;  %v2820_v42 = vrot.slane %v2819_v24, 4  ;;  %v2827_v31 = vrot.slane %v2826_v2, 4 }
 0xa2b   :  { %12193 = vpow2.f32 %v2896_v46  ;;  %v2833_v61 = vsel %vm51_vm1, %v13286_v21, -inf  ;;  %v2840_v55 = vsel %vm51_vm1, %v13292_v54, -inf  ;;  %v2847_v0 = vsel %vm51_vm1, %v13298_v5, -inf }
 0xa2c   :  { %12195 = vpow2.f32 %v2898_v41  ;;  %v2814_v36 = vmax.f32 %v2812_v52, %v2813_v19  ;;  %v2821_v34 = vmax.f32 %v2819_v24, %v2820_v42  ;;  %v2828_v47 = vmax.f32 %v2826_v2, %v2827_v31 }
 0xa2d   :  { %v2834_v39 = vrot.slane %v2833_v61, 4  ;;  %v2841_v51 = vrot.slane %v2840_v55, 4  ;;  %v2848_v56 = vrot.slane %v2847_v0, 4  ;;  %v2854_v9 = vsel %vm51_vm1, %v13302_v63, -inf }
 0xa2e   :  { %v2815_v50 = vrot.slane %v2814_v36, 2  ;;  %v2822_v37 = vrot.slane %v2821_v34, 2  ;;  %v2829_v38 = vrot.slane %v2828_v47, 2  ;;  %v2855_v40 = vrot.slane %v2854_v9, 4 }
 0xa2f   :  { %v13322_v57 = vpop.eup %12181  ;;  %v2835_v60 = vmax.f32 %v2833_v61, %v2834_v39  ;;  %v2842_v7 = vmax.f32 %v2840_v55, %v2841_v51  ;;  %v2849_v3 = vmax.f32 %v2847_v0, %v2848_v56  ;;  %v2861_v53 = vsel %vm51_vm1, %v13306_v8, -inf }
 0xa30   :  { %v13326_v14 = vpop.eup %12183  ;;  %v2916_v15 = vsel %vm51_vm1, %v13322_v57, 0.0  ;;  %v2816_v35 = vmax.f32 %v2814_v36, %v2815_v50  ;;  %v2823_v29 = vmax.f32 %v2821_v34, %v2822_v37  ;;  %v2830_v28 = vmax.f32 %v2828_v47, %v2829_v38 }
 0xa31   :  { %v13330_v4 = vpop.eup %12185  ;;  %v2917_v26 = vrot.slane %v2916_v15, 4  ;;  %v2923_v20 = vsel %vm51_vm1, %v13326_v14, 0.0  ;;  %v2836_v22 = vrot.slane %v2835_v60, 2  ;;  %v2843_v44 = vrot.slane %v2842_v7, 2 }
 0xa32   :  { %v13334_v43 = vpop.eup %12187  ;;  %v2924_v32 = vrot.slane %v2923_v20, 4  ;;  %v2930_v23 = vsel %vm51_vm1, %v13330_v4, 0.0  ;;  %v2817_v11 = vrot.slane %v2816_v35, 1  ;;  %v2824_v27 = vrot.slane %v2823_v29, 1 }
 0xa33   :  { %v13338_v58 = vpop.eup %12189  ;;  %v2918_v17 = vadd.f32 %v2917_v26, %v2916_v15  ;;  %v2931_v30 = vrot.slane %v2930_v23, 4  ;;  %v2937_v1 = vsel %vm51_vm1, %v13334_v43, 0.0  ;;  %v2831_v59 = vrot.slane %v2830_v28, 1 }
 0xa34   :  { %v13342_v46 = vpop.eup %12191  ;;  %v2925_v41 = vadd.f32 %v2924_v32, %v2923_v20  ;;  %v2938_v52 = vrot.slane %v2937_v1, 4  ;;  %v2944_v24 = vsel %vm51_vm1, %v13338_v58, 0.0  ;;  %v2818_v2 = vmax.f32 %v2816_v35, %v2817_v11 }
 0xa35   :  { %v13346_v19 = vpop.eup %12193  ;;  %v2919_v42 = vrot.slane %v2918_v17, 2  ;;  %v2932_v31 = vadd.f32 %v2931_v30, %v2930_v23  ;;  %v2945_v61 = vrot.slane %v2944_v24, 4  ;;  %v2951_v55 = vsel %vm51_vm1, %v13342_v46, 0.0 }
 0xa36   :  { %v13350_v0 = vpop.eup %12195  ;;  %v2926_v36 = vrot.slane %v2925_v41, 2  ;;  %v2939_v34 = vadd.f32 %v2938_v52, %v2937_v1  ;;  %v2952_v47 = vrot.slane %v2951_v55, 4  ;;  %v13354_v39 = vsel %vm51_vm1, %v13346_v19, 0.0 }
 0xa37   :  { %v2933_v51 = vrot.slane %v2932_v31, 2  ;;  %v2946_v56 = vadd.f32 %v2945_v61, %v2944_v24  ;;  %v2959_v50 = vrot.slane %v13354_v39, 4  ;;  %v2825_v37 = vmax.f32 %v2823_v29, %v2824_v27 }
 0xa38   :  { %v2940_v38 = vrot.slane %v2939_v34, 2  ;;  %v2953_v15 = vadd.f32 %v2952_v47, %v2951_v55  ;;  %v2832_v35 = vmax.f32 %v2830_v28, %v2831_v59  ;;  %v2837_v26 = vmax.f32 %v2835_v60, %v2836_v22 }
 0xa39   :  { %v2947_v20 = vrot.slane %v2946_v56, 2  ;;  %v2844_v32 = vmax.f32 %v2842_v7, %v2843_v44  ;;  %v2850_v23 = vrot.slane %v2849_v3, 2  ;;  %v2856_v11 = vmax.f32 %v2854_v9, %v2855_v40 }
 0xa3a   :  { %v2954_v30 = vrot.slane %v2953_v15, 2  ;;  %v2838_v1 = vrot.slane %v2837_v26, 1  ;;  %v2862_v52 = vrot.slane %v2861_v53, 4  ;;  %v2876_v13 = vsub.f32 %v13267_v62, %v2818_v2 }
 0xa3b   :  { %v2845_v49 = vrot.slane %v2844_v32, 1  ;;  %v2851_v16 = vmax.f32 %v2849_v3, %v2850_v23  ;;  %v2857_v25 = vrot.slane %v2856_v11, 2  ;;  %v2877_v24 = vsub.f32 %v13278_v12, %v2825_v37 }
 0xa3c   :  { %v2839_v61 = vmax.f32 %v2837_v26, %v2838_v1  ;;  %v2863_v29 = vmax.f32 %v2861_v53, %v2862_v52  ;;  %v2878_v27 = vsub.f32 %v13282_v18, %v2832_v35  ;;  %v2900_v28 = vmul.f32 1.442695, %v2876_v13 }
 0xa3d   :  { %v2846_v60 = vmax.f32 %v2844_v32, %v2845_v49  ;;  %v2852_v22 = vrot.slane %v2851_v16, 1  ;;  %v2858_v7 = vmax.f32 %v2856_v11, %v2857_v25  ;;  %v2902_v44 = vmul.f32 1.442695, %v2877_v24 }
 0xa3e   :  { %v2864_v9 = vrot.slane %v2863_v29, 2  ;;  %v2879_v40 = vsub.f32 %v13286_v21, %v2839_v61  ;;  %12197 = vpow2.f32 %v2900_v28  ;;  %v2904_v59 = vmul.f32 1.442695, %v2878_v27 }
 0xa3f   :  { %v2853_v62 = vmax.f32 %v2851_v16, %v2852_v22  ;;  %v2859_v2 = vrot.slane %v2858_v7, 1  ;;  %v2880_v3 = vsub.f32 %v13292_v54, %v2846_v60  ;;  %12199 = vpow2.f32 %v2902_v44 }
 0xa40   :  { %v2865_v12 = vmax.f32 %v2863_v29, %v2864_v9  ;;  %12201 = vpow2.f32 %v2904_v59  ;;  %v2906_v53 = vmul.f32 1.442695, %v2879_v40  ;;  %v2920_v55 = vadd.f32 %v2919_v42, %v2918_v17 }
 0xa41   :  { %v2860_v18 = vmax.f32 %v2858_v7, %v2859_v2  ;;  %v2881_v13 = vsub.f32 %v13298_v5, %v2853_v62  ;;  %v2908_v49 = vmul.f32 1.442695, %v2880_v3  ;;  %v2927_v25 = vadd.f32 %v2926_v36, %v2925_v41 }
 0xa42   :  { %v2866_v47 = vrot.slane %v2865_v12, 1  ;;  %12203 = vpow2.f32 %v2906_v53  ;;  %v2921_v37 = vrot.slane %v2920_v55, 1  ;;  %v2934_v21 = vadd.f32 %v2933_v51, %v2932_v31 }
 0xa43   :  { %v2882_v35 = vsub.f32 %v13302_v63, %v2860_v18  ;;  %12205 = vpow2.f32 %v2908_v49  ;;  %v2910_v16 = vmul.f32 1.442695, %v2881_v13  ;;  %v2928_v26 = vrot.slane %v2927_v25, 1 }
 0xa44   :  { %v2867_v54 = vmax.f32 %v2865_v12, %v2866_v47  ;;  %v2922_v32 = vadd.f32 %v2921_v37, %v2920_v55  ;;  %v2935_v23 = vrot.slane %v2934_v21, 1  ;;  %v2941_v11 = vadd.f32 %v2940_v38, %v2939_v34 }
 0xa45   :  { %12207 = vpow2.f32 %v2910_v16  ;;  %v2912_v17 = vmul.f32 1.442695, %v2882_v35  ;;  %v2929_v42 = vadd.f32 %v2928_v26, %v2927_v25  ;;  %v2948_v1 = vadd.f32 %v2947_v20, %v2946_v56 }
 0xa46   :  { %v2883_v5 = vsub.f32 %v13306_v8, %v2867_v54  ;;  %v2936_v41 = vadd.f32 %v2935_v23, %v2934_v21  ;;  %v2942_v36 = vrot.slane %v2941_v11, 1  ;;  %12209 = vrcp.f32 %v2922_v32 }
 0xa47   :  { %12211 = vpow2.f32 %v2912_v17  ;;  %v2949_v31 = vrot.slane %v2948_v1, 1  ;;  %v2955_v51 = vadd.f32 %v2954_v30, %v2953_v15  ;;  %v2960_v63 = vadd.f32 %v2959_v50, %v13354_v39 }
 0xa48   :  { %v13368_v52 = vpop.eup %12197  ;;  %v2914_v24 = vmul.f32 1.442695, %v2883_v5  ;;  %v2943_v34 = vadd.f32 %v2942_v36, %v2941_v11  ;;  %12213 = vrcp.f32 %v2929_v42  ;;  %v2965_v56 = vsel %vm51_vm1, %v13350_v0, 0.0 }
 0xa49   :  { %v13372_v38 = vpop.eup %12199  ;;  %v2972_v8 = vsel %vm51_vm1, %v13368_v52, 0.0  ;;  %v2950_v20 = vadd.f32 %v2949_v31, %v2948_v1  ;;  %12215 = vrcp.f32 %v2936_v41  ;;  %v2956_v15 = vrot.slane %v2955_v51, 1 }
 0xa4a   :  { %v13376_v30 = vpop.eup %12201  ;;  %12217 = vpow2.f32 %v2914_v24  ;;  %v2973_v39 = vrot.slane %v2972_v8, 4  ;;  %v2979_v50 = vsel %vm51_vm1, %v13372_v38, 0.0  ;;  %v2961_v61 = vrot.slane %v2960_v63, 2 }
 0xa4b   :  { %v2980_v29 = vrot.slane %v2979_v50, 4  ;;  %v2986_v27 = vsel %vm51_vm1, %v13376_v30, 0.0  ;;  %12219 = vrcp.f32 %v2943_v34  ;;  %v2957_v28 = vadd.f32 %v2956_v15, %v2955_v51 }
 0xa4c   :  { %v13382_v60 = vpop.eup %12203  ;;  %v2974_v22 = vadd.f32 %v2973_v39, %v2972_v8  ;;  %v2987_v7 = vrot.slane %v2986_v27, 4  ;;  %12221 = vrcp.f32 %v2950_v20  ;;  %v13384_v44 = vadd.f32 %v2961_v61, %v2960_v63 }
 0xa4d   :  { %v13386_v9 = vpop.eup %12205  ;;  %v2981_v40 = vadd.f32 %v2980_v29, %v2979_v50  ;;  %v2993_v59 = vsel %vm51_vm1, %v13382_v60, 0.0  ;;  %v2966_v62 = vrot.slane %v2965_v56, 4  ;;  %12223 = vrcp.f32 %v2957_v28 }
 0xa4e   :  { %v2975_v2 = vrot.slane %v2974_v22, 2  ;;  %v2988_v3 = vadd.f32 %v2987_v7, %v2986_v27  ;;  %v2994_v12 = vrot.slane %v2993_v59, 4  ;;  %v3000_v53 = vsel %vm51_vm1, %v13386_v9, 0.0 }
 0xa4f   :  { %v13392_v55 = vpop.eup %12207  ;;  %v2982_v18 = vrot.slane %v2981_v40, 2  ;;  %v3001_v13 = vrot.slane %v3000_v53, 4  ;;  %v2963_v49 = vrot.slane %v13384_v44, 1  ;;  %v13395_v25 = vadd.f32 %v2966_v62, %v2965_v56 }
 0xa50   :  { %v12210_v47 = vpop.eup %12209  ;;  %v2989_v37 = vrot.slane %v2988_v3, 2  ;;  %v2995_v21 = vadd.f32 %v2994_v12, %v2993_v59  ;;  %v3007_v35 = vsel %vm51_vm1, %v13392_v55, 0.0  ;;  %v2976_v16 = vadd.f32 %v2975_v2, %v2974_v22 }
 0xa51   :  { %v13399_v26 = vpop.eup %12211  ;;  %v3002_v54 = vadd.f32 %v3001_v13, %v3000_v53  ;;  %v3008_v32 = vrot.slane %v3007_v35, 4  ;;  %v3029_v23 = vmul.f32 %v12210_v47, %v13322_v57  ;;  %v2983_v11 = vadd.f32 %v2982_v18, %v2981_v40 }
 0xa52   :  { %v12214_v17 = vpop.eup %12213  ;;  %v2996_v42 = vrot.slane %v2995_v21, 2  ;;  %v3014_v1 = vsel %vm51_vm1, %v13399_v26, 0.0  ;;  %v2977_v5 = vrot.slane %v2976_v16, 1  ;;  %v2990_v41 = vadd.f32 %v2989_v37, %v2988_v3 }
 0xa53   :  { %v12216_v36 = vpop.eup %12215  ;;  %v3003_v31 = vrot.slane %v3002_v54, 2  ;;  %v3009_v51 = vadd.f32 %v3008_v32, %v3007_v35  ;;  %v3015_v63 = vrot.slane %v3014_v1, 4  ;;  %v3031_v24 = vmul.f32 %v12214_v17, %v13326_v14 }
 0xa54   :  { %v13405_v34 = vpop.eup %12217  ;;  %v3033_v56 = vmul.f32 %v12216_v36, %v13330_v4  ;;  %v3066_v57 = vmul.f32 %v13254_v10, %v3029_v23  ;;  %v2978_v8 = vadd.f32 %v2977_v5, %v2976_v16  ;;  %v2984_v20 = vrot.slane %v2983_v11, 1 }
 0xa55   :  { %v12220_v15 = vpop.eup %12219  ;;  %v3010_v39 = vrot.slane %v3009_v51, 2  ;;  %v3016_v50 = vadd.f32 %v3015_v63, %v3014_v1  ;;  %v3021_v61 = vsel %vm51_vm1, %v13405_v34, 0.0  ;;  %v3067_v29 = vmul.f32 %v13254_v10, %v3031_v24 }
 0xa56   :  { %v12222_v27 = vpop.eup %12221  ;;  %v3022_v28 = vrot.slane %v3021_v61, 4  ;;  %v3035_v14 = vmul.f32 %v12220_v15, %v13334_v43  ;;  %v3068_v22 = vmul.f32 %v13254_v10, %v3033_v56  ;;  %v3082_v4 = vsel %vm51_vm1, %v3066_v57, 0.0 }
 0xa57   :  { %v12224_v7 = vpop.eup %12223  ;;  %v3017_v40 = vrot.slane %v3016_v50, 2  ;;  %v3037_v59 = vmul.f32 %v12222_v27, %v13338_v58  ;;  %v3083_v62 = vrot.slane %v3082_v4, 4  ;;  %v3089_v2 = vsel %vm51_vm1, %v3067_v29, 0.0 }
 0xa58   :  { %v3023_v3 = vadd.f32 %v3022_v28, %v3021_v61  ;;  %v3069_v12 = vmul.f32 %v13254_v10, %v3035_v14  ;;  %v3090_v53 = vrot.slane %v3089_v2, 4  ;;  %v3096_v18 = vsel %vm51_vm1, %v3068_v22, 0.0 }
 0xa59   :  { %v3070_v13 = vmul.f32 %v13254_v10, %v3037_v59  ;;  %v3084_v43 = vadd.f32 %v3083_v62, %v3082_v4  ;;  %v3097_v47 = vrot.slane %v3096_v18, 4  ;;  %v2985_v37 = vadd.f32 %v2984_v20, %v2983_v11 }
 0xa5a   :  { %v3024_v35 = vrot.slane %v3023_v3, 2  ;;  %v3091_v16 = vadd.f32 %v3090_v53, %v3089_v2  ;;  %v3103_v32 = vsel %vm51_vm1, %v3069_v12, 0.0  ;;  %v2991_v23 = vrot.slane %v2990_v41, 1 }
 0xa5b   :  { %v3085_v58 = vrot.slane %v3084_v43, 2  ;;  %v3098_v17 = vadd.f32 %v3097_v47, %v3096_v18  ;;  %v3104_v1 = vrot.slane %v3103_v32, 4  ;;  %v2997_v5 = vadd.f32 %v2996_v42, %v2995_v21 }
 0xa5c   :  { %v3092_v36 = vrot.slane %v3091_v16, 2  ;;  %v2992_v63 = vadd.f32 %v2991_v23, %v2990_v41  ;;  %v3004_v24 = vadd.f32 %v3003_v31, %v3002_v54  ;;  %v3011_v56 = vadd.f32 %v3010_v39, %v3009_v51 }
 0xa5d   :  { %v2998_v57 = vrot.slane %v2997_v5, 1  ;;  %v3018_v15 = vadd.f32 %v3017_v40, %v3016_v50  ;;  %v3025_v61 = vadd.f32 %v3024_v35, %v3023_v3  ;;  %12225 = vrcp.f32 %v2978_v8 }
 0xa5e   :  { %v3005_v29 = vrot.slane %v3004_v24, 1  ;;  %v3012_v27 = vrot.slane %v3011_v56, 1  ;;  %12227 = vrcp.f32 %v2985_v37  ;;  %v2964_v11 = vadd.f32 %v2963_v49, %v13384_v44 }
 0xa5f   :  { %v2999_v20 = vadd.f32 %v2998_v57, %v2997_v5  ;;  %v3019_v28 = vrot.slane %v3018_v15, 1  ;;  %v3026_v14 = vrot.slane %v3025_v61, 1  ;;  %12229 = vrcp.f32 %v2992_v63 }
 0xa60   :  { %v3006_v21 = vadd.f32 %v3005_v29, %v3004_v24  ;;  %v3013_v42 = vadd.f32 %v3012_v27, %v3011_v56  ;;  %v2968_v54 = vrot.slane %v13395_v25, 2  ;;  %v3039_v41 = vmul.f32 %v12224_v7, %v13342_v46 }
 0xa61   :  { %v3020_v31 = vadd.f32 %v3019_v28, %v3018_v15  ;;  %v3027_v51 = vadd.f32 %v3026_v14, %v3025_v61  ;;  %12231 = vrcp.f32 %v2999_v20  ;;  %v3086_v8 = vadd.f32 %v3085_v58, %v3084_v43 }
 0xa62   :  { %12233 = vrcp.f32 %v3006_v21  ;;  %v2969_v39 = vadd.f32 %v2968_v54, %v13395_v25  ;;  %v3071_v50 = vmul.f32 %v13254_v10, %v3039_v41  ;;  %v3093_v44 = vadd.f32 %v3092_v36, %v3091_v16 }
 0xa63   :  { %12235 = vrcp.f32 %v3013_v42  ;;  %v3087_v49 = vrot.slane %v3086_v8, 1  ;;  %v3099_v22 = vrot.slane %v3098_v17, 2  ;;  %v3105_v4 = vadd.f32 %v3104_v1, %v3103_v32 }
 0xa64   :  { %12237 = vrcp.f32 %v3020_v31  ;;  %v2970_v40 = vrot.slane %v2969_v39, 1  ;;  %v3094_v59 = vrot.slane %v3093_v44, 1  ;;  %v3110_v62 = vsel %vm51_vm1, %v3070_v13, 0.0 }
 0xa65   :  { %12239 = vrcp.f32 %v3027_v51  ;;  %v3088_v46 = vadd.f32 %v3087_v49, %v3086_v8  ;;  %v3100_v7 = vadd.f32 %v3099_v22, %v3098_v17  ;;  %v3106_v2 = vrot.slane %v3105_v4, 2 }
 0xa66   :  { %v2971_v3 = vadd.f32 %v2970_v40, %v2969_v39  ;;  %v3095_v12 = vadd.f32 %v3094_v59, %v3093_v44  ;;  %v3111_v53 = vrot.slane %v3110_v62, 4  ;;  %12241 = vrcp.f32 %v2964_v11 }
 0xa67   :  { %v12226_v25 = vpop.eup %12225  ;;  %v3101_v18 = vrot.slane %v3100_v7, 1  ;;  %v3107_v43 = vadd.f32 %v3106_v2, %v3105_v4  ;;  %v3117_v47 = vsel %vm51_vm1, %v3071_v50, 0.0 }
 0xa68   :  { %v12228_v37 = vpop.eup %12227  ;;  %v3045_v35 = vmul.f32 %v12226_v25, %v13368_v52  ;;  %12243 = vrcp.f32 %v2971_v3  ;;  %v3112_v16 = vadd.f32 %v3111_v53, %v3110_v62  ;;  %v3118_v32 = vrot.slane %v3117_v47, 4 }
 0xa69   :  { %v12230_v13 = vpop.eup %12229  ;;  %v3047_v23 = vmul.f32 %v12228_v37, %v13372_v38  ;;  %v3102_v58 = vadd.f32 %v3101_v18, %v3100_v7  ;;  %v3108_v17 = vrot.slane %v3107_v43, 1  ;;  %v3210_v1 = vsel %vm793_vm2, %v3095_v12, %v3088_v46 }
 0xa6a   :  { %v3049_v5 = vmul.f32 %v12230_v13, %v13376_v30  ;;  %v3074_v36 = vmul.f32 %v13256_v48, %v3045_v35  ;;  %v3113_v63 = vrot.slane %v3112_v16, 2  ;;  %v3119_v52 = vadd.f32 %v3118_v32, %v3117_v47 }
 0xa6b   :  { %v12232_v24 = vpop.eup %12231  ;;  %v3075_v56 = vmul.f32 %v13256_v48, %v3047_v23  ;;  %v3109_v57 = vadd.f32 %v3108_v17, %v3107_v43  ;;  %v3211_v27 = vsel %vm795_vm3, %v3102_v58, %v3210_v1 }
 0xa6c   :  { %v12234_v15 = vpop.eup %12233  ;;  %v3051_v61 = vmul.f32 %v12232_v24, %v13382_v60  ;;  %v3076_v29 = vmul.f32 %v13256_v48, %v3049_v5  ;;  %v3138_v38 = vsel %vm51_vm1, %v3074_v36, 0.0  ;;  %v3114_v14 = vadd.f32 %v3113_v63, %v3112_v16 }
 0xa6d   :  { %v12236_v11 = vpop.eup %12235  ;;  %v3053_v30 = vmul.f32 %v12234_v15, %v13386_v9  ;;  %v3139_v20 = vrot.slane %v3138_v38, 4  ;;  %v3145_v28 = vsel %vm51_vm1, %v3075_v56, 0.0  ;;  %v3120_v22 = vrot.slane %v3119_v52, 2 }
 0xa6e   :  { %v12238_v21 = vpop.eup %12237  ;;  %v3055_v42 = vmul.f32 %v12236_v11, %v13392_v55  ;;  %v3077_v54 = vmul.f32 %v13256_v48, %v3051_v61  ;;  %v3146_v41 = vrot.slane %v3145_v28, 4  ;;  %v3152_v60 = vsel %vm51_vm1, %v3076_v29, 0.0 }
 0xa6f   :  { %v12240_v31 = vpop.eup %12239  ;;  %v3057_v51 = vmul.f32 %v12238_v21, %v13399_v26  ;;  %v3078_v8 = vmul.f32 %v13256_v48, %v3053_v30  ;;  %v3140_v39 = vadd.f32 %v3139_v20, %v3138_v38  ;;  %v3153_v50 = vrot.slane %v3152_v60, 4 }
 0xa70   :  { %v3079_v9 = vmul.f32 %v13256_v48, %v3055_v42  ;;  %v3147_v44 = vadd.f32 %v3146_v41, %v3145_v28  ;;  %v3159_v49 = vsel %vm51_vm1, %v3077_v54, 0.0  ;;  %v12242_v4 = vpop.eup %12241  ;;  %v3059_v55 = vmul.f32 %v12240_v31, %v13405_v34 }
 0xa71   :  { %v3141_v40 = vrot.slane %v3140_v39, 2  ;;  %v3154_v59 = vadd.f32 %v3153_v50, %v3152_v60  ;;  %v3160_v62 = vrot.slane %v3159_v49, 4  ;;  %v3080_v7 = vmul.f32 %v13256_v48, %v3057_v51 }
 0xa72   :  { %v12244_v46 = vpop.eup %12243  ;;  %v3148_v26 = vrot.slane %v3147_v44, 2  ;;  %v3166_v2 = vsel %vm51_vm1, %v3078_v8, 0.0  ;;  %v3173_v3 = vsel %vm51_vm1, %v3079_v9, 0.0  ;;  %v3041_v37 = vmul.f32 %v12242_v4, %v13346_v19 }
 0xa73   :  { %v3142_v12 = vadd.f32 %v3141_v40, %v3140_v39  ;;  %v3155_v53 = vrot.slane %v3154_v59, 2  ;;  %v3161_v25 = vadd.f32 %v3160_v62, %v3159_v49  ;;  %v3167_v18 = vrot.slane %v3166_v2, 4 }
 0xa74   :  { %v3149_v43 = vadd.f32 %v3148_v26, %v3147_v44  ;;  %v3174_v47 = vrot.slane %v3173_v3, 4  ;;  %v3043_v34 = vmul.f32 %v12244_v46, %v13350_v0  ;;  %v3072_v58 = vmul.f32 %v13254_v10, %v3041_v37 }
 0xa75   :  { %v3143_v35 = vrot.slane %v3142_v12, 1  ;;  %v3156_v16 = vadd.f32 %v3155_v53, %v3154_v59  ;;  %v3162_v32 = vrot.slane %v3161_v25, 2  ;;  %v3168_v13 = vadd.f32 %v3167_v18, %v3166_v2 }
 0xa76   :  { %v3150_v23 = vrot.slane %v3149_v43, 1  ;;  %v3073_v17 = vmul.f32 %v13254_v10, %v3043_v34  ;;  %v3115_v1 = vrot.slane %v3114_v14, 1  ;;  %v3081_v5 = vmul.f32 %v13256_v48, %v3059_v55 }
 0xa77   :  { %v3121_v36 = vadd.f32 %v3120_v22, %v3119_v52  ;;  %v3212_v63 = vsel %vm797_vm4, %v3109_v57, %v3211_v27  ;;  %v3157_v24 = vrot.slane %v3156_v16, 1  ;;  %v3124_v19 = vsel %vm51_vm1, %v3072_v58, 0.0 }
 0xa78   :  { %v3116_v56 = vadd.f32 %v3115_v1, %v3114_v14  ;;  %v3131_v0 = vsel %vm51_vm1, %v3073_v17, 0.0  ;;  %v3144_v15 = vadd.f32 %v3143_v35, %v3142_v12  ;;  %v3125_v29 = vrot.slane %v3124_v19, 4 }
 0xa79   :  { %v3122_v61 = vrot.slane %v3121_v36, 1  ;;  %v3132_v38 = vrot.slane %v3131_v0, 4  ;;  %v3151_v11 = vadd.f32 %v3150_v23, %v3149_v43  ;;  %v3158_v30 = vadd.f32 %v3157_v24, %v3156_v16 }
 0xa7a   :  { %v3163_v20 = vadd.f32 %v3162_v32, %v3161_v25  ;;  %v3169_v10 = vrot.slane %v3168_v13, 2  ;;  %v3175_v28 = vadd.f32 %v3174_v47, %v3173_v3  ;;  %v3126_v21 = vadd.f32 %v3125_v29, %v3124_v19 }
 0xa7b   :  { %v3133_v48 = vadd.f32 %v3132_v38, %v3131_v0  ;;  %v3213_v52 = vsel %vm799_vm5, %v3116_v56, %v3212_v63  ;;  %v3180_v57 = vsel %vm51_vm1, %v3080_v7, 0.0  ;;  %v3123_v41 = vadd.f32 %v3122_v61, %v3121_v36  ;;  %v3228_v36 = vpop.permute.xlu0 %3227 }
 0xa7c   :  { %v3164_v27 = vrot.slane %v3163_v20, 1  ;;  %v3170_v14 = vadd.f32 %v3169_v10, %v3168_v13  ;;  %v3176_v42 = vrot.slane %v3175_v28, 2  ;;  %v3181_v54 = vrot.slane %v3180_v57, 4 }
 0xa7d   :  { %v3127_v60 = vrot.slane %v3126_v21, 2  ;;  %v3134_v31 = vrot.slane %v3133_v48, 2  ;;  %v3187_v51 = vsel %vm51_vm1, %v3081_v5, 0.0  ;;  %v3217_v4 = vsel %vm793_vm2, %v3151_v11, %v3144_v15 }
 0xa7e   :  { %v3165_v8 = vadd.f32 %v3164_v27, %v3163_v20  ;;  %v3171_v39 = vrot.slane %v3170_v14, 1  ;;  %v3177_v50 = vadd.f32 %v3176_v42, %v3175_v28  ;;  %v3182_v9 = vadd.f32 %v3181_v54, %v3180_v57  ;;  %v3357_v57 = vld [vmem:[#allocation5 + $0x108] sm:$0xf]  ;;  %v3356_v27 = vld [vmem:[#allocation5 + $0x100] sm:$0xf] }
 0xa7f   :  { %v3128_v44 = vadd.f32 %v3127_v60, %v3126_v21  ;;  %v3135_v49 = vadd.f32 %v3134_v31, %v3133_v48  ;;  %v3188_v22 = vrot.slane %v3187_v51, 4  ;;  %v3218_v62 = vsel %vm795_vm3, %v3158_v30, %v3217_v4  ;;  %11826 = vmatprep.subr.msk.mxu0 %vm58_vm0, %v3357_v57  ;;  %v3358_v42 = vld [vmem:[#allocation5 + $0x110] sm:$0xf]  ;;  %v3568_v54 = vld [vmem:[#allocation5 + $0x128] sm:$0xf] }
 0xa80   :  { %v3172_v55 = vadd.f32 %v3171_v39, %v3170_v14  ;;  %v3178_v40 = vrot.slane %v3177_v50, 1  ;;  %v3183_v59 = vrot.slane %v3182_v9, 2  ;;  %v3219_v2 = vsel %vm797_vm4, %v3165_v8, %v3218_v62  ;;  %11827 = vmatpush1.msk.msra.mxu0 %vm58_vm0, %v3356_v27  ;;  %v3359_v14 = vld [vmem:[#allocation5 + $0x118] sm:$0xf] }
 0xa81   :  { %v3129_v46 = vrot.slane %v3128_v44, 1  ;;  %v3136_v7 = vrot.slane %v3135_v49, 1  ;;  %v3189_v26 = vadd.f32 %v3188_v22, %v3187_v51  ;;  %v3214_v3 = vsel %vm801_vm6, %v3123_v41, %v3213_v52  ;;  %11830 = vmatprep.subr.msk.mxu1 %vm58_vm0, %v3359_v14  ;;  %11834 = vmatprep.subr.msk.mxu0 %vm58_vm0, %v3568_v54  ;;  %v3570_v41 = vld [vmem:[#allocation5 + $0x138] sm:$0xf] }
 0xa82   :  { %v3184_v12 = vadd.f32 %v3183_v59, %v3182_v9  ;;  %v3220_v53 = vsel %vm799_vm5, %v3172_v55, %v3219_v2  ;;  %v3179_v18 = vadd.f32 %v3178_v40, %v3177_v50  ;;  %v15297_v5 = vmov 0.0   ;;  %v3572_v2 = vld [vmem:[#allocation5 + $0x128] sm:$0xf0] }
 0xa83   :  { %v3130_v25 = vadd.f32 %v3129_v46, %v3128_v44  ;;  %v3190_v43 = vrot.slane %v3189_v26, 2  ;;  %v3137_v47 = vadd.f32 %v3136_v7, %v3135_v49  ;;  %v3567_v46 = vld [vmem:[#allocation5 + $0x120] sm:$0xf]  ;;  %v3569_v7 = vld [vmem:[#allocation5 + $0x130] sm:$0xf] }
 0xa84   :  { %v3185_v37 = vrot.slane %v3184_v12, 1  ;;  %v3221_v16 = vsel %vm801_vm6, %v3179_v18, %v3220_v53 }
 0xa85   :  { %v3215_v34 = vsel %vm803_vm7, %v3130_v25, %v3214_v3  ;;  %v3191_v35 = vadd.f32 %v3190_v43, %v3189_v26  ;;  %v3571_v3 = vld [vmem:[#allocation5 + $0x120] sm:$0xf0]  ;;  %v3574_v25 = vld [vmem:[#allocation5 + $0x138] sm:$0xf0]  ;;  %v3573_v43 = vld [vmem:[#allocation5 + $0x130] sm:$0xf0] }
 0xa86   :  { %v3216_v32 = vsel %vm805_vm8, %v3137_v47, %v3215_v34  ;;  %v3186_v13 = vadd.f32 %v3185_v37, %v3184_v12  ;;  %v3777_v12 = vrot.slane %v3572_v2, 4  ;;  %v3776_v53 = vrot.slane %v3571_v3, 4  ;;  %v3361_v37 = vld [vmem:[#allocation5 + $0x108] sm:$0xf0]  ;;  %v4099_v2 = vld [vmem:[#allocation5 + $0x158] sm:$0xf] }
 0xa87   :  { %12023 = vmatprep.mubr.msk.f32.mxu1 %vm51_vm1, %v3216_v32  ;;  %v3192_v23 = vrot.slane %v3191_v35, 1  ;;  %v3779_v18 = vrot.slane %v3574_v25, 4  ;;  %v3778_v47 = vrot.slane %v3573_v43, 4  ;;  %v3939_v34 = vrot.slane %v3361_v37, 4 }
 0xa88   :  { %v3222_v58 = vsel %vm803_vm7, %v3186_v13, %v3221_v16 }
 0xa89   :  { %v3193_v17 = vadd.f32 %v3192_v23, %v3191_v35  ;;  %v3363_v35 = vld [vmem:[#allocation5 + $0x118] sm:$0xf0] }
 0xa8a   :  { %v3941_v16 = vrot.slane %v3363_v35, 4 }
 0xa8b   :  { %v3223_v1 = vsel %vm805_vm8, %v3193_v17, %v3222_v58  ;;  %v3576_v17 = vld [vmem:[#allocation5 + $0x1a0] ss:$8 sm:$0xf] }
 0xa8c   :  { %12024 = vmatmul.mubr.msk.f32.vlgmr.msra.gmra.mrb[34].mxu1 %vm51_vm1, %v3223_v1 }
 0xa8d   :  { %3546 = vmatprep.mubr.f32.mxu1 %v15297_v5  ;;  %11831 = vmatpush1.msk.msra.mxu1 %vm58_vm0, %v3358_v42 }
 0xa8e   :  { %11838 = vmatprep.subr.msk.mxu1 %vm58_vm0, %v3570_v41 }
 0xb5f   :  { %v12025_v63 = vpop.f32.mrb[34].mxu1 }
 0xb60   :  { %v3308_v24 = vadd.f32 %v12025_v63, %v3228_v36  ;;  %v3302_v56 = vpop.f32.mrb[35].mxu1  ;;  %v3365_v63 = vld [vmem:[#allocation5 + $0x180] ss:$8 sm:$0xf] }
 0xb61   :  { %v3303_v19 = vadd.f32 %v3302_v56, %v3228_v36  ;;  %v3370_v42 = vrot.slane %v3365_v63, %v12731_v33 }
 0xb62   :  { %v3312_v0 = vadd.f32 %v3308_v24, %v13153_v45 }
 0xb63   :  { %v3311_v15 = vadd.f32 %v3303_v19, %v13149_v6  ;;  %v11825_v6 = vld [vmem:[#allocation2 + $0x30] ss:$0 sm:$0xff]  ;;  %v3581_v19 = vrot.slane %v3576_v17, %v12731_v33 }
 0xb64   :  { %v3317_v61 = vsel %vm51_vm1, %v3312_v0, 0.0 }
 0xb65   :  { %3318 = vadd.xlane.f32.xlu0 %v3317_v61  ;;  %v3314_v29 = vsel %vm51_vm1, %v3311_v15, 0.0  ;;  %v15299_v61 = vld [vmem:[#allocation14_spill] sm:$0xff] }
 0xb66   :  { %3315 = vadd.xlane.f32.xlu1 %v3314_v29  ;;  %v3585_v29 = vrot.slane %v3576_v17, %v15299_v61 }
 0xbf2   :  { %v3319_v38 = vpop.xlane.xlu0 %3318 }
 0xbf3   :  { %v3321_v11 = vmul.f32 0.25, %v3319_v38  ;;  %v3316_v30 = vpop.xlane.xlu1 %3315  ;;  %v15300_v38 = vld [vmem:[#allocation15_spill] sm:$0xff] }
 0xbf4   :  { %v3320_v20 = vmul.f32 0.25, %v3316_v30  ;;  %v3374_v30 = vrot.slane %v3365_v63, %v15299_v61  ;;  %v3382_v57 = vrot.slane %v3365_v63, %v15300_v38 }
 0xbf5   :  { %v3323_v10 = vsub.f32 %v3312_v0, %v3321_v11  ;;  %v15298_v0 = vld [vmem:[#allocation13_spill] sm:$0xff]  ;;  %v3593_v11 = vrot.slane %v3576_v17, %v15300_v38 }
 0xbf6   :  { %v3322_v28 = vsub.f32 %v3311_v15, %v3320_v20  ;;  %v3589_v15 = vrot.slane %v3576_v17, %v15298_v0  ;;  %v3378_v54 = vrot.slane %v3365_v63, %v15298_v0  ;;  %v4098_v63 = vld [vmem:[#allocation5 + $0x150] sm:$0xf] }
 0xbf7   :  { %v3325_v21 = vmul.f32 %v3323_v10, %v3323_v10 }
 0xbf8   :  { %v3324_v48 = vmul.f32 %v3322_v28, %v3322_v28 }
 0xbf9   :  { %v3329_v52 = vsel %vm51_vm1, %v3325_v21, 0.0 }
 0xbfa   :  { %3330 = vadd.xlane.f32.xlu1 %v3329_v52  ;;  %v3326_v45 = vsel %vm51_vm1, %v3324_v48, 0.0 }
 0xbfb   :  { %3327 = vadd.xlane.f32.xlu0 %v3326_v45 }
 0xc0b   :  { %3350 = vrot.lane.b32.xlu1 %v11825_v6, %s12622_s16 }
 0xc11   :  { %3345 = vrot.lane.b32.xlu0 %v11825_v6, %s12620_s2  ;;  %v3362_v6 = vld [vmem:[#allocation5 + $0x110] sm:$0xf0] }
 0xc87   :  { %v3331_v60 = vpop.xlane.xlu1 %3330 }
 0xc88   :  { %v3333_v31 = vmul.f32 0.25, %v3331_v60  ;;  %v3328_v51 = vpop.xlane.xlu0 %3327 }
 0xc89   :  { %v3332_v8 = vmul.f32 0.25, %v3328_v51 }
 0xc8a   :  { %v3335_v39 = vadd.f32 1e-05, %v3333_v31 }
 0xc8b   :  { %v3334_v50 = vadd.f32 1e-05, %v3332_v8  ;;  %v3351_v55 = vpop.permute.xlu1 %3350 }
 0xc8c   :  { %12245 = vrsqrt.f32 %v3335_v39  ;;  %v3346_v49 = vpop.permute.xlu0 %3345 }
 0xc8d   :  { %12247 = vrsqrt.f32 %v3334_v50  ;;  %v3940_v50 = vrot.slane %v3362_v6, 4 }
 0xc96   :  { %v12246_v9 = vpop.eup %12245 }
 0xc97   :  { %v12248_v44 = vpop.eup %12247  ;;  %v3339_v4 = vmul.f32 %v12246_v9, %v3323_v10 }
 0xc98   :  { %v3338_v22 = vmul.f32 %v12248_v44, %v3322_v28  ;;  %v3360_v28 = vld [vmem:[#allocation5 + $0x100] sm:$0xf0] }
 0xc99   :  { %v3349_v59 = vmul.f32 %v3346_v49, %v3339_v4  ;;  %v3938_v41 = vrot.slane %v3360_v28, 4  ;;  %v4466_v28 = vld [vmem:[#allocation5 + $0x168] sm:$0xf] }
 0xc9a   :  { %v3348_v40 = vmul.f32 %v3346_v49, %v3338_v22 }
 0xc9b   :  { %v13499_v26 = vadd.f32 %v3351_v55, %v3349_v59 }
 0xc9c   :  { %v13491_v62 = vadd.f32 %v3351_v55, %v3348_v40 }
 0xc9e   :  { %11828 = vmatmul.mubr.msk.f32.vlgmr.msra.gmra.mrb[36].mxu0 %vm51_vm1, %v13491_v62  ;;  %11832 = vmatmul.mubr.msk.f32.vlgmr.msra.gmra.mrb[36].mxu1 %vm51_vm1, %v13491_v62 }
 0xc9f   :  { %11835 = vmatpush1.msk.msra.mxu0 %vm58_vm0, %v3567_v46  ;;  %3475 = vmatprep.mubr.f32.mxu0 %v15297_v5 }
 0xca0   :  { %3552 = vmatprep.mubr.f32.mxu1 %v15297_v5  ;;  %11839 = vmatpush1.msk.msra.mxu1 %vm58_vm0, %v3569_v7  ;;  %v4097_v7 = vld [vmem:[#allocation5 + $0x148] sm:$0xf] }
 0xca1   :  { %3784 = vmatprep.subr.mxu0 %v3777_v12  ;;  %3859 = vmatprep.subr.mxu1 %v3779_v18 }
 0xca2   :  { %11829 = vmatmul.mubr.msk.f32.gmra.mrb[38].mxu0 %vm51_vm1, %v13499_v26  ;;  %11833 = vmatmul.mubr.msk.f32.gmra.mrb[38].mxu1 %vm51_vm1, %v13499_v26 }
 0xca3   :  { %3674 = vmatprep.mubr.f32.mxu0 %v15297_v5  ;;  %3751 = vmatprep.mubr.f32.mxu1 %v15297_v5 }
 0xca6   :  { %11836 = vmatmul.mubr.msk.f32.vlgmr.msra.gmra.mrb[40].mxu0 %vm51_vm1, %v13491_v62  ;;  %11840 = vmatmul.mubr.msk.f32.vlgmr.msra.gmra.mrb[40].mxu1 %vm51_vm1, %v13491_v62 }
 0xca7   :  { %3680 = vmatprep.mubr.f32.mxu0 %v15297_v5  ;;  %3757 = vmatprep.mubr.f32.mxu1 %v15297_v5 }
 0xca8   :  { %3785 = vmatpush1.xpose.msra.mxu0 %v3776_v53  ;;  %3860 = vmatpush1.xpose.msra.mxu1 %v3778_v47 }
 0xca9   :  { %3946 = vmatprep.subr.mxu0 %v3939_v34  ;;  %4021 = vmatprep.subr.mxu1 %v3941_v16 }
 0xcaa   :  { %11837 = vmatmul.mubr.msk.f32.gmra.mrb[42].mxu0 %vm51_vm1, %v13499_v26  ;;  %11841 = vmatmul.mubr.msk.f32.gmra.mrb[42].mxu1 %vm51_vm1, %v13499_v26 }
 0xd71   :  { %v3471_v32 = vpop.f32.mrb[36].mxu0  ;;  %v3548_v13 = vpop.f32.mrb[36].mxu1 }
 0xd72   :  { %v3473_v23 = vpop.f32.mrb[37].mxu0  ;;  %v3550_v58 = vpop.f32.mrb[37].mxu1  ;;  %v3472_v53 = vadd.f32 %v3471_v32, %v3370_v42  ;;  %v3549_v25 = vadd.f32 %v3548_v13, %v3378_v54 }
 0xd73   :  { %v3474_v60 = vadd.f32 %v3473_v23, %v3374_v30  ;;  %v3551_v40 = vadd.f32 %v3550_v58, %v3382_v57  ;;  %v4096_v58 = vld [vmem:[#allocation5 + $0x140] sm:$0xf] }
 0xd74   :  { %v3559_v16 = vmax.f32 %v3472_v53, 0.0  ;;  %v3561_v23 = vmax.f32 %v3549_v25, 0.0 }
 0xd75   :  { %v13519_v1 = vpop.f32.mrb[38].mxu0  ;;  %v13521_v36 = vpop.f32.mrb[38].mxu1  ;;  %v3560_v47 = vmax.f32 %v3474_v60, 0.0  ;;  %v3562_v37 = vmax.f32 %v3551_v40, 0.0 }
 0xd76   :  { %v3479_v24 = vpop.f32.mrb[39].mxu0  ;;  %v3556_v56 = vpop.f32.mrb[39].mxu1  ;;  %v3478_v32 = vadd.f32 %v13519_v1, %v3370_v42  ;;  %v3555_v13 = vadd.f32 %v13521_v36, %v3378_v54  ;;  %v4101_v1 = vld [vmem:[#allocation5 + $0x148] sm:$0xf0]  ;;  %v4100_v36 = vld [vmem:[#allocation5 + $0x140] sm:$0xf0] }
 0xd77   :  { %v3480_v34 = vadd.f32 %v3479_v24, %v3374_v30  ;;  %v3557_v35 = vadd.f32 %v3556_v56, %v3382_v57 }
 0xd78   :  { %v3563_v24 = vmax.f32 %v3478_v32, 0.0  ;;  %v3565_v56 = vmax.f32 %v3555_v13, 0.0  ;;  %v4465_v32 = vld [vmem:[#allocation5 + $0x160] sm:$0xf] }
 0xd79   :  { %v3676_v20 = vpop.f32.mrb[40].mxu0  ;;  %v3753_v10 = vpop.f32.mrb[40].mxu1  ;;  %v3564_v17 = vmax.f32 %v3480_v34, 0.0 }
 0xd7a   :  { %v3677_v21 = vadd.f32 %v3676_v20, %v3581_v19  ;;  %v3754_v48 = vadd.f32 %v3753_v10, %v3589_v15  ;;  %v3678_v52 = vpop.f32.mrb[41].mxu0  ;;  %v3755_v45 = vpop.f32.mrb[41].mxu1  ;;  %v4102_v20 = vld [vmem:[#allocation5 + $0x150] sm:$0xf0] }
 0xd7b   :  { %v3679_v27 = vadd.f32 %v3678_v52, %v3585_v29  ;;  %v3756_v14 = vadd.f32 %v3755_v45, %v3593_v11  ;;  %v4307_v10 = vrot.slane %v4102_v20, 4  ;;  %v4470_v20 = vld [vmem:[#allocation5 + $0x168] sm:$0xf0] }
 0xd7c   :  { %v3764_v9 = vmax.f32 %v3677_v21, 0.0  ;;  %v3766_v44 = vmax.f32 %v3754_v48, 0.0  ;;  %v4468_v21 = vld [vmem:[#allocation5 + $0x178] sm:$0xf] }
 0xd7d   :  { %v3765_v31 = vmax.f32 %v3679_v27, 0.0  ;;  %v3767_v51 = vmax.f32 %v3756_v14, 0.0  ;;  %v3682_v8 = vpop.f32.mrb[42].mxu0  ;;  %v3759_v39 = vpop.f32.mrb[42].mxu1 }
 0xd7e   :  { %v3683_v49 = vadd.f32 %v3682_v8, %v3581_v19  ;;  %v3760_v22 = vadd.f32 %v3759_v39, %v3589_v15  ;;  %v3684_v4 = vpop.f32.mrb[43].mxu0  ;;  %v3761_v55 = vpop.f32.mrb[43].mxu1  ;;  %v3566_v19 = vmax.f32 %v3557_v35, 0.0  ;;  %v4306_v15 = vrot.slane %v4101_v1, 4 }
 0xd7f   :  { %v3685_v59 = vadd.f32 %v3684_v4, %v3585_v29  ;;  %v3762_v46 = vadd.f32 %v3761_v55, %v3593_v11  ;;  %3848 = vmatprep.mubr.f32.mxu0 %v3765_v31  ;;  %3923 = vmatprep.mubr.f32.mxu1 %v3767_v51  ;;  %v4305_v29 = vrot.slane %v4100_v36, 4  ;;  %v4103_v11 = vld [vmem:[#allocation5 + $0x158] sm:$0xf0] }
 0xd80   :  { %3849 = vmatmul.mubr.f32.vlgmr.msra.gmra.mrb[44].mxu0 %v3764_v9  ;;  %3924 = vmatmul.mubr.f32.vlgmr.msra.gmra.mrb[44].mxu1 %v3766_v44  ;;  %v3768_v18 = vmax.f32 %v3683_v49, 0.0  ;;  %v3770_v43 = vmax.f32 %v3760_v22, 0.0  ;;  %v4308_v30 = vrot.slane %v4103_v11, 4 }
 0xd81   :  { %v3769_v3 = vmax.f32 %v3685_v59, 0.0  ;;  %v3771_v12 = vmax.f32 %v3762_v46, 0.0  ;;  %3947 = vmatpush1.xpose.msra.mxu0 %v3938_v41  ;;  %4022 = vmatpush1.xpose.msra.mxu1 %v3940_v50  ;;  %v4105_v50 = vld [vmem:[#allocation5 + $0x1c0] ss:$8 sm:$0xf] }
 0xd82   :  { %11842 = vmatprep.subr.msk.mxu0 %vm58_vm0, %v4097_v7  ;;  %11846 = vmatprep.subr.msk.mxu1 %vm58_vm0, %v4099_v2  ;;  %v4110_v40 = vrot.slane %v4105_v50, %v12731_v33  ;;  %v4118_v59 = vrot.slane %v4105_v50, %v15298_v0  ;;  %v4114_v46 = vrot.slane %v4105_v50, %v15299_v61 }
 0xd83   :  { %3853 = vmatprep.mubr.f32.mxu0 %v3769_v3  ;;  %3928 = vmatprep.mubr.f32.mxu1 %v3771_v12  ;;  %v4122_v7 = vrot.slane %v4105_v50, %v15300_v38 }
 0xd84   :  { %3854 = vmatmul.mubr.f32.gmra.mrb[46].mxu0 %v3768_v18  ;;  %3929 = vmatmul.mubr.f32.gmra.mrb[46].mxu1 %v3770_v43 }
 0xd85   :  { %4010 = vmatprep.mubr.f32.mxu0 %v3560_v47  ;;  %4085 = vmatprep.mubr.f32.mxu1 %v3562_v37 }
 0xd88   :  { %4011 = vmatmul.mubr.f32.vlgmr.msra.gmra.mrb[48].mxu0 %v3559_v16  ;;  %4086 = vmatmul.mubr.f32.vlgmr.msra.gmra.mrb[48].mxu1 %v3561_v23 }
 0xd89   :  { %11843 = vmatpush1.msk.msra.mxu0 %vm58_vm0, %v4096_v58  ;;  %4015 = vmatprep.mubr.f32.mxu0 %v3564_v17 }
 0xd8a   :  { %4090 = vmatprep.mubr.f32.mxu1 %v3566_v19  ;;  %11847 = vmatpush1.msk.msra.mxu1 %vm58_vm0, %v4098_v63 }
 0xd8b   :  { %4313 = vmatprep.subr.mxu0 %v4306_v15  ;;  %4388 = vmatprep.subr.mxu1 %v4308_v30 }
 0xd8c   :  { %4016 = vmatmul.mubr.f32.gmra.mrb[50].mxu0 %v3563_v24  ;;  %4091 = vmatmul.mubr.f32.gmra.mrb[50].mxu1 %v3565_v56  ;;  %v4467_v56 = vld [vmem:[#allocation5 + $0x170] sm:$0xf] }
 0xd8d   :  { %4203 = vmatprep.mubr.f32.mxu0 %v15297_v5  ;;  %4280 = vmatprep.mubr.f32.mxu1 %v15297_v5 }
 0xd90   :  { %11844 = vmatmul.mubr.msk.f32.vlgmr.msra.gmra.mrb[52].mxu0 %vm51_vm1, %v13491_v62  ;;  %11848 = vmatmul.mubr.msk.f32.vlgmr.msra.gmra.mrb[52].mxu1 %vm51_vm1, %v13491_v62 }
 0xd91   :  { %4209 = vmatprep.mubr.f32.mxu0 %v15297_v5  ;;  %4286 = vmatprep.mubr.f32.mxu1 %v15297_v5 }
 0xd92   :  { %4314 = vmatpush1.xpose.msra.mxu0 %v4305_v29  ;;  %4389 = vmatpush1.xpose.msra.mxu1 %v4307_v10  ;;  %v4469_v10 = vld [vmem:[#allocation5 + $0x160] sm:$0xf0] }
 0xd93   :  { %11850 = vmatprep.subr.msk.mxu0 %vm58_vm0, %v4466_v28  ;;  %11854 = vmatprep.subr.msk.mxu1 %vm58_vm0, %v4468_v21  ;;  %v4675_v28 = vrot.slane %v4470_v20, 4  ;;  %v4674_v21 = vrot.slane %v4469_v10, 4 }
 0xd94   :  { %11845 = vmatmul.mubr.msk.f32.gmra.mrb[54].mxu0 %vm51_vm1, %v13499_v26  ;;  %11849 = vmatmul.mubr.msk.f32.gmra.mrb[54].mxu1 %vm51_vm1, %v13499_v26 }
 0xe53   :  { %v3850_v48 = vpop.f32.mrb[44].mxu0  ;;  %v3925_v52 = vpop.f32.mrb[44].mxu1 }
 0xe54   :  { %v3926_v45 = vadd.f32 %v3925_v52, %v3850_v48  ;;  %v3852_v6 = vpop.f32.mrb[45].mxu0  ;;  %v3927_v57 = vpop.f32.mrb[45].mxu1  ;;  %v4472_v48 = vld [vmem:[#allocation5 + $0x178] sm:$0xf0] }
 0xe55   :  { %v4677_v52 = vrot.slane %v4472_v48, 4  ;;  %v13573_v57 = vld [vmem:[#allocation2 + $0x10] sm:$0xf] }
 0xe57   :  { %v3855_v27 = vpop.f32.mrb[46].mxu0  ;;  %v3930_v14 = vpop.f32.mrb[46].mxu1 }
 0xe58   :  { %v3931_v42 = vadd.f32 %v3930_v14, %v3855_v27  ;;  %v3857_v54 = vpop.f32.mrb[47].mxu0  ;;  %v3932_v41 = vpop.f32.mrb[47].mxu1 }
 0xe5b   :  { %v4012_v60 = vpop.f32.mrb[48].mxu0  ;;  %v4087_v31 = vpop.f32.mrb[48].mxu1 }
 0xe5c   :  { %v4013_v51 = vadd.f32 %v4012_v60, %v3926_v45  ;;  %v4014_v8 = vpop.f32.mrb[49].mxu0  ;;  %v4089_v39 = vpop.f32.mrb[49].mxu1  ;;  %v4471_v45 = vld [vmem:[#allocation5 + $0x170] sm:$0xf0] }
 0xe5d   :  { %v4676_v6 = vrot.slane %v4471_v45, 4  ;;  %v4474_v60 = vld [vmem:[#allocation5 + $0x1e0] ss:$8 sm:$0xf]  ;;  %v11858_v45 = vld [vmem:[#allocation2 + $0x14] ss:$0 sm:$0xff] }
 0xe5e   :  { %v13551_v9 = vadd.f32 %v4087_v31, %v4013_v51 }
 0xe5f   :  { %v4017_v44 = vpop.f32.mrb[50].mxu0  ;;  %v4092_v49 = vpop.f32.mrb[50].mxu1 }
 0xe60   :  { %v4018_v22 = vadd.f32 %v4017_v44, %v3931_v42  ;;  %v4019_v4 = vpop.f32.mrb[51].mxu0  ;;  %v4094_v55 = vpop.f32.mrb[51].mxu1 }
 0xe61   :  { %v4483_v4 = vrot.slane %v4474_v60, %v15299_v61  ;;  %v4491_v55 = vrot.slane %v4474_v60, %v15300_v38 }
 0xe62   :  { %v13557_v2 = vadd.f32 %v4092_v49, %v4018_v22  ;;  %v4479_v49 = vrot.slane %v4474_v60, %v12731_v33  ;;  %v4487_v22 = vrot.slane %v4474_v60, %v15298_v0 }
 0xe63   :  { %v4205_v3 = vpop.f32.mrb[52].mxu0  ;;  %v4282_v12 = vpop.f32.mrb[52].mxu1 }
 0xe64   :  { %v4206_v53 = vadd.f32 %v4205_v3, %v4110_v40  ;;  %v4283_v25 = vadd.f32 %v4282_v12, %v4118_v59  ;;  %v4207_v18 = vpop.f32.mrb[53].mxu0  ;;  %v4284_v43 = vpop.f32.mrb[53].mxu1 }
 0xe65   :  { %v4208_v47 = vadd.f32 %v4207_v18, %v4114_v46  ;;  %v4285_v37 = vadd.f32 %v4284_v43, %v4122_v7 }
 0xe66   :  { %v4293_v13 = vmax.f32 %v4206_v53, 0.0  ;;  %v4295_v58 = vmax.f32 %v4283_v25, 0.0 }
 0xe67   :  { %v4294_v34 = vmax.f32 %v4208_v47, 0.0  ;;  %v4296_v35 = vmax.f32 %v4285_v37, 0.0  ;;  %v4211_v16 = vpop.f32.mrb[54].mxu0  ;;  %v4288_v23 = vpop.f32.mrb[54].mxu1 }
 0xe68   :  { %v4212_v17 = vadd.f32 %v4211_v16, %v4110_v40  ;;  %v4289_v63 = vadd.f32 %v4288_v23, %v4118_v59  ;;  %v4213_v19 = vpop.f32.mrb[55].mxu0  ;;  %v4290_v24 = vpop.f32.mrb[55].mxu1 }
 0xe69   :  { %v4214_v1 = vadd.f32 %v4213_v19, %v4114_v46  ;;  %v4291_v36 = vadd.f32 %v4290_v24, %v4122_v7  ;;  %4377 = vmatprep.mubr.f32.mxu0 %v4294_v34  ;;  %4452 = vmatprep.mubr.f32.mxu1 %v4296_v35 }
 0xe6a   :  { %4378 = vmatmul.mubr.f32.vlgmr.msra.gmra.mrb[56].mxu0 %v4293_v13  ;;  %4453 = vmatmul.mubr.f32.vlgmr.msra.gmra.mrb[56].mxu1 %v4295_v58  ;;  %v4297_v11 = vmax.f32 %v4212_v17, 0.0  ;;  %v4299_v30 = vmax.f32 %v4289_v63, 0.0 }
 0xe6b   :  { %v4298_v15 = vmax.f32 %v4214_v1, 0.0  ;;  %v4300_v29 = vmax.f32 %v4291_v36, 0.0  ;;  %11851 = vmatpush1.msk.msra.mxu0 %vm58_vm0, %v4465_v32  ;;  %11855 = vmatpush1.msk.msra.mxu1 %vm58_vm0, %v4467_v56  ;;  %v12537_v56 = vld [vmem:[%s15262_s0] sm:$0xff]  ;;  %v12538_v1 = vld [vmem:[%s15262_s0 + $0x8] sm:$0xff] }
 0xe6c   :  { %4682 = vmatprep.subr.mxu0 %v4675_v28  ;;  %4757 = vmatprep.subr.mxu1 %v4677_v52 }
 0xe6d   :  { %4382 = vmatprep.mubr.f32.mxu0 %v4298_v15  ;;  %4457 = vmatprep.mubr.f32.mxu1 %v4300_v29 }
 0xe6e   :  { %4383 = vmatmul.mubr.f32.gmra.mrb[58].mxu0 %v4297_v11  ;;  %4458 = vmatmul.mubr.f32.gmra.mrb[58].mxu1 %v4299_v30 }
 0xe6f   :  { %4572 = vmatprep.mubr.f32.mxu0 %v15297_v5  ;;  %4649 = vmatprep.mubr.f32.mxu1 %v15297_v5 }
 0xe72   :  { %11852 = vmatmul.mubr.msk.f32.vlgmr.msra.gmra.mrb[60].mxu0 %vm51_vm1, %v13491_v62  ;;  %11856 = vmatmul.mubr.msk.f32.vlgmr.msra.gmra.mrb[60].mxu1 %vm51_vm1, %v13491_v62 }
 0xe73   :  { %4578 = vmatprep.mubr.f32.mxu0 %v15297_v5  ;;  %4655 = vmatprep.mubr.f32.mxu1 %v15297_v5 }
 0xe74   :  { %4683 = vmatpush1.xpose.msra.mxu0 %v4674_v21  ;;  %4758 = vmatpush1.xpose.msra.mxu1 %v4676_v6 }
 0xe75   :  { %12026 = vmatprep.subr.msk.mxu0 %vm58_vm0, %v13573_v57 }
 0xe76   :  { %11853 = vmatmul.mubr.msk.f32.gmra.mrb[62].mxu0 %vm51_vm1, %v13499_v26  ;;  %11857 = vmatmul.mubr.msk.f32.gmra.mrb[62].mxu1 %vm51_vm1, %v13499_v26 }
 0xf3d   :  { %v4379_v27 = vpop.f32.mrb[56].mxu0  ;;  %v4454_v14 = vpop.f32.mrb[56].mxu1 }
 0xf3e   :  { %v4455_v42 = vadd.f32 %v4454_v14, %v4379_v27  ;;  %v4381_v54 = vpop.f32.mrb[57].mxu0  ;;  %v4456_v41 = vpop.f32.mrb[57].mxu1 }
 0xf3f   :  { %v4834_v41 = vld [vmem:[#allocation5 + $0x181] ss:$0 sm:$0xff] }
 0xf40   :  { %v4463_v31 = vadd.f32 %v4455_v42, %v13551_v9 }
 0xf41   :  { %v4384_v51 = vpop.f32.mrb[58].mxu0  ;;  %v4459_v8 = vpop.f32.mrb[58].mxu1 }
 0xf42   :  { %v4460_v39 = vadd.f32 %v4459_v8, %v4384_v51  ;;  %v4386_v50 = vpop.f32.mrb[59].mxu0  ;;  %v4461_v44 = vpop.f32.mrb[59].mxu1 }
 0xf44   :  { %v4464_v40 = vadd.f32 %v4460_v39, %v13557_v2 }
 0xf45   :  { %v4574_v59 = vpop.f32.mrb[60].mxu0  ;;  %v4651_v46 = vpop.f32.mrb[60].mxu1 }
 0xf46   :  { %v4575_v7 = vadd.f32 %v4574_v59, %v4479_v49  ;;  %v4652_v3 = vadd.f32 %v4651_v46, %v4487_v22  ;;  %v4576_v9 = vpop.f32.mrb[61].mxu0  ;;  %v4653_v12 = vpop.f32.mrb[61].mxu1 }
 0xf47   :  { %v4577_v53 = vadd.f32 %v4576_v9, %v4483_v4  ;;  %v4654_v25 = vadd.f32 %v4653_v12, %v4491_v55 }
 0xf48   :  { %v4662_v34 = vmax.f32 %v4575_v7, 0.0  ;;  %v4664_v35 = vmax.f32 %v4652_v3, 0.0 }
 0xf49   :  { %v4663_v18 = vmax.f32 %v4577_v53, 0.0  ;;  %v4665_v43 = vmax.f32 %v4654_v25, 0.0  ;;  %v4580_v47 = vpop.f32.mrb[62].mxu0  ;;  %v4657_v37 = vpop.f32.mrb[62].mxu1 }
 0xf4a   :  { %v4581_v16 = vadd.f32 %v4580_v47, %v4479_v49  ;;  %v4658_v23 = vadd.f32 %v4657_v37, %v4487_v22  ;;  %v4582_v32 = vpop.f32.mrb[63].mxu0  ;;  %v4659_v13 = vpop.f32.mrb[63].mxu1 }
 0xf4b   :  { %v4583_v58 = vadd.f32 %v4582_v32, %v4483_v4  ;;  %v4660_v2 = vadd.f32 %v4659_v13, %v4491_v55  ;;  %4746 = vmatprep.mubr.f32.mxu0 %v4663_v18  ;;  %4821 = vmatprep.mubr.f32.mxu1 %v4665_v43 }
 0xf4c   :  { %4747 = vmatmul.mubr.f32.vlgmr.msra.gmra.mrb[64].mxu0 %v4662_v34  ;;  %4822 = vmatmul.mubr.f32.vlgmr.msra.gmra.mrb[64].mxu1 %v4664_v35  ;;  %v4666_v19 = vmax.f32 %v4581_v16, 0.0  ;;  %v4668_v24 = vmax.f32 %v4658_v23, 0.0 }
 0xf4d   :  { %v4667_v17 = vmax.f32 %v4583_v58, 0.0  ;;  %v4669_v63 = vmax.f32 %v4660_v2, 0.0  ;;  %12027 = vmatpush3.msk.msra.mxu0 %vm58_vm0, %v13573_v57 }
 0xf4f   :  { %4751 = vmatprep.mubr.f32.mxu0 %v4667_v17  ;;  %4826 = vmatprep.mubr.f32.mxu1 %v4669_v63 }
 0xf50   :  { %4752 = vmatmul.mubr.f32.gmra.mrb[66].mxu0 %v4666_v19  ;;  %4827 = vmatmul.mubr.f32.gmra.mrb[66].mxu1 %v4668_v24 }
 0xf51   :  { %12028 = vmatprep.mubr.msk.f32.mxu0 %vm51_vm1, %v12537_v56 }
 0xf54   :  { %12029 = vmatmul.mubr.msk.f32.vlgmr.msra.gmra.mrb[68].mxu0 %vm51_vm1, %v12538_v1 }
0x101f   :  { %v4748_v36 = vpop.f32.mrb[64].mxu0  ;;  %v4823_v15 = vpop.f32.mrb[64].mxu1 }
0x1020   :  { %v4824_v29 = vadd.f32 %v4823_v15, %v4748_v36  ;;  %v4750_v11 = vpop.f32.mrb[65].mxu0  ;;  %v4825_v30 = vpop.f32.mrb[65].mxu1 }
0x1022   :  { %v4832_v20 = vadd.f32 %v4824_v29, %v4463_v31 }
0x1023   :  { %v4753_v10 = vpop.f32.mrb[66].mxu0  ;;  %v4828_v28 = vpop.f32.mrb[66].mxu1 }
0x1024   :  { %v4829_v21 = vadd.f32 %v4828_v28, %v4753_v10  ;;  %v4755_v48 = vpop.f32.mrb[67].mxu0  ;;  %v4830_v52 = vpop.f32.mrb[67].mxu1  ;;  %v4835_v51 = vadd.f32 %v4834_v41, %v4832_v20 }
0x1026   :  { %v4833_v6 = vadd.f32 %v4829_v21, %v4464_v40  ;;  %v13606_v39 = vadd.f32 %v4835_v51, %v13491_v62 }
0x1027   :  { %v12030_v27 = vpop.f32.mrb[68].mxu0 }
0x1028   :  { %v4957_v14 = vadd.f32 %v12030_v27, %v11858_v45  ;;  %v4951_v42 = vpop.f32.mrb[69].mxu0  ;;  %v4836_v60 = vadd.f32 %v4834_v41, %v4833_v6  ;;  %v4839_v50 = vsel %vm51_vm1, %v13606_v39, 0.0 }
0x1029   :  { %v4952_v54 = vadd.f32 %v11858_v45, %v4951_v42 }
0x102a   :  { %5142 = vrot.lane.b32.xlu0 %v4957_v14, %s12621_s15  ;;  %v13601_v31 = vadd.f32 %v4836_v60, %v13499_v26  ;;  %v5011_v44 = vcombine.high %v4957_v14, %v4957_v14 }
0x102b   :  { %5140 = vrot.lane.b32.xlu1 %v4952_v54, %s12621_s15  ;;  %v4962_v49 = vcombine.high %v4952_v54, %v4952_v54 }
0x102c   :  { %v4842_v8 = vsel %vm51_vm1, %v13601_v31, 0.0 }
0x102e   :  { %5468 = vrot.lane.b32.xlu0 %v4957_v14, %s12620_s2 }
0x102f   :  { %5466 = vrot.lane.b32.xlu1 %v4952_v54, %s12620_s2 }
0x1032   :  { %5633 = vrot.lane.b32.xlu0 %v11858_v45, %s12622_s16 }
0x1033   :  { %5630 = vrot.lane.b32.xlu1 %v13573_v57, %s12622_s16  ;;  %v15301_v57 = vld [vmem:[#allocation11_spill] sm:$0xff] }
0x1034   :  { %v5018_v22 = vrot.slane %v4957_v14, %v15301_v57  ;;  %v5025_v4 = vrot.slane %v5011_v44, %v15301_v57  ;;  %v4969_v26 = vrot.slane %v4952_v54, %v15301_v57  ;;  %v4976_v55 = vrot.slane %v4962_v49, %v15301_v57 }
0x1036   :  { %v5026_v40 = vcombine.high %v5018_v22, %v5018_v22  ;;  %v5027_v59 = vcombine.high %v5025_v4, %v5025_v4  ;;  %v4977_v46 = vcombine.high %v4969_v26, %v4969_v26  ;;  %v4978_v7 = vcombine.high %v4976_v55, %v4976_v55 }
0x1037   :  { %v5034_v62 = vrot.slane %v5018_v22, %v15301_v57  ;;  %v5041_v3 = vrot.slane %v5025_v4, %v15301_v57  ;;  %v13619_v53 = vrot.slane %v4969_v26, %v15301_v57  ;;  %v13622_v25 = vrot.slane %v4976_v55, %v15301_v57 }
0x1038   :  { %v5048_v9 = vrot.slane %v5026_v40, %v15301_v57  ;;  %v5055_v12 = vrot.slane %v5027_v59, %v15301_v57  ;;  %v13625_v18 = vrot.slane %v4977_v46, %v15301_v57  ;;  %v13628_v43 = vrot.slane %v4978_v7, %v15301_v57 }
0x1039   :  { %v5056_v47 = vcombine.high %v5034_v62, %v5034_v62  ;;  %v5057_v37 = vcombine.high %v5041_v3, %v5041_v3  ;;  %v5007_v16 = vcombine.high %v13619_v53, %v13619_v53  ;;  %v5008_v23 = vcombine.high %v13622_v25, %v13622_v25 }
0x103a   :  { %v5058_v34 = vcombine.high %v5048_v9, %v5048_v9  ;;  %v5059_v35 = vcombine.high %v5055_v12, %v5055_v12  ;;  %v5009_v32 = vcombine.high %v13625_v18, %v13625_v18  ;;  %v5010_v13 = vcombine.high %v13628_v43, %v13628_v43 }
0x103b   :  { %v5095_v58 = vrot.slane %v5034_v62, %v12731_v33  ;;  %v5099_v2 = vrot.slane %v5048_v9, %v12731_v33  ;;  %v5103_v17 = vrot.slane %v5056_v47, %v12731_v33  ;;  %v5111_v63 = vrot.slane %v5041_v3, %v12731_v33 }
0x103c   :  { %v5107_v19 = vrot.slane %v5058_v34, %v12731_v33  ;;  %v5115_v24 = vrot.slane %v5055_v12, %v12731_v33  ;;  %v5119_v56 = vrot.slane %v5057_v37, %v12731_v33  ;;  %v5063_v1 = vrot.slane %v13619_v53, %v12731_v33 }
0x103d   :  { %v5123_v36 = vrot.slane %v5059_v35, %v12731_v33  ;;  %v5067_v15 = vrot.slane %v13625_v18, %v12731_v33  ;;  %v13651_v29 = vrot.slane %v5007_v16, %v12731_v33  ;;  %v5079_v11 = vrot.slane %v13622_v25, %v12731_v33 }
0x103e   :  { %v13656_v30 = vrot.slane %v5009_v32, %v12731_v33  ;;  %v5083_v20 = vrot.slane %v13628_v43, %v12731_v33  ;;  %v13661_v10 = vrot.slane %v5008_v23, %v12731_v33  ;;  %v13664_v28 = vrot.slane %v5010_v13, %v12731_v33 }
0x1051   :  { %4843 = vadd.xlane.f32.xlu0 %v4842_v8 }
0x1057   :  { %4840 = vadd.xlane.f32.xlu1 %v4839_v50 }
0x109c   :  { %v5143_v21 = vpop.permute.xlu0 %5142 }
0x109d   :  { %v13666_v48 = vmul.f32 %v5143_v21, %v5095_v58  ;;  %v13668_v52 = vmul.f32 %v5143_v21, %v5099_v2  ;;  %v13670_v45 = vmul.f32 %v5143_v21, %v5103_v17  ;;  %v13672_v6 = vmul.f32 %v5143_v21, %v5107_v19  ;;  %v13674_v27 = vpop.permute.xlu1 %5140 }
0x109e   :  { %v13676_v14 = vmul.f32 %v5143_v21, %v5111_v63  ;;  %v13678_v42 = vmul.f32 %v5143_v21, %v5115_v24  ;;  %v13680_v54 = vmul.f32 %v5143_v21, %v5119_v56  ;;  %v13682_v41 = vmul.f32 %v5143_v21, %v5123_v36 }
0x109f   :  { %v5218_v60 = vsel %vm51_vm1, %v13666_v48, -inf  ;;  %v5225_v51 = vsel %vm51_vm1, %v13668_v52, -inf  ;;  %v5232_v8 = vsel %vm51_vm1, %v13670_v45, -inf  ;;  %v5239_v50 = vsel %vm51_vm1, %v13672_v6, -inf }
0x10a0   :  { %v5219_v44 = vrot.slane %v5218_v60, 4  ;;  %v5226_v49 = vrot.slane %v5225_v51, 4  ;;  %v5233_v22 = vrot.slane %v5232_v8, 4  ;;  %v5240_v4 = vrot.slane %v5239_v50, 4 }
0x10a1   :  { %v5246_v26 = vsel %vm51_vm1, %v13676_v14, -inf  ;;  %v5253_v55 = vsel %vm51_vm1, %v13678_v42, -inf  ;;  %v5260_v40 = vsel %vm51_vm1, %v13680_v54, -inf  ;;  %v5267_v59 = vsel %vm51_vm1, %v13682_v41, -inf  ;;  %v13700_v46 = vpop.permute.xlu1 %5466 }
0x10a2   :  { %v5220_v7 = vmax.f32 %v5218_v60, %v5219_v44  ;;  %v5227_v62 = vmax.f32 %v5225_v51, %v5226_v49  ;;  %v5234_v3 = vmax.f32 %v5232_v8, %v5233_v22  ;;  %v5241_v9 = vmax.f32 %v5239_v50, %v5240_v4 }
0x10a3   :  { %v5247_v12 = vrot.slane %v5246_v26, 4  ;;  %v5254_v47 = vrot.slane %v5253_v55, 4  ;;  %v5261_v37 = vrot.slane %v5260_v40, 4  ;;  %v5268_v34 = vrot.slane %v5267_v59, 4 }
0x10a4   :  { %v5221_v35 = vrot.slane %v5220_v7, 2  ;;  %v5228_v16 = vrot.slane %v5227_v62, 2  ;;  %v5235_v23 = vrot.slane %v5234_v3, 2  ;;  %v5242_v32 = vrot.slane %v5241_v9, 2 }
0x10a5   :  { %v5248_v13 = vmax.f32 %v5246_v26, %v5247_v12  ;;  %v5255_v58 = vmax.f32 %v5253_v55, %v5254_v47  ;;  %v5262_v2 = vmax.f32 %v5260_v40, %v5261_v37  ;;  %v5269_v17 = vmax.f32 %v5267_v59, %v5268_v34  ;;  %v5631_v63 = vpop.permute.xlu1 %5630 }
0x10a6   :  { %v5222_v19 = vmax.f32 %v5220_v7, %v5221_v35  ;;  %v5229_v24 = vmax.f32 %v5227_v62, %v5228_v16  ;;  %v5236_v56 = vmax.f32 %v5234_v3, %v5235_v23  ;;  %v5243_v36 = vmax.f32 %v5241_v9, %v5242_v32  ;;  %12031 = vmatprep.subr.msk.mxu1 %vm58_vm0, %v5631_v63 }
0x10a7   :  { %v5249_v21 = vrot.slane %v5248_v13, 2  ;;  %v5256_v60 = vrot.slane %v5255_v58, 2  ;;  %v5263_v51 = vrot.slane %v5262_v2, 2  ;;  %v5270_v8 = vrot.slane %v5269_v17, 2  ;;  %12032 = vmatpush3.msk.msra.mxu1 %vm58_vm0, %v5631_v63 }
0x10a8   :  { %v5223_v50 = vrot.slane %v5222_v19, 1  ;;  %v5230_v44 = vrot.slane %v5229_v24, 1  ;;  %v5237_v49 = vrot.slane %v5236_v56, 1  ;;  %v5244_v22 = vrot.slane %v5243_v36, 1 }
0x10a9   :  { %v5250_v4 = vmax.f32 %v5248_v13, %v5249_v21  ;;  %v5257_v26 = vmax.f32 %v5255_v58, %v5256_v60  ;;  %v5264_v55 = vmax.f32 %v5262_v2, %v5263_v51  ;;  %v5271_v40 = vmax.f32 %v5269_v17, %v5270_v8 }
0x10aa   :  { %v5224_v59 = vmax.f32 %v5222_v19, %v5223_v50  ;;  %v5231_v7 = vmax.f32 %v5229_v24, %v5230_v44  ;;  %v5238_v62 = vmax.f32 %v5236_v56, %v5237_v49  ;;  %v5245_v3 = vmax.f32 %v5243_v36, %v5244_v22 }
0x10ab   :  { %v5251_v9 = vrot.slane %v5250_v4, 1  ;;  %v5258_v12 = vrot.slane %v5257_v26, 1  ;;  %v5265_v47 = vrot.slane %v5264_v55, 1  ;;  %v5272_v37 = vrot.slane %v5271_v40, 1 }
0x10ac   :  { %v5282_v34 = vsub.f32 %v13666_v48, %v5224_v59  ;;  %v5283_v35 = vsub.f32 %v13668_v52, %v5231_v7  ;;  %v5284_v16 = vsub.f32 %v13670_v45, %v5238_v62  ;;  %v5285_v23 = vsub.f32 %v13672_v6, %v5245_v3 }
0x10ad   :  { %v5252_v32 = vmax.f32 %v5250_v4, %v5251_v9  ;;  %v5259_v13 = vmax.f32 %v5257_v26, %v5258_v12  ;;  %v5266_v58 = vmax.f32 %v5264_v55, %v5265_v47  ;;  %v5273_v2 = vmax.f32 %v5271_v40, %v5272_v37 }
0x10ae   :  { %v5306_v17 = vmul.f32 1.442695, %v5282_v34  ;;  %v5308_v63 = vmul.f32 1.442695, %v5283_v35  ;;  %v5310_v19 = vmul.f32 1.442695, %v5284_v16  ;;  %v13712_v24 = vmul.f32 %v13674_v27, %v5063_v1 }
0x10af   :  { %v5286_v48 = vsub.f32 %v13676_v14, %v5252_v32  ;;  %v5287_v52 = vsub.f32 %v13678_v42, %v5259_v13  ;;  %v5288_v45 = vsub.f32 %v13680_v54, %v5266_v58  ;;  %v5289_v6 = vsub.f32 %v13682_v41, %v5273_v2 }
0x10b0   :  { %12249 = vpow2.f32 %v5306_v17  ;;  %v5312_v56 = vmul.f32 1.442695, %v5285_v23  ;;  %v13722_v36 = vmul.f32 %v13674_v27, %v5067_v15  ;;  %v13726_v53 = vmul.f32 %v13674_v27, %v13651_v29 }
0x10b1   :  { %12251 = vpow2.f32 %v5308_v63  ;;  %v5314_v1 = vmul.f32 1.442695, %v5286_v48  ;;  %v5316_v14 = vmul.f32 1.442695, %v5287_v52  ;;  %v5318_v42 = vmul.f32 1.442695, %v5288_v45 }
0x10b2   :  { %12253 = vpow2.f32 %v5310_v19  ;;  %v5320_v54 = vmul.f32 1.442695, %v5289_v6  ;;  %v13730_v41 = vmul.f32 %v13674_v27, %v13656_v30  ;;  %v13736_v18 = vmul.f32 %v13674_v27, %v5079_v11 }
0x10b3   :  { %12255 = vpow2.f32 %v5312_v56  ;;  %v13742_v15 = vmul.f32 %v13674_v27, %v5083_v20  ;;  %v13746_v29 = vmul.f32 %v13674_v27, %v13661_v10  ;;  %v13750_v30 = vmul.f32 %v13674_v27, %v13664_v28 }
0x10b4   :  { %12257 = vpow2.f32 %v5314_v1  ;;  %v5162_v25 = vsel %vm51_vm1, %v13712_v24, -inf  ;;  %v5169_v11 = vsel %vm51_vm1, %v13722_v36, -inf  ;;  %v5176_v43 = vsel %vm51_vm1, %v13726_v53, -inf }
0x10b5   :  { %12259 = vpow2.f32 %v5316_v14  ;;  %v5163_v20 = vrot.slane %v5162_v25, 4  ;;  %v5170_v21 = vrot.slane %v5169_v11, 4  ;;  %v5177_v60 = vrot.slane %v5176_v43, 4 }
0x10b6   :  { %12261 = vpow2.f32 %v5318_v42  ;;  %v5183_v10 = vsel %vm51_vm1, %v13730_v41, -inf  ;;  %v5190_v28 = vsel %vm51_vm1, %v13736_v18, -inf  ;;  %v5197_v27 = vsel %vm51_vm1, %v13742_v15, -inf }
0x10b7   :  { %12263 = vpow2.f32 %v5320_v54  ;;  %v5164_v51 = vmax.f32 %v5162_v25, %v5163_v20  ;;  %v5171_v8 = vmax.f32 %v5169_v11, %v5170_v21  ;;  %v5178_v50 = vmax.f32 %v5176_v43, %v5177_v60 }
0x10b8   :  { %v5184_v44 = vrot.slane %v5183_v10, 4  ;;  %v5191_v49 = vrot.slane %v5190_v28, 4  ;;  %v5198_v22 = vrot.slane %v5197_v27, 4  ;;  %v13766_v4 = vsel %vm51_vm1, %v13746_v29, -inf }
0x10b9   :  { %v5165_v26 = vrot.slane %v5164_v51, 2  ;;  %v5172_v55 = vrot.slane %v5171_v8, 2  ;;  %v5179_v40 = vrot.slane %v5178_v50, 2  ;;  %v5205_v59 = vrot.slane %v13766_v4, 4 }
0x10ba   :  { %v13769_v7 = vpop.eup %12249  ;;  %v5185_v62 = vmax.f32 %v5183_v10, %v5184_v44  ;;  %v5192_v3 = vmax.f32 %v5190_v28, %v5191_v49  ;;  %v5199_v9 = vmax.f32 %v5197_v27, %v5198_v22  ;;  %v5211_v12 = vsel %vm51_vm1, %v13750_v30, -inf }
0x10bb   :  { %v13773_v47 = vpop.eup %12251  ;;  %v5378_v37 = vsel %vm51_vm1, %v13769_v7, 0.0  ;;  %v5166_v34 = vmax.f32 %v5164_v51, %v5165_v26  ;;  %v5173_v35 = vmax.f32 %v5171_v8, %v5172_v55  ;;  %v5180_v16 = vmax.f32 %v5178_v50, %v5179_v40 }
0x10bc   :  { %v13777_v23 = vpop.eup %12253  ;;  %v5379_v32 = vrot.slane %v5378_v37, 4  ;;  %v5385_v13 = vsel %vm51_vm1, %v13773_v47, 0.0  ;;  %v5186_v58 = vrot.slane %v5185_v62, 2  ;;  %v5193_v2 = vrot.slane %v5192_v3, 2 }
0x10bd   :  { %v13781_v17 = vpop.eup %12255  ;;  %v5386_v63 = vrot.slane %v5385_v13, 4  ;;  %v5392_v19 = vsel %vm51_vm1, %v13777_v23, 0.0  ;;  %v5167_v48 = vrot.slane %v5166_v34, 1  ;;  %v5174_v52 = vrot.slane %v5173_v35, 1 }
0x10be   :  { %v13785_v45 = vpop.eup %12257  ;;  %v13787_v6 = vadd.f32 %v5379_v32, %v5378_v37  ;;  %v5393_v56 = vrot.slane %v5392_v19, 4  ;;  %v5399_v1 = vsel %vm51_vm1, %v13781_v17, 0.0  ;;  %v5181_v14 = vrot.slane %v5180_v16, 1 }
0x10bf   :  { %v13791_v42 = vpop.eup %12259  ;;  %v13793_v54 = vadd.f32 %v5386_v63, %v5385_v13  ;;  %v5400_v25 = vrot.slane %v5399_v1, 4  ;;  %v5406_v11 = vsel %vm51_vm1, %v13785_v45, 0.0  ;;  %v5168_v43 = vmax.f32 %v5166_v34, %v5167_v48 }
0x10c0   :  { %v13797_v20 = vpop.eup %12261  ;;  %v5381_v21 = vrot.slane %v13787_v6, 2  ;;  %v13800_v60 = vadd.f32 %v5393_v56, %v5392_v19  ;;  %v5407_v10 = vrot.slane %v5406_v11, 4  ;;  %v5413_v28 = vsel %vm51_vm1, %v13791_v42, 0.0 }
0x10c1   :  { %v13804_v27 = vpop.eup %12263  ;;  %v5388_v51 = vrot.slane %v13793_v54, 2  ;;  %v5401_v8 = vadd.f32 %v5400_v25, %v5399_v1  ;;  %v5414_v50 = vrot.slane %v5413_v28, 4  ;;  %v5420_v44 = vsel %vm51_vm1, %v13797_v20, 0.0 }
0x10c2   :  { %v5395_v49 = vrot.slane %v13800_v60, 2  ;;  %v5408_v22 = vadd.f32 %v5407_v10, %v5406_v11  ;;  %v5421_v26 = vrot.slane %v5420_v44, 4  ;;  %v5427_v55 = vsel %vm51_vm1, %v13804_v27, 0.0 }
0x10c3   :  { %v5402_v40 = vrot.slane %v5401_v8, 2  ;;  %v5415_v37 = vadd.f32 %v5414_v50, %v5413_v28  ;;  %v5428_v34 = vrot.slane %v5427_v55, 4  ;;  %v5175_v32 = vmax.f32 %v5173_v35, %v5174_v52 }
0x10c4   :  { %v5409_v13 = vrot.slane %v5408_v22, 2  ;;  %v5422_v63 = vadd.f32 %v5421_v26, %v5420_v44  ;;  %v5182_v19 = vmax.f32 %v5180_v16, %v5181_v14  ;;  %v5187_v48 = vmax.f32 %v5185_v62, %v5186_v58 }
0x10c5   :  { %v5416_v56 = vrot.slane %v5415_v37, 2  ;;  %v5429_v1 = vadd.f32 %v5428_v34, %v5427_v55  ;;  %v5194_v25 = vmax.f32 %v5192_v3, %v5193_v2  ;;  %v5200_v38 = vrot.slane %v5199_v9, 2 }
0x10c6   :  { %v5423_v61 = vrot.slane %v5422_v63, 2  ;;  %v5188_v0 = vrot.slane %v5187_v48, 1  ;;  %v5206_v11 = vmax.f32 %v13766_v4, %v5205_v59  ;;  %v5212_v10 = vrot.slane %v5211_v12, 4 }
0x10c7   :  { %v5430_v33 = vrot.slane %v5429_v1, 2  ;;  %v5195_v57 = vrot.slane %v5194_v25, 1  ;;  %v5201_v5 = vmax.f32 %v5199_v9, %v5200_v38  ;;  %v5274_v28 = vsub.f32 %v13712_v24, %v5168_v43 }
0x10c8   :  { %v5189_v50 = vmax.f32 %v5187_v48, %v5188_v0  ;;  %v5207_v35 = vrot.slane %v5206_v11, 2  ;;  %v5213_v52 = vmax.f32 %v5211_v12, %v5212_v10  ;;  %v5275_v16 = vsub.f32 %v13722_v36, %v5175_v32 }
0x10c9   :  { %v5196_v62 = vmax.f32 %v5194_v25, %v5195_v57  ;;  %v5202_v58 = vrot.slane %v5201_v5, 1  ;;  %v5276_v3 = vsub.f32 %v13726_v53, %v5182_v19  ;;  %v5290_v2 = vmul.f32 1.442695, %v5274_v28 }
0x10ca   :  { %v5208_v14 = vmax.f32 %v5206_v11, %v5207_v35  ;;  %v5214_v44 = vrot.slane %v5213_v52, 2  ;;  %v5277_v4 = vsub.f32 %v13730_v41, %v5189_v50  ;;  %v5292_v59 = vmul.f32 1.442695, %v5275_v16 }
0x10cb   :  { %v5203_v26 = vmax.f32 %v5201_v5, %v5202_v58  ;;  %v5278_v38 = vsub.f32 %v13736_v18, %v5196_v62  ;;  %12265 = vpow2.f32 %v5290_v2  ;;  %v5294_v24 = vmul.f32 1.442695, %v5276_v3 }
0x10cc   :  { %v5209_v0 = vrot.slane %v5208_v14, 1  ;;  %v5215_v9 = vmax.f32 %v5213_v52, %v5214_v44  ;;  %12267 = vpow2.f32 %v5292_v59  ;;  %v5296_v12 = vmul.f32 1.442695, %v5277_v4 }
0x10cd   :  { %v5279_v57 = vsub.f32 %v13742_v15, %v5203_v26  ;;  %12269 = vpow2.f32 %v5294_v24  ;;  %v5298_v36 = vmul.f32 1.442695, %v5278_v38  ;;  %v5382_v53 = vadd.f32 %v5381_v21, %v13787_v6 }
0x10ce   :  { %v5210_v43 = vmax.f32 %v5208_v14, %v5209_v0  ;;  %v5216_v55 = vrot.slane %v5215_v9, 1  ;;  %12271 = vpow2.f32 %v5296_v12  ;;  %v5389_v41 = vadd.f32 %v5388_v51, %v13793_v54 }
0x10cf   :  { %12273 = vpow2.f32 %v5298_v36  ;;  %v5300_v5 = vmul.f32 1.442695, %v5279_v57  ;;  %v5383_v18 = vrot.slane %v5382_v53, 1  ;;  %v5396_v34 = vadd.f32 %v5395_v49, %v13800_v60 }
0x10d0   :  { %v5217_v32 = vmax.f32 %v5215_v9, %v5216_v55  ;;  %v5280_v19 = vsub.f32 %v13746_v29, %v5210_v43  ;;  %v5390_v48 = vrot.slane %v5389_v41, 1  ;;  %v5403_v25 = vadd.f32 %v5402_v40, %v5401_v8 }
0x10d1   :  { %v5384_v15 = vadd.f32 %v5383_v18, %v5382_v53  ;;  %v5397_v11 = vrot.slane %v5396_v34, 1  ;;  %v5410_v10 = vadd.f32 %v5409_v13, %v5408_v22  ;;  %12275 = vpow2.f32 %v5300_v5 }
0x10d2   :  { %v5302_v6 = vmul.f32 1.442695, %v5280_v19  ;;  %v5404_v21 = vrot.slane %v5403_v25, 1  ;;  %v5417_v50 = vadd.f32 %v5416_v56, %v5415_v37  ;;  %v5424_v35 = vadd.f32 %v5423_v61, %v5422_v63 }
0x10d3   :  { %v5411_v28 = vrot.slane %v5410_v10, 1  ;;  %v5281_v54 = vsub.f32 %v13750_v30, %v5217_v32  ;;  %v5391_v51 = vadd.f32 %v5390_v48, %v5389_v41  ;;  %v5431_v52 = vadd.f32 %v5430_v33, %v5429_v1 }
0x10d4   :  { %12277 = vpow2.f32 %v5302_v6  ;;  %v5398_v49 = vadd.f32 %v5397_v11, %v5396_v34  ;;  %v5418_v29 = vrot.slane %v5417_v50, 1  ;;  %v5425_v16 = vrot.slane %v5424_v35, 1  ;;  %v5469_v6 = vpop.permute.xlu0 %5468 }
0x10d5   :  { %v13824_v60 = vpop.eup %12265  ;;  %12279 = vrcp.f32 %v5384_v15  ;;  %v5405_v40 = vadd.f32 %v5404_v21, %v5403_v25  ;;  %v5412_v13 = vadd.f32 %v5411_v28, %v5410_v10  ;;  %v5432_v37 = vrot.slane %v5431_v52, 1 }
0x10d6   :  { %v13826_v8 = vpop.eup %12267  ;;  %v5322_v22 = vsel %vm51_vm1, %v13824_v60, 0.0  ;;  %v5419_v63 = vadd.f32 %v5418_v29, %v5417_v50  ;;  %v5426_v56 = vadd.f32 %v5425_v16, %v5424_v35  ;;  %12281 = vrcp.f32 %v5391_v51 }
0x10d7   :  { %v13830_v61 = vpop.eup %12269  ;;  %v5323_v30 = vrot.slane %v5322_v22, 4  ;;  %v5329_v33 = vsel %vm51_vm1, %v13826_v8, 0.0  ;;  %v5433_v3 = vadd.f32 %v5432_v37, %v5431_v52  ;;  %12283 = vrcp.f32 %v5398_v49 }
0x10d8   :  { %v13834_v1 = vpop.eup %12271  ;;  %v5330_v62 = vrot.slane %v5329_v33, 4  ;;  %v5336_v58 = vsel %vm51_vm1, %v13830_v61, 0.0  ;;  %12285 = vrcp.f32 %v5405_v40  ;;  %v5304_v32 = vmul.f32 1.442695, %v5281_v54 }
0x10d9   :  { %v13838_v2 = vpop.eup %12273  ;;  %v5324_v14 = vadd.f32 %v5323_v30, %v5322_v22  ;;  %v5337_v44 = vrot.slane %v5336_v58, 4  ;;  %v5343_v4 = vsel %vm51_vm1, %v13834_v1, 0.0  ;;  %12287 = vrcp.f32 %v5412_v13 }
0x10da   :  { %v5331_v59 = vadd.f32 %v5330_v62, %v5329_v33  ;;  %v5344_v26 = vrot.slane %v5343_v4, 4  ;;  %v5350_v38 = vsel %vm51_vm1, %v13838_v2, 0.0  ;;  %12289 = vrcp.f32 %v5419_v63 }
0x10db   :  { %v5325_v24 = vrot.slane %v5324_v14, 2  ;;  %v5338_v0 = vadd.f32 %v5337_v44, %v5336_v58  ;;  %v5351_v9 = vrot.slane %v5350_v38, 4  ;;  %v13844_v12 = vpop.eup %12275  ;;  %12291 = vrcp.f32 %v5426_v56 }
0x10dc   :  { %v5332_v57 = vrot.slane %v5331_v59, 2  ;;  %v5345_v36 = vadd.f32 %v5344_v26, %v5343_v4  ;;  %v5357_v48 = vsel %vm51_vm1, %v13844_v12, 0.0  ;;  %12293 = vrcp.f32 %v5433_v3 }
0x10dd   :  { %v5339_v53 = vrot.slane %v5338_v0, 2  ;;  %v5352_v43 = vadd.f32 %v5351_v9, %v5350_v38  ;;  %v5326_v5 = vadd.f32 %v5325_v24, %v5324_v14  ;;  %12295 = vpow2.f32 %v5304_v32 }
0x10de   :  { %v13846_v55 = vpop.eup %12277  ;;  %v5346_v41 = vrot.slane %v5345_v36, 2  ;;  %v5333_v18 = vadd.f32 %v5332_v57, %v5331_v59  ;;  %v5358_v49 = vrot.slane %v5357_v48, 4 }
0x10df   :  { %v12280_v34 = vpop.eup %12279  ;;  %v5353_v19 = vrot.slane %v5352_v43, 2  ;;  %v5327_v15 = vrot.slane %v5326_v5, 1  ;;  %v5340_v10 = vadd.f32 %v5339_v53, %v5338_v0  ;;  %v5364_v44 = vsel %vm51_vm1, %v13846_v55, 0.0 }
0x10e0   :  { %v5451_v25 = vmul.f32 %v12280_v34, %v13769_v7  ;;  %v5334_v11 = vrot.slane %v5333_v18, 1  ;;  %v5347_v21 = vadd.f32 %v5346_v41, %v5345_v36  ;;  %v12282_v28 = vpop.eup %12281  ;;  %v5365_v57 = vrot.slane %v5364_v44, 4 }
0x10e1   :  { %v5328_v35 = vadd.f32 %v5327_v15, %v5326_v5  ;;  %v12284_v52 = vpop.eup %12283  ;;  %v5453_v54 = vmul.f32 %v12282_v28, %v13773_v47  ;;  %v5354_v29 = vadd.f32 %v5353_v19, %v5352_v43  ;;  %v5341_v40 = vrot.slane %v5340_v10, 1 }
0x10e2   :  { %v5480_v50 = vmul.f32 %v5469_v6, %v5451_v25  ;;  %v5335_v51 = vadd.f32 %v5334_v11, %v5333_v18  ;;  %v12286_v16 = vpop.eup %12285  ;;  %v5455_v22 = vmul.f32 %v12284_v52, %v13777_v23  ;;  %v5348_v33 = vrot.slane %v5347_v21, 1 }
0x10e3   :  { %12297 = vrcp.f32 %v5328_v35  ;;  %v12288_v13 = vpop.eup %12287  ;;  %v5481_v37 = vmul.f32 %v5469_v6, %v5453_v54  ;;  %v5457_v58 = vmul.f32 %v12286_v16, %v13781_v17  ;;  %v5355_v14 = vrot.slane %v5354_v29, 1 }
0x10e4   :  { %v5544_v7 = vsel %vm51_vm1, %v5480_v50, 0.0  ;;  %v12290_v63 = vpop.eup %12289  ;;  %v5482_v56 = vmul.f32 %v5469_v6, %v5455_v22  ;;  %12299 = vrcp.f32 %v5335_v51  ;;  %v5459_v47 = vmul.f32 %v12288_v13, %v13785_v45 }
0x10e5   :  { %v5545_v30 = vrot.slane %v5544_v7, 4  ;;  %v12292_v62 = vpop.eup %12291  ;;  %v5551_v3 = vsel %vm51_vm1, %v5481_v37, 0.0  ;;  %v5359_v23 = vadd.f32 %v5358_v49, %v5357_v48  ;;  %v5342_v59 = vadd.f32 %v5341_v40, %v5340_v10 }
0x10e6   :  { %v12294_v26 = vpop.eup %12293  ;;  %v5349_v38 = vadd.f32 %v5348_v33, %v5347_v21  ;;  %v5461_v24 = vmul.f32 %v12290_v63, %v13791_v42  ;;  %v5463_v0 = vmul.f32 %v12292_v62, %v13797_v20  ;;  %v5552_v9 = vrot.slane %v5551_v3, 4 }
0x10e7   :  { %v5546_v4 = vadd.f32 %v5545_v30, %v5544_v7  ;;  %v5558_v17 = vsel %vm51_vm1, %v5482_v56, 0.0  ;;  %v5483_v45 = vmul.f32 %v5469_v6, %v5457_v58  ;;  %v5484_v36 = vmul.f32 %v5469_v6, %v5459_v47  ;;  %v13863_v18 = vpop.eup %12295 }
0x10e8   :  { %v5356_v53 = vadd.f32 %v5355_v14, %v5354_v29  ;;  %v5360_v43 = vrot.slane %v5359_v23, 2  ;;  %v5465_v41 = vmul.f32 %v12294_v26, %v13804_v27  ;;  %12301 = vrcp.f32 %v5342_v59 }
0x10e9   :  { %v5547_v5 = vrot.slane %v5546_v4, 2  ;;  %v5559_v34 = vrot.slane %v5558_v17, 4  ;;  %v5485_v19 = vmul.f32 %v5469_v6, %v5461_v24  ;;  %v13865_v42 = vmul.f32 %v5469_v6, %v5463_v0 }
0x10ea   :  { %v5553_v20 = vadd.f32 %v5552_v9, %v5551_v3  ;;  %12303 = vrcp.f32 %v5349_v38  ;;  %v5565_v48 = vsel %vm51_vm1, %v5483_v45, 0.0  ;;  %v5572_v25 = vsel %vm51_vm1, %v5484_v36, 0.0 }
0x10eb   :  { %12305 = vrcp.f32 %v5356_v53  ;;  %v13870_v27 = vmul.f32 %v5469_v6, %v5465_v41  ;;  %v5548_v10 = vadd.f32 %v5547_v5, %v5546_v4  ;;  %v5361_v21 = vadd.f32 %v5360_v43, %v5359_v23 }
0x10ec   :  { %v5366_v28 = vadd.f32 %v5365_v57, %v5364_v44  ;;  %v5560_v50 = vadd.f32 %v5559_v34, %v5558_v17  ;;  %v5371_v52 = vsel %vm51_vm1, %v13863_v18, 0.0  ;;  %v5566_v49 = vrot.slane %v5565_v48, 4 }
0x10ed   :  { %v12298_v32 = vpop.eup %12297  ;;  %v5362_v54 = vrot.slane %v5361_v21, 1  ;;  %v5372_v16 = vrot.slane %v5371_v52, 4  ;;  %v5579_v22 = vsel %vm51_vm1, %v5485_v19, 0.0  ;;  %v5549_v30 = vrot.slane %v5548_v10, 1 }
0x10ee   :  { %v5435_v15 = vmul.f32 %v12298_v32, %v13824_v60  ;;  %v12300_v11 = vpop.eup %12299  ;;  %v5367_v29 = vrot.slane %v5366_v28, 2  ;;  %v5554_v60 = vrot.slane %v5553_v20, 2  ;;  %v5561_v33 = vrot.slane %v5560_v50, 2 }
0x10ef   :  { %v5437_v35 = vmul.f32 %v12300_v11, %v13826_v8  ;;  %v5363_v13 = vadd.f32 %v5362_v54, %v5361_v21  ;;  %v5373_v8 = vadd.f32 %v5372_v16, %v5371_v52  ;;  %v5573_v63 = vrot.slane %v5572_v25, 4 }
0x10f0   :  { %v5472_v51 = vmul.f32 %v13700_v46, %v5435_v15  ;;  %v5368_v37 = vadd.f32 %v5367_v29, %v5366_v28  ;;  %v5567_v23 = vadd.f32 %v5566_v49, %v5565_v48  ;;  %v5580_v44 = vrot.slane %v5579_v22, 4 }
0x10f1   :  { %v5473_v6 = vmul.f32 %v13700_v46, %v5437_v35  ;;  %v5374_v14 = vrot.slane %v5373_v8, 2  ;;  %12307 = vrcp.f32 %v5363_v13  ;;  %v5555_v17 = vadd.f32 %v5554_v60, %v5553_v20 }
0x10f2   :  { %v5488_v7 = vsel %vm51_vm1, %v5472_v51, 0.0  ;;  %v12302_v62 = vpop.eup %12301  ;;  %v5369_v3 = vrot.slane %v5368_v37, 1  ;;  %v5574_v57 = vadd.f32 %v5573_v63, %v5572_v25  ;;  %v5562_v5 = vadd.f32 %v5561_v33, %v5560_v50 }
0x10f3   :  { %v5489_v40 = vrot.slane %v5488_v7, 4  ;;  %v5495_v56 = vsel %vm51_vm1, %v5473_v6, 0.0  ;;  %v5439_v4 = vmul.f32 %v12302_v62, %v13830_v61  ;;  %v5375_v0 = vadd.f32 %v5374_v14, %v5373_v8 }
0x10f4   :  { %v5496_v47 = vrot.slane %v5495_v56, 4  ;;  %v12304_v59 = vpop.eup %12303  ;;  %v5370_v24 = vadd.f32 %v5369_v3, %v5368_v37  ;;  %v5556_v15 = vrot.slane %v5555_v17, 1  ;;  %v5550_v50 = vadd.f32 %v5549_v30, %v5548_v10 }
0x10f5   :  { %v5490_v58 = vadd.f32 %v5489_v40, %v5488_v7  ;;  %v12306_v9 = vpop.eup %12305  ;;  %v5441_v45 = vmul.f32 %v12304_v59, %v13834_v1  ;;  %v5474_v36 = vmul.f32 %v13700_v46, %v5439_v4  ;;  %v5376_v41 = vrot.slane %v5375_v0, 1 }
0x10f6   :  { %v5497_v38 = vadd.f32 %v5496_v47, %v5495_v56  ;;  %v5443_v53 = vmul.f32 %v12306_v9, %v13838_v2  ;;  %12309 = vrcp.f32 %v5370_v24  ;;  %v5568_v1 = vrot.slane %v5567_v23, 2 }
0x10f7   :  { %v5491_v26 = vrot.slane %v5490_v58, 2  ;;  %v5475_v61 = vmul.f32 %v13700_v46, %v5441_v45  ;;  %v5502_v34 = vsel %vm51_vm1, %v5474_v36, 0.0  ;;  %v5377_v20 = vadd.f32 %v5376_v41, %v5375_v0 }
0x10f8   :  { %v5498_v43 = vrot.slane %v5497_v38, 2  ;;  %v5476_v19 = vmul.f32 %v13700_v46, %v5443_v53  ;;  %v5503_v48 = vrot.slane %v5502_v34, 4  ;;  %v5586_v2 = vsel %vm51_vm1, %v13865_v42, 0.0 }
0x10f9   :  { %v5492_v32 = vadd.f32 %v5491_v26, %v5490_v58  ;;  %v5509_v11 = vsel %vm51_vm1, %v5475_v61, 0.0  ;;  %12311 = vrcp.f32 %v5377_v20  ;;  %v5587_v49 = vrot.slane %v5586_v2, 4 }
0x10fa   :  { %v5499_v25 = vadd.f32 %v5498_v43, %v5497_v38  ;;  %v5504_v21 = vadd.f32 %v5503_v48, %v5502_v34  ;;  %v5510_v28 = vrot.slane %v5509_v11, 4  ;;  %v5516_v52 = vsel %vm51_vm1, %v5476_v19, 0.0 }
0x10fb   :  { %v5493_v35 = vrot.slane %v5492_v32, 1  ;;  %v5517_v16 = vrot.slane %v5516_v52, 4  ;;  %v5563_v60 = vrot.slane %v5562_v5, 1  ;;  %v12308_v6 = vpop.eup %12307  ;;  %v5569_v7 = vadd.f32 %v5568_v1, %v5567_v23 }
0x10fc   :  { %v5500_v51 = vrot.slane %v5499_v25, 1  ;;  %v5505_v54 = vrot.slane %v5504_v21, 2  ;;  %v5511_v29 = vadd.f32 %v5510_v28, %v5509_v11  ;;  %v5575_v40 = vrot.slane %v5574_v57, 2 }
0x10fd   :  { %v5581_v13 = vadd.f32 %v5580_v44, %v5579_v22  ;;  %v5593_v42 = vsel %vm51_vm1, %v13870_v27, 0.0  ;;  %v5445_v37 = vmul.f32 %v12308_v6, %v13844_v12  ;;  %v5518_v30 = vadd.f32 %v5517_v16, %v5516_v52 }
0x10fe   :  { %v5506_v8 = vadd.f32 %v5505_v54, %v5504_v21  ;;  %v5512_v10 = vrot.slane %v5511_v29, 2  ;;  %v5494_v33 = vadd.f32 %v5493_v35, %v5492_v32  ;;  %v5501_v63 = vadd.f32 %v5500_v51, %v5499_v25 }
0x10ff   :  { %v5557_v56 = vadd.f32 %v5556_v15, %v5555_v17  ;;  %v5588_v62 = vadd.f32 %v5587_v49, %v5586_v2  ;;  %v5477_v47 = vmul.f32 %v13700_v46, %v5445_v37  ;;  %v5519_v23 = vrot.slane %v5518_v30, 2 }
0x1100   :  { %v12310_v58 = vpop.eup %12309  ;;  %v5507_v3 = vrot.slane %v5506_v8, 1  ;;  %v5513_v14 = vadd.f32 %v5512_v10, %v5511_v29  ;;  %v5564_v44 = vadd.f32 %v5563_v60, %v5562_v5  ;;  %v5594_v4 = vrot.slane %v5593_v42, 4 }
0x1101   :  { %v5447_v22 = vmul.f32 %v12310_v58, %v13846_v55  ;;  %v5523_v27 = vsel %vm51_vm1, %v5477_v47, 0.0  ;;  %v5570_v12 = vrot.slane %v5569_v7, 1  ;;  %v5576_v59 = vadd.f32 %v5575_v40, %v5574_v57 }
0x1102   :  { %v5582_v26 = vrot.slane %v5581_v13, 2  ;;  %v5508_v24 = vadd.f32 %v5507_v3, %v5506_v8  ;;  %v5520_v0 = vadd.f32 %v5519_v23, %v5518_v30  ;;  %v5524_v9 = vrot.slane %v5523_v27, 4 }
0x1103   :  { %v5478_v38 = vmul.f32 %v13700_v46, %v5447_v22  ;;  %v12312_v17 = vpop.eup %12311  ;;  %v5514_v45 = vrot.slane %v5513_v14, 1  ;;  %v5616_v36 = vsel %vm793_vm2, %v5501_v63, %v5494_v33  ;;  %v5589_v53 = vrot.slane %v5588_v62, 2 }
0x1104   :  { %v5623_v43 = vsel %vm793_vm2, %v5557_v56, %v5550_v50  ;;  %v5449_v55 = vmul.f32 %v12312_v17, %v13863_v18  ;;  %v5525_v41 = vadd.f32 %v5524_v9, %v5523_v27  ;;  %v5595_v61 = vadd.f32 %v5594_v4, %v5593_v42 }
0x1105   :  { %v5530_v5 = vsel %vm51_vm1, %v5478_v38, 0.0  ;;  %v5571_v34 = vadd.f32 %v5570_v12, %v5569_v7  ;;  %v5583_v32 = vadd.f32 %v5582_v26, %v5581_v13  ;;  %v5521_v48 = vrot.slane %v5520_v0, 1  ;;  %v5634_v12 = vpop.permute.xlu0 %5633  ;;  %v4841_v26 = vpop.xlane.xlu1 %4840 }
0x1106   :  { %v5531_v57 = vrot.slane %v5530_v5, 4  ;;  %v5479_v19 = vmul.f32 %v13700_v46, %v5449_v55  ;;  %v5526_v20 = vrot.slane %v5525_v41, 2  ;;  %v5617_v25 = vsel %vm795_vm3, %v5508_v24, %v5616_v36 }
0x1107   :  { %v5515_v15 = vadd.f32 %v5514_v45, %v5513_v14  ;;  %v5577_v11 = vrot.slane %v5576_v59, 1  ;;  %v5624_v2 = vsel %vm795_vm3, %v5564_v44, %v5623_v43  ;;  %v5590_v28 = vadd.f32 %v5589_v53, %v5588_v62  ;;  %v12539_v43 = vld [vmem:[%s15262_s0 + $0x8] sm:$0xff] }
0x1108   :  { %v5532_v1 = vadd.f32 %v5531_v57, %v5530_v5  ;;  %v5527_v21 = vadd.f32 %v5526_v20, %v5525_v41  ;;  %v5537_v18 = vsel %vm51_vm1, %v5479_v19, 0.0  ;;  %v5596_v50 = vrot.slane %v5595_v61, 2  ;;  %v12540_v41 = vld [vmem:[%s15262_s0] sm:$0xff]  ;;  %v12541_v19 = vld [vmem:[#allocation2 + $0x30] ss:$0 sm:$0xff]  ;;  %s12629_s0 = smov 92  }
0x1109   :  { %v5538_v51 = vrot.slane %v5537_v18, 4  ;;  %v5618_v52 = vsel %vm797_vm4, %v5515_v15, %v5617_v25  ;;  %v5522_v49 = vadd.f32 %v5521_v48, %v5520_v0  ;;  %v5584_v54 = vrot.slane %v5583_v32, 1  ;;  %v13930_v48 = vld [vmem:[#allocation2 + $0x20] sm:$0xf] }
0x110a   :  { %v5533_v35 = vrot.slane %v5532_v1, 2  ;;  %v5528_v46 = vrot.slane %v5527_v21, 1  ;;  %v5625_v29 = vsel %vm797_vm4, %v5571_v34, %v5624_v2  ;;  %v5578_v6 = vadd.f32 %v5577_v11, %v5576_v59  ;;  %v4844_v59 = vpop.xlane.xlu0 %4843  ;;  %12041 = vmatprep.subr.msk.mxu1 %vm58_vm0, %v13930_v48  ;;  %12036 = vmatprep.subr.msk.mxu0 %vm58_vm0, %v13930_v48 }
0x110b   :  { %v5539_v60 = vadd.f32 %v5538_v51, %v5537_v18  ;;  %v5619_v7 = vsel %vm799_vm5, %v5522_v49, %v5618_v52  ;;  %v5591_v40 = vrot.slane %v5590_v28, 1  ;;  %v5597_v13 = vadd.f32 %v5596_v50, %v5595_v61  ;;  %12037 = vmatpush3.msk.msra.mxu0 %vm58_vm0, %v13930_v48 }
0x110c   :  { %v5534_v16 = vadd.f32 %v5533_v35, %v5532_v1  ;;  %v5529_v42 = vadd.f32 %v5528_v46, %v5527_v21  ;;  %v5626_v10 = vsel %vm799_vm5, %v5578_v6, %v5625_v29  ;;  %v5585_v30 = vadd.f32 %v5584_v54, %v5583_v32 }
0x110d   :  { %v5540_v8 = vrot.slane %v5539_v60, 2  ;;  %v5598_v62 = vrot.slane %v5597_v13, 1  ;;  %v5592_v3 = vadd.f32 %v5591_v40, %v5590_v28  ;;  %v4846_v38 = vmul.f32 0.25, %v4844_v59 }
0x110e   :  { %v5535_v37 = vrot.slane %v5534_v16, 1  ;;  %v5620_v63 = vsel %vm801_vm6, %v5529_v42, %v5619_v7  ;;  %v5627_v58 = vsel %vm801_vm6, %v5585_v30, %v5626_v10  ;;  %v4845_v24 = vmul.f32 0.25, %v4841_v26 }
0x110f   :  { %v5541_v33 = vadd.f32 %v5540_v8, %v5539_v60  ;;  %v5628_v22 = vsel %vm803_vm7, %v5592_v3, %v5627_v58  ;;  %v5599_v44 = vadd.f32 %v5598_v62, %v5597_v13  ;;  %v4848_v9 = vsub.f32 %v13601_v31, %v4846_v38  ;;  %v11865_v8 = vld [vmem:[#allocation2 + $0x30] ss:$0 sm:$0xff]  ;;  %v11866_v38 = vld [vmem:[#allocation2 + $0x24] ss:$0 sm:$0xff] }
0x1110   :  { %v5536_v56 = vadd.f32 %v5535_v37, %v5534_v16  ;;  %v4847_v36 = vsub.f32 %v13606_v39, %v4845_v24  ;;  %v15303_v30 = vmov 0.0  }
0x1111   :  { %v5542_v47 = vrot.slane %v5541_v33, 1  ;;  %v5629_v27 = vsel %vm805_vm8, %v5599_v44, %v5628_v22  ;;  %v4850_v57 = vmul.f32 %v4848_v9, %v4848_v9 }
0x1112   :  { %v5621_v14 = vsel %vm803_vm7, %v5536_v56, %v5620_v63  ;;  %v4849_v34 = vmul.f32 %v4847_v36, %v4847_v36 }
0x1113   :  { %v5543_v23 = vadd.f32 %v5542_v47, %v5541_v33  ;;  %v4854_v39 = vsel %vm51_vm1, %v4850_v57, 0.0  ;;  %v15304_v57 = vld [vmem:[#allocation11_spill] sm:$0xff] }
0x1114   :  { %v4851_v32 = vsel %vm51_vm1, %v4849_v34, 0.0 }
0x1115   :  { %v5622_v4 = vsel %vm805_vm8, %v5543_v23, %v5621_v14 }
0x1116   :  { %12033 = vmatprep.mubr.msk.f32.mxu1 %vm51_vm1, %v5622_v4 }
0x1117   :  { %12034 = vmatmul.mubr.msk.f32.vlgmr.msra.gmra.mrb[68].mxu1 %vm51_vm1, %v5629_v27 }
0x1118   :  { %12042 = vmatpush3.msk.msra.mxu1 %vm58_vm0, %v13930_v48 }
0x11ea   :  { %v12035_v0 = vpop.f32.mrb[68].mxu1 }
0x11eb   :  { %v5714_v17 = vadd.f32 %v12035_v0, %v5634_v12  ;;  %v5708_v45 = vpop.f32.mrb[69].mxu1 }
0x11ec   :  { %v5709_v53 = vadd.f32 %v5708_v45, %v5634_v12 }
0x11ed   :  { %v5718_v55 = vadd.f32 %v12539_v43, %v5714_v17 }
0x11ee   :  { %v5717_v5 = vadd.f32 %v12540_v41, %v5709_v53 }
0x11ef   :  { %v5723_v61 = vsel %vm51_vm1, %v5718_v55, 0.0 }
0x11f0   :  { %5724 = vadd.xlane.f32.xlu1 %v5723_v61  ;;  %v5720_v31 = vsel %vm51_vm1, %v5717_v5, 0.0 }
0x11f1   :  { %5721 = vadd.xlane.f32.xlu0 %v5720_v31 }
0x11f4   :  { %4855 = vadd.xlane.f32.xlu1 %v4854_v39 }
0x11f5   :  { %4852 = vadd.xlane.f32.xlu0 %v4851_v32 }
0x1205   :  { %4870 = vrot.lane.b32.xlu1 %v12541_v19, %s12627_s4 }
0x120b   :  { %4865 = vrot.lane.b32.xlu0 %v12541_v19, %s12628_s5 }
0x127d   :  { %v5725_v20 = vpop.xlane.xlu1 %5724 }
0x127e   :  { %v5727_v25 = vmul.f32 0.25, %v5725_v20  ;;  %v5722_v15 = vpop.xlane.xlu0 %5721 }
0x127f   :  { %v5726_v1 = vmul.f32 0.25, %v5722_v15 }
0x1280   :  { %v5729_v11 = vsub.f32 %v5718_v55, %v5727_v25 }
0x1281   :  { %v5728_v2 = vsub.f32 %v5717_v5, %v5726_v1  ;;  %v4856_v21 = vpop.xlane.xlu1 %4855 }
0x1282   :  { %v4858_v18 = vmul.f32 0.25, %v4856_v21  ;;  %v4853_v28 = vpop.xlane.xlu0 %4852  ;;  %v5731_v50 = vmul.f32 %v5729_v11, %v5729_v11 }
0x1283   :  { %v4857_v35 = vmul.f32 0.25, %v4853_v28  ;;  %v5730_v51 = vmul.f32 %v5728_v2, %v5728_v2 }
0x1284   :  { %v4860_v52 = vadd.f32 1e-05, %v4858_v18  ;;  %v5735_v49 = vsel %vm51_vm1, %v5731_v50, 0.0  ;;  %v15305_v18 = vld [vmem:[#allocation12_spill] sm:$0xff] }
0x1285   :  { %v4859_v46 = vadd.f32 1e-05, %v4857_v35  ;;  %5736 = vadd.xlane.f32.xlu0 %v5735_v49  ;;  %v5732_v54 = vsel %vm51_vm1, %v5730_v51, 0.0  ;;  %v4871_v13 = vpop.permute.xlu1 %4870 }
0x1286   :  { %12313 = vrsqrt.f32 %v4860_v52  ;;  %5733 = vadd.xlane.f32.xlu1 %v5732_v54  ;;  %v4866_v16 = vpop.permute.xlu0 %4865 }
0x1287   :  { %12315 = vrsqrt.f32 %v4859_v46 }
0x1290   :  { %v12314_v29 = vpop.eup %12313 }
0x1291   :  { %v12316_v60 = vpop.eup %12315  ;;  %v4864_v6 = vmul.f32 %v12314_v29, %v4848_v9 }
0x1292   :  { %v4863_v7 = vmul.f32 %v12316_v60, %v4847_v36 }
0x1293   :  { %v4869_v40 = vmul.f32 %v4866_v16, %v4864_v6 }
0x1294   :  { %v4868_v42 = vmul.f32 %v4866_v16, %v4863_v7 }
0x1295   :  { %v13944_v10 = vadd.f32 %v4871_v13, %v4869_v40 }
0x1296   :  { %v13942_v37 = vadd.f32 %v4871_v13, %v4868_v42 }
0x1297   :  { %15302 = vst [vmem:[#allocation16_spill] sm:$0xff] %v13944_v10  ;;  %5756 = vrot.lane.b32.xlu1 %v11865_v8, %s12629_s0 }
0x1298   :  { %12043 = vmatprep.mubr.msk.f32.mxu1 %vm51_vm1, %v13942_v37 }
0x1299   :  { %12044 = vmatmul.mubr.msk.f32.vlgmr.msra.gmra.mrb[70].mxu1 %vm51_vm1, %v13944_v10 }
0x129a   :  { %6850 = vmatprep.mubr.f32.mxu1 %v15303_v30 }
0x129b   :  { %5751 = vrot.lane.b32.xlu0 %v11865_v8, %s12630_s6 }
0x1312   :  { %v5737_v33 = vpop.xlane.xlu0 %5736 }
0x1313   :  { %v5739_v63 = vmul.f32 0.25, %v5737_v33  ;;  %v5734_v56 = vpop.xlane.xlu1 %5733 }
0x1314   :  { %v5738_v62 = vmul.f32 0.25, %v5734_v56 }
0x1315   :  { %v5741_v58 = vadd.f32 1e-05, %v5739_v63 }
0x1316   :  { %v5740_v47 = vadd.f32 1e-05, %v5738_v62  ;;  %v5752_v14 = vpop.permute.xlu0 %5751 }
0x1317   :  { %12317 = vrsqrt.f32 %v5741_v58  ;;  %v5757_v27 = vpop.permute.xlu1 %5756 }
0x1318   :  { %12319 = vrsqrt.f32 %v5740_v47 }
0x1321   :  { %v12318_v3 = vpop.eup %12317 }
0x1322   :  { %v12320_v23 = vpop.eup %12319  ;;  %v5745_v22 = vmul.f32 %v12318_v3, %v5729_v11 }
0x1323   :  { %v5744_v44 = vmul.f32 %v12320_v23, %v5728_v2 }
0x1324   :  { %v5755_v4 = vmul.f32 %v5752_v14, %v5745_v22 }
0x1325   :  { %v5754_v12 = vmul.f32 %v5752_v14, %v5744_v44 }
0x1326   :  { %v13953_v26 = vadd.f32 %v5757_v27, %v5755_v4 }
0x1327   :  { %v13951_v59 = vadd.f32 %v5757_v27, %v5754_v12 }
0x1329   :  { %12038 = vmatprep.mubr.msk.f32.mxu0 %vm51_vm1, %v13951_v59 }
0x132a   :  { %12039 = vmatmul.mubr.msk.f32.vlgmr.msra.gmra.mrb[70].mxu0 %vm51_vm1, %v13953_v26 }
0x136c   :  { %v12045_v24 = vpop.f32.mrb[70].mxu1 }
0x136d   :  { %v5930_v0 = vadd.f32 %v12045_v24, %v11866_v38  ;;  %v5924_v9 = vpop.f32.mrb[71].mxu1 }
0x136e   :  { %v5925_v17 = vadd.f32 %v11866_v38, %v5924_v9 }
0x136f   :  { %6117 = vrot.lane.b32.xlu0 %v5930_v0, %s12621_s15 }
0x1370   :  { %6115 = vrot.lane.b32.xlu1 %v5925_v17, %s12621_s15 }
0x1373   :  { %6443 = vrot.lane.b32.xlu0 %v5930_v0, %s12620_s2 }
0x1374   :  { %6441 = vrot.lane.b32.xlu1 %v5925_v17, %s12620_s2 }
0x1377   :  { %6608 = vrot.lane.b32.xlu0 %v11866_v38, %s12622_s16 }
0x1378   :  { %6605 = vrot.lane.b32.xlu1 %v13930_v48, %s12622_s16 }
0x13e1   :  { %v6118_v52 = vpop.permute.xlu0 %6117 }
0x13e2   :  { %v13966_v45 = vpop.permute.xlu1 %6115 }
0x13e6   :  { %v13968_v36 = vpop.permute.xlu1 %6441 }
0x13ea   :  { %v6606_v53 = vpop.permute.xlu1 %6605 }
0x13eb   :  { %12046 = vmatprep.subr.msk.mxu0 %vm58_vm0, %v6606_v53 }
0x13ec   :  { %12047 = vmatpush3.msk.msra.mxu0 %vm58_vm0, %v6606_v53 }
0x13fd   :  { %v12040_v43 = vpop.f32.mrb[70].mxu0 }
0x13fe   :  { %v5849_v55 = vadd.f32 %v12040_v43, %v11866_v38  ;;  %v5843_v41 = vpop.f32.mrb[71].mxu0 }
0x13ff   :  { %v5844_v5 = vadd.f32 %v11866_v38, %v5843_v41 }
0x1400   :  { %v5984_v61 = vcombine.high %v5849_v55, %v5849_v55  ;;  %v5991_v31 = vrot.slane %v5849_v55, %v15304_v57 }
0x1401   :  { %v5935_v34 = vcombine.high %v5844_v5, %v5844_v5  ;;  %v5942_v39 = vrot.slane %v5844_v5, %v15304_v57 }
0x1402   :  { %v5998_v32 = vrot.slane %v5984_v61, %v15304_v57  ;;  %v5999_v19 = vcombine.high %v5991_v31, %v5991_v31  ;;  %v6007_v48 = vrot.slane %v5991_v31, %v15304_v57 }
0x1403   :  { %v5949_v20 = vrot.slane %v5935_v34, %v15304_v57  ;;  %v5950_v25 = vcombine.high %v5942_v39, %v5942_v39  ;;  %v13978_v15 = vrot.slane %v5942_v39, %v15304_v57 }
0x1404   :  { %v6000_v1 = vcombine.high %v5998_v32, %v5998_v32  ;;  %v6014_v11 = vrot.slane %v5998_v32, %v15304_v57  ;;  %v6021_v2 = vrot.slane %v5999_v19, %v15304_v57  ;;  %v6029_v21 = vcombine.high %v6007_v48, %v6007_v48 }
0x1405   :  { %v6068_v28 = vrot.slane %v6007_v48, %v15305_v18  ;;  %v5951_v50 = vcombine.high %v5949_v20, %v5949_v20  ;;  %v13984_v35 = vrot.slane %v5949_v20, %v15304_v57  ;;  %v13987_v51 = vrot.slane %v5950_v25, %v15304_v57 }
0x1406   :  { %v6028_v49 = vrot.slane %v6000_v1, %v15304_v57  ;;  %v6030_v46 = vcombine.high %v6014_v11, %v6014_v11  ;;  %v6031_v54 = vcombine.high %v6021_v2, %v6021_v2  ;;  %v6072_v29 = vrot.slane %v6021_v2, %v15305_v18 }
0x1407   :  { %v6076_v16 = vrot.slane %v6029_v21, %v15305_v18  ;;  %v6084_v60 = vrot.slane %v6014_v11, %v15305_v18  ;;  %v13993_v6 = vmul.f32 %v6118_v52, %v6068_v28  ;;  %v13996_v7 = vrot.slane %v5951_v50, %v15304_v57 }
0x1408   :  { %v6032_v40 = vcombine.high %v6028_v49, %v6028_v49  ;;  %v6080_v13 = vrot.slane %v6031_v54, %v15305_v18  ;;  %v6088_v42 = vrot.slane %v6028_v49, %v15305_v18  ;;  %v6092_v8 = vrot.slane %v6030_v46, %v15305_v18 }
0x1409   :  { %v14001_v33 = vmul.f32 %v6118_v52, %v6072_v29  ;;  %v14003_v63 = vmul.f32 %v6118_v52, %v6076_v16  ;;  %v14005_v56 = vmul.f32 %v6118_v52, %v6084_v60  ;;  %v6193_v62 = vsel %vm51_vm1, %v13993_v6, -inf }
0x140a   :  { %v6096_v58 = vrot.slane %v6032_v40, %v15305_v18  ;;  %v14010_v47 = vmul.f32 %v6118_v52, %v6080_v13  ;;  %v14012_v3 = vmul.f32 %v6118_v52, %v6088_v42  ;;  %v14014_v14 = vmul.f32 %v6118_v52, %v6092_v8 }
0x140b   :  { %v6194_v23 = vrot.slane %v6193_v62, 4  ;;  %v6200_v22 = vsel %vm51_vm1, %v14001_v33, -inf  ;;  %v6207_v44 = vsel %vm51_vm1, %v14003_v63, -inf  ;;  %v6221_v4 = vsel %vm51_vm1, %v14005_v56, -inf }
0x140c   :  { %v14022_v27 = vmul.f32 %v6118_v52, %v6096_v58  ;;  %v6201_v12 = vrot.slane %v6200_v22, 4  ;;  %v6208_v38 = vrot.slane %v6207_v44, 4  ;;  %v6214_v24 = vsel %vm51_vm1, %v14010_v47, -inf }
0x140d   :  { %v6195_v0 = vmax.f32 %v6193_v62, %v6194_v23  ;;  %v6215_v9 = vrot.slane %v6214_v24, 4  ;;  %v6222_v17 = vrot.slane %v6221_v4, 4  ;;  %v6228_v53 = vsel %vm51_vm1, %v14012_v3, -inf }
0x140e   :  { %v6202_v43 = vmax.f32 %v6200_v22, %v6201_v12  ;;  %v6209_v55 = vmax.f32 %v6207_v44, %v6208_v38  ;;  %v6229_v41 = vrot.slane %v6228_v53, 4  ;;  %v6235_v5 = vsel %vm51_vm1, %v14014_v14, -inf }
0x140f   :  { %v6196_v61 = vrot.slane %v6195_v0, 2  ;;  %v6216_v31 = vmax.f32 %v6214_v24, %v6215_v9  ;;  %v6223_v34 = vmax.f32 %v6221_v4, %v6222_v17  ;;  %v6236_v39 = vrot.slane %v6235_v5, 4 }
0x1410   :  { %v6203_v32 = vrot.slane %v6202_v43, 2  ;;  %v6210_v19 = vrot.slane %v6209_v55, 2  ;;  %v6230_v48 = vmax.f32 %v6228_v53, %v6229_v41  ;;  %v6242_v20 = vsel %vm51_vm1, %v14022_v27, -inf }
0x1411   :  { %v6197_v25 = vmax.f32 %v6195_v0, %v6196_v61  ;;  %v6217_v1 = vrot.slane %v6216_v31, 2  ;;  %v6224_v11 = vrot.slane %v6223_v34, 2  ;;  %v6237_v2 = vmax.f32 %v6235_v5, %v6236_v39 }
0x1412   :  { %v6204_v21 = vmax.f32 %v6202_v43, %v6203_v32  ;;  %v6211_v28 = vmax.f32 %v6209_v55, %v6210_v19  ;;  %v6231_v50 = vrot.slane %v6230_v48, 2  ;;  %v6243_v52 = vrot.slane %v6242_v20, 4 }
0x1413   :  { %v6198_v49 = vrot.slane %v6197_v25, 1  ;;  %v6218_v46 = vmax.f32 %v6216_v31, %v6217_v1  ;;  %v6225_v54 = vmax.f32 %v6223_v34, %v6224_v11  ;;  %v6238_v29 = vrot.slane %v6237_v2, 2 }
0x1414   :  { %v6205_v16 = vrot.slane %v6204_v21, 1  ;;  %v6212_v60 = vrot.slane %v6211_v28, 1  ;;  %v6232_v40 = vmax.f32 %v6230_v48, %v6231_v50  ;;  %v6244_v13 = vmax.f32 %v6242_v20, %v6243_v52 }
0x1415   :  { %v6199_v42 = vmax.f32 %v6197_v25, %v6198_v49  ;;  %v6219_v8 = vrot.slane %v6218_v46, 1  ;;  %v6226_v62 = vrot.slane %v6225_v54, 1  ;;  %v6239_v58 = vmax.f32 %v6237_v2, %v6238_v29 }
0x1416   :  { %v6206_v23 = vmax.f32 %v6204_v21, %v6205_v16  ;;  %v6213_v22 = vmax.f32 %v6211_v28, %v6212_v60  ;;  %v6233_v44 = vrot.slane %v6232_v40, 1  ;;  %v6245_v4 = vrot.slane %v6244_v13, 2 }
0x1417   :  { %v6220_v12 = vmax.f32 %v6218_v46, %v6219_v8  ;;  %v6227_v38 = vmax.f32 %v6225_v54, %v6226_v62  ;;  %v6240_v24 = vrot.slane %v6239_v58, 1  ;;  %v6257_v0 = vsub.f32 %v13993_v6, %v6199_v42 }
0x1418   :  { %v6234_v9 = vmax.f32 %v6232_v40, %v6233_v44  ;;  %v6246_v17 = vmax.f32 %v6244_v13, %v6245_v4  ;;  %v6258_v53 = vsub.f32 %v14001_v33, %v6206_v23  ;;  %v6259_v43 = vsub.f32 %v14003_v63, %v6213_v22 }
0x1419   :  { %v6241_v55 = vmax.f32 %v6239_v58, %v6240_v24  ;;  %v6260_v41 = vsub.f32 %v14010_v47, %v6220_v12  ;;  %v6261_v5 = vsub.f32 %v14005_v56, %v6227_v38  ;;  %v6281_v61 = vmul.f32 1.442695, %v6257_v0 }
0x141a   :  { %v6247_v31 = vrot.slane %v6246_v17, 1  ;;  %v6262_v34 = vsub.f32 %v14012_v3, %v6234_v9  ;;  %v6283_v39 = vmul.f32 1.442695, %v6258_v53  ;;  %v6285_v32 = vmul.f32 1.442695, %v6259_v43 }
0x141b   :  { %v6263_v19 = vsub.f32 %v14014_v14, %v6241_v55  ;;  %12321 = vpow2.f32 %v6281_v61  ;;  %v6287_v6 = vmul.f32 1.442695, %v6260_v41  ;;  %v6289_v48 = vmul.f32 1.442695, %v6261_v5 }
0x141c   :  { %v6248_v20 = vmax.f32 %v6246_v17, %v6247_v31  ;;  %12323 = vpow2.f32 %v6283_v39  ;;  %v6291_v33 = vmul.f32 1.442695, %v6262_v34  ;;  %v5980_v63 = vcombine.high %v13978_v15, %v13978_v15 }
0x141d   :  { %12325 = vpow2.f32 %v6285_v32  ;;  %v6293_v47 = vmul.f32 1.442695, %v6263_v19  ;;  %v5981_v56 = vcombine.high %v13984_v35, %v13984_v35  ;;  %v5982_v3 = vcombine.high %v13987_v51, %v13987_v51 }
0x141e   :  { %v6264_v25 = vsub.f32 %v14022_v27, %v6248_v20  ;;  %12327 = vpow2.f32 %v6287_v6  ;;  %v5983_v14 = vcombine.high %v13996_v7, %v13996_v7  ;;  %v6036_v1 = vrot.slane %v13978_v15, %v15305_v18 }
0x141f   :  { %12329 = vpow2.f32 %v6289_v48  ;;  %v6040_v11 = vrot.slane %v13987_v51, %v15305_v18  ;;  %v6044_v2 = vrot.slane %v5980_v63, %v15305_v18  ;;  %v6048_v21 = vrot.slane %v5982_v3, %v15305_v18 }
0x1420   :  { %12331 = vpow2.f32 %v6291_v33  ;;  %v6295_v28 = vmul.f32 1.442695, %v6264_v25  ;;  %v6052_v27 = vrot.slane %v13984_v35, %v15305_v18  ;;  %v6056_v50 = vrot.slane %v13996_v7, %v15305_v18 }
0x1421   :  { %12333 = vpow2.f32 %v6293_v47  ;;  %v6060_v52 = vrot.slane %v5981_v56, %v15305_v18  ;;  %v6064_v15 = vrot.slane %v5983_v14, %v15305_v18  ;;  %v14061_v49 = vmul.f32 %v13966_v45, %v6036_v1 }
0x1422   :  { %12335 = vpow2.f32 %v6295_v28  ;;  %v14064_v51 = vmul.f32 %v13966_v45, %v6040_v11  ;;  %v14067_v46 = vmul.f32 %v13966_v45, %v6044_v2  ;;  %v14070_v35 = vmul.f32 %v13966_v45, %v6048_v21 }
0x1423   :  { %v14073_v7 = vmul.f32 %v13966_v45, %v6052_v27  ;;  %v14076_v54 = vmul.f32 %v13966_v45, %v6056_v50  ;;  %v14079_v29 = vmul.f32 %v13966_v45, %v6060_v52  ;;  %v14082_v16 = vmul.f32 %v13966_v45, %v6064_v15 }
0x1424   :  { %v6137_v60 = vsel %vm51_vm1, %v14061_v49, -inf  ;;  %v6144_v40 = vsel %vm51_vm1, %v14064_v51, -inf  ;;  %v6151_v13 = vsel %vm51_vm1, %v14067_v46, -inf  ;;  %v6158_v42 = vsel %vm51_vm1, %v14070_v35, -inf }
0x1425   :  { %v14092_v8 = vpop.eup %12321  ;;  %v6138_v62 = vrot.slane %v6137_v60, 4  ;;  %v6145_v58 = vrot.slane %v6144_v40, 4  ;;  %v6152_v23 = vrot.slane %v6151_v13, 4  ;;  %v6159_v22 = vrot.slane %v6158_v42, 4 }
0x1426   :  { %v14094_v45 = vpop.eup %12323  ;;  %v6353_v44 = vsel %vm51_vm1, %v14092_v8, 0.0  ;;  %v14100_v4 = vsel %vm51_vm1, %v14073_v7, -inf  ;;  %v14104_v12 = vsel %vm51_vm1, %v14076_v54, -inf }
0x1427   :  { %v14106_v38 = vpop.eup %12325  ;;  %v6354_v24 = vrot.slane %v6353_v44, 4  ;;  %v6360_v0 = vsel %vm51_vm1, %v14094_v45, 0.0  ;;  %v6139_v9 = vmax.f32 %v6137_v60, %v6138_v62  ;;  %v14110_v17 = vmax.f32 %v6144_v40, %v6145_v58 }
0x1428   :  { %v14112_v53 = vpop.eup %12327  ;;  %v6361_v43 = vrot.slane %v6360_v0, 4  ;;  %v6367_v55 = vsel %vm51_vm1, %v14106_v38, 0.0  ;;  %v14116_v41 = vmax.f32 %v6151_v13, %v6152_v23  ;;  %v14118_v5 = vmax.f32 %v6158_v42, %v6159_v22 }
0x1429   :  { %v14120_v61 = vpop.eup %12329  ;;  %v6355_v31 = vadd.f32 %v6354_v24, %v6353_v44  ;;  %v6368_v34 = vrot.slane %v6367_v55, 4  ;;  %v6374_v39 = vsel %vm51_vm1, %v14112_v53, 0.0  ;;  %v6140_v32 = vrot.slane %v6139_v9, 2 }
0x142a   :  { %v14124_v19 = vpop.eup %12331  ;;  %v6362_v6 = vadd.f32 %v6361_v43, %v6360_v0  ;;  %v6375_v48 = vrot.slane %v6374_v39, 4  ;;  %v6381_v20 = vsel %vm51_vm1, %v14120_v61, 0.0  ;;  %v6147_v33 = vrot.slane %v14110_v17, 2 }
0x142b   :  { %v14129_v63 = vpop.eup %12333  ;;  %v6356_v47 = vrot.slane %v6355_v31, 2  ;;  %v6369_v56 = vadd.f32 %v6368_v34, %v6367_v55  ;;  %v6382_v3 = vrot.slane %v6381_v20, 4  ;;  %v6388_v25 = vsel %vm51_vm1, %v14124_v19, 0.0 }
0x142c   :  { %v14133_v14 = vpop.eup %12335  ;;  %v6363_v1 = vrot.slane %v6362_v6, 2  ;;  %v6376_v11 = vadd.f32 %v6375_v48, %v6374_v39  ;;  %v6389_v2 = vrot.slane %v6388_v25, 4  ;;  %v6395_v21 = vsel %vm51_vm1, %v14129_v63, 0.0 }
0x142d   :  { %v6357_v28 = vadd.f32 %v6356_v47, %v6355_v31  ;;  %v6370_v27 = vrot.slane %v6369_v56, 2  ;;  %v6383_v50 = vadd.f32 %v6382_v3, %v6381_v20  ;;  %v6396_v52 = vrot.slane %v6395_v21, 4 }
0x142e   :  { %v6364_v15 = vadd.f32 %v6363_v1, %v6362_v6  ;;  %v6377_v60 = vrot.slane %v6376_v11, 2  ;;  %v6390_v40 = vadd.f32 %v6389_v2, %v6388_v25  ;;  %v6402_v13 = vsel %vm51_vm1, %v14133_v14, 0.0 }
0x142f   :  { %v6358_v42 = vrot.slane %v6357_v28, 1  ;;  %v6371_v62 = vadd.f32 %v6370_v27, %v6369_v56  ;;  %v6384_v58 = vrot.slane %v6383_v50, 2  ;;  %v6397_v23 = vadd.f32 %v6396_v52, %v6395_v21 }
0x1430   :  { %v6365_v22 = vrot.slane %v6364_v15, 1  ;;  %v6378_v44 = vadd.f32 %v6377_v60, %v6376_v11  ;;  %v6391_v24 = vrot.slane %v6390_v40, 2  ;;  %v6403_v0 = vrot.slane %v6402_v13, 4 }
0x1431   :  { %v6359_v43 = vadd.f32 %v6358_v42, %v6357_v28  ;;  %v6372_v55 = vrot.slane %v6371_v62, 1  ;;  %v6385_v31 = vadd.f32 %v6384_v58, %v6383_v50  ;;  %v6398_v34 = vrot.slane %v6397_v23, 2 }
0x1432   :  { %v6366_v39 = vadd.f32 %v6365_v22, %v6364_v15  ;;  %v6379_v48 = vrot.slane %v6378_v44, 1  ;;  %v6392_v6 = vadd.f32 %v6391_v24, %v6390_v40  ;;  %v6404_v20 = vadd.f32 %v6403_v0, %v6402_v13 }
0x1433   :  { %v6373_v47 = vadd.f32 %v6372_v55, %v6371_v62  ;;  %v6386_v3 = vrot.slane %v6385_v31, 1  ;;  %v6399_v25 = vadd.f32 %v6398_v34, %v6397_v23  ;;  %12337 = vrcp.f32 %v6359_v43 }
0x1434   :  { %v6380_v1 = vadd.f32 %v6379_v48, %v6378_v44  ;;  %v6393_v56 = vrot.slane %v6392_v6, 1  ;;  %v6405_v2 = vrot.slane %v6404_v20, 2  ;;  %12339 = vrcp.f32 %v6366_v39 }
0x1435   :  { %v6387_v21 = vadd.f32 %v6386_v3, %v6385_v31  ;;  %v6400_v11 = vrot.slane %v6399_v25, 1  ;;  %12341 = vrcp.f32 %v6373_v47  ;;  %v6141_v27 = vmax.f32 %v6139_v9, %v6140_v32 }
0x1436   :  { %v6394_v28 = vadd.f32 %v6393_v56, %v6392_v6  ;;  %12343 = vrcp.f32 %v6380_v1  ;;  %v6148_v50 = vmax.f32 %v14110_v17, %v6147_v33  ;;  %v6179_v52 = vsel %vm51_vm1, %v14079_v29, -inf  ;;  %v14157_v56 = vpop.permute.xlu0 %6443 }
0x1437   :  { %v14142_v15 = vadd.f32 %v6405_v2, %v6404_v20  ;;  %12345 = vrcp.f32 %v6387_v21  ;;  %v6142_v60 = vrot.slane %v6141_v27, 1  ;;  %v6154_v40 = vrot.slane %v14116_v41, 2 }
0x1438   :  { %v6401_v13 = vadd.f32 %v6400_v11, %v6399_v25  ;;  %v6149_v42 = vrot.slane %v6148_v50, 1  ;;  %v6161_v62 = vrot.slane %v14118_v5, 2  ;;  %v6166_v58 = vrot.slane %v14100_v4, 4 }
0x1439   :  { %12347 = vrcp.f32 %v6394_v28  ;;  %v6143_v9 = vmax.f32 %v6141_v27, %v6142_v60  ;;  %v6155_v32 = vmax.f32 %v14116_v41, %v6154_v40  ;;  %v6173_v17 = vrot.slane %v14104_v12, 4 }
0x143a   :  { %v6150_v33 = vmax.f32 %v6148_v50, %v6149_v42  ;;  %v6162_v23 = vmax.f32 %v14118_v5, %v6161_v62  ;;  %v6167_v22 = vmax.f32 %v14100_v4, %v6166_v58  ;;  %v6180_v44 = vrot.slane %v6179_v52, 4 }
0x143b   :  { %v6156_v24 = vrot.slane %v6155_v32, 1  ;;  %v6174_v0 = vmax.f32 %v14104_v12, %v6173_v17  ;;  %v6186_v43 = vsel %vm51_vm1, %v14082_v16, -inf  ;;  %v6249_v55 = vsub.f32 %v14061_v49, %v6143_v9 }
0x143c   :  { %v6163_v31 = vrot.slane %v6162_v23, 1  ;;  %v6168_v34 = vrot.slane %v6167_v22, 2  ;;  %v6181_v39 = vmax.f32 %v6179_v52, %v6180_v44  ;;  %v6187_v41 = vrot.slane %v6186_v43, 4 }
0x143d   :  { %v12338_v48 = vpop.eup %12337  ;;  %12349 = vrcp.f32 %v6401_v13  ;;  %v6157_v6 = vmax.f32 %v6155_v32, %v6156_v24  ;;  %v6175_v20 = vrot.slane %v6174_v0, 2  ;;  %v6250_v5 = vsub.f32 %v14064_v51, %v6150_v33 }
0x143e   :  { %v12340_v4 = vpop.eup %12339  ;;  %v6426_v47 = vmul.f32 %v12338_v48, %v14092_v8  ;;  %v6169_v3 = vmax.f32 %v6167_v22, %v6168_v34  ;;  %v6182_v12 = vrot.slane %v6181_v39, 2  ;;  %v6265_v25 = vmul.f32 1.442695, %v6249_v55 }
0x143f   :  { %v12342_v1 = vpop.eup %12341  ;;  %v6428_v49 = vmul.f32 %v12340_v4, %v14094_v45  ;;  %v6164_v2 = vmax.f32 %v6162_v23, %v6163_v31  ;;  %v6176_v21 = vmax.f32 %v6174_v0, %v6175_v20  ;;  %v6188_v11 = vmax.f32 %v6186_v43, %v6187_v41 }
0x1440   :  { %v12344_v27 = vpop.eup %12343  ;;  %v6430_v28 = vmul.f32 %v12342_v1, %v14106_v38  ;;  %v6455_v50 = vmul.f32 %v14157_v56, %v6426_v47  ;;  %v6170_v51 = vrot.slane %v6169_v3, 1  ;;  %v6183_v52 = vmax.f32 %v6181_v39, %v6182_v12 }
0x1441   :  { %v12346_v60 = vpop.eup %12345  ;;  %v6456_v8 = vmul.f32 %v14157_v56, %v6428_v49  ;;  %v6177_v40 = vrot.slane %v6176_v21, 1  ;;  %v6189_v13 = vrot.slane %v6188_v11, 2  ;;  %v6251_v42 = vsub.f32 %v14067_v46, %v6157_v6 }
0x1442   :  { %v6432_v62 = vmul.f32 %v12344_v27, %v14112_v53  ;;  %v6434_v45 = vmul.f32 %v12346_v60, %v14120_v61  ;;  %v6519_v58 = vsel %vm51_vm1, %v6455_v50, 0.0  ;;  %v6171_v9 = vmax.f32 %v6169_v3, %v6170_v51 }
0x1443   :  { %v12348_v32 = vpop.eup %12347  ;;  %v6520_v38 = vrot.slane %v6519_v58, 4  ;;  %v6526_v17 = vsel %vm51_vm1, %v6456_v8, 0.0  ;;  %v6178_v33 = vmax.f32 %v6176_v21, %v6177_v40  ;;  %v6184_v23 = vrot.slane %v6183_v52, 1 }
0x1444   :  { %v6457_v22 = vmul.f32 %v14157_v56, %v6430_v28  ;;  %v6190_v44 = vmax.f32 %v6188_v11, %v6189_v13  ;;  %v6252_v24 = vsub.f32 %v14070_v35, %v6164_v2  ;;  %v6253_v46 = vsub.f32 %v14073_v7, %v6171_v9 }
0x1445   :  { %v6527_v0 = vrot.slane %v6526_v17, 4  ;;  %v6185_v53 = vmax.f32 %v6183_v52, %v6184_v23  ;;  %v6254_v61 = vsub.f32 %v14076_v54, %v6178_v33  ;;  %12351 = vpow2.f32 %v6265_v25 }
0x1446   :  { %v6191_v43 = vrot.slane %v6190_v44, 1  ;;  %v6267_v55 = vmul.f32 1.442695, %v6250_v5  ;;  %v6269_v31 = vmul.f32 1.442695, %v6251_v42  ;;  %v6407_v34 = vrot.slane %v14142_v15, 1 }
0x1447   :  { %v12350_v39 = vpop.eup %12349  ;;  %v6521_v41 = vadd.f32 %v6520_v38, %v6519_v58  ;;  %v6255_v48 = vsub.f32 %v14079_v29, %v6185_v53  ;;  %v6271_v6 = vmul.f32 1.442695, %v6252_v24  ;;  %v6273_v20 = vmul.f32 1.442695, %v6253_v46 }
0x1448   :  { %v6192_v4 = vmax.f32 %v6190_v44, %v6191_v43  ;;  %12353 = vpow2.f32 %v6267_v55  ;;  %v6275_v35 = vmul.f32 1.442695, %v6254_v61  ;;  %v6436_v7 = vmul.f32 %v12348_v32, %v14124_v19 }
0x1449   :  { %12355 = vpow2.f32 %v6269_v31  ;;  %v6277_v47 = vmul.f32 1.442695, %v6255_v48  ;;  %v6408_v54 = vadd.f32 %v6407_v34, %v14142_v15  ;;  %v6458_v5 = vmul.f32 %v14157_v56, %v6432_v62 }
0x144a   :  { %v6256_v3 = vsub.f32 %v14082_v16, %v6192_v4  ;;  %12357 = vpow2.f32 %v6271_v6  ;;  %v6459_v12 = vmul.f32 %v14157_v56, %v6434_v45  ;;  %v6460_v29 = vmul.f32 %v14157_v56, %v6436_v7 }
0x144b   :  { %12359 = vpow2.f32 %v6273_v20  ;;  %v6438_v25 = vmul.f32 %v12350_v39, %v14129_v63  ;;  %v6522_v1 = vrot.slane %v6521_v41, 2  ;;  %v6528_v49 = vadd.f32 %v6527_v0, %v6526_v17 }
0x144c   :  { %12361 = vpow2.f32 %v6275_v35  ;;  %v6279_v19 = vmul.f32 1.442695, %v6256_v3  ;;  %v6533_v2 = vsel %vm51_vm1, %v6457_v22, 0.0  ;;  %v6540_v15 = vsel %vm51_vm1, %v6458_v5, 0.0 }
0x144d   :  { %12363 = vpow2.f32 %v6277_v47  ;;  %v6523_v21 = vadd.f32 %v6522_v1, %v6521_v41  ;;  %v6529_v11 = vrot.slane %v6528_v49, 2  ;;  %v6534_v16 = vrot.slane %v6533_v2, 4 }
0x144e   :  { %12365 = vpow2.f32 %v6279_v19  ;;  %v6541_v27 = vrot.slane %v6540_v15, 4  ;;  %v6547_v28 = vsel %vm51_vm1, %v6459_v12, 0.0  ;;  %v6554_v50 = vsel %vm51_vm1, %v6460_v29, 0.0 }
0x144f   :  { %v14185_v51 = vpop.eup %12351  ;;  %v6461_v63 = vmul.f32 %v14157_v56, %v6438_v25  ;;  %v6524_v52 = vrot.slane %v6523_v21, 1  ;;  %v6530_v60 = vadd.f32 %v6529_v11, %v6528_v49  ;;  %v6535_v8 = vadd.f32 %v6534_v16, %v6533_v2 }
0x1450   :  { %v6297_v40 = vsel %vm51_vm1, %v14185_v51, 0.0  ;;  %v6542_v13 = vadd.f32 %v6541_v27, %v6540_v15  ;;  %v6548_v42 = vrot.slane %v6547_v28, 4  ;;  %v6555_v62 = vrot.slane %v6554_v50, 4 }
0x1451   :  { %v6298_v45 = vrot.slane %v6297_v40, 4  ;;  %12367 = vrcp.f32 %v6408_v54  ;;  %v6531_v58 = vrot.slane %v6530_v60, 1  ;;  %v6536_v9 = vrot.slane %v6535_v8, 2 }
0x1452   :  { %v14190_v32 = vpop.eup %12353  ;;  %v14192_v38 = vadd.f32 %v6524_v52, %v6523_v21  ;;  %v6543_v17 = vrot.slane %v6542_v13, 2  ;;  %v14194_v33 = vadd.f32 %v6548_v42, %v6547_v28  ;;  %v14196_v23 = vadd.f32 %v6555_v62, %v6554_v50 }
0x1453   :  { %v14198_v22 = vpop.eup %12355  ;;  %v6299_v44 = vadd.f32 %v6298_v45, %v6297_v40  ;;  %v6304_v24 = vsel %vm51_vm1, %v14190_v32, 0.0  ;;  %v14202_v46 = vadd.f32 %v6536_v9, %v6535_v8  ;;  %v14205_v0 = vsel %vm51_vm1, %v6461_v63, 0.0 }
0x1454   :  { %v14207_v53 = vpop.eup %12357  ;;  %v6305_v61 = vrot.slane %v6304_v24, 4  ;;  %v6311_v43 = vsel %vm51_vm1, %v14198_v22, 0.0  ;;  %v14211_v55 = vadd.f32 %v6531_v58, %v6530_v60  ;;  %v14213_v31 = vadd.f32 %v6543_v17, %v6542_v13 }
0x1455   :  { %v14215_v34 = vpop.eup %12359  ;;  %v6300_v39 = vrot.slane %v6299_v44, 2  ;;  %v6312_v41 = vrot.slane %v6311_v43, 4  ;;  %v6318_v48 = vsel %vm51_vm1, %v14207_v53, 0.0  ;;  %v6550_v6 = vrot.slane %v14194_v33, 2 }
0x1456   :  { %v14220_v20 = vpop.eup %12361  ;;  %v6306_v4 = vadd.f32 %v6305_v61, %v6304_v24  ;;  %v6319_v35 = vrot.slane %v6318_v48, 4  ;;  %v6325_v7 = vsel %vm51_vm1, %v14215_v34, 0.0  ;;  %v6538_v47 = vrot.slane %v14202_v46, 1 }
0x1457   :  { %v14225_v54 = vpop.eup %12363  ;;  %v6301_v5 = vadd.f32 %v6300_v39, %v6299_v44  ;;  %v6313_v3 = vadd.f32 %v6312_v41, %v6311_v43  ;;  %v6326_v12 = vrot.slane %v6325_v7, 4  ;;  %v6332_v29 = vsel %vm51_vm1, %v14220_v20, 0.0 }
0x1458   :  { %v14229_v25 = vpop.eup %12365  ;;  %v6307_v1 = vrot.slane %v6306_v4, 2  ;;  %v6320_v49 = vadd.f32 %v6319_v35, %v6318_v48  ;;  %v6333_v19 = vrot.slane %v6332_v29, 4  ;;  %v6339_v2 = vsel %vm51_vm1, %v14225_v54, 0.0 }
0x1459   :  { %v6302_v15 = vrot.slane %v6301_v5, 1  ;;  %v6314_v21 = vrot.slane %v6313_v3, 2  ;;  %v6327_v11 = vadd.f32 %v6326_v12, %v6325_v7  ;;  %v6340_v16 = vrot.slane %v6339_v2, 4 }
0x145a   :  { %v6308_v27 = vadd.f32 %v6307_v1, %v6306_v4  ;;  %v6321_v28 = vrot.slane %v6320_v49, 2  ;;  %v6334_v50 = vadd.f32 %v6333_v19, %v6332_v29  ;;  %v6346_v63 = vsel %vm51_vm1, %v14229_v25, 0.0 }
0x145b   :  { %v12368_v52 = vpop.eup %12367  ;;  %v6303_v60 = vadd.f32 %v6302_v15, %v6301_v5  ;;  %v6315_v8 = vadd.f32 %v6314_v21, %v6313_v3  ;;  %v6328_v40 = vrot.slane %v6327_v11, 2  ;;  %v6341_v13 = vadd.f32 %v6340_v16, %v6339_v2 }
0x145c   :  { %v6309_v42 = vrot.slane %v6308_v27, 1  ;;  %v6322_v62 = vadd.f32 %v6321_v28, %v6320_v49  ;;  %v6335_v45 = vrot.slane %v6334_v50, 2  ;;  %v6347_v58 = vrot.slane %v6346_v63, 4 }
0x145d   :  { %v6316_v9 = vrot.slane %v6315_v8, 1  ;;  %v6329_v17 = vadd.f32 %v6328_v40, %v6327_v11  ;;  %v6342_v44 = vrot.slane %v6341_v13, 2  ;;  %12369 = vrcp.f32 %v6303_v60 }
0x145e   :  { %v6310_v24 = vadd.f32 %v6309_v42, %v6308_v27  ;;  %v6323_v61 = vrot.slane %v6322_v62, 1  ;;  %v6336_v43 = vadd.f32 %v6335_v45, %v6334_v50  ;;  %v6348_v39 = vadd.f32 %v6347_v58, %v6346_v63 }
0x145f   :  { %v6317_v41 = vadd.f32 %v6316_v9, %v6315_v8  ;;  %v6330_v48 = vrot.slane %v6329_v17, 1  ;;  %v6343_v4 = vadd.f32 %v6342_v44, %v6341_v13  ;;  %v6440_v35 = vmul.f32 %v12368_v52, %v14133_v14 }
0x1460   :  { %v6324_v7 = vadd.f32 %v6323_v61, %v6322_v62  ;;  %v6337_v5 = vrot.slane %v6336_v43, 1  ;;  %v6349_v3 = vrot.slane %v6348_v39, 2  ;;  %12371 = vrcp.f32 %v6310_v24 }
0x1461   :  { %v6331_v12 = vadd.f32 %v6330_v48, %v6329_v17  ;;  %v6344_v29 = vrot.slane %v6343_v4, 1  ;;  %12373 = vrcp.f32 %v6317_v41  ;;  %v6545_v1 = vrot.slane %v14213_v31, 1 }
0x1462   :  { %v6338_v49 = vadd.f32 %v6337_v5, %v6336_v43  ;;  %12375 = vrcp.f32 %v6324_v7  ;;  %v6350_v19 = vadd.f32 %v6349_v3, %v6348_v39  ;;  %v6462_v2 = vmul.f32 %v14157_v56, %v6440_v35 }
0x1463   :  { %12377 = vrcp.f32 %v6331_v12  ;;  %v6345_v15 = vadd.f32 %v6344_v29, %v6343_v4  ;;  %v6539_v21 = vadd.f32 %v6538_v47, %v14202_v46  ;;  %v6551_v14 = vadd.f32 %v6550_v6, %v14194_v33 }
0x1464   :  { %12379 = vrcp.f32 %v6338_v49  ;;  %v6351_v11 = vrot.slane %v6350_v19, 1  ;;  %v6557_v16 = vrot.slane %v14196_v23, 2  ;;  %v6562_v27 = vrot.slane %v14205_v0, 4 }
0x1465   :  { %12381 = vrcp.f32 %v6345_v15  ;;  %v6598_v28 = vsel %vm793_vm2, %v14211_v55, %v14192_v38  ;;  %v6568_v63 = vsel %vm51_vm1, %v6462_v2, 0.0  ;;  %v6546_v46 = vadd.f32 %v6545_v1, %v14213_v31 }
0x1466   :  { %v6352_v50 = vadd.f32 %v6351_v11, %v6350_v19  ;;  %v6563_v56 = vadd.f32 %v6562_v27, %v14205_v0  ;;  %v6552_v33 = vrot.slane %v6551_v14, 1  ;;  %v14250_v47 = vadd.f32 %v6557_v16, %v14196_v23 }
0x1467   :  { %v12370_v52 = vpop.eup %12369  ;;  %v6599_v60 = vsel %vm795_vm3, %v6539_v21, %v6598_v28  ;;  %v6569_v8 = vrot.slane %v6568_v63, 4 }
0x1468   :  { %v6410_v6 = vmul.f32 %v12370_v52, %v14185_v51  ;;  %12383 = vrcp.f32 %v6352_v50  ;;  %v6564_v55 = vrot.slane %v6563_v56, 2  ;;  %v6600_v42 = vsel %vm797_vm4, %v6546_v46, %v6599_v60 }
0x1469   :  { %v6553_v45 = vadd.f32 %v6552_v33, %v6551_v14  ;;  %v6559_v23 = vrot.slane %v14250_v47, 1  ;;  %v6570_v24 = vadd.f32 %v6569_v8, %v6568_v63 }
0x146a   :  { %v12372_v40 = vpop.eup %12371  ;;  %v6447_v38 = vmul.f32 %v13968_v36, %v6410_v6  ;;  %v14263_v39 = vadd.f32 %v6564_v55, %v6563_v56 }
0x146b   :  { %v12374_v0 = vpop.eup %12373  ;;  %v6412_v13 = vmul.f32 %v12372_v40, %v14190_v32 }
0x146c   :  { %v12376_v31 = vpop.eup %12375  ;;  %v6414_v62 = vmul.f32 %v12374_v0, %v14198_v22  ;;  %v6463_v51 = vsel %vm51_vm1, %v6447_v38, 0.0  ;;  %v14266_v22 = vsel %vm799_vm5, %v6553_v45, %v6600_v42  ;;  %v6571_v0 = vrot.slane %v6570_v24, 2 }
0x146d   :  { %v12378_v58 = vpop.eup %12377  ;;  %v6448_v9 = vmul.f32 %v13968_v36, %v6412_v13  ;;  %v6416_v17 = vmul.f32 %v12376_v31, %v14207_v53  ;;  %v6464_v44 = vrot.slane %v6463_v51, 4 }
0x146e   :  { %v12380_v61 = vpop.eup %12379  ;;  %v6418_v32 = vmul.f32 %v12378_v58, %v14215_v34  ;;  %v6449_v43 = vmul.f32 %v13968_v36, %v6414_v62 }
0x146f   :  { %v12382_v41 = vpop.eup %12381  ;;  %v6420_v48 = vmul.f32 %v12380_v61, %v14220_v20  ;;  %v6450_v4 = vmul.f32 %v13968_v36, %v6416_v17  ;;  %v6465_v35 = vadd.f32 %v6464_v44, %v6463_v51  ;;  %v6470_v53 = vsel %vm51_vm1, %v6448_v9, 0.0 }
0x1470   :  { %v6422_v7 = vmul.f32 %v12382_v41, %v14225_v54  ;;  %v6451_v5 = vmul.f32 %v13968_v36, %v6418_v32  ;;  %v6471_v34 = vrot.slane %v6470_v53, 4  ;;  %v6477_v3 = vsel %vm51_vm1, %v6449_v43, 0.0 }
0x1471   :  { %v6452_v12 = vmul.f32 %v13968_v36, %v6420_v48  ;;  %v6466_v29 = vrot.slane %v6465_v35, 2  ;;  %v6478_v1 = vrot.slane %v6477_v3, 4  ;;  %v6484_v49 = vsel %vm51_vm1, %v6450_v4, 0.0 }
0x1472   :  { %v12384_v19 = vpop.eup %12383  ;;  %v6453_v20 = vmul.f32 %v13968_v36, %v6422_v7  ;;  %v6472_v2 = vadd.f32 %v6471_v34, %v6470_v53  ;;  %v6485_v15 = vrot.slane %v6484_v49, 4  ;;  %v6491_v21 = vsel %vm51_vm1, %v6451_v5, 0.0 }
0x1473   :  { %v6424_v54 = vmul.f32 %v12384_v19, %v14229_v25  ;;  %v6467_v14 = vadd.f32 %v6466_v29, %v6465_v35  ;;  %v6479_v11 = vadd.f32 %v6478_v1, %v6477_v3  ;;  %v6492_v16 = vrot.slane %v6491_v21, 4 }
0x1474   :  { %v6473_v27 = vrot.slane %v6472_v2, 2  ;;  %v6486_v28 = vadd.f32 %v6485_v15, %v6484_v49  ;;  %v6498_v50 = vsel %vm51_vm1, %v6452_v12, 0.0  ;;  %v6505_v56 = vsel %vm51_vm1, %v6453_v20, 0.0 }
0x1475   :  { %v6454_v63 = vmul.f32 %v13968_v36, %v6424_v54  ;;  %v6468_v52 = vrot.slane %v6467_v14, 1  ;;  %v6480_v46 = vrot.slane %v6479_v11, 2  ;;  %v6493_v33 = vadd.f32 %v6492_v16, %v6491_v21 }
0x1476   :  { %v6474_v6 = vadd.f32 %v6473_v27, %v6472_v2  ;;  %v6487_v60 = vrot.slane %v6486_v28, 2  ;;  %v6499_v8 = vrot.slane %v6498_v50, 4  ;;  %v6506_v40 = vrot.slane %v6505_v56, 4 }
0x1477   :  { %v6481_v38 = vadd.f32 %v6480_v46, %v6479_v11  ;;  %v6494_v25 = vrot.slane %v6493_v33, 2  ;;  %v6512_v55 = vsel %vm51_vm1, %v6454_v63, 0.0  ;;  %v6469_v51 = vadd.f32 %v6468_v52, %v6467_v14 }
0x1478   :  { %v6475_v13 = vrot.slane %v6474_v6, 1  ;;  %v6488_v42 = vadd.f32 %v6487_v60, %v6486_v28  ;;  %v6500_v31 = vadd.f32 %v6499_v8, %v6498_v50  ;;  %v6507_v62 = vadd.f32 %v6506_v40, %v6505_v56 }
0x1479   :  { %v6482_v45 = vrot.slane %v6481_v38, 1  ;;  %v6495_v58 = vadd.f32 %v6494_v25, %v6493_v33  ;;  %v6513_v36 = vrot.slane %v6512_v55, 4  ;;  %v6572_v48 = vadd.f32 %v6571_v0, %v6570_v24 }
0x147a   :  { %v6476_v9 = vadd.f32 %v6475_v13, %v6474_v6  ;;  %v6489_v17 = vrot.slane %v6488_v42, 1  ;;  %v6501_v44 = vrot.slane %v6500_v31, 2  ;;  %v6508_v61 = vrot.slane %v6507_v62, 2 }
0x147b   :  { %v6483_v32 = vadd.f32 %v6482_v45, %v6481_v38  ;;  %v6496_v43 = vrot.slane %v6495_v58, 1  ;;  %v6514_v41 = vadd.f32 %v6513_v36, %v6512_v55  ;;  %v6566_v12 = vrot.slane %v14263_v39, 1  ;;  %v6740_v45 = vld [vmem:[#allocation5 + $0x218] sm:$0xf]  ;;  %v6739_v36 = vld [vmem:[#allocation5 + $0x210] sm:$0xf] }
0x147c   :  { %v6490_v4 = vadd.f32 %v6489_v17, %v6488_v42  ;;  %v6502_v35 = vadd.f32 %v6501_v44, %v6500_v31  ;;  %v6509_v53 = vadd.f32 %v6508_v61, %v6507_v62  ;;  %v6591_v7 = vsel %vm793_vm2, %v6476_v9, %v6469_v51  ;;  %v6738_v51 = vld [vmem:[#allocation5 + $0x208] sm:$0xf]  ;;  %11881 = vmatprep.subr.msk.mxu0 %vm58_vm0, %v6740_v45  ;;  %v6951_v17 = vld [vmem:[#allocation5 + $0x238] sm:$0xf] }
0x147d   :  { %v6497_v5 = vadd.f32 %v6496_v43, %v6495_v58  ;;  %v6515_v34 = vrot.slane %v6514_v41, 2  ;;  %v6592_v3 = vsel %vm795_vm3, %v6483_v32, %v6591_v7  ;;  %v6560_v19 = vadd.f32 %v6559_v23, %v14250_v47  ;;  %v6737_v58 = vld [vmem:[#allocation5 + $0x200] sm:$0xf]  ;;  %11877 = vmatprep.subr.msk.mxu1 %vm58_vm0, %v6738_v51  ;;  %v6949_v9 = vld [vmem:[#allocation5 + $0x228] sm:$0xf] }
0x147e   :  { %v6503_v29 = vrot.slane %v6502_v35, 1  ;;  %v6510_v1 = vrot.slane %v6509_v53, 1  ;;  %v6593_v49 = vsel %vm797_vm4, %v6490_v4, %v6592_v3  ;;  %v6573_v15 = vrot.slane %v6572_v48, 1  ;;  %11878 = vmatpush1.msk.msra.mxu1 %vm58_vm0, %v6737_v58 }
0x147f   :  { %v6516_v24 = vadd.f32 %v6515_v34, %v6514_v41  ;;  %v6594_v20 = vsel %vm799_vm5, %v6497_v5, %v6593_v49  ;;  %v6602_v21 = vsel %vm801_vm6, %v6560_v19, %v14266_v22  ;;  %v6567_v11 = vadd.f32 %v6566_v12, %v14263_v39  ;;  %v6609_v22 = vpop.permute.xlu0 %6608  ;;  %11885 = vmatprep.subr.msk.mxu1 %vm58_vm0, %v6949_v9  ;;  %v6950_v49 = vld [vmem:[#allocation5 + $0x230] sm:$0xf] }
0x1480   :  { %v6504_v2 = vadd.f32 %v6503_v29, %v6502_v35  ;;  %v6511_v54 = vadd.f32 %v6510_v1, %v6509_v53  ;;  %v6574_v47 = vadd.f32 %v6573_v15, %v6572_v48  ;;  %v6948_v1 = vld [vmem:[#allocation5 + $0x220] sm:$0xf] }
0x1481   :  { %v6517_v14 = vrot.slane %v6516_v24, 1  ;;  %v6603_v50 = vsel %vm803_vm7, %v6567_v11, %v6602_v21 }
0x1482   :  { %v6595_v16 = vsel %vm801_vm6, %v6504_v2, %v6594_v20  ;;  %v6604_v56 = vsel %vm805_vm8, %v6574_v47, %v6603_v50  ;;  %v6955_v20 = vld [vmem:[#allocation5 + $0x238] sm:$0xf0]  ;;  %v6952_v2 = vld [vmem:[#allocation5 + $0x220] sm:$0xf0] }
0x1483   :  { %v6518_v27 = vadd.f32 %v6517_v14, %v6516_v24  ;;  %v6596_v28 = vsel %vm803_vm7, %v6511_v54, %v6595_v16  ;;  %v6953_v24 = vld [vmem:[#allocation5 + $0x228] sm:$0xf0]  ;;  %v7160_v21 = vrot.slane %v6955_v20, 4  ;;  %v7157_v54 = vrot.slane %v6952_v2, 4  ;;  %v6954_v14 = vld [vmem:[#allocation5 + $0x230] sm:$0xf0] }
0x1484   :  { %v7158_v15 = vrot.slane %v6953_v24, 4  ;;  %v7159_v11 = vrot.slane %v6954_v14, 4  ;;  %v6742_v16 = vld [vmem:[#allocation5 + $0x208] sm:$0xf0] }
0x1485   :  { %v6597_v23 = vsel %vm805_vm8, %v6518_v27, %v6596_v28  ;;  %v6744_v27 = vld [vmem:[#allocation5 + $0x218] sm:$0xf0]  ;;  %v7320_v28 = vrot.slane %v6742_v16, 4 }
0x1486   :  { %12048 = vmatprep.mubr.msk.f32.mxu0 %vm51_vm1, %v6597_v23  ;;  %v7322_v50 = vrot.slane %v6744_v27, 4 }
0x1487   :  { %12049 = vmatmul.mubr.msk.f32.vlgmr.msra.gmra.mrb[72].mxu0 %vm51_vm1, %v6604_v56 }
0x1488   :  { %6927 = vmatprep.mubr.f32.mxu0 %v15303_v30  ;;  %11882 = vmatpush1.msk.msra.mxu0 %vm58_vm0, %v6739_v36  ;;  %v6743_v36 = vld [vmem:[#allocation5 + $0x210] sm:$0xf0] }
0x1489   :  { %11889 = vmatprep.subr.msk.mxu0 %vm58_vm0, %v6951_v17 }
0x155a   :  { %v12050_v39 = vpop.f32.mrb[72].mxu0 }
0x155b   :  { %v6689_v63 = vadd.f32 %v12050_v39, %v6609_v22  ;;  %v6683_v52 = vpop.f32.mrb[73].mxu0  ;;  %v6957_v39 = vld [vmem:[#allocation5 + $0x2a0] ss:$8 sm:$0xf] }
0x155c   :  { %v6684_v46 = vadd.f32 %v6683_v52, %v6609_v22 }
0x155d   :  { %v6693_v33 = vadd.f32 %v6689_v63, %v13953_v26 }
0x155e   :  { %v6692_v6 = vadd.f32 %v6684_v46, %v13951_v59  ;;  %v14308_v59 = vld [vmem:[#allocation2 + $0x30] ss:$0 sm:$0xff] }
0x155f   :  { %v6698_v60 = vsel %vm51_vm1, %v6693_v33, 0.0  ;;  %v6746_v46 = vld [vmem:[#allocation5 + $0x280] ss:$8 sm:$0xf] }
0x1560   :  { %6699 = vadd.xlane.f32.xlu0 %v6698_v60  ;;  %v6695_v8 = vsel %vm51_vm1, %v6692_v6, 0.0  ;;  %v6962_v60 = vrot.slane %v6957_v39, %v15305_v18 }
0x1561   :  { %6696 = vadd.xlane.f32.xlu1 %v6695_v8  ;;  %v15306_v8 = vld [vmem:[#allocation13_spill] sm:$0xff] }
0x15ed   :  { %v6700_v40 = vpop.xlane.xlu0 %6699 }
0x15ee   :  { %v6702_v38 = vmul.f32 0.25, %v6700_v40  ;;  %v6697_v25 = vpop.xlane.xlu1 %6696  ;;  %v6970_v40 = vrot.slane %v6957_v39, %v15306_v8 }
0x15ef   :  { %v6701_v55 = vmul.f32 0.25, %v6697_v25 }
0x15f0   :  { %v6704_v0 = vsub.f32 %v6693_v33, %v6702_v38  ;;  %v15307_v38 = vld [vmem:[#allocation14_spill] sm:$0xff] }
0x15f1   :  { %v6703_v13 = vsub.f32 %v6692_v6, %v6701_v55  ;;  %v6966_v25 = vrot.slane %v6957_v39, %v15307_v38  ;;  %v15308_v55 = vld [vmem:[#allocation15_spill] sm:$0xff] }
0x15f2   :  { %v6706_v42 = vmul.f32 %v6704_v0, %v6704_v0  ;;  %v6763_v9 = vrot.slane %v6746_v46, %v15308_v55 }
0x15f3   :  { %v6705_v31 = vmul.f32 %v6703_v13, %v6703_v13 }
0x15f4   :  { %v6710_v62 = vsel %vm51_vm1, %v6706_v42, 0.0 }
0x15f5   :  { %6711 = vadd.xlane.f32.xlu1 %v6710_v62  ;;  %v6707_v26 = vsel %vm51_vm1, %v6705_v31, 0.0  ;;  %v6741_v62 = vld [vmem:[#allocation5 + $0x200] sm:$0xf0] }
0x15f6   :  { %6708 = vadd.xlane.f32.xlu0 %v6707_v26 }
0x1606   :  { %6731 = vrot.lane.b32.xlu1 %v14308_v59, %s12631_s7 }
0x160c   :  { %6726 = vrot.lane.b32.xlu0 %v14308_v59, %s12632_s8 }
0x1682   :  { %v6712_v44 = vpop.xlane.xlu1 %6711 }
0x1683   :  { %v6714_v61 = vmul.f32 0.25, %v6712_v44  ;;  %v6709_v32 = vpop.xlane.xlu0 %6708 }
0x1684   :  { %v6713_v43 = vmul.f32 0.25, %v6709_v32  ;;  %v6759_v32 = vrot.slane %v6746_v46, %v15306_v8 }
0x1685   :  { %v6716_v41 = vadd.f32 1e-05, %v6714_v61  ;;  %v6751_v61 = vrot.slane %v6746_v46, %v15305_v18 }
0x1686   :  { %v6715_v48 = vadd.f32 1e-05, %v6713_v43  ;;  %v6732_v34 = vpop.permute.xlu1 %6731  ;;  %v7319_v43 = vrot.slane %v6741_v62, 4 }
0x1687   :  { %12385 = vrsqrt.f32 %v6716_v41  ;;  %v6727_v53 = vpop.permute.xlu0 %6726 }
0x1688   :  { %12387 = vrsqrt.f32 %v6715_v48 }
0x1691   :  { %v12386_v4 = vpop.eup %12385 }
0x1692   :  { %v12388_v35 = vpop.eup %12387  ;;  %v6720_v5 = vmul.f32 %v12386_v4, %v6704_v0  ;;  %v6974_v0 = vrot.slane %v6957_v39, %v15308_v55 }
0x1693   :  { %v6719_v7 = vmul.f32 %v12388_v35, %v6703_v13  ;;  %v6755_v13 = vrot.slane %v6746_v46, %v15307_v38 }
0x1694   :  { %v6730_v12 = vmul.f32 %v6727_v53, %v6720_v5 }
0x1695   :  { %v6729_v3 = vmul.f32 %v6727_v53, %v6719_v7  ;;  %v7321_v7 = vrot.slane %v6743_v36, 4  ;;  %v7849_v36 = vld [vmem:[#allocation5 + $0x278] sm:$0xf] }
0x1696   :  { %v14326_v19 = vadd.f32 %v6732_v34, %v6730_v12 }
0x1697   :  { %v14318_v29 = vadd.f32 %v6732_v34, %v6729_v3 }
0x1699   :  { %11879 = vmatmul.mubr.msk.f32.vlgmr.msra.gmra.mrb[72].mxu1 %vm51_vm1, %v14318_v29  ;;  %11883 = vmatmul.mubr.msk.f32.vlgmr.msra.gmra.mrb[74].mxu0 %vm51_vm1, %v14318_v29 }
0x169a   :  { %11886 = vmatpush1.msk.msra.mxu1 %vm58_vm0, %v6948_v1  ;;  %11890 = vmatpush1.msk.msra.mxu0 %vm58_vm0, %v6950_v49 }
0x169b   :  { %6856 = vmatprep.mubr.f32.mxu1 %v15303_v30  ;;  %6933 = vmatprep.mubr.f32.mxu0 %v15303_v30 }
0x169c   :  { %7165 = vmatprep.subr.mxu1 %v7158_v15  ;;  %7240 = vmatprep.subr.mxu0 %v7160_v21  ;;  %v7478_v15 = vld [vmem:[#allocation5 + $0x248] sm:$0xf]  ;;  %v7480_v21 = vld [vmem:[#allocation5 + $0x258] sm:$0xf] }
0x169d   :  { %11880 = vmatmul.mubr.msk.f32.gmra.mrb[74].mxu1 %vm51_vm1, %v14326_v19  ;;  %11884 = vmatmul.mubr.msk.f32.gmra.mrb[76].mxu0 %vm51_vm1, %v14326_v19 }
0x169e   :  { %7055 = vmatprep.mubr.f32.mxu1 %v15303_v30  ;;  %7132 = vmatprep.mubr.f32.mxu0 %v15303_v30 }
0x16a1   :  { %11887 = vmatmul.mubr.msk.f32.vlgmr.msra.gmra.mrb[76].mxu1 %vm51_vm1, %v14318_v29  ;;  %11891 = vmatmul.mubr.msk.f32.vlgmr.msra.gmra.mrb[78].mxu0 %vm51_vm1, %v14318_v29 }
0x16a2   :  { %7061 = vmatprep.mubr.f32.mxu1 %v15303_v30  ;;  %7138 = vmatprep.mubr.f32.mxu0 %v15303_v30 }
0x16a3   :  { %7166 = vmatpush1.xpose.msra.mxu1 %v7157_v54  ;;  %7241 = vmatpush1.xpose.msra.mxu0 %v7159_v11 }
0x16a4   :  { %7327 = vmatprep.subr.mxu1 %v7320_v28  ;;  %7402 = vmatprep.subr.mxu0 %v7322_v50 }
0x16a5   :  { %11888 = vmatmul.mubr.msk.f32.gmra.mrb[78].mxu1 %vm51_vm1, %v14326_v19  ;;  %11892 = vmatmul.mubr.msk.f32.gmra.mrb[80].mxu0 %vm51_vm1, %v14326_v19 }
0x176c   :  { %v6852_v47 = vpop.f32.mrb[72].mxu1  ;;  %v6929_v23 = vpop.f32.mrb[74].mxu0 }
0x176d   :  { %v6854_v56 = vpop.f32.mrb[73].mxu1  ;;  %v6931_v22 = vpop.f32.mrb[75].mxu0  ;;  %v6853_v11 = vadd.f32 %v6852_v47, %v6751_v61  ;;  %v6930_v16 = vadd.f32 %v6929_v23, %v6759_v32 }
0x176e   :  { %v6855_v41 = vadd.f32 %v6854_v56, %v6755_v13  ;;  %v6932_v24 = vadd.f32 %v6931_v22, %v6763_v9 }
0x176f   :  { %v6940_v46 = vmax.f32 %v6853_v11, 0.0 }
0x1770   :  { %v14346_v63 = vpop.f32.mrb[74].mxu1  ;;  %v14348_v52 = vpop.f32.mrb[76].mxu0  ;;  %v6941_v50 = vmax.f32 %v6855_v41, 0.0  ;;  %v6943_v56 = vmax.f32 %v6932_v24, 0.0 }
0x1771   :  { %v6860_v33 = vpop.f32.mrb[75].mxu1  ;;  %v6937_v6 = vpop.f32.mrb[77].mxu0  ;;  %v6859_v47 = vadd.f32 %v14346_v63, %v6751_v61  ;;  %v6936_v23 = vadd.f32 %v14348_v52, %v6759_v32  ;;  %v7482_v63 = vld [vmem:[#allocation5 + $0x248] sm:$0xf0]  ;;  %v7484_v52 = vld [vmem:[#allocation5 + $0x258] sm:$0xf0] }
0x1772   :  { %v6861_v22 = vadd.f32 %v6860_v33, %v6755_v13  ;;  %v6938_v39 = vadd.f32 %v6937_v6, %v6763_v9  ;;  %v7481_v13 = vld [vmem:[#allocation5 + $0x240] sm:$0xf0]  ;;  %v7689_v62 = vrot.slane %v7484_v52, 4 }
0x1773   :  { %v6944_v33 = vmax.f32 %v6859_v47, 0.0  ;;  %v6946_v6 = vmax.f32 %v6936_v23, 0.0 }
0x1774   :  { %v7057_v42 = vpop.f32.mrb[76].mxu1  ;;  %v7134_v31 = vpop.f32.mrb[78].mxu0 }
0x1775   :  { %v7058_v26 = vadd.f32 %v7057_v42, %v6962_v60  ;;  %v7135_v51 = vadd.f32 %v7134_v31, %v6970_v40  ;;  %v7059_v45 = vpop.f32.mrb[77].mxu1  ;;  %v7136_v58 = vpop.f32.mrb[79].mxu0  ;;  %v6947_v42 = vmax.f32 %v6938_v39, 0.0  ;;  %v7687_v31 = vrot.slane %v7482_v63, 4 }
0x1776   :  { %v7060_v17 = vadd.f32 %v7059_v45, %v6966_v25  ;;  %v7137_v44 = vadd.f32 %v7136_v58, %v6974_v0  ;;  %v7847_v58 = vld [vmem:[#allocation5 + $0x268] sm:$0xf] }
0x1777   :  { %v7145_v5 = vmax.f32 %v7058_v26, 0.0  ;;  %v7147_v34 = vmax.f32 %v7135_v51, 0.0  ;;  %v7686_v26 = vrot.slane %v7481_v13, 4  ;;  %v7483_v51 = vld [vmem:[#allocation5 + $0x250] sm:$0xf0] }
0x1778   :  { %v7146_v48 = vmax.f32 %v7060_v17, 0.0  ;;  %v7148_v4 = vmax.f32 %v7137_v44, 0.0  ;;  %v7063_v35 = vpop.f32.mrb[78].mxu1  ;;  %v7140_v53 = vpop.f32.mrb[80].mxu0  ;;  %v7688_v45 = vrot.slane %v7483_v51, 4 }
0x1779   :  { %v7064_v3 = vadd.f32 %v7063_v35, %v6962_v60  ;;  %v7141_v12 = vadd.f32 %v7140_v53, %v6970_v40  ;;  %v7065_v1 = vpop.f32.mrb[79].mxu1  ;;  %v7142_v49 = vpop.f32.mrb[81].mxu0  ;;  %v6942_v60 = vmax.f32 %v6930_v16, 0.0  ;;  %v7477_v40 = vld [vmem:[#allocation5 + $0x240] sm:$0xf] }
0x177a   :  { %v7066_v20 = vadd.f32 %v7065_v1, %v6966_v25  ;;  %v7143_v2 = vadd.f32 %v7142_v49, %v6974_v0  ;;  %7229 = vmatprep.mubr.f32.mxu1 %v7146_v48  ;;  %7304 = vmatprep.mubr.f32.mxu0 %v7148_v4  ;;  %v7479_v25 = vld [vmem:[#allocation5 + $0x250] sm:$0xf]  ;;  %v6945_v0 = vmax.f32 %v6861_v22, 0.0 }
0x177b   :  { %7230 = vmatmul.mubr.f32.vlgmr.msra.gmra.mrb[80].mxu1 %v7145_v5  ;;  %7305 = vmatmul.mubr.f32.vlgmr.msra.gmra.mrb[82].mxu0 %v7147_v34  ;;  %v7149_v27 = vmax.f32 %v7064_v3, 0.0  ;;  %v7151_v28 = vmax.f32 %v7141_v12, 0.0  ;;  %v7486_v12 = vld [vmem:[#allocation5 + $0x2c0] ss:$8 sm:$0xf] }
0x177c   :  { %v7150_v54 = vmax.f32 %v7066_v20, 0.0  ;;  %v7152_v14 = vmax.f32 %v7143_v2, 0.0  ;;  %7328 = vmatpush1.xpose.msra.mxu1 %v7319_v43  ;;  %7403 = vmatpush1.xpose.msra.mxu0 %v7321_v7  ;;  %v7503_v11 = vrot.slane %v7486_v12, %v15308_v55 }
0x177d   :  { %11893 = vmatprep.subr.msk.mxu1 %vm58_vm0, %v7478_v15  ;;  %11897 = vmatprep.subr.msk.mxu0 %vm58_vm0, %v7480_v21  ;;  %v7491_v21 = vrot.slane %v7486_v12, %v15305_v18 }
0x177e   :  { %7234 = vmatprep.mubr.f32.mxu1 %v7150_v54  ;;  %7309 = vmatprep.mubr.f32.mxu0 %v7152_v14  ;;  %v7499_v54 = vrot.slane %v7486_v12, %v15306_v8  ;;  %v7495_v14 = vrot.slane %v7486_v12, %v15307_v38 }
0x177f   :  { %7235 = vmatmul.mubr.f32.gmra.mrb[82].mxu1 %v7149_v27  ;;  %7310 = vmatmul.mubr.f32.gmra.mrb[84].mxu0 %v7151_v28 }
0x1780   :  { %7391 = vmatprep.mubr.f32.mxu1 %v6941_v50  ;;  %7466 = vmatprep.mubr.f32.mxu0 %v6943_v56 }
0x1783   :  { %7392 = vmatmul.mubr.f32.vlgmr.msra.gmra.mrb[84].mxu1 %v6940_v46  ;;  %7467 = vmatmul.mubr.f32.vlgmr.msra.gmra.mrb[86].mxu0 %v6942_v60 }
0x1784   :  { %11894 = vmatpush1.msk.msra.mxu1 %vm58_vm0, %v7477_v40  ;;  %11898 = vmatpush1.msk.msra.mxu0 %vm58_vm0, %v7479_v25 }
0x1785   :  { %7396 = vmatprep.mubr.f32.mxu1 %v6945_v0  ;;  %7471 = vmatprep.mubr.f32.mxu0 %v6947_v42  ;;  %v7846_v0 = vld [vmem:[#allocation5 + $0x260] sm:$0xf] }
0x1786   :  { %7694 = vmatprep.subr.mxu1 %v7687_v31  ;;  %7769 = vmatprep.subr.mxu0 %v7689_v62  ;;  %v7848_v31 = vld [vmem:[#allocation5 + $0x270] sm:$0xf] }
0x1787   :  { %7397 = vmatmul.mubr.f32.gmra.mrb[86].mxu1 %v6944_v33  ;;  %7472 = vmatmul.mubr.f32.gmra.mrb[88].mxu0 %v6946_v6 }
0x1788   :  { %7584 = vmatprep.mubr.f32.mxu1 %v15303_v30  ;;  %7661 = vmatprep.mubr.f32.mxu0 %v15303_v30 }
0x178b   :  { %11895 = vmatmul.mubr.msk.f32.vlgmr.msra.gmra.mrb[88].mxu1 %vm51_vm1, %v14318_v29  ;;  %11899 = vmatmul.mubr.msk.f32.vlgmr.msra.gmra.mrb[90].mxu0 %vm51_vm1, %v14318_v29 }
0x178c   :  { %7590 = vmatprep.mubr.f32.mxu1 %v15303_v30  ;;  %7667 = vmatprep.mubr.f32.mxu0 %v15303_v30 }
0x178d   :  { %7695 = vmatpush1.xpose.msra.mxu1 %v7686_v26  ;;  %7770 = vmatpush1.xpose.msra.mxu0 %v7688_v45 }
0x178e   :  { %11901 = vmatprep.subr.msk.mxu1 %vm58_vm0, %v7847_v58  ;;  %11905 = vmatprep.subr.msk.mxu0 %vm58_vm0, %v7849_v36 }
0x178f   :  { %11896 = vmatmul.mubr.msk.f32.gmra.mrb[90].mxu1 %vm51_vm1, %v14326_v19  ;;  %11900 = vmatmul.mubr.msk.f32.gmra.mrb[92].mxu0 %vm51_vm1, %v14326_v19 }
0x184e   :  { %v7231_v9 = vpop.f32.mrb[80].mxu1  ;;  %v7306_v17 = vpop.f32.mrb[82].mxu0 }
0x184f   :  { %v7307_v44 = vadd.f32 %v7306_v17, %v7231_v9  ;;  %v7233_v61 = vpop.f32.mrb[81].mxu1  ;;  %v7308_v32 = vpop.f32.mrb[83].mxu0  ;;  %v7851_v9 = vld [vmem:[#allocation5 + $0x268] sm:$0xf0]  ;;  %v7853_v17 = vld [vmem:[#allocation5 + $0x278] sm:$0xf0] }
0x1850   :  { %v8056_v61 = vrot.slane %v7851_v9, 4  ;;  %v8058_v32 = vrot.slane %v7853_v17, 4  ;;  %v8215_v17 = vld [vmem:[#allocation5 + $0x281] ss:$0 sm:$0xff] }
0x1852   :  { %v7236_v43 = vpop.f32.mrb[82].mxu1  ;;  %v7311_v41 = vpop.f32.mrb[84].mxu0 }
0x1853   :  { %v7312_v48 = vadd.f32 %v7311_v41, %v7236_v43  ;;  %v7238_v4 = vpop.f32.mrb[83].mxu1  ;;  %v7313_v35 = vpop.f32.mrb[85].mxu0  ;;  %v7852_v41 = vld [vmem:[#allocation5 + $0x270] sm:$0xf0] }
0x1856   :  { %v7393_v53 = vpop.f32.mrb[84].mxu1  ;;  %v7468_v7 = vpop.f32.mrb[86].mxu0 }
0x1857   :  { %v7394_v5 = vadd.f32 %v7393_v53, %v7307_v44  ;;  %v7395_v34 = vpop.f32.mrb[85].mxu1  ;;  %v7470_v3 = vpop.f32.mrb[87].mxu0  ;;  %v7850_v44 = vld [vmem:[#allocation5 + $0x260] sm:$0xf0] }
0x1858   :  { %v8055_v43 = vrot.slane %v7850_v44, 4  ;;  %v7855_v34 = vld [vmem:[#allocation5 + $0x2e0] ss:$8 sm:$0xf] }
0x1859   :  { %v14378_v1 = vadd.f32 %v7468_v7, %v7394_v5 }
0x185a   :  { %v7398_v49 = vpop.f32.mrb[86].mxu1  ;;  %v7473_v24 = vpop.f32.mrb[88].mxu0 }
0x185b   :  { %v7399_v20 = vadd.f32 %v7398_v49, %v7312_v48  ;;  %v7400_v2 = vpop.f32.mrb[87].mxu1  ;;  %v7475_v15 = vpop.f32.mrb[89].mxu0  ;;  %v8057_v48 = vrot.slane %v7852_v41, 4 }
0x185c   :  { %v7860_v15 = vrot.slane %v7855_v34, %v15305_v18 }
0x185d   :  { %v14384_v16 = vadd.f32 %v7473_v24, %v7399_v20 }
0x185e   :  { %v7586_v27 = vpop.f32.mrb[88].mxu1  ;;  %v7663_v28 = vpop.f32.mrb[90].mxu0 }
0x185f   :  { %v7587_v50 = vadd.f32 %v7586_v27, %v7491_v21  ;;  %v7664_v56 = vadd.f32 %v7663_v28, %v7499_v54  ;;  %v7588_v22 = vpop.f32.mrb[89].mxu1  ;;  %v7665_v39 = vpop.f32.mrb[91].mxu0 }
0x1860   :  { %v7589_v46 = vadd.f32 %v7588_v22, %v7495_v14  ;;  %v7666_v60 = vadd.f32 %v7665_v39, %v7503_v11 }
0x1861   :  { %v7674_v42 = vmax.f32 %v7587_v50, 0.0  ;;  %v7676_v33 = vmax.f32 %v7664_v56, 0.0 }
0x1862   :  { %v7675_v47 = vmax.f32 %v7589_v46, 0.0  ;;  %v7677_v23 = vmax.f32 %v7666_v60, 0.0  ;;  %v7592_v40 = vpop.f32.mrb[90].mxu1  ;;  %v7669_v25 = vpop.f32.mrb[92].mxu0 }
0x1863   :  { %v7593_v6 = vadd.f32 %v7592_v40, %v7491_v21  ;;  %v7670_v63 = vadd.f32 %v7669_v25, %v7499_v54  ;;  %v7594_v52 = vpop.f32.mrb[91].mxu1  ;;  %v7671_v13 = vpop.f32.mrb[93].mxu0  ;;  %v7868_v21 = vrot.slane %v7855_v34, %v15306_v8  ;;  %v7864_v54 = vrot.slane %v7855_v34, %v15307_v38 }
0x1864   :  { %v7595_v62 = vadd.f32 %v7594_v52, %v7495_v14  ;;  %v7672_v26 = vadd.f32 %v7671_v13, %v7503_v11  ;;  %7758 = vmatprep.mubr.f32.mxu1 %v7675_v47  ;;  %7833 = vmatprep.mubr.f32.mxu0 %v7677_v23  ;;  %v7872_v14 = vrot.slane %v7855_v34, %v15308_v55 }
0x1865   :  { %7759 = vmatmul.mubr.f32.vlgmr.msra.gmra.mrb[92].mxu1 %v7674_v42  ;;  %7834 = vmatmul.mubr.f32.vlgmr.msra.gmra.mrb[94].mxu0 %v7676_v33  ;;  %v7678_v58 = vmax.f32 %v7593_v6, 0.0  ;;  %v7680_v36 = vmax.f32 %v7670_v63, 0.0 }
0x1866   :  { %v7679_v51 = vmax.f32 %v7595_v62, 0.0  ;;  %v7681_v45 = vmax.f32 %v7672_v26, 0.0  ;;  %11902 = vmatpush1.msk.msra.mxu1 %vm58_vm0, %v7846_v0  ;;  %11906 = vmatpush1.msk.msra.mxu0 %vm58_vm0, %v7848_v31 }
0x1867   :  { %8063 = vmatprep.subr.mxu1 %v8056_v61  ;;  %8138 = vmatprep.subr.mxu0 %v8058_v32 }
0x1868   :  { %7763 = vmatprep.mubr.f32.mxu1 %v7679_v51  ;;  %7838 = vmatprep.mubr.f32.mxu0 %v7681_v45 }
0x1869   :  { %7764 = vmatmul.mubr.f32.gmra.mrb[94].mxu1 %v7678_v58  ;;  %7839 = vmatmul.mubr.f32.gmra.mrb[96].mxu0 %v7680_v36 }
0x186a   :  { %7953 = vmatprep.mubr.f32.mxu1 %v15303_v30  ;;  %8030 = vmatprep.mubr.f32.mxu0 %v15303_v30 }
0x186d   :  { %11903 = vmatmul.mubr.msk.f32.vlgmr.msra.gmra.mrb[96].mxu1 %vm51_vm1, %v14318_v29  ;;  %11907 = vmatmul.mubr.msk.f32.vlgmr.msra.gmra.mrb[98].mxu0 %vm51_vm1, %v14318_v29 }
0x186e   :  { %7959 = vmatprep.mubr.f32.mxu1 %v15303_v30  ;;  %8036 = vmatprep.mubr.f32.mxu0 %v15303_v30 }
0x186f   :  { %8064 = vmatpush1.xpose.msra.mxu1 %v8055_v43  ;;  %8139 = vmatpush1.xpose.msra.mxu0 %v8057_v48 }
0x1871   :  { %11904 = vmatmul.mubr.msk.f32.gmra.mrb[98].mxu1 %vm51_vm1, %v14326_v19  ;;  %11908 = vmatmul.mubr.msk.f32.gmra.mrb[100].mxu0 %vm51_vm1, %v14326_v19 }
0x1938   :  { %v7760_v4 = vpop.f32.mrb[92].mxu1  ;;  %v7835_v35 = vpop.f32.mrb[94].mxu0 }
0x1939   :  { %v7836_v53 = vadd.f32 %v7835_v35, %v7760_v4  ;;  %v7762_v7 = vpop.f32.mrb[93].mxu1  ;;  %v7837_v5 = vpop.f32.mrb[95].mxu0 }
0x193b   :  { %v7844_v3 = vadd.f32 %v7836_v53, %v14378_v1 }
0x193c   :  { %v7765_v12 = vpop.f32.mrb[94].mxu1  ;;  %v7840_v49 = vpop.f32.mrb[96].mxu0 }
0x193d   :  { %v7841_v24 = vadd.f32 %v7840_v49, %v7765_v12  ;;  %v7767_v20 = vpop.f32.mrb[95].mxu1  ;;  %v7842_v2 = vpop.f32.mrb[97].mxu0 }
0x193f   :  { %v7845_v11 = vadd.f32 %v7841_v24, %v14384_v16 }
0x1940   :  { %v7955_v27 = vpop.f32.mrb[96].mxu1  ;;  %v8032_v28 = vpop.f32.mrb[98].mxu0 }
0x1941   :  { %v7956_v50 = vadd.f32 %v7955_v27, %v7860_v15  ;;  %v8033_v56 = vadd.f32 %v8032_v28, %v7868_v21  ;;  %v7957_v1 = vpop.f32.mrb[97].mxu1  ;;  %v8034_v22 = vpop.f32.mrb[99].mxu0 }
0x1942   :  { %v7958_v39 = vadd.f32 %v7957_v1, %v7864_v54  ;;  %v8035_v46 = vadd.f32 %v8034_v22, %v7872_v14 }
0x1943   :  { %v8043_v25 = vmax.f32 %v7956_v50, 0.0  ;;  %v8045_v0 = vmax.f32 %v8033_v56, 0.0 }
0x1944   :  { %v8044_v60 = vmax.f32 %v7958_v39, 0.0  ;;  %v8046_v47 = vmax.f32 %v8035_v46, 0.0  ;;  %v7961_v23 = vpop.f32.mrb[98].mxu1  ;;  %v8038_v40 = vpop.f32.mrb[100].mxu0 }
0x1945   :  { %v7962_v42 = vadd.f32 %v7961_v23, %v7860_v15  ;;  %v8039_v33 = vadd.f32 %v8038_v40, %v7868_v21  ;;  %v7963_v6 = vpop.f32.mrb[99].mxu1  ;;  %v8040_v63 = vpop.f32.mrb[101].mxu0 }
0x1946   :  { %v7964_v52 = vadd.f32 %v7963_v6, %v7864_v54  ;;  %v8041_v16 = vadd.f32 %v8040_v63, %v7872_v14  ;;  %8127 = vmatprep.mubr.f32.mxu1 %v8044_v60  ;;  %8202 = vmatprep.mubr.f32.mxu0 %v8046_v47 }
0x1947   :  { %8128 = vmatmul.mubr.f32.vlgmr.msra.gmra.mrb[100].mxu1 %v8043_v25  ;;  %8203 = vmatmul.mubr.f32.vlgmr.msra.gmra.mrb[102].mxu0 %v8045_v0  ;;  %v8047_v62 = vmax.f32 %v7962_v42, 0.0  ;;  %v8049_v26 = vmax.f32 %v8039_v33, 0.0  ;;  %v11909_v42 = vld [vmem:[#allocation2 + $0x1c] ss:$0 sm:$0xff] }
0x1948   :  { %v8048_v13 = vmax.f32 %v7964_v52, 0.0  ;;  %v8050_v31 = vmax.f32 %v8041_v16, 0.0 }
0x194a   :  { %8132 = vmatprep.mubr.f32.mxu1 %v8048_v13  ;;  %8207 = vmatprep.mubr.f32.mxu0 %v8050_v31 }
0x194b   :  { %8133 = vmatmul.mubr.f32.gmra.mrb[102].mxu1 %v8047_v62  ;;  %8208 = vmatmul.mubr.f32.gmra.mrb[104].mxu0 %v8049_v26 }
0x1a1a   :  { %v8129_v51 = vpop.f32.mrb[100].mxu1  ;;  %v8204_v45 = vpop.f32.mrb[102].mxu0 }
0x1a1b   :  { %v8205_v58 = vadd.f32 %v8204_v45, %v8129_v51  ;;  %v8131_v36 = vpop.f32.mrb[101].mxu1  ;;  %v8206_v9 = vpop.f32.mrb[103].mxu0 }
0x1a1d   :  { %v8213_v44 = vadd.f32 %v8205_v58, %v7844_v3 }
0x1a1e   :  { %v8134_v61 = vpop.f32.mrb[102].mxu1  ;;  %v8209_v32 = vpop.f32.mrb[104].mxu0 }
0x1a1f   :  { %v8210_v43 = vadd.f32 %v8209_v32, %v8134_v61  ;;  %v8136_v41 = vpop.f32.mrb[103].mxu1  ;;  %v8211_v48 = vpop.f32.mrb[105].mxu0  ;;  %v8216_v4 = vadd.f32 %v8215_v17, %v8213_v44 }
0x1a21   :  { %v8214_v35 = vadd.f32 %v8210_v43, %v7845_v11  ;;  %v8218_v53 = vadd.f32 %v8216_v4, %v14318_v29 }
0x1a23   :  { %v8220_v7 = vsel %vm51_vm1, %v8218_v53, 0.0  ;;  %v8217_v5 = vadd.f32 %v8215_v17, %v8214_v35 }
0x1a24   :  { %8221 = vadd.xlane.f32.xlu1 %v8220_v7 }
0x1a25   :  { %v8219_v34 = vadd.f32 %v8217_v5, %v14326_v19  ;;  %v8257_v19 = vld [vmem:[#allocation2 + $0x18] sm:$0xf] }
0x1a26   :  { %12051 = vmatprep.subr.msk.mxu1 %vm58_vm0, %v8257_v19 }
0x1a27   :  { %v8223_v12 = vsel %vm51_vm1, %v8219_v34, 0.0  ;;  %12052 = vmatpush3.msk.msra.mxu1 %vm58_vm0, %v8257_v19 }
0x1a28   :  { %8224 = vadd.xlane.f32.xlu0 %v8223_v12 }
0x1ab1   :  { %v8222_v49 = vpop.xlane.xlu1 %8221 }
0x1ab2   :  { %v8226_v3 = vmul.f32 0.25, %v8222_v49 }
0x1ab4   :  { %v8228_v24 = vsub.f32 %v8218_v53, %v8226_v3 }
0x1ab5   :  { %v8225_v20 = vpop.xlane.xlu0 %8224 }
0x1ab6   :  { %v8227_v2 = vmul.f32 0.25, %v8225_v20  ;;  %v8230_v15 = vmul.f32 %v8228_v24, %v8228_v24 }
0x1ab8   :  { %v8229_v21 = vsub.f32 %v8219_v34, %v8227_v2  ;;  %v8232_v54 = vsel %vm51_vm1, %v8230_v15, 0.0 }
0x1ab9   :  { %8233 = vadd.xlane.f32.xlu0 %v8232_v54 }
0x1aba   :  { %v8231_v29 = vmul.f32 %v8229_v21, %v8229_v21 }
0x1abc   :  { %v8235_v14 = vsel %vm51_vm1, %v8231_v29, 0.0 }
0x1abd   :  { %8236 = vadd.xlane.f32.xlu1 %v8235_v14 }
0x1ace   :  { %8251 = vrot.lane.b32.xlu1 %v14308_v59, %s12633_s1 }
0x1acf   :  { %8246 = vrot.lane.b32.xlu0 %v14308_v59, %s12634_s9 }
0x1b46   :  { %v8234_v11 = vpop.xlane.xlu0 %8233 }
0x1b47   :  { %v8238_v27 = vmul.f32 0.25, %v8234_v11 }
0x1b49   :  { %v8240_v28 = vadd.f32 1e-05, %v8238_v27 }
0x1b4a   :  { %v8237_v50 = vpop.xlane.xlu1 %8236  ;;  %v8247_v39 = vpop.permute.xlu0 %8246 }
0x1b4b   :  { %12389 = vrsqrt.f32 %v8240_v28  ;;  %v8239_v56 = vmul.f32 0.25, %v8237_v50 }
0x1b4d   :  { %v8241_v1 = vadd.f32 1e-05, %v8239_v56 }
0x1b4e   :  { %v8252_v60 = vpop.permute.xlu1 %8251 }
0x1b4f   :  { %12391 = vrsqrt.f32 %v8241_v1 }
0x1b55   :  { %v12390_v22 = vpop.eup %12389 }
0x1b56   :  { %v8244_v46 = vmul.f32 %v12390_v22, %v8228_v24 }
0x1b58   :  { %v8249_v47 = vmul.f32 %v8247_v39, %v8244_v46  ;;  %v14486_v46 = vld [vmem:[#allocation2 + $0x28] sm:$0xf] }
0x1b59   :  { %v12392_v23 = vpop.eup %12391  ;;  %12061 = vmatprep.subr.msk.mxu1 %vm58_vm0, %v14486_v46 }
0x1b5a   :  { %v8245_v59 = vmul.f32 %v12392_v23, %v8229_v21  ;;  %v14416_v40 = vadd.f32 %v8252_v60, %v8249_v47 }
0x1b5c   :  { %15309 = vst [vmem:[#allocation17_spill] sm:$0xff] %v14416_v40  ;;  %v8250_v25 = vmul.f32 %v8247_v39, %v8245_v59  ;;  %12053 = vmatprep.mubr.msk.f32.mxu1 %vm51_vm1, %v14416_v40 }
0x1b5e   :  { %v14420_v0 = vadd.f32 %v8252_v60, %v8250_v25 }
0x1b60   :  { %15310 = vst [vmem:[#allocation18_spill] sm:$0xff] %v14420_v0  ;;  %12054 = vmatmul.mubr.msk.f32.vlgmr.msra.gmra.mrb[104].mxu1 %vm51_vm1, %v14420_v0 }
0x1b61   :  { %12062 = vmatpush3.msk.msra.mxu1 %vm58_vm0, %v14486_v46 }
0x1c33   :  { %v12055_v33 = vpop.f32.mrb[104].mxu1 }
0x1c34   :  { %v8344_v6 = vadd.f32 %v12055_v33, %v11909_v42  ;;  %v8338_v63 = vpop.f32.mrb[105].mxu1 }
0x1c35   :  { %v8339_v52 = vadd.f32 %v11909_v42, %v8338_v63 }
0x1c36   :  { %8529 = vrot.lane.b32.xlu0 %v8344_v6, %s12621_s15  ;;  %v8398_v16 = vcombine.high %v8344_v6, %v8344_v6  ;;  %v8405_v31 = vrot.slane %v8344_v6, %v15304_v57 }
0x1c37   :  { %8527 = vrot.lane.b32.xlu1 %v8339_v52, %s12621_s15  ;;  %v8349_v13 = vcombine.high %v8339_v52, %v8339_v52  ;;  %v8356_v26 = vrot.slane %v8339_v52, %v15304_v57 }
0x1c38   :  { %v8412_v62 = vrot.slane %v8398_v16, %v15304_v57  ;;  %v8413_v45 = vcombine.high %v8405_v31, %v8405_v31  ;;  %v8421_v17 = vrot.slane %v8405_v31, %v15304_v57 }
0x1c39   :  { %v8363_v51 = vrot.slane %v8349_v13, %v15304_v57  ;;  %v8364_v36 = vcombine.high %v8356_v26, %v8356_v26  ;;  %v14439_v43 = vrot.slane %v8356_v26, %v15304_v57 }
0x1c3a   :  { %8855 = vrot.lane.b32.xlu0 %v8344_v6, %s12620_s2  ;;  %v8414_v58 = vcombine.high %v8412_v62, %v8412_v62  ;;  %v8428_v44 = vrot.slane %v8412_v62, %v15304_v57  ;;  %v8435_v61 = vrot.slane %v8413_v45, %v15304_v57  ;;  %v8443_v35 = vcombine.high %v8421_v17, %v8421_v17 }
0x1c3b   :  { %8853 = vrot.lane.b32.xlu1 %v8339_v52, %s12620_s2  ;;  %v8365_v9 = vcombine.high %v8363_v51, %v8363_v51  ;;  %v14442_v41 = vrot.slane %v8363_v51, %v15304_v57  ;;  %v14445_v48 = vrot.slane %v8364_v36, %v15304_v57  ;;  %v8394_v34 = vcombine.high %v14439_v43, %v14439_v43 }
0x1c3c   :  { %v8442_v32 = vrot.slane %v8414_v58, %v15304_v57  ;;  %v8444_v53 = vcombine.high %v8428_v44, %v8428_v44  ;;  %v8445_v7 = vcombine.high %v8435_v61, %v8435_v61  ;;  %v8482_v24 = vrot.slane %v8421_v17, %v15305_v18 }
0x1c3d   :  { %v14448_v4 = vrot.slane %v8365_v9, %v15304_v57  ;;  %v8395_v12 = vcombine.high %v14442_v41, %v14442_v41  ;;  %v8396_v49 = vcombine.high %v14445_v48, %v14445_v48  ;;  %v8486_v20 = vrot.slane %v8435_v61, %v15305_v18 }
0x1c3e   :  { %9020 = vrot.lane.b32.xlu0 %v11909_v42, %s12622_s16  ;;  %v8446_v5 = vcombine.high %v8442_v32, %v8442_v32  ;;  %v8490_v2 = vrot.slane %v8443_v35, %v15305_v18  ;;  %v8498_v15 = vrot.slane %v8428_v44, %v15305_v18  ;;  %v8494_v21 = vrot.slane %v8445_v7, %v15305_v18 }
0x1c3f   :  { %9017 = vrot.lane.b32.xlu1 %v8257_v19, %s12622_s16  ;;  %v8397_v3 = vcombine.high %v14448_v4, %v14448_v4  ;;  %v8502_v54 = vrot.slane %v8442_v32, %v15305_v18  ;;  %v8506_v29 = vrot.slane %v8444_v53, %v15305_v18  ;;  %v8450_v14 = vrot.slane %v14439_v43, %v15305_v18 }
0x1c40   :  { %v8510_v19 = vrot.slane %v8446_v5, %v15305_v18  ;;  %v8454_v11 = vrot.slane %v14445_v48, %v15305_v18  ;;  %v14471_v27 = vrot.slane %v8394_v34, %v15305_v18  ;;  %v8466_v28 = vrot.slane %v14442_v41, %v15305_v18 }
0x1c41   :  { %v14476_v50 = vrot.slane %v8396_v49, %v15305_v18  ;;  %v14481_v1 = vrot.slane %v8395_v12, %v15305_v18  ;;  %v14484_v22 = vrot.slane %v8397_v3, %v15305_v18 }
0x1ca8   :  { %v8530_v39 = vpop.permute.xlu0 %8529 }
0x1ca9   :  { %v14488_v60 = vmul.f32 %v8530_v39, %v8482_v24  ;;  %v14490_v47 = vmul.f32 %v8530_v39, %v8486_v20  ;;  %v14492_v23 = vmul.f32 %v8530_v39, %v8490_v2  ;;  %v14494_v59 = vmul.f32 %v8530_v39, %v8494_v21  ;;  %v14496_v25 = vpop.permute.xlu1 %8527 }
0x1caa   :  { %v14500_v42 = vmul.f32 %v8530_v39, %v8498_v15  ;;  %v14502_v33 = vmul.f32 %v8530_v39, %v8502_v54  ;;  %v14504_v6 = vmul.f32 %v8530_v39, %v8506_v29  ;;  %v14506_v63 = vmul.f32 %v8530_v39, %v8510_v19 }
0x1cab   :  { %v8605_v52 = vsel %vm51_vm1, %v14488_v60, -inf  ;;  %v8612_v16 = vsel %vm51_vm1, %v14490_v47, -inf  ;;  %v8619_v13 = vsel %vm51_vm1, %v14492_v23, -inf  ;;  %v8626_v31 = vsel %vm51_vm1, %v14494_v59, -inf }
0x1cac   :  { %v8606_v62 = vrot.slane %v8605_v52, 4  ;;  %v8613_v26 = vrot.slane %v8612_v16, 4  ;;  %v8620_v51 = vrot.slane %v8619_v13, 4  ;;  %v8627_v45 = vrot.slane %v8626_v31, 4 }
0x1cad   :  { %v8633_v58 = vsel %vm51_vm1, %v14500_v42, -inf  ;;  %v8640_v36 = vsel %vm51_vm1, %v14502_v33, -inf  ;;  %v8647_v9 = vsel %vm51_vm1, %v14504_v6, -inf  ;;  %v8654_v17 = vsel %vm51_vm1, %v14506_v63, -inf  ;;  %v14526_v44 = vpop.permute.xlu1 %8853 }
0x1cae   :  { %v8607_v61 = vmax.f32 %v8605_v52, %v8606_v62  ;;  %v8614_v32 = vmax.f32 %v8612_v16, %v8613_v26  ;;  %v8621_v35 = vmax.f32 %v8619_v13, %v8620_v51  ;;  %v8628_v53 = vmax.f32 %v8626_v31, %v8627_v45 }
0x1caf   :  { %v8634_v7 = vrot.slane %v8633_v58, 4  ;;  %v8641_v5 = vrot.slane %v8640_v36, 4  ;;  %v8648_v34 = vrot.slane %v8647_v9, 4  ;;  %v8655_v12 = vrot.slane %v8654_v17, 4 }
0x1cb0   :  { %v8608_v49 = vrot.slane %v8607_v61, 2  ;;  %v8615_v3 = vrot.slane %v8614_v32, 2  ;;  %v8622_v24 = vrot.slane %v8621_v35, 2  ;;  %v8629_v20 = vrot.slane %v8628_v53, 2 }
0x1cb1   :  { %v8635_v2 = vmax.f32 %v8633_v58, %v8634_v7  ;;  %v8642_v15 = vmax.f32 %v8640_v36, %v8641_v5  ;;  %v8649_v21 = vmax.f32 %v8647_v9, %v8648_v34  ;;  %v8656_v54 = vmax.f32 %v8654_v17, %v8655_v12  ;;  %v9018_v29 = vpop.permute.xlu1 %9017 }
0x1cb2   :  { %v8609_v19 = vmax.f32 %v8607_v61, %v8608_v49  ;;  %v8616_v39 = vmax.f32 %v8614_v32, %v8615_v3  ;;  %v8623_v56 = vmax.f32 %v8621_v35, %v8622_v24  ;;  %v8630_v52 = vmax.f32 %v8628_v53, %v8629_v20  ;;  %12056 = vmatprep.subr.msk.mxu0 %vm58_vm0, %v9018_v29 }
0x1cb3   :  { %v8636_v16 = vrot.slane %v8635_v2, 2  ;;  %v8643_v13 = vrot.slane %v8642_v15, 2  ;;  %v8650_v31 = vrot.slane %v8649_v21, 2  ;;  %v8657_v62 = vrot.slane %v8656_v54, 2  ;;  %12057 = vmatpush3.msk.msra.mxu0 %vm58_vm0, %v9018_v29 }
0x1cb4   :  { %v8610_v26 = vrot.slane %v8609_v19, 1  ;;  %v8617_v51 = vrot.slane %v8616_v39, 1  ;;  %v8624_v45 = vrot.slane %v8623_v56, 1  ;;  %v8631_v58 = vrot.slane %v8630_v52, 1  ;;  %12066 = vmatprep.subr.msk.mxu0 %vm58_vm0, %v14486_v46 }
0x1cb5   :  { %v8637_v36 = vmax.f32 %v8635_v2, %v8636_v16  ;;  %v8644_v9 = vmax.f32 %v8642_v15, %v8643_v13  ;;  %v8651_v17 = vmax.f32 %v8649_v21, %v8650_v31  ;;  %v8658_v61 = vmax.f32 %v8656_v54, %v8657_v62 }
0x1cb6   :  { %v8611_v32 = vmax.f32 %v8609_v19, %v8610_v26  ;;  %v8618_v35 = vmax.f32 %v8616_v39, %v8617_v51  ;;  %v8625_v53 = vmax.f32 %v8623_v56, %v8624_v45  ;;  %v8632_v7 = vmax.f32 %v8630_v52, %v8631_v58 }
0x1cb7   :  { %v8638_v5 = vrot.slane %v8637_v36, 1  ;;  %v8645_v34 = vrot.slane %v8644_v9, 1  ;;  %v8652_v12 = vrot.slane %v8651_v17, 1  ;;  %v8659_v49 = vrot.slane %v8658_v61, 1 }
0x1cb8   :  { %v8669_v3 = vsub.f32 %v14488_v60, %v8611_v32  ;;  %v8670_v24 = vsub.f32 %v14490_v47, %v8618_v35  ;;  %v8671_v20 = vsub.f32 %v14492_v23, %v8625_v53  ;;  %v8672_v29 = vsub.f32 %v14494_v59, %v8632_v7 }
0x1cb9   :  { %v8639_v2 = vmax.f32 %v8637_v36, %v8638_v5  ;;  %v8646_v15 = vmax.f32 %v8644_v9, %v8645_v34  ;;  %v8653_v21 = vmax.f32 %v8651_v17, %v8652_v12  ;;  %v8660_v54 = vmax.f32 %v8658_v61, %v8659_v49 }
0x1cba   :  { %v8693_v19 = vmul.f32 1.442695, %v8669_v3  ;;  %v8695_v39 = vmul.f32 1.442695, %v8670_v24  ;;  %v8697_v56 = vmul.f32 1.442695, %v8671_v20  ;;  %v14540_v52 = vmul.f32 %v14496_v25, %v8450_v14 }
0x1cbb   :  { %v8673_v60 = vsub.f32 %v14500_v42, %v8639_v2  ;;  %v8674_v47 = vsub.f32 %v14502_v33, %v8646_v15  ;;  %v8675_v23 = vsub.f32 %v14504_v6, %v8653_v21  ;;  %v8676_v59 = vsub.f32 %v14506_v63, %v8660_v54 }
0x1cbc   :  { %12393 = vpow2.f32 %v8693_v19  ;;  %v8699_v16 = vmul.f32 1.442695, %v8672_v29  ;;  %v14550_v13 = vmul.f32 %v14496_v25, %v8454_v11  ;;  %v14554_v43 = vmul.f32 %v14496_v25, %v14471_v27 }
0x1cbd   :  { %12395 = vpow2.f32 %v8695_v39  ;;  %v8701_v14 = vmul.f32 1.442695, %v8673_v60  ;;  %v8703_v42 = vmul.f32 1.442695, %v8674_v47  ;;  %v8705_v33 = vmul.f32 1.442695, %v8675_v23 }
0x1cbe   :  { %12397 = vpow2.f32 %v8697_v56  ;;  %v8707_v6 = vmul.f32 1.442695, %v8676_v59  ;;  %v14558_v63 = vmul.f32 %v14496_v25, %v14476_v50  ;;  %v14564_v48 = vmul.f32 %v14496_v25, %v8466_v28 }
0x1cbf   :  { %12399 = vpow2.f32 %v8699_v16  ;;  %v15311_v11 = vrot.slane %v14448_v4, %v15305_v18  ;;  %v14574_v31 = vmul.f32 %v14496_v25, %v14481_v1  ;;  %v14578_v50 = vmul.f32 %v14496_v25, %v14484_v22 }
0x1cc0   :  { %12401 = vpow2.f32 %v8701_v14  ;;  %v8549_v41 = vsel %vm51_vm1, %v14540_v52, -inf  ;;  %v8556_v28 = vsel %vm51_vm1, %v14550_v13, -inf  ;;  %v8563_v4 = vsel %vm51_vm1, %v14554_v43, -inf }
0x1cc1   :  { %v14570_v27 = vmul.f32 %v14496_v25, %v15311_v11  ;;  %12403 = vpow2.f32 %v8703_v42  ;;  %v8550_v62 = vrot.slane %v8549_v41, 4  ;;  %v8557_v26 = vrot.slane %v8556_v28, 4 }
0x1cc2   :  { %v8564_v51 = vrot.slane %v8563_v4, 4  ;;  %12405 = vpow2.f32 %v8705_v33  ;;  %v8570_v1 = vsel %vm51_vm1, %v14558_v63, -inf  ;;  %v8577_v22 = vsel %vm51_vm1, %v14564_v48, -inf }
0x1cc3   :  { %v8584_v25 = vsel %vm51_vm1, %v14570_v27, -inf  ;;  %12407 = vpow2.f32 %v8707_v6  ;;  %v8551_v45 = vmax.f32 %v8549_v41, %v8550_v62  ;;  %v8558_v58 = vmax.f32 %v8556_v28, %v8557_v26 }
0x1cc4   :  { %v8565_v36 = vmax.f32 %v8563_v4, %v8564_v51  ;;  %v8571_v9 = vrot.slane %v8570_v1, 4  ;;  %v8578_v17 = vrot.slane %v8577_v22, 4  ;;  %v8585_v61 = vrot.slane %v8584_v25, 4 }
0x1cc5   :  { %v14594_v32 = vsel %vm51_vm1, %v14574_v31, -inf  ;;  %v8552_v35 = vrot.slane %v8551_v45, 2  ;;  %v8559_v53 = vrot.slane %v8558_v58, 2  ;;  %v8598_v24 = vsel %vm51_vm1, %v14578_v50, -inf }
0x1cc6   :  { %v8566_v7 = vrot.slane %v8565_v36, 2  ;;  %v8592_v5 = vrot.slane %v14594_v32, 4  ;;  %v14597_v34 = vpop.eup %12393  ;;  %v8572_v12 = vmax.f32 %v8570_v1, %v8571_v9  ;;  %v8579_v49 = vmax.f32 %v8577_v22, %v8578_v17 }
0x1cc7   :  { %v8586_v3 = vmax.f32 %v8584_v25, %v8585_v61  ;;  %v14601_v20 = vpop.eup %12395  ;;  %v8765_v29 = vsel %vm51_vm1, %v14597_v34, 0.0  ;;  %v8553_v2 = vmax.f32 %v8551_v45, %v8552_v35  ;;  %v8560_v15 = vmax.f32 %v8558_v58, %v8559_v53 }
0x1cc8   :  { %v8567_v21 = vmax.f32 %v8565_v36, %v8566_v7  ;;  %v14605_v54 = vpop.eup %12397  ;;  %v8766_v19 = vrot.slane %v8765_v29, 4  ;;  %v8772_v39 = vsel %vm51_vm1, %v14601_v20, 0.0  ;;  %v8573_v56 = vrot.slane %v8572_v12, 2 }
0x1cc9   :  { %v8580_v60 = vrot.slane %v8579_v49, 2  ;;  %v14609_v47 = vpop.eup %12399  ;;  %v8773_v23 = vrot.slane %v8772_v39, 4  ;;  %v8779_v59 = vsel %vm51_vm1, %v14605_v54, 0.0  ;;  %v8554_v16 = vrot.slane %v8553_v2, 1 }
0x1cca   :  { %v8561_v14 = vrot.slane %v8560_v15, 1  ;;  %v14613_v42 = vpop.eup %12401  ;;  %v14615_v33 = vadd.f32 %v8766_v19, %v8765_v29  ;;  %v8780_v6 = vrot.slane %v8779_v59, 4  ;;  %v8786_v11 = vsel %vm51_vm1, %v14609_v47, 0.0 }
0x1ccb   :  { %v8568_v41 = vrot.slane %v8567_v21, 1  ;;  %v14619_v28 = vpop.eup %12403  ;;  %v14621_v4 = vadd.f32 %v8773_v23, %v8772_v39  ;;  %v8787_v62 = vrot.slane %v8786_v11, 4  ;;  %v8793_v26 = vsel %vm51_vm1, %v14613_v42, 0.0 }
0x1ccc   :  { %v8555_v51 = vmax.f32 %v8553_v2, %v8554_v16  ;;  %v14625_v1 = vpop.eup %12405  ;;  %v8768_v22 = vrot.slane %v14615_v33, 2  ;;  %v14628_v25 = vadd.f32 %v8780_v6, %v8779_v59  ;;  %v8794_v45 = vrot.slane %v8793_v26, 4 }
0x1ccd   :  { %v8800_v58 = vsel %vm51_vm1, %v14619_v28, 0.0  ;;  %v14632_v36 = vpop.eup %12407  ;;  %v8775_v9 = vrot.slane %v14621_v4, 2  ;;  %v8788_v17 = vadd.f32 %v8787_v62, %v8786_v11  ;;  %v8807_v35 = vsel %vm51_vm1, %v14625_v1, 0.0 }
0x1cce   :  { %v8801_v61 = vrot.slane %v8800_v58, 4  ;;  %v8782_v53 = vrot.slane %v14628_v25, 2  ;;  %v8795_v7 = vadd.f32 %v8794_v45, %v8793_v26  ;;  %v8808_v29 = vrot.slane %v8807_v35, 4 }
0x1ccf   :  { %v8814_v2 = vsel %vm51_vm1, %v14632_v36, 0.0  ;;  %v8789_v19 = vrot.slane %v8788_v17, 2  ;;  %v8562_v59 = vmax.f32 %v8560_v15, %v8561_v14  ;;  %v8569_v55 = vmax.f32 %v8567_v21, %v8568_v41 }
0x1cd0   :  { %v8802_v39 = vadd.f32 %v8801_v61, %v8800_v58  ;;  %v8815_v23 = vrot.slane %v8814_v2, 4  ;;  %v8796_v16 = vrot.slane %v8795_v7, 2  ;;  %v8809_v6 = vadd.f32 %v8808_v29, %v8807_v35 }
0x1cd1   :  { %v8574_v38 = vmax.f32 %v8572_v12, %v8573_v56  ;;  %v8581_v8 = vmax.f32 %v8579_v49, %v8580_v60  ;;  %v8587_v18 = vrot.slane %v8586_v3, 2  ;;  %v8593_v26 = vmax.f32 %v14594_v32, %v8592_v5 }
0x1cd2   :  { %v8803_v11 = vrot.slane %v8802_v39, 2  ;;  %v8816_v62 = vadd.f32 %v8815_v23, %v8814_v2  ;;  %v8810_v57 = vrot.slane %v8809_v6, 2  ;;  %v8599_v45 = vrot.slane %v8598_v24, 4 }
0x1cd3   :  { %v8575_v40 = vrot.slane %v8574_v38, 1  ;;  %v8582_v30 = vrot.slane %v8581_v8, 1  ;;  %v8588_v10 = vmax.f32 %v8586_v3, %v8587_v18  ;;  %v8661_v58 = vsub.f32 %v14540_v52, %v8555_v51 }
0x1cd4   :  { %v8817_v0 = vrot.slane %v8816_v62, 2  ;;  %v8594_v15 = vrot.slane %v8593_v26, 2  ;;  %v8600_v14 = vmax.f32 %v8598_v24, %v8599_v45  ;;  %v8662_v21 = vsub.f32 %v14550_v13, %v8562_v59 }
0x1cd5   :  { %v8576_v61 = vmax.f32 %v8574_v38, %v8575_v40  ;;  %v8583_v12 = vmax.f32 %v8581_v8, %v8582_v30  ;;  %v8589_v56 = vrot.slane %v8588_v10, 1  ;;  %v8663_v49 = vsub.f32 %v14554_v43, %v8569_v55 }
0x1cd6   :  { %v8677_v60 = vmul.f32 1.442695, %v8661_v58  ;;  %v8595_v41 = vmax.f32 %v8593_v26, %v8594_v15  ;;  %v8601_v35 = vrot.slane %v8600_v14, 2  ;;  %v8679_v5 = vmul.f32 1.442695, %v8662_v21 }
0x1cd7   :  { %v8664_v32 = vsub.f32 %v14558_v63, %v8576_v61  ;;  %v8590_v29 = vmax.f32 %v8588_v10, %v8589_v56  ;;  %v8665_v18 = vsub.f32 %v14564_v48, %v8583_v12  ;;  %v8681_v52 = vmul.f32 1.442695, %v8663_v49 }
0x1cd8   :  { %12409 = vpow2.f32 %v8677_v60  ;;  %v8596_v38 = vrot.slane %v8595_v41, 1  ;;  %v8602_v40 = vmax.f32 %v8600_v14, %v8601_v35  ;;  %v8769_v55 = vadd.f32 %v8768_v22, %v14615_v33 }
0x1cd9   :  { %12411 = vpow2.f32 %v8679_v5  ;;  %v8683_v3 = vmul.f32 1.442695, %v8664_v32  ;;  %v8666_v30 = vsub.f32 %v14570_v27, %v8590_v29  ;;  %v8685_v8 = vmul.f32 1.442695, %v8665_v18 }
0x1cda   :  { %12413 = vpow2.f32 %v8681_v52  ;;  %v8597_v13 = vmax.f32 %v8595_v41, %v8596_v38  ;;  %v8603_v43 = vrot.slane %v8602_v40, 1  ;;  %v8776_v63 = vadd.f32 %v8775_v9, %v14621_v4 }
0x1cdb   :  { %12415 = vpow2.f32 %v8683_v3  ;;  %v8687_v10 = vmul.f32 1.442695, %v8666_v30  ;;  %v8770_v48 = vrot.slane %v8769_v55, 1  ;;  %v8783_v24 = vadd.f32 %v8782_v53, %v14628_v25 }
0x1cdc   :  { %12417 = vpow2.f32 %v8685_v8  ;;  %v14650_v51 = vmax.f32 %v8602_v40, %v8603_v43  ;;  %v8667_v2 = vsub.f32 %v14574_v31, %v8597_v13  ;;  %v8777_v23 = vrot.slane %v8776_v63, 1 }
0x1cdd   :  { %v8790_v27 = vadd.f32 %v8789_v19, %v8788_v17  ;;  %12419 = vpow2.f32 %v8687_v10  ;;  %v8771_v59 = vadd.f32 %v8770_v48, %v8769_v55  ;;  %v8784_v26 = vrot.slane %v8783_v24, 1 }
0x1cde   :  { %v8797_v33 = vadd.f32 %v8796_v16, %v8795_v7  ;;  %v8689_v22 = vmul.f32 1.442695, %v8667_v2  ;;  %v8804_v61 = vadd.f32 %v8803_v11, %v8802_v39  ;;  %v8811_v4 = vadd.f32 %v8810_v57, %v8809_v6 }
0x1cdf   :  { %v8791_v45 = vrot.slane %v8790_v27, 1  ;;  %v8668_v9 = vsub.f32 %v14578_v50, %v14650_v51  ;;  %v8778_v25 = vadd.f32 %v8777_v23, %v8776_v63  ;;  %v8818_v53 = vadd.f32 %v8817_v0, %v8816_v62 }
0x1ce0   :  { %v8798_v58 = vrot.slane %v8797_v33, 1  ;;  %12421 = vpow2.f32 %v8689_v22  ;;  %v8785_v31 = vadd.f32 %v8784_v26, %v8783_v24  ;;  %v8805_v14 = vrot.slane %v8804_v61, 1 }
0x1ce1   :  { %v8812_v17 = vrot.slane %v8811_v4, 1  ;;  %12423 = vrcp.f32 %v8771_v59  ;;  %v8792_v16 = vadd.f32 %v8791_v45, %v8790_v27  ;;  %v8819_v57 = vrot.slane %v8818_v53, 1 }
0x1ce2   :  { %v14655_v15 = vpop.eup %12409  ;;  %v8799_v39 = vadd.f32 %v8798_v58, %v8797_v33  ;;  %v8806_v11 = vadd.f32 %v8805_v14, %v8804_v61  ;;  %12425 = vrcp.f32 %v8778_v25  ;;  %v8691_v23 = vmul.f32 1.442695, %v8668_v9  ;;  %v14682_v58 = vpop.permute.xlu0 %8855 }
0x1ce3   :  { %v14657_v19 = vpop.eup %12411  ;;  %v8709_v7 = vsel %vm51_vm1, %v14655_v15, 0.0  ;;  %v8813_v62 = vadd.f32 %v8812_v17, %v8811_v4  ;;  %v8820_v49 = vadd.f32 %v8819_v57, %v8818_v53  ;;  %12427 = vrcp.f32 %v8785_v31 }
0x1ce4   :  { %v14661_v6 = vpop.eup %12413  ;;  %v8710_v50 = vrot.slane %v8709_v7, 4  ;;  %v8716_v0 = vsel %vm51_vm1, %v14657_v19, 0.0  ;;  %12429 = vrcp.f32 %v8792_v16 }
0x1ce5   :  { %v14665_v21 = vpop.eup %12415  ;;  %v8717_v12 = vrot.slane %v8716_v0, 4  ;;  %v8723_v56 = vsel %vm51_vm1, %v14661_v6, 0.0  ;;  %12431 = vrcp.f32 %v8799_v39 }
0x1ce6   :  { %v14669_v60 = vpop.eup %12417  ;;  %v8711_v41 = vadd.f32 %v8710_v50, %v8709_v7  ;;  %v8724_v35 = vrot.slane %v8723_v56, 4  ;;  %v8730_v32 = vsel %vm51_vm1, %v14665_v21, 0.0  ;;  %12433 = vrcp.f32 %v8806_v11 }
0x1ce7   :  { %v8718_v5 = vadd.f32 %v8717_v12, %v8716_v0  ;;  %v8731_v29 = vrot.slane %v8730_v32, 4  ;;  %v8737_v18 = vsel %vm51_vm1, %v14669_v60, 0.0  ;;  %v14675_v52 = vpop.eup %12419  ;;  %12435 = vrcp.f32 %v8813_v62 }
0x1ce8   :  { %v8712_v38 = vrot.slane %v8711_v41, 2  ;;  %v8725_v40 = vadd.f32 %v8724_v35, %v8723_v56  ;;  %v8738_v3 = vrot.slane %v8737_v18, 4  ;;  %v8744_v55 = vsel %vm51_vm1, %v14675_v52, 0.0 }
0x1ce9   :  { %v8719_v30 = vrot.slane %v8718_v5, 2  ;;  %v8732_v8 = vadd.f32 %v8731_v29, %v8730_v32  ;;  %v8745_v63 = vrot.slane %v8744_v55, 4  ;;  %12437 = vrcp.f32 %v8820_v49 }
0x1cea   :  { %v8726_v13 = vrot.slane %v8725_v40, 2  ;;  %v8739_v43 = vadd.f32 %v8738_v3, %v8737_v18  ;;  %v14679_v10 = vpop.eup %12421  ;;  %v8713_v24 = vadd.f32 %v8712_v38, %v8711_v41  ;;  %12439 = vpow2.f32 %v8691_v23 }
0x1ceb   :  { %v8733_v48 = vrot.slane %v8732_v8, 2  ;;  %v8720_v51 = vadd.f32 %v8719_v30, %v8718_v5  ;;  %v12424_v2 = vpop.eup %12423  ;;  %v8746_v45 = vadd.f32 %v8745_v63, %v8744_v55  ;;  %v8751_v9 = vsel %vm51_vm1, %v14679_v10, 0.0 }
0x1cec   :  { %v8740_v27 = vrot.slane %v8739_v43, 2  ;;  %v8838_v59 = vmul.f32 %v12424_v2, %v14597_v34  ;;  %v8714_v26 = vrot.slane %v8713_v24, 1  ;;  %v8727_v22 = vadd.f32 %v8726_v13, %v8725_v40  ;;  %v12426_v4 = vpop.eup %12425 }
0x1ced   :  { %v8721_v33 = vrot.slane %v8720_v51, 1  ;;  %v8734_v61 = vadd.f32 %v8733_v48, %v8732_v8  ;;  %v12428_v14 = vpop.eup %12427  ;;  %v8840_v17 = vmul.f32 %v12426_v4, %v14601_v20  ;;  %v8747_v0 = vrot.slane %v8746_v45, 2 }
0x1cee   :  { %v8867_v25 = vmul.f32 %v14682_v58, %v8838_v59  ;;  %v8715_v53 = vadd.f32 %v8714_v26, %v8713_v24  ;;  %v8741_v34 = vadd.f32 %v8740_v27, %v8739_v43  ;;  %v12430_v7 = vpop.eup %12429  ;;  %v8842_v16 = vmul.f32 %v12428_v14, %v14605_v54 }
0x1cef   :  { %v8722_v31 = vadd.f32 %v8721_v33, %v8720_v51  ;;  %v8728_v57 = vrot.slane %v8727_v22, 1  ;;  %v12432_v50 = vpop.eup %12431  ;;  %v8868_v11 = vmul.f32 %v14682_v58, %v8840_v17  ;;  %v8735_v12 = vrot.slane %v8734_v61, 1 }
0x1cf0   :  { %v8931_v39 = vsel %vm51_vm1, %v8867_v25, 0.0  ;;  %12441 = vrcp.f32 %v8715_v53  ;;  %v12434_v56 = vpop.eup %12433  ;;  %v8844_v49 = vmul.f32 %v12430_v7, %v14609_v47  ;;  %v8846_v41 = vmul.f32 %v12432_v50, %v14613_v42 }
0x1cf1   :  { %v8932_v62 = vrot.slane %v8931_v39, 4  ;;  %v8869_v20 = vmul.f32 %v14682_v58, %v8842_v16  ;;  %12443 = vrcp.f32 %v8722_v31  ;;  %v12436_v35 = vpop.eup %12435  ;;  %v8938_v32 = vsel %vm51_vm1, %v8868_v11, 0.0 }
0x1cf2   :  { %v8742_v5 = vrot.slane %v8741_v34, 1  ;;  %v8752_v29 = vrot.slane %v8751_v9, 4  ;;  %v8939_v18 = vrot.slane %v8938_v32, 4  ;;  %v8729_v38 = vadd.f32 %v8728_v57, %v8727_v22 }
0x1cf3   :  { %v8933_v54 = vadd.f32 %v8932_v62, %v8931_v39  ;;  %v12438_v40 = vpop.eup %12437  ;;  %v8848_v3 = vmul.f32 %v12434_v56, %v14619_v28  ;;  %v8850_v30 = vmul.f32 %v12436_v35, %v14625_v1  ;;  %v8945_v47 = vsel %vm51_vm1, %v8869_v20, 0.0 }
0x1cf4   :  { %v8870_v42 = vmul.f32 %v14682_v58, %v8844_v49  ;;  %v8871_v8 = vmul.f32 %v14682_v58, %v8846_v41  ;;  %v8736_v55 = vadd.f32 %v8735_v12, %v8734_v61  ;;  %v8748_v13 = vadd.f32 %v8747_v0, %v8746_v45  ;;  %v14700_v2 = vpop.eup %12439 }
0x1cf5   :  { %v8934_v43 = vrot.slane %v8933_v54, 2  ;;  %v8940_v63 = vadd.f32 %v8939_v18, %v8938_v32  ;;  %v8743_v48 = vadd.f32 %v8742_v5, %v8741_v34  ;;  %v8946_v24 = vrot.slane %v8945_v47, 4 }
0x1cf6   :  { %12445 = vrcp.f32 %v8729_v38  ;;  %v8753_v51 = vadd.f32 %v8752_v29, %v8751_v9  ;;  %v8852_v28 = vmul.f32 %v12438_v40, %v14632_v36  ;;  %v8872_v1 = vmul.f32 %v14682_v58, %v8848_v3 }
0x1cf7   :  { %v14705_v23 = vmul.f32 %v14682_v58, %v8850_v30  ;;  %v8952_v59 = vsel %vm51_vm1, %v8870_v42, 0.0  ;;  %v8959_v26 = vsel %vm51_vm1, %v8871_v8, 0.0  ;;  %12447 = vrcp.f32 %v8736_v55 }
0x1cf8   :  { %v8749_v33 = vrot.slane %v8748_v13, 1  ;;  %v8935_v22 = vadd.f32 %v8934_v43, %v8933_v54  ;;  %v8941_v45 = vrot.slane %v8940_v63, 2  ;;  %12449 = vrcp.f32 %v8743_v48 }
0x1cf9   :  { %v8947_v25 = vadd.f32 %v8946_v24, %v8945_v47  ;;  %v8754_v53 = vrot.slane %v8753_v51, 2  ;;  %v8758_v31 = vsel %vm51_vm1, %v14700_v2, 0.0  ;;  %v8953_v14 = vrot.slane %v8952_v59, 4 }
0x1cfa   :  { %v12442_v27 = vpop.eup %12441  ;;  %v8750_v36 = vadd.f32 %v8749_v33, %v8748_v13  ;;  %v8759_v34 = vrot.slane %v8758_v31, 4  ;;  %v8960_v7 = vrot.slane %v8959_v26, 4  ;;  %v14715_v16 = vsel %vm51_vm1, %v8872_v1, 0.0 }
0x1cfb   :  { %v8822_v61 = vmul.f32 %v12442_v27, %v14655_v15  ;;  %v12444_v4 = vpop.eup %12443  ;;  %v8755_v39 = vadd.f32 %v8754_v53, %v8753_v51  ;;  %v8942_v15 = vadd.f32 %v8941_v45, %v8940_v63  ;;  %v8874_v11 = vmul.f32 %v14682_v58, %v8852_v28 }
0x1cfc   :  { %v8824_v9 = vmul.f32 %v12444_v4, %v14657_v19  ;;  %12451 = vrcp.f32 %v8750_v36  ;;  %v8760_v0 = vadd.f32 %v8759_v34, %v8758_v31  ;;  %v8948_v62 = vrot.slane %v8947_v25, 2 }
0x1cfd   :  { %v8859_v17 = vmul.f32 %v14526_v44, %v8822_v61  ;;  %v8756_v19 = vrot.slane %v8755_v39, 1  ;;  %v8936_v56 = vrot.slane %v8935_v22, 1  ;;  %v8954_v49 = vadd.f32 %v8953_v14, %v8952_v59 }
0x1cfe   :  { %v8860_v57 = vmul.f32 %v14526_v44, %v8824_v9  ;;  %v8761_v20 = vrot.slane %v8760_v0, 2  ;;  %v8967_v54 = vrot.slane %v14715_v16, 4  ;;  %v8943_v18 = vrot.slane %v8942_v15, 1 }
0x1cff   :  { %v8875_v50 = vsel %vm51_vm1, %v8859_v17, 0.0  ;;  %v8757_v29 = vadd.f32 %v8756_v19, %v8755_v39  ;;  %v14722_v38 = vadd.f32 %v8960_v7, %v8959_v26  ;;  %v8949_v30 = vadd.f32 %v8948_v62, %v8947_v25 }
0x1d00   :  { %v8876_v12 = vrot.slane %v8875_v50, 4  ;;  %v8882_v41 = vsel %vm51_vm1, %v8860_v57, 0.0  ;;  %v12446_v35 = vpop.eup %12445  ;;  %v8762_v58 = vadd.f32 %v8761_v20, %v8760_v0  ;;  %v8955_v55 = vrot.slane %v8954_v49, 2 }
0x1d01   :  { %v8883_v5 = vrot.slane %v8882_v41, 4  ;;  %v8826_v40 = vmul.f32 %v12446_v35, %v14661_v6  ;;  %v12448_v3 = vpop.eup %12447  ;;  %12453 = vrcp.f32 %v8757_v29  ;;  %v8937_v28 = vadd.f32 %v8936_v56, %v8935_v22 }
0x1d02   :  { %v8877_v32 = vadd.f32 %v8876_v12, %v8875_v50  ;;  %v12450_v8 = vpop.eup %12449  ;;  %v8828_v13 = vmul.f32 %v12448_v3, %v14665_v21  ;;  %v8763_v63 = vrot.slane %v8762_v58, 1  ;;  %v8944_v59 = vadd.f32 %v8943_v18, %v8942_v15 }
0x1d03   :  { %v8884_v42 = vadd.f32 %v8883_v5, %v8882_v41  ;;  %v8861_v43 = vmul.f32 %v14526_v44, %v8826_v40  ;;  %v8830_v48 = vmul.f32 %v12450_v8, %v14669_v60  ;;  %v8950_v21 = vrot.slane %v8949_v30, 1 }
0x1d04   :  { %v8878_v47 = vrot.slane %v8877_v32, 2  ;;  %v8862_v6 = vmul.f32 %v14526_v44, %v8828_v13  ;;  %v8764_v27 = vadd.f32 %v8763_v63, %v8762_v58  ;;  %v8956_v53 = vadd.f32 %v8955_v55, %v8954_v49 }
0x1d05   :  { %v8885_v24 = vrot.slane %v8884_v42, 2  ;;  %v8889_v1 = vsel %vm51_vm1, %v8861_v43, 0.0  ;;  %v8863_v33 = vmul.f32 %v14526_v44, %v8830_v48  ;;  %v8962_v31 = vrot.slane %v14722_v38, 2 }
0x1d06   :  { %v8879_v51 = vadd.f32 %v8878_v47, %v8877_v32  ;;  %v12452_v26 = vpop.eup %12451  ;;  %v8890_v45 = vrot.slane %v8889_v1, 4  ;;  %v8896_v4 = vsel %vm51_vm1, %v8862_v6, 0.0  ;;  %12455 = vrcp.f32 %v8764_v27 }
0x1d07   :  { %v8886_v61 = vadd.f32 %v8885_v24, %v8884_v42  ;;  %v8832_v25 = vmul.f32 %v12452_v26, %v14675_v52  ;;  %v8897_v22 = vrot.slane %v8896_v4, 4  ;;  %v8903_v17 = vsel %vm51_vm1, %v8863_v33, 0.0 }
0x1d08   :  { %v8880_v60 = vrot.slane %v8879_v51, 1  ;;  %v8891_v36 = vadd.f32 %v8890_v45, %v8889_v1  ;;  %v8973_v34 = vsel %vm51_vm1, %v14705_v23, 0.0  ;;  %v8904_v15 = vrot.slane %v8903_v17, 4 }
0x1d09   :  { %v8864_v14 = vmul.f32 %v14526_v44, %v8832_v25  ;;  %v8887_v9 = vrot.slane %v8886_v61, 1  ;;  %v8898_v39 = vadd.f32 %v8897_v22, %v8896_v4  ;;  %v8980_v52 = vsel %vm51_vm1, %v8874_v11, 0.0 }
0x1d0a   :  { %v8892_v7 = vrot.slane %v8891_v36, 2  ;;  %v8881_v57 = vadd.f32 %v8880_v60, %v8879_v51  ;;  %v8968_v0 = vadd.f32 %v8967_v54, %v14715_v16  ;;  %v8974_v62 = vrot.slane %v8973_v34, 4 }
0x1d0b   :  { %v8910_v50 = vsel %vm51_vm1, %v8864_v14, 0.0  ;;  %v12454_v12 = vpop.eup %12453  ;;  %v8899_v56 = vrot.slane %v8898_v39, 2  ;;  %v8905_v49 = vadd.f32 %v8904_v15, %v8903_v17  ;;  %v8888_v35 = vadd.f32 %v8887_v9, %v8886_v61 }
0x1d0c   :  { %v8893_v19 = vadd.f32 %v8892_v7, %v8891_v36  ;;  %v8911_v41 = vrot.slane %v8910_v50, 4  ;;  %v8834_v20 = vmul.f32 %v12454_v12, %v14679_v10  ;;  %v8975_v23 = vadd.f32 %v8974_v62, %v8973_v34 }
0x1d0d   :  { %v8981_v32 = vrot.slane %v8980_v52, 4  ;;  %v8900_v29 = vadd.f32 %v8899_v56, %v8898_v39  ;;  %v8906_v18 = vrot.slane %v8905_v49, 2  ;;  %v8951_v58 = vadd.f32 %v8950_v21, %v8949_v30 }
0x1d0e   :  { %v8894_v5 = vrot.slane %v8893_v19, 1  ;;  %v8912_v11 = vadd.f32 %v8911_v41, %v8910_v50  ;;  %v8865_v40 = vmul.f32 %v14526_v44, %v8834_v20  ;;  %v8957_v3 = vrot.slane %v8956_v53, 1 }
0x1d0f   :  { %v8907_v54 = vadd.f32 %v8906_v18, %v8905_v49  ;;  %v8969_v42 = vrot.slane %v8968_v0, 2  ;;  %v8901_v55 = vrot.slane %v8900_v29, 1  ;;  %v9003_v10 = vsel %vm793_vm2, %v8888_v35, %v8881_v57 }
0x1d10   :  { %v8895_v16 = vadd.f32 %v8894_v5, %v8893_v19  ;;  %v8913_v47 = vrot.slane %v8912_v11, 2  ;;  %v12456_v8 = vpop.eup %12455  ;;  %v8917_v13 = vsel %vm51_vm1, %v8865_v40, 0.0  ;;  %v8963_v43 = vadd.f32 %v8962_v31, %v14722_v38 }
0x1d11   :  { %v8836_v63 = vmul.f32 %v12456_v8, %v14700_v2  ;;  %v8976_v48 = vrot.slane %v8975_v23, 2  ;;  %v8982_v24 = vadd.f32 %v8981_v32, %v8980_v52  ;;  %v9010_v51 = vsel %vm793_vm2, %v8944_v59, %v8937_v28 }
0x1d12   :  { %v8914_v30 = vadd.f32 %v8913_v47, %v8912_v11  ;;  %v8918_v6 = vrot.slane %v8917_v13, 4  ;;  %v8908_v27 = vrot.slane %v8907_v54, 1  ;;  %v9004_v26 = vsel %vm795_vm3, %v8895_v16, %v9003_v10  ;;  %v15312_v11 = vld [vmem:[#allocation16_spill] sm:$0xff] }
0x1d13   :  { %v8866_v1 = vmul.f32 %v14526_v44, %v8836_v63  ;;  %v8970_v33 = vadd.f32 %v8969_v42, %v8968_v0  ;;  %v8902_v45 = vadd.f32 %v8901_v55, %v8900_v29  ;;  %v8964_v21 = vrot.slane %v8963_v43, 1  ;;  %v15314_v42 = vld [vmem:[#allocation18_spill] sm:$0xff] }
0x1d14   :  { %v8919_v61 = vadd.f32 %v8918_v6, %v8917_v13  ;;  %v9011_v4 = vsel %vm795_vm3, %v8951_v58, %v9010_v51  ;;  %v8958_v2 = vadd.f32 %v8957_v3, %v8956_v53  ;;  %v8977_v25 = vadd.f32 %v8976_v48, %v8975_v23  ;;  %v9021_v58 = vpop.permute.xlu0 %9020  ;;  %v15315_v13 = vld [vmem:[#allocation17_spill] sm:$0xff] }
0x1d15   :  { %v8924_v38 = vsel %vm51_vm1, %v8866_v1, 0.0  ;;  %v8983_v60 = vrot.slane %v8982_v24, 2  ;;  %v8915_v36 = vrot.slane %v8914_v30, 1  ;;  %v9005_v22 = vsel %vm797_vm4, %v8902_v45, %v9004_v26  ;;  %v11916_v45 = vld [vmem:[#allocation2 + $0x30] ss:$0 sm:$0xff] }
0x1d16   :  { %v8920_v28 = vrot.slane %v8919_v61, 2  ;;  %v8925_v59 = vrot.slane %v8924_v38, 4  ;;  %v8909_v44 = vadd.f32 %v8908_v27, %v8907_v54  ;;  %v8971_v31 = vrot.slane %v8970_v33, 1 }
0x1d17   :  { %v9012_v14 = vsel %vm797_vm4, %v8958_v2, %v9011_v4  ;;  %v8965_v34 = vadd.f32 %v8964_v21, %v8963_v43  ;;  %v8978_v39 = vrot.slane %v8977_v25, 1  ;;  %v8984_v15 = vadd.f32 %v8983_v60, %v8982_v24 }
0x1d18   :  { %v8921_v9 = vadd.f32 %v8920_v28, %v8919_v61  ;;  %v8926_v17 = vadd.f32 %v8925_v59, %v8924_v38  ;;  %v9006_v7 = vsel %vm799_vm5, %v8909_v44, %v9005_v22  ;;  %v8916_v52 = vadd.f32 %v8915_v36, %v8914_v30  ;;  %v11917_v61 = vld [vmem:[#allocation2 + $0x2c] ss:$0 sm:$0xff]  ;;  %v12542_v38 = vld [vmem:[#allocation2 + $0x28] sm:$0xf] }
0x1d19   :  { %v9013_v50 = vsel %vm799_vm5, %v8965_v34, %v9012_v14  ;;  %v8972_v0 = vadd.f32 %v8971_v31, %v8970_v33  ;;  %v8985_v56 = vrot.slane %v8984_v15, 1  ;;  %v8979_v20 = vadd.f32 %v8978_v39, %v8977_v25 }
0x1d1a   :  { %v8922_v53 = vrot.slane %v8921_v9, 1  ;;  %v8927_v57 = vrot.slane %v8926_v17, 2  ;;  %v9007_v12 = vsel %vm801_vm6, %v8916_v52, %v9006_v7  ;;  %v15313_v40 = vmov 0.0  }
0x1d1b   :  { %v9014_v49 = vsel %vm801_vm6, %v8972_v0, %v9013_v50  ;;  %v8986_v5 = vadd.f32 %v8985_v56, %v8984_v15  ;;  %v15316_v56 = vld [vmem:[#allocation11_spill] sm:$0xff] }
0x1d1c   :  { %v8928_v62 = vadd.f32 %v8927_v57, %v8926_v17  ;;  %v8923_v19 = vadd.f32 %v8922_v53, %v8921_v9  ;;  %v9015_v32 = vsel %vm803_vm7, %v8979_v20, %v9014_v49 }
0x1d1d   :  { %v9016_v18 = vsel %vm805_vm8, %v8986_v5, %v9015_v32 }
0x1d1e   :  { %v8929_v41 = vrot.slane %v8928_v62, 1  ;;  %v9008_v35 = vsel %vm803_vm7, %v8923_v19, %v9007_v12 }
0x1d20   :  { %v8930_v23 = vadd.f32 %v8929_v41, %v8928_v62 }
0x1d22   :  { %v9009_v29 = vsel %vm805_vm8, %v8930_v23, %v9008_v35 }
0x1d23   :  { %12058 = vmatprep.mubr.msk.f32.mxu0 %vm51_vm1, %v9009_v29 }
0x1d24   :  { %12059 = vmatmul.mubr.msk.f32.vlgmr.msra.gmra.mrb[106].mxu0 %vm51_vm1, %v9016_v18 }
0x1d25   :  { %12068 = vmatprep.mubr.msk.f32.mxu0 %vm51_vm1, %v13942_v37  ;;  %12067 = vmatpush3.msk.msra.mxu0 %vm58_vm0, %v14486_v46 }
0x1d28   :  { %12069 = vmatmul.mubr.msk.f32.vlgmr.msra.gmra.mrb[108].mxu0 %vm51_vm1, %v15312_v11 }
0x1d29   :  { %10231 = vmatprep.mubr.f32.mxu0 %v15313_v40 }
0x1df7   :  { %v12060_v3 = vpop.f32.mrb[106].mxu0 }
0x1df8   :  { %v9101_v16 = vadd.f32 %v12060_v3, %v9021_v58  ;;  %v9095_v54 = vpop.f32.mrb[107].mxu0 }
0x1df9   :  { %v9096_v47 = vadd.f32 %v9095_v54, %v9021_v58  ;;  %v15317_v54 = vld [vmem:[#allocation12_spill] sm:$0xff] }
0x1dfa   :  { %v9105_v8 = vadd.f32 %v9101_v16, %v15314_v42 }
0x1dfb   :  { %v12070_v55 = vpop.f32.mrb[108].mxu0  ;;  %v9104_v10 = vadd.f32 %v9096_v47, %v15315_v13 }
0x1dfc   :  { %v9305_v43 = vpop.f32.mrb[109].mxu0  ;;  %v9110_v37 = vsel %vm51_vm1, %v9105_v8, 0.0  ;;  %v9311_v4 = vadd.f32 %v12070_v55, %v11917_v61 }
0x1dfd   :  { %9111 = vadd.xlane.f32.xlu0 %v9110_v37  ;;  %v9107_v46 = vsel %vm51_vm1, %v9104_v10, 0.0  ;;  %v9306_v21 = vadd.f32 %v11917_v61, %v9305_v43 }
0x1dfe   :  { %9108 = vadd.xlane.f32.xlu1 %v9107_v46 }
0x1e8a   :  { %v9112_v63 = vpop.xlane.xlu0 %9111 }
0x1e8b   :  { %v9114_v48 = vmul.f32 0.25, %v9112_v63  ;;  %v9109_v24 = vpop.xlane.xlu1 %9108 }
0x1e8c   :  { %v9113_v51 = vmul.f32 0.25, %v9109_v24 }
0x1e8d   :  { %v9116_v30 = vsub.f32 %v9105_v8, %v9114_v48 }
0x1e8e   :  { %v9115_v6 = vsub.f32 %v9104_v10, %v9113_v51 }
0x1e8f   :  { %v9118_v1 = vmul.f32 %v9116_v30, %v9116_v30 }
0x1e90   :  { %v9117_v27 = vmul.f32 %v9115_v6, %v9115_v6 }
0x1e91   :  { %v9122_v26 = vsel %vm51_vm1, %v9118_v1, 0.0 }
0x1e92   :  { %9123 = vadd.xlane.f32.xlu1 %v9122_v26  ;;  %v9119_v33 = vsel %vm51_vm1, %v9117_v27, 0.0 }
0x1e93   :  { %9120 = vadd.xlane.f32.xlu0 %v9119_v33 }
0x1ea3   :  { %9143 = vrot.lane.b32.xlu1 %v11916_v45, %s12635_s10 }
0x1ea7   :  { %9496 = vrot.lane.b32.xlu1 %v9306_v21, %s12621_s15 }
0x1ea9   :  { %9138 = vrot.lane.b32.xlu0 %v11916_v45, %s12636_s11 }
0x1eab   :  { %9822 = vrot.lane.b32.xlu1 %v9306_v21, %s12620_s2 }
0x1ead   :  { %9498 = vrot.lane.b32.xlu0 %v9311_v4, %s12621_s15 }
0x1eaf   :  { %9986 = vrot.lane.b32.xlu1 %v12542_v38, %s12622_s16 }
0x1eb1   :  { %9824 = vrot.lane.b32.xlu0 %v9311_v4, %s12620_s2 }
0x1eb5   :  { %9989 = vrot.lane.b32.xlu0 %v11917_v61, %s12622_s16 }
0x1f1f   :  { %v9124_v2 = vpop.xlane.xlu1 %9123 }
0x1f20   :  { %v9126_v25 = vmul.f32 0.25, %v9124_v2  ;;  %v9121_v60 = vpop.xlane.xlu0 %9120 }
0x1f21   :  { %v9125_v36 = vmul.f32 0.25, %v9121_v60 }
0x1f22   :  { %v9128_v28 = vadd.f32 1e-05, %v9126_v25 }
0x1f23   :  { %v9127_v59 = vadd.f32 1e-05, %v9125_v36  ;;  %v9144_v7 = vpop.permute.xlu1 %9143 }
0x1f24   :  { %12457 = vrsqrt.f32 %v9128_v28  ;;  %v9139_v9 = vpop.permute.xlu0 %9138 }
0x1f25   :  { %12459 = vrsqrt.f32 %v9127_v59 }
0x1f27   :  { %v14791_v52 = vpop.permute.xlu1 %9496 }
0x1f28   :  { %v9499_v13 = vpop.permute.xlu0 %9498 }
0x1f2b   :  { %v14793_v53 = vpop.permute.xlu1 %9822 }
0x1f2e   :  { %v12458_v22 = vpop.eup %12457 }
0x1f2f   :  { %v12460_v44 = vpop.eup %12459  ;;  %v9132_v31 = vmul.f32 %v12458_v22, %v9116_v30  ;;  %v9987_v57 = vpop.permute.xlu1 %9986 }
0x1f30   :  { %v9131_v14 = vmul.f32 %v12460_v44, %v9115_v6  ;;  %12071 = vmatprep.subr.msk.mxu1 %vm58_vm0, %v9987_v57 }
0x1f31   :  { %v9142_v17 = vmul.f32 %v9139_v9, %v9132_v31 }
0x1f32   :  { %v9141_v34 = vmul.f32 %v9139_v9, %v9131_v14 }
0x1f33   :  { %v14785_v15 = vadd.f32 %v9144_v7, %v9142_v17 }
0x1f34   :  { %v14783_v39 = vadd.f32 %v9144_v7, %v9141_v34 }
0x1f36   :  { %12063 = vmatprep.mubr.msk.f32.mxu1 %vm51_vm1, %v14783_v39 }
0x1f37   :  { %12064 = vmatmul.mubr.msk.f32.vlgmr.msra.gmra.mrb[106].mxu1 %vm51_vm1, %v14785_v15 }
0x1f38   :  { %12072 = vmatpush3.msk.msra.mxu1 %vm58_vm0, %v9987_v57 }
0x200a   :  { %v12065_v50 = vpop.f32.mrb[106].mxu1 }
0x200b   :  { %v9236_v0 = vadd.f32 %v12065_v50, %v11917_v61  ;;  %v9230_v62 = vpop.f32.mrb[107].mxu1 }
0x200c   :  { %v9231_v12 = vadd.f32 %v11917_v61, %v9230_v62 }
0x200d   :  { %v9365_v19 = vcombine.high %v9236_v0, %v9236_v0  ;;  %v9372_v49 = vrot.slane %v9236_v0, %v15316_v56 }
0x200e   :  { %v9316_v41 = vcombine.high %v9231_v12, %v9231_v12  ;;  %v9323_v20 = vrot.slane %v9231_v12, %v15316_v56 }
0x200f   :  { %v9379_v35 = vrot.slane %v9365_v19, %v15316_v56  ;;  %v9380_v23 = vcombine.high %v9372_v49, %v9372_v49  ;;  %v9388_v32 = vrot.slane %v9372_v49, %v15316_v56 }
0x2010   :  { %v9330_v5 = vrot.slane %v9316_v41, %v15316_v56  ;;  %v9331_v29 = vcombine.high %v9323_v20, %v9323_v20  ;;  %v14803_v18 = vrot.slane %v9323_v20, %v15316_v56 }
0x2011   :  { %v9381_v11 = vcombine.high %v9379_v35, %v9379_v35  ;;  %v9395_v58 = vrot.slane %v9379_v35, %v15316_v56  ;;  %v9402_v3 = vrot.slane %v9380_v23, %v15316_v56  ;;  %v9410_v16 = vcombine.high %v9388_v32, %v9388_v32 }
0x2012   :  { %v9449_v47 = vrot.slane %v9388_v32, %v15317_v54  ;;  %v9332_v42 = vcombine.high %v9330_v5, %v9330_v5  ;;  %v14809_v8 = vrot.slane %v9330_v5, %v15316_v56  ;;  %v14812_v55 = vrot.slane %v9331_v29, %v15316_v56 }
0x2013   :  { %v9409_v10 = vrot.slane %v9381_v11, %v15316_v56  ;;  %v9411_v43 = vcombine.high %v9395_v58, %v9395_v58  ;;  %v9412_v37 = vcombine.high %v9402_v3, %v9402_v3  ;;  %v9453_v46 = vrot.slane %v9402_v3, %v15317_v54 }
0x2014   :  { %v9457_v63 = vrot.slane %v9410_v16, %v15317_v54  ;;  %v9465_v48 = vrot.slane %v9395_v58, %v15317_v54  ;;  %v14818_v24 = vmul.f32 %v9499_v13, %v9449_v47  ;;  %v14821_v51 = vrot.slane %v9332_v42, %v15316_v56 }
0x2015   :  { %v9413_v30 = vcombine.high %v9409_v10, %v9409_v10  ;;  %v9461_v6 = vrot.slane %v9412_v37, %v15317_v54  ;;  %v9469_v1 = vrot.slane %v9409_v10, %v15317_v54  ;;  %v9473_v27 = vrot.slane %v9411_v43, %v15317_v54 }
0x2016   :  { %v14826_v26 = vmul.f32 %v9499_v13, %v9453_v46  ;;  %v14828_v33 = vmul.f32 %v9499_v13, %v9457_v63  ;;  %v14830_v45 = vmul.f32 %v9499_v13, %v9465_v48  ;;  %v9574_v61 = vsel %vm51_vm1, %v14818_v24, -inf }
0x2017   :  { %v9477_v21 = vrot.slane %v9413_v30, %v15317_v54  ;;  %v14835_v4 = vmul.f32 %v9499_v13, %v9461_v6  ;;  %v14837_v38 = vmul.f32 %v9499_v13, %v9469_v1  ;;  %v14839_v2 = vmul.f32 %v9499_v13, %v9473_v27 }
0x2018   :  { %v9575_v25 = vrot.slane %v9574_v61, 4  ;;  %v9581_v60 = vsel %vm51_vm1, %v14826_v26, -inf  ;;  %v9588_v36 = vsel %vm51_vm1, %v14828_v33, -inf  ;;  %v9602_v28 = vsel %vm51_vm1, %v14830_v45, -inf }
0x2019   :  { %v14847_v59 = vmul.f32 %v9499_v13, %v9477_v21  ;;  %v9582_v22 = vrot.slane %v9581_v60, 4  ;;  %v9589_v44 = vrot.slane %v9588_v36, 4  ;;  %v9595_v31 = vsel %vm51_vm1, %v14835_v4, -inf }
0x201a   :  { %v9576_v14 = vmax.f32 %v9574_v61, %v9575_v25  ;;  %v9596_v9 = vrot.slane %v9595_v31, 4  ;;  %v9603_v17 = vrot.slane %v9602_v28, 4  ;;  %v9609_v34 = vsel %vm51_vm1, %v14837_v38, -inf }
0x201b   :  { %v9583_v7 = vmax.f32 %v9581_v60, %v9582_v22  ;;  %v9590_v57 = vmax.f32 %v9588_v36, %v9589_v44  ;;  %v9610_v50 = vrot.slane %v9609_v34, 4  ;;  %v9616_v0 = vsel %vm51_vm1, %v14839_v2, -inf }
0x201c   :  { %v9577_v62 = vrot.slane %v9576_v14, 2  ;;  %v9597_v12 = vmax.f32 %v9595_v31, %v9596_v9  ;;  %v9604_v19 = vmax.f32 %v9602_v28, %v9603_v17  ;;  %v9617_v56 = vrot.slane %v9616_v0, 4 }
0x201d   :  { %v9584_v49 = vrot.slane %v9583_v7, 2  ;;  %v9591_v41 = vrot.slane %v9590_v57, 2  ;;  %v9611_v20 = vmax.f32 %v9609_v34, %v9610_v50  ;;  %v9623_v35 = vsel %vm51_vm1, %v14847_v59, -inf }
0x201e   :  { %v9578_v23 = vmax.f32 %v9576_v14, %v9577_v62  ;;  %v9598_v32 = vrot.slane %v9597_v12, 2  ;;  %v9605_v5 = vrot.slane %v9604_v19, 2  ;;  %v9618_v29 = vmax.f32 %v9616_v0, %v9617_v56 }
0x201f   :  { %v9585_v11 = vmax.f32 %v9583_v7, %v9584_v49  ;;  %v9592_v58 = vmax.f32 %v9590_v57, %v9591_v41  ;;  %v9612_v3 = vrot.slane %v9611_v20, 2  ;;  %v9624_v16 = vrot.slane %v9623_v35, 4 }
0x2020   :  { %v9579_v47 = vrot.slane %v9578_v23, 1  ;;  %v9599_v42 = vmax.f32 %v9597_v12, %v9598_v32  ;;  %v9606_v13 = vmax.f32 %v9604_v19, %v9605_v5  ;;  %v9619_v10 = vrot.slane %v9618_v29, 2 }
0x2021   :  { %v9586_v43 = vrot.slane %v9585_v11, 1  ;;  %v9593_v37 = vrot.slane %v9592_v58, 1  ;;  %v9613_v46 = vmax.f32 %v9611_v20, %v9612_v3  ;;  %v9625_v63 = vmax.f32 %v9623_v35, %v9624_v16 }
0x2022   :  { %v9580_v48 = vmax.f32 %v9578_v23, %v9579_v47  ;;  %v9600_v30 = vrot.slane %v9599_v42, 1  ;;  %v9607_v6 = vrot.slane %v9606_v13, 1  ;;  %v9620_v1 = vmax.f32 %v9618_v29, %v9619_v10 }
0x2023   :  { %v9587_v27 = vmax.f32 %v9585_v11, %v9586_v43  ;;  %v9594_v61 = vmax.f32 %v9592_v58, %v9593_v37  ;;  %v9614_v21 = vrot.slane %v9613_v46, 1  ;;  %v9626_v25 = vrot.slane %v9625_v63, 2 }
0x2024   :  { %v9601_v60 = vmax.f32 %v9599_v42, %v9600_v30  ;;  %v9608_v36 = vmax.f32 %v9606_v13, %v9607_v6  ;;  %v9621_v28 = vrot.slane %v9620_v1, 1  ;;  %v9638_v22 = vsub.f32 %v14818_v24, %v9580_v48 }
0x2025   :  { %v9615_v44 = vmax.f32 %v9613_v46, %v9614_v21  ;;  %v9627_v31 = vmax.f32 %v9625_v63, %v9626_v25  ;;  %v9639_v14 = vsub.f32 %v14826_v26, %v9587_v27  ;;  %v9640_v9 = vsub.f32 %v14828_v33, %v9594_v61 }
0x2026   :  { %v9622_v17 = vmax.f32 %v9620_v1, %v9621_v28  ;;  %v9641_v34 = vsub.f32 %v14835_v4, %v9601_v60  ;;  %v9642_v7 = vsub.f32 %v14830_v45, %v9608_v36  ;;  %v9662_v57 = vmul.f32 1.442695, %v9638_v22 }
0x2027   :  { %v9628_v50 = vrot.slane %v9627_v31, 1  ;;  %v9643_v0 = vsub.f32 %v14837_v38, %v9615_v44  ;;  %v9664_v62 = vmul.f32 1.442695, %v9639_v14  ;;  %v9666_v12 = vmul.f32 1.442695, %v9640_v9 }
0x2028   :  { %v9644_v19 = vsub.f32 %v14839_v2, %v9622_v17  ;;  %12461 = vpow2.f32 %v9662_v57  ;;  %v9668_v24 = vmul.f32 1.442695, %v9641_v34  ;;  %v9670_v56 = vmul.f32 1.442695, %v9642_v7 }
0x2029   :  { %v9629_v49 = vmax.f32 %v9627_v31, %v9628_v50  ;;  %12463 = vpow2.f32 %v9664_v62  ;;  %v9672_v26 = vmul.f32 1.442695, %v9643_v0  ;;  %v9361_v33 = vcombine.high %v14803_v18, %v14803_v18 }
0x202a   :  { %12465 = vpow2.f32 %v9666_v12  ;;  %v9674_v4 = vmul.f32 1.442695, %v9644_v19  ;;  %v9362_v45 = vcombine.high %v14809_v8, %v14809_v8  ;;  %v9363_v38 = vcombine.high %v14812_v55, %v14812_v55 }
0x202b   :  { %v9645_v41 = vsub.f32 %v14847_v59, %v9629_v49  ;;  %12467 = vpow2.f32 %v9668_v24  ;;  %v9364_v2 = vcombine.high %v14821_v51, %v14821_v51  ;;  %v9417_v20 = vrot.slane %v14803_v18, %v15317_v54 }
0x202c   :  { %12469 = vpow2.f32 %v9670_v56  ;;  %v9421_v35 = vrot.slane %v14812_v55, %v15317_v54  ;;  %v9425_v23 = vrot.slane %v9361_v33, %v15317_v54  ;;  %v9429_v32 = vrot.slane %v9363_v38, %v15317_v54 }
0x202d   :  { %12471 = vpow2.f32 %v9672_v26  ;;  %v9676_v5 = vmul.f32 1.442695, %v9645_v41  ;;  %v9433_v59 = vrot.slane %v14809_v8, %v15317_v54  ;;  %v9437_v29 = vrot.slane %v14821_v51, %v15317_v54 }
0x202e   :  { %12473 = vpow2.f32 %v9674_v4  ;;  %v9441_v11 = vrot.slane %v9362_v45, %v15317_v54  ;;  %v9445_v18 = vrot.slane %v9364_v2, %v15317_v54  ;;  %v14886_v58 = vmul.f32 %v14791_v52, %v9417_v20 }
0x202f   :  { %12475 = vpow2.f32 %v9676_v5  ;;  %v14889_v55 = vmul.f32 %v14791_v52, %v9421_v35  ;;  %v14892_v3 = vmul.f32 %v14791_v52, %v9425_v23  ;;  %v14895_v8 = vmul.f32 %v14791_v52, %v9429_v32 }
0x2030   :  { %v14898_v51 = vmul.f32 %v14791_v52, %v9433_v59  ;;  %v14901_v16 = vmul.f32 %v14791_v52, %v9437_v29  ;;  %v14904_v47 = vmul.f32 %v14791_v52, %v9441_v11  ;;  %v9518_v42 = vsel %vm51_vm1, %v14886_v58, -inf }
0x2031   :  { %v9525_v13 = vsel %vm51_vm1, %v14889_v55, -inf  ;;  %v9532_v10 = vsel %vm51_vm1, %v14892_v3, -inf  ;;  %v9539_v43 = vsel %vm51_vm1, %v14895_v8, -inf  ;;  %v9519_v46 = vrot.slane %v9518_v42, 4 }
0x2032   :  { %v14914_v37 = vpop.eup %12461  ;;  %v9526_v63 = vrot.slane %v9525_v13, 4  ;;  %v9533_v48 = vrot.slane %v9532_v10, 4  ;;  %v9540_v30 = vrot.slane %v9539_v43, 4  ;;  %v14921_v27 = vmul.f32 %v14791_v52, %v9445_v18 }
0x2033   :  { %v14916_v6 = vpop.eup %12463  ;;  %v9734_v1 = vsel %vm51_vm1, %v14914_v37, 0.0  ;;  %v14925_v61 = vsel %vm51_vm1, %v14898_v51, -inf  ;;  %v14929_v21 = vsel %vm51_vm1, %v14901_v16, -inf  ;;  %v9520_v28 = vmax.f32 %v9518_v42, %v9519_v46 }
0x2034   :  { %v14931_v25 = vpop.eup %12465  ;;  %v9735_v60 = vrot.slane %v9734_v1, 4  ;;  %v9741_v36 = vsel %vm51_vm1, %v14916_v6, 0.0  ;;  %v14935_v22 = vmax.f32 %v9525_v13, %v9526_v63  ;;  %v14941_v14 = vmax.f32 %v9532_v10, %v9533_v48 }
0x2035   :  { %v14937_v44 = vpop.eup %12467  ;;  %v9742_v52 = vrot.slane %v9741_v36, 4  ;;  %v9748_v31 = vsel %vm51_vm1, %v14931_v25, 0.0  ;;  %v14943_v9 = vmax.f32 %v9539_v43, %v9540_v30  ;;  %v9521_v50 = vrot.slane %v9520_v28, 2 }
0x2036   :  { %v14945_v17 = vpop.eup %12469  ;;  %v9736_v34 = vadd.f32 %v9735_v60, %v9734_v1  ;;  %v9749_v7 = vrot.slane %v9748_v31, 4  ;;  %v9755_v57 = vsel %vm51_vm1, %v14937_v44, 0.0  ;;  %v9528_v24 = vrot.slane %v14935_v22, 2 }
0x2037   :  { %v14949_v0 = vpop.eup %12471  ;;  %v9743_v62 = vadd.f32 %v9742_v52, %v9741_v36  ;;  %v9756_v12 = vrot.slane %v9755_v57, 4  ;;  %v9762_v19 = vsel %vm51_vm1, %v14945_v17, 0.0 }
0x2038   :  { %v14954_v56 = vpop.eup %12473  ;;  %v9737_v49 = vrot.slane %v9736_v34, 2  ;;  %v9750_v26 = vadd.f32 %v9749_v7, %v9748_v31  ;;  %v9763_v33 = vrot.slane %v9762_v19, 4  ;;  %v9769_v4 = vsel %vm51_vm1, %v14949_v0, 0.0 }
0x2039   :  { %v14958_v45 = vpop.eup %12475  ;;  %v9744_v38 = vrot.slane %v9743_v62, 2  ;;  %v9757_v41 = vadd.f32 %v9756_v12, %v9755_v57  ;;  %v9770_v2 = vrot.slane %v9769_v4, 4  ;;  %v9776_v20 = vsel %vm51_vm1, %v14954_v56, 0.0 }
0x203a   :  { %v9738_v35 = vadd.f32 %v9737_v49, %v9736_v34  ;;  %v9751_v23 = vrot.slane %v9750_v26, 2  ;;  %v9764_v32 = vadd.f32 %v9763_v33, %v9762_v19  ;;  %v9777_v5 = vrot.slane %v9776_v20, 4 }
0x203b   :  { %v9745_v59 = vadd.f32 %v9744_v38, %v9743_v62  ;;  %v9758_v29 = vrot.slane %v9757_v41, 2  ;;  %v9771_v11 = vadd.f32 %v9770_v2, %v9769_v4  ;;  %v9783_v18 = vsel %vm51_vm1, %v14958_v45, 0.0 }
0x203c   :  { %v9739_v42 = vrot.slane %v9738_v35, 1  ;;  %v9752_v13 = vadd.f32 %v9751_v23, %v9750_v26  ;;  %v9765_v10 = vrot.slane %v9764_v32, 2  ;;  %v9778_v43 = vadd.f32 %v9777_v5, %v9776_v20 }
0x203d   :  { %v9746_v46 = vrot.slane %v9745_v59, 1  ;;  %v9759_v63 = vadd.f32 %v9758_v29, %v9757_v41  ;;  %v9772_v48 = vrot.slane %v9771_v11, 2  ;;  %v9784_v30 = vrot.slane %v9783_v18, 4 }
0x203e   :  { %v9740_v1 = vadd.f32 %v9739_v42, %v9738_v35  ;;  %v9753_v60 = vrot.slane %v9752_v13, 1  ;;  %v9766_v36 = vadd.f32 %v9765_v10, %v9764_v32  ;;  %v9779_v52 = vrot.slane %v9778_v43, 2 }
0x203f   :  { %v9747_v31 = vadd.f32 %v9746_v46, %v9745_v59  ;;  %v9760_v34 = vrot.slane %v9759_v63, 1  ;;  %v9773_v7 = vadd.f32 %v9772_v48, %v9771_v11  ;;  %v9785_v57 = vadd.f32 %v9784_v30, %v9783_v18 }
0x2040   :  { %v9754_v62 = vadd.f32 %v9753_v60, %v9752_v13  ;;  %v9767_v12 = vrot.slane %v9766_v36, 1  ;;  %v9780_v19 = vadd.f32 %v9779_v52, %v9778_v43  ;;  %12477 = vrcp.f32 %v9740_v1 }
0x2041   :  { %v9761_v49 = vadd.f32 %v9760_v34, %v9759_v63  ;;  %v9774_v26 = vrot.slane %v9773_v7, 1  ;;  %v9786_v33 = vrot.slane %v9785_v57, 2  ;;  %12479 = vrcp.f32 %v9747_v31 }
0x2042   :  { %v9768_v4 = vadd.f32 %v9767_v12, %v9766_v36  ;;  %v9781_v38 = vrot.slane %v9780_v19, 1  ;;  %12481 = vrcp.f32 %v9754_v62  ;;  %v9522_v41 = vmax.f32 %v9520_v28, %v9521_v50  ;;  %v14982_v12 = vpop.permute.xlu0 %9824 }
0x2043   :  { %v9775_v2 = vadd.f32 %v9774_v26, %v9773_v7  ;;  %12483 = vrcp.f32 %v9761_v49  ;;  %v9529_v20 = vmax.f32 %v14935_v22, %v9528_v24  ;;  %v9560_v35 = vsel %vm51_vm1, %v14904_v47, -inf }
0x2044   :  { %v14967_v23 = vadd.f32 %v9786_v33, %v9785_v57  ;;  %12485 = vrcp.f32 %v9768_v4  ;;  %v9523_v32 = vrot.slane %v9522_v41, 1  ;;  %v9535_v5 = vrot.slane %v14941_v14, 2 }
0x2045   :  { %v9782_v59 = vadd.f32 %v9781_v38, %v9780_v19  ;;  %v9530_v29 = vrot.slane %v9529_v20, 1  ;;  %v9542_v11 = vrot.slane %v14943_v9, 2  ;;  %v9547_v18 = vrot.slane %v14925_v61, 4 }
0x2046   :  { %12487 = vrcp.f32 %v9775_v2  ;;  %v9524_v28 = vmax.f32 %v9522_v41, %v9523_v32  ;;  %v9536_v50 = vmax.f32 %v14941_v14, %v9535_v5  ;;  %v9554_v22 = vrot.slane %v14929_v21, 4 }
0x2047   :  { %v9531_v24 = vmax.f32 %v9529_v20, %v9530_v29  ;;  %v9543_v42 = vmax.f32 %v14943_v9, %v9542_v11  ;;  %v9548_v13 = vmax.f32 %v14925_v61, %v9547_v18  ;;  %v9561_v10 = vrot.slane %v9560_v35, 4 }
0x2048   :  { %v9537_v43 = vrot.slane %v9536_v50, 1  ;;  %v9555_v46 = vmax.f32 %v14929_v21, %v9554_v22  ;;  %v9567_v63 = vsel %vm51_vm1, %v14921_v27, -inf  ;;  %v9630_v48 = vsub.f32 %v14886_v58, %v9524_v28 }
0x2049   :  { %v9544_v30 = vrot.slane %v9543_v42, 1  ;;  %v9549_v1 = vrot.slane %v9548_v13, 2  ;;  %v9562_v60 = vmax.f32 %v9560_v35, %v9561_v10  ;;  %v9568_v14 = vrot.slane %v9567_v63, 4 }
0x204a   :  { %v12478_v36 = vpop.eup %12477  ;;  %12489 = vrcp.f32 %v9782_v59  ;;  %v9538_v52 = vmax.f32 %v9536_v50, %v9537_v43  ;;  %v9556_v31 = vrot.slane %v9555_v46, 2  ;;  %v9631_v9 = vsub.f32 %v14889_v55, %v9531_v24 }
0x204b   :  { %v12480_v61 = vpop.eup %12479  ;;  %v9807_v34 = vmul.f32 %v12478_v36, %v14914_v37  ;;  %v9550_v7 = vmax.f32 %v9548_v13, %v9549_v1  ;;  %v9563_v21 = vrot.slane %v9562_v60, 2  ;;  %v9646_v57 = vmul.f32 1.442695, %v9630_v48 }
0x204c   :  { %v12482_v62 = vpop.eup %12481  ;;  %v9809_v58 = vmul.f32 %v12480_v61, %v14916_v6  ;;  %v9545_v19 = vmax.f32 %v9543_v42, %v9544_v30  ;;  %v9557_v49 = vmax.f32 %v9555_v46, %v9556_v31  ;;  %v9569_v26 = vmax.f32 %v9567_v63, %v9568_v14 }
0x204d   :  { %v12484_v33 = vpop.eup %12483  ;;  %v9811_v4 = vmul.f32 %v12482_v62, %v14931_v25  ;;  %v9836_v38 = vmul.f32 %v14982_v12, %v9807_v34  ;;  %v9551_v55 = vrot.slane %v9550_v7, 1  ;;  %v9564_v41 = vmax.f32 %v9562_v60, %v9563_v21 }
0x204e   :  { %v12486_v2 = vpop.eup %12485  ;;  %v9837_v37 = vmul.f32 %v14982_v12, %v9809_v58  ;;  %v9558_v20 = vrot.slane %v9557_v49, 1  ;;  %v9570_v35 = vrot.slane %v9569_v26, 2  ;;  %v9632_v32 = vsub.f32 %v14892_v3, %v9538_v52 }
0x204f   :  { %v9813_v5 = vmul.f32 %v12484_v33, %v14937_v44  ;;  %v9815_v6 = vmul.f32 %v12486_v2, %v14945_v17  ;;  %v9900_v59 = vsel %vm51_vm1, %v9836_v38, 0.0  ;;  %v9552_v29 = vmax.f32 %v9550_v7, %v9551_v55 }
0x2050   :  { %v12488_v11 = vpop.eup %12487  ;;  %v9901_v25 = vrot.slane %v9900_v59, 4  ;;  %v9907_v18 = vsel %vm51_vm1, %v9837_v37, 0.0  ;;  %v9559_v28 = vmax.f32 %v9557_v49, %v9558_v20  ;;  %v9565_v50 = vrot.slane %v9564_v41, 1 }
0x2051   :  { %v9838_v22 = vmul.f32 %v14982_v12, %v9811_v4  ;;  %v9571_v24 = vmax.f32 %v9569_v26, %v9570_v35  ;;  %v9633_v42 = vsub.f32 %v14895_v8, %v9545_v19  ;;  %v9634_v3 = vsub.f32 %v14898_v51, %v9552_v29 }
0x2052   :  { %v9908_v13 = vrot.slane %v9907_v18, 4  ;;  %v9566_v44 = vmax.f32 %v9564_v41, %v9565_v50  ;;  %v9635_v17 = vsub.f32 %v14901_v16, %v9559_v28  ;;  %12491 = vpow2.f32 %v9646_v57 }
0x2053   :  { %v9572_v10 = vrot.slane %v9571_v24, 1  ;;  %v9648_v43 = vmul.f32 1.442695, %v9631_v9  ;;  %v9650_v46 = vmul.f32 1.442695, %v9632_v32  ;;  %v9788_v63 = vrot.slane %v14967_v23, 1 }
0x2054   :  { %v12490_v48 = vpop.eup %12489  ;;  %v9902_v30 = vadd.f32 %v9901_v25, %v9900_v59  ;;  %v9636_v1 = vsub.f32 %v14904_v47, %v9566_v44  ;;  %v9652_v60 = vmul.f32 1.442695, %v9633_v42  ;;  %v9654_v14 = vmul.f32 1.442695, %v9634_v3 }
0x2055   :  { %v9573_v36 = vmax.f32 %v9571_v24, %v9572_v10  ;;  %12493 = vpow2.f32 %v9648_v43  ;;  %v9656_v8 = vmul.f32 1.442695, %v9635_v17  ;;  %v9817_v51 = vmul.f32 %v12488_v11, %v14949_v0 }
0x2056   :  { %12495 = vpow2.f32 %v9650_v46  ;;  %v9658_v52 = vmul.f32 1.442695, %v9636_v1  ;;  %v9789_v16 = vadd.f32 %v9788_v63, %v14967_v23  ;;  %v9839_v31 = vmul.f32 %v14982_v12, %v9813_v5 }
0x2057   :  { %v9637_v9 = vsub.f32 %v14921_v27, %v9573_v36  ;;  %12497 = vpow2.f32 %v9652_v60  ;;  %v9840_v61 = vmul.f32 %v14982_v12, %v9815_v6  ;;  %v9841_v47 = vmul.f32 %v14982_v12, %v9817_v51 }
0x2058   :  { %12499 = vpow2.f32 %v9654_v14  ;;  %v9819_v34 = vmul.f32 %v12490_v48, %v14954_v56  ;;  %v9903_v7 = vrot.slane %v9902_v30, 2  ;;  %v9909_v21 = vadd.f32 %v9908_v13, %v9907_v18 }
0x2059   :  { %12501 = vpow2.f32 %v9656_v8  ;;  %v9660_v0 = vmul.f32 1.442695, %v9637_v9  ;;  %v9914_v57 = vsel %vm51_vm1, %v9838_v22, 0.0  ;;  %v9921_v23 = vsel %vm51_vm1, %v9839_v31, 0.0 }
0x205a   :  { %12503 = vpow2.f32 %v9658_v52  ;;  %v9904_v62 = vadd.f32 %v9903_v7, %v9902_v30  ;;  %v9910_v58 = vrot.slane %v9909_v21, 2  ;;  %v9915_v27 = vrot.slane %v9914_v57, 4 }
0x205b   :  { %12505 = vpow2.f32 %v9660_v0  ;;  %v9922_v19 = vrot.slane %v9921_v23, 4  ;;  %v9928_v49 = vsel %vm51_vm1, %v9840_v61, 0.0  ;;  %v9935_v26 = vsel %vm51_vm1, %v9841_v47, 0.0 }
0x205c   :  { %v15010_v33 = vpop.eup %12491  ;;  %v9842_v56 = vmul.f32 %v14982_v12, %v9819_v34  ;;  %v9905_v4 = vrot.slane %v9904_v62, 1  ;;  %v9911_v38 = vadd.f32 %v9910_v58, %v9909_v21  ;;  %v9916_v55 = vadd.f32 %v9915_v27, %v9914_v57 }
0x205d   :  { %v9678_v41 = vsel %vm51_vm1, %v15010_v33, 0.0  ;;  %v9923_v2 = vadd.f32 %v9922_v19, %v9921_v23  ;;  %v9929_v37 = vrot.slane %v9928_v49, 4  ;;  %v9936_v20 = vrot.slane %v9935_v26, 4 }
0x205e   :  { %v9679_v35 = vrot.slane %v9678_v41, 4  ;;  %12507 = vrcp.f32 %v9789_v16  ;;  %v9912_v32 = vrot.slane %v9911_v38, 1  ;;  %v9917_v5 = vrot.slane %v9916_v55, 2 }
0x205f   :  { %v15015_v6 = vpop.eup %12493  ;;  %v15017_v59 = vadd.f32 %v9905_v4, %v9904_v62  ;;  %v9924_v29 = vrot.slane %v9923_v2, 2  ;;  %v15019_v11 = vadd.f32 %v9929_v37, %v9928_v49  ;;  %v15021_v25 = vadd.f32 %v9936_v20, %v9935_v26 }
0x2060   :  { %v15023_v18 = vpop.eup %12495  ;;  %v9680_v28 = vadd.f32 %v9679_v35, %v9678_v41  ;;  %v9685_v50 = vsel %vm51_vm1, %v15015_v6, 0.0  ;;  %v15027_v22 = vadd.f32 %v9917_v5, %v9916_v55  ;;  %v15030_v24 = vsel %vm51_vm1, %v9842_v56, 0.0 }
0x2061   :  { %v15032_v42 = vpop.eup %12497  ;;  %v9686_v3 = vrot.slane %v9685_v50, 4  ;;  %v9692_v13 = vsel %vm51_vm1, %v15023_v18, 0.0  ;;  %v15036_v44 = vadd.f32 %v9912_v32, %v9911_v38  ;;  %v15038_v17 = vadd.f32 %v9924_v29, %v9923_v2 }
0x2062   :  { %v15040_v10 = vpop.eup %12499  ;;  %v9681_v43 = vrot.slane %v9680_v28, 2  ;;  %v9693_v46 = vrot.slane %v9692_v13, 4  ;;  %v9699_v63 = vsel %vm51_vm1, %v15032_v42, 0.0  ;;  %v9931_v48 = vrot.slane %v15019_v11, 2 }
0x2063   :  { %v15045_v30 = vpop.eup %12501  ;;  %v9687_v1 = vadd.f32 %v9686_v3, %v9685_v50  ;;  %v9700_v60 = vrot.slane %v9699_v63, 4  ;;  %v9706_v14 = vsel %vm51_vm1, %v15040_v10, 0.0  ;;  %v9919_v36 = vrot.slane %v15027_v22, 1 }
0x2064   :  { %v15050_v8 = vpop.eup %12503  ;;  %v9682_v51 = vadd.f32 %v9681_v43, %v9680_v28  ;;  %v9694_v52 = vadd.f32 %v9693_v46, %v9692_v13  ;;  %v9707_v16 = vrot.slane %v9706_v14, 4  ;;  %v9713_v31 = vsel %vm51_vm1, %v15045_v30, 0.0 }
0x2065   :  { %v15054_v9 = vpop.eup %12505  ;;  %v9688_v61 = vrot.slane %v9687_v1, 2  ;;  %v9701_v47 = vadd.f32 %v9700_v60, %v9699_v63  ;;  %v9714_v34 = vrot.slane %v9713_v31, 4  ;;  %v9720_v7 = vsel %vm51_vm1, %v15050_v8, 0.0 }
0x2066   :  { %v9683_v21 = vrot.slane %v9682_v51, 1  ;;  %v9695_v0 = vrot.slane %v9694_v52, 2  ;;  %v9708_v57 = vadd.f32 %v9707_v16, %v9706_v14  ;;  %v9721_v23 = vrot.slane %v9720_v7, 4 }
0x2067   :  { %v9689_v62 = vadd.f32 %v9688_v61, %v9687_v1  ;;  %v9702_v58 = vrot.slane %v9701_v47, 2  ;;  %v9715_v27 = vadd.f32 %v9714_v34, %v9713_v31  ;;  %v9727_v19 = vsel %vm51_vm1, %v15054_v9, 0.0 }
0x2068   :  { %v12508_v49 = vpop.eup %12507  ;;  %v9684_v26 = vadd.f32 %v9683_v21, %v9682_v51  ;;  %v9696_v56 = vadd.f32 %v9695_v0, %v9694_v52  ;;  %v9709_v4 = vrot.slane %v9708_v57, 2  ;;  %v9722_v38 = vadd.f32 %v9721_v23, %v9720_v7 }
0x2069   :  { %v9690_v55 = vrot.slane %v9689_v62, 1  ;;  %v9703_v41 = vadd.f32 %v9702_v58, %v9701_v47  ;;  %v9716_v2 = vrot.slane %v9715_v27, 2  ;;  %v9728_v37 = vrot.slane %v9727_v19, 4 }
0x206a   :  { %v9697_v20 = vrot.slane %v9696_v56, 1  ;;  %v9710_v35 = vadd.f32 %v9709_v4, %v9708_v57  ;;  %v9723_v32 = vrot.slane %v9722_v38, 2  ;;  %12509 = vrcp.f32 %v9684_v26 }
0x206b   :  { %v9691_v5 = vadd.f32 %v9690_v55, %v9689_v62  ;;  %v9704_v29 = vrot.slane %v9703_v41, 1  ;;  %v9717_v28 = vadd.f32 %v9716_v2, %v9715_v27  ;;  %v9729_v50 = vadd.f32 %v9728_v37, %v9727_v19 }
0x206c   :  { %v9698_v3 = vadd.f32 %v9697_v20, %v9696_v56  ;;  %v9711_v13 = vrot.slane %v9710_v35, 1  ;;  %v9724_v43 = vadd.f32 %v9723_v32, %v9722_v38  ;;  %v9821_v46 = vmul.f32 %v12508_v49, %v14958_v45 }
0x206d   :  { %v9705_v63 = vadd.f32 %v9704_v29, %v9703_v41  ;;  %v9718_v1 = vrot.slane %v9717_v28, 1  ;;  %v9730_v60 = vrot.slane %v9729_v50, 2  ;;  %12511 = vrcp.f32 %v9691_v5 }
0x206e   :  { %v9712_v14 = vadd.f32 %v9711_v13, %v9710_v35  ;;  %v9725_v51 = vrot.slane %v9724_v43, 1  ;;  %12513 = vrcp.f32 %v9698_v3  ;;  %v9926_v52 = vrot.slane %v15038_v17, 1 }
0x206f   :  { %v9719_v16 = vadd.f32 %v9718_v1, %v9717_v28  ;;  %12515 = vrcp.f32 %v9705_v63  ;;  %v9731_v31 = vadd.f32 %v9730_v60, %v9729_v50  ;;  %v9843_v61 = vmul.f32 %v14982_v12, %v9821_v46 }
0x2070   :  { %12517 = vrcp.f32 %v9712_v14  ;;  %v9726_v47 = vadd.f32 %v9725_v51, %v9724_v43  ;;  %v9920_v34 = vadd.f32 %v9919_v36, %v15027_v22  ;;  %v9932_v45 = vadd.f32 %v9931_v48, %v15019_v11 }
0x2071   :  { %12519 = vrcp.f32 %v9719_v16  ;;  %v9732_v7 = vrot.slane %v9731_v31, 1  ;;  %v9938_v21 = vrot.slane %v15021_v25, 2  ;;  %v9943_v0 = vrot.slane %v15030_v24, 4 }
0x2072   :  { %12521 = vrcp.f32 %v9726_v47  ;;  %v9979_v57 = vsel %vm793_vm2, %v15036_v44, %v15017_v59  ;;  %v9949_v62 = vsel %vm51_vm1, %v9843_v61, 0.0  ;;  %v9927_v22 = vadd.f32 %v9926_v52, %v15038_v17 }
0x2073   :  { %v9733_v23 = vadd.f32 %v9732_v7, %v9731_v31  ;;  %v9944_v12 = vadd.f32 %v9943_v0, %v15030_v24  ;;  %v9933_v11 = vrot.slane %v9932_v45, 1  ;;  %v15075_v36 = vadd.f32 %v9938_v21, %v15021_v25 }
0x2074   :  { %v12510_v58 = vpop.eup %12509  ;;  %v9980_v27 = vsel %vm795_vm3, %v9920_v34, %v9979_v57  ;;  %v9950_v19 = vrot.slane %v9949_v62, 4 }
0x2075   :  { %v9791_v48 = vmul.f32 %v12510_v58, %v15010_v33  ;;  %12523 = vrcp.f32 %v9733_v23  ;;  %v9945_v44 = vrot.slane %v9944_v12, 2  ;;  %v9981_v56 = vsel %vm797_vm4, %v9927_v22, %v9980_v27 }
0x2076   :  { %v9934_v38 = vadd.f32 %v9933_v11, %v9932_v45  ;;  %v9940_v25 = vrot.slane %v15075_v36, 1  ;;  %v9951_v20 = vadd.f32 %v9950_v19, %v9949_v62 }
0x2077   :  { %v12512_v49 = vpop.eup %12511  ;;  %v9828_v59 = vmul.f32 %v14793_v53, %v9791_v48  ;;  %v15088_v5 = vadd.f32 %v9945_v44, %v9944_v12 }
0x2078   :  { %v12514_v24 = vpop.eup %12513  ;;  %v9793_v26 = vmul.f32 %v12512_v49, %v15015_v6  ;;  %v9952_v49 = vrot.slane %v9951_v20, 2 }
0x2079   :  { %v12516_v17 = vpop.eup %12515  ;;  %v9795_v4 = vmul.f32 %v12514_v24, %v15023_v18  ;;  %v9844_v33 = vsel %vm51_vm1, %v9828_v59, 0.0  ;;  %v15091_v18 = vsel %vm799_vm5, %v9934_v38, %v9981_v56 }
0x207a   :  { %v12518_v55 = vpop.eup %12517  ;;  %v9829_v41 = vmul.f32 %v14793_v53, %v9793_v26  ;;  %v9797_v2 = vmul.f32 %v12516_v17, %v15032_v42  ;;  %v9845_v37 = vrot.slane %v9844_v33, 4 }
0x207b   :  { %v12520_v35 = vpop.eup %12519  ;;  %v9799_v6 = vmul.f32 %v12518_v55, %v15040_v10  ;;  %v9830_v32 = vmul.f32 %v14793_v53, %v9795_v4 }
0x207c   :  { %v12522_v29 = vpop.eup %12521  ;;  %v9801_v28 = vmul.f32 %v12520_v35, %v15045_v30  ;;  %v9831_v50 = vmul.f32 %v14793_v53, %v9797_v2  ;;  %v9846_v3 = vadd.f32 %v9845_v37, %v9844_v33  ;;  %v9851_v42 = vsel %vm51_vm1, %v9829_v41, 0.0 }
0x207d   :  { %v9803_v13 = vmul.f32 %v12522_v29, %v15050_v8  ;;  %v9832_v43 = vmul.f32 %v14793_v53, %v9799_v6  ;;  %v9852_v10 = vrot.slane %v9851_v42, 4  ;;  %v9858_v46 = vsel %vm51_vm1, %v9830_v32, 0.0 }
0x207e   :  { %v9833_v63 = vmul.f32 %v14793_v53, %v9801_v28  ;;  %v9847_v1 = vrot.slane %v9846_v3, 2  ;;  %v9859_v60 = vrot.slane %v9858_v46, 4  ;;  %v9865_v14 = vsel %vm51_vm1, %v9831_v50, 0.0 }
0x207f   :  { %v12524_v51 = vpop.eup %12523  ;;  %v9834_v30 = vmul.f32 %v14793_v53, %v9803_v13  ;;  %v9853_v52 = vadd.f32 %v9852_v10, %v9851_v42  ;;  %v9866_v16 = vrot.slane %v9865_v14, 4  ;;  %v9872_v31 = vsel %vm51_vm1, %v9832_v43, 0.0 }
0x2080   :  { %v9805_v8 = vmul.f32 %v12524_v51, %v15054_v9  ;;  %v9848_v61 = vadd.f32 %v9847_v1, %v9846_v3  ;;  %v9860_v47 = vadd.f32 %v9859_v60, %v9858_v46  ;;  %v9873_v34 = vrot.slane %v9872_v31, 4 }
0x2081   :  { %v9854_v45 = vrot.slane %v9853_v52, 2  ;;  %v9867_v7 = vadd.f32 %v9866_v16, %v9865_v14  ;;  %v9879_v21 = vsel %vm51_vm1, %v9833_v63, 0.0  ;;  %v9886_v0 = vsel %vm51_vm1, %v9834_v30, 0.0 }
0x2082   :  { %v9835_v57 = vmul.f32 %v14793_v53, %v9805_v8  ;;  %v9849_v23 = vrot.slane %v9848_v61, 1  ;;  %v9861_v12 = vrot.slane %v9860_v47, 2  ;;  %v9874_v62 = vadd.f32 %v9873_v34, %v9872_v31 }
0x2083   :  { %v9855_v58 = vadd.f32 %v9854_v45, %v9853_v52  ;;  %v9868_v22 = vrot.slane %v9867_v7, 2  ;;  %v9880_v11 = vrot.slane %v9879_v21, 4  ;;  %v9887_v48 = vrot.slane %v9886_v0, 4 }
0x2084   :  { %v9862_v27 = vadd.f32 %v9861_v12, %v9860_v47  ;;  %v9875_v9 = vrot.slane %v9874_v62, 2  ;;  %v9893_v19 = vsel %vm51_vm1, %v9835_v57, 0.0  ;;  %v9850_v56 = vadd.f32 %v9849_v23, %v9848_v61 }
0x2085   :  { %v9856_v59 = vrot.slane %v9855_v58, 1  ;;  %v9869_v44 = vadd.f32 %v9868_v22, %v9867_v7  ;;  %v9881_v24 = vadd.f32 %v9880_v11, %v9879_v21  ;;  %v9888_v26 = vadd.f32 %v9887_v48, %v9886_v0 }
0x2086   :  { %v9863_v17 = vrot.slane %v9862_v27, 1  ;;  %v9876_v4 = vadd.f32 %v9875_v9, %v9874_v62  ;;  %v9894_v53 = vrot.slane %v9893_v19, 4  ;;  %v9953_v6 = vadd.f32 %v9952_v49, %v9951_v20 }
0x2087   :  { %v9857_v33 = vadd.f32 %v9856_v59, %v9855_v58  ;;  %v9870_v38 = vrot.slane %v9869_v44, 1  ;;  %v9882_v55 = vrot.slane %v9881_v24, 2  ;;  %v9889_v41 = vrot.slane %v9888_v26, 2 }
0x2088   :  { %v9864_v2 = vadd.f32 %v9863_v17, %v9862_v27  ;;  %v9877_v37 = vrot.slane %v9876_v4, 1  ;;  %v9895_v35 = vadd.f32 %v9894_v53, %v9893_v19  ;;  %v9947_v43 = vrot.slane %v15088_v5, 1  ;;  %v10330_v17 = vld [vmem:[#allocation5 + $0x328] sm:$0xf] }
0x2089   :  { %v9871_v32 = vadd.f32 %v9870_v38, %v9869_v44  ;;  %v9883_v29 = vadd.f32 %v9882_v55, %v9881_v24  ;;  %v9890_v28 = vadd.f32 %v9889_v41, %v9888_v26  ;;  %v9972_v50 = vsel %vm793_vm2, %v9857_v33, %v9850_v56  ;;  %v10119_v44 = vld [vmem:[#allocation5 + $0x308] sm:$0xf]  ;;  %v10121_v24 = vld [vmem:[#allocation5 + $0x318] sm:$0xf]  ;;  %v10118_v26 = vld [vmem:[#allocation5 + $0x300] sm:$0xf] }
0x208a   :  { %v9878_v3 = vadd.f32 %v9877_v37, %v9876_v4  ;;  %v9896_v42 = vrot.slane %v9895_v35, 2  ;;  %v9973_v13 = vsel %vm795_vm3, %v9864_v2, %v9972_v50  ;;  %v9941_v1 = vadd.f32 %v9940_v25, %v15075_v36  ;;  %11928 = vmatprep.subr.msk.mxu0 %vm58_vm0, %v10119_v44  ;;  %11932 = vmatprep.subr.msk.mxu1 %vm58_vm0, %v10121_v24  ;;  %v10120_v56 = vld [vmem:[#allocation5 + $0x310] sm:$0xf]  ;;  %v10332_v4 = vld [vmem:[#allocation5 + $0x338] sm:$0xf] }
0x208b   :  { %v9884_v10 = vrot.slane %v9883_v29, 1  ;;  %v9891_v46 = vrot.slane %v9890_v28, 1  ;;  %v9974_v63 = vsel %vm797_vm4, %v9871_v32, %v9973_v13  ;;  %v9954_v51 = vrot.slane %v9953_v6, 1  ;;  %11929 = vmatpush1.msk.msra.mxu0 %vm58_vm0, %v10118_v26  ;;  %v10329_v13 = vld [vmem:[#allocation5 + $0x320] sm:$0xf] }
0x208c   :  { %v9897_v20 = vadd.f32 %v9896_v42, %v9895_v35  ;;  %v9975_v60 = vsel %vm799_vm5, %v9878_v3, %v9974_v63  ;;  %v9983_v30 = vsel %vm801_vm6, %v9941_v1, %v15091_v18  ;;  %v9948_v31 = vadd.f32 %v9947_v43, %v15088_v5  ;;  %v9990_v18 = vpop.permute.xlu0 %9989  ;;  %11936 = vmatprep.subr.msk.mxu0 %vm58_vm0, %v10330_v17  ;;  %v10331_v43 = vld [vmem:[#allocation5 + $0x330] sm:$0xf]  ;;  %v10336_v63 = vld [vmem:[#allocation5 + $0x338] sm:$0xf0]  ;;  %v10333_v1 = vld [vmem:[#allocation5 + $0x320] sm:$0xf0] }
0x208d   :  { %v9885_v14 = vadd.f32 %v9884_v10, %v9883_v29  ;;  %v9892_v52 = vadd.f32 %v9891_v46, %v9890_v28  ;;  %v9955_v36 = vadd.f32 %v9954_v51, %v9953_v6  ;;  %v10334_v46 = vld [vmem:[#allocation5 + $0x328] sm:$0xf0]  ;;  %v10335_v51 = vld [vmem:[#allocation5 + $0x330] sm:$0xf0] }
0x208e   :  { %v9898_v16 = vrot.slane %v9897_v20, 1  ;;  %v9984_v34 = vsel %vm803_vm7, %v9948_v31, %v9983_v30  ;;  %v10540_v30 = vrot.slane %v10335_v51, 4  ;;  %v10124_v44 = vld [vmem:[#allocation5 + $0x310] sm:$0xf0] }
0x208f   :  { %v9976_v8 = vsel %vm801_vm6, %v9885_v14, %v9975_v60  ;;  %v9985_v45 = vsel %vm805_vm8, %v9955_v36, %v9984_v34  ;;  %v10541_v60 = vrot.slane %v10336_v63, 4  ;;  %v10538_v14 = vrot.slane %v10333_v1, 4  ;;  %v10861_v63 = vld [vmem:[#allocation5 + $0x358] sm:$0xf] }
0x2090   :  { %v9899_v61 = vadd.f32 %v9898_v16, %v9897_v20  ;;  %v9977_v47 = vsel %vm803_vm7, %v9892_v52, %v9976_v8  ;;  %v10539_v20 = vrot.slane %v10334_v46, 4  ;;  %v10123_v52 = vld [vmem:[#allocation5 + $0x308] sm:$0xf0]  ;;  %v10125_v16 = vld [vmem:[#allocation5 + $0x318] sm:$0xf0] }
0x2091   :  { %v10701_v31 = vrot.slane %v10123_v52, 4  ;;  %v10703_v8 = vrot.slane %v10125_v16, 4  ;;  %v10859_v46 = vld [vmem:[#allocation5 + $0x348] sm:$0xf] }
0x2092   :  { %v9978_v25 = vsel %vm805_vm8, %v9899_v61, %v9977_v47 }
0x2093   :  { %12073 = vmatprep.mubr.msk.f32.mxu1 %vm51_vm1, %v9978_v25  ;;  %v10338_v25 = vld [vmem:[#allocation5 + $0x3a0] ss:$8 sm:$0xf] }
0x2094   :  { %12074 = vmatmul.mubr.msk.f32.vlgmr.msra.gmra.mrb[108].mxu1 %vm51_vm1, %v9985_v45 }
0x2095   :  { %10308 = vmatprep.mubr.f32.mxu1 %v15313_v40  ;;  %11933 = vmatpush1.msk.msra.mxu1 %vm58_vm0, %v10120_v56 }
0x2096   :  { %11940 = vmatprep.subr.msk.mxu1 %vm58_vm0, %v10332_v4 }
0x2167   :  { %v12075_v5 = vpop.f32.mrb[108].mxu1 }
0x2168   :  { %v10070_v7 = vadd.f32 %v12075_v5, %v9990_v18  ;;  %v10064_v21 = vpop.f32.mrb[109].mxu1  ;;  %v10127_v5 = vld [vmem:[#allocation5 + $0x380] ss:$8 sm:$0xf] }
0x2169   :  { %v10065_v0 = vadd.f32 %v10064_v21, %v9990_v18  ;;  %v10132_v17 = vrot.slane %v10127_v5, %v15317_v54 }
0x216a   :  { %v10074_v57 = vadd.f32 %v10070_v7, %v14785_v15 }
0x216b   :  { %v10073_v23 = vadd.f32 %v10065_v0, %v14783_v39  ;;  %v15133_v39 = vld [vmem:[#allocation2 + $0x30] ss:$0 sm:$0xff]  ;;  %v10343_v0 = vrot.slane %v10338_v25, %v15317_v54 }
0x216c   :  { %v10079_v12 = vsel %vm51_vm1, %v10074_v57, 0.0 }
0x216d   :  { %10080 = vadd.xlane.f32.xlu0 %v10079_v12  ;;  %v10076_v62 = vsel %vm51_vm1, %v10073_v23, 0.0  ;;  %v15319_v12 = vld [vmem:[#allocation14_spill] sm:$0xff] }
0x216e   :  { %10077 = vadd.xlane.f32.xlu1 %v10076_v62  ;;  %v10347_v62 = vrot.slane %v10338_v25, %v15319_v12 }
0x21fa   :  { %v10081_v58 = vpop.xlane.xlu0 %10080 }
0x21fb   :  { %v10083_v22 = vmul.f32 0.25, %v10081_v58  ;;  %v10078_v11 = vpop.xlane.xlu1 %10077  ;;  %v15320_v58 = vld [vmem:[#allocation15_spill] sm:$0xff] }
0x21fc   :  { %v10082_v48 = vmul.f32 0.25, %v10078_v11  ;;  %v10136_v11 = vrot.slane %v10127_v5, %v15319_v12  ;;  %v10144_v24 = vrot.slane %v10127_v5, %v15320_v58 }
0x21fd   :  { %v10085_v27 = vsub.f32 %v10074_v57, %v10083_v22  ;;  %v15318_v57 = vld [vmem:[#allocation13_spill] sm:$0xff]  ;;  %v10355_v22 = vrot.slane %v10338_v25, %v15320_v58 }
0x21fe   :  { %v10084_v9 = vsub.f32 %v10073_v23, %v10082_v48  ;;  %v10351_v23 = vrot.slane %v10338_v25, %v15318_v57  ;;  %v10140_v4 = vrot.slane %v10127_v5, %v15318_v57  ;;  %v10858_v25 = vld [vmem:[#allocation5 + $0x340] sm:$0xf]  ;;  %v10860_v5 = vld [vmem:[#allocation5 + $0x350] sm:$0xf] }
0x21ff   :  { %v10087_v19 = vmul.f32 %v10085_v27, %v10085_v27 }
0x2200   :  { %v10086_v49 = vmul.f32 %v10084_v9, %v10084_v9 }
0x2201   :  { %v10091_v59 = vsel %vm51_vm1, %v10087_v19, 0.0 }
0x2202   :  { %10092 = vadd.xlane.f32.xlu1 %v10091_v59  ;;  %v10088_v15 = vsel %vm51_vm1, %v10086_v49, 0.0 }
0x2203   :  { %10089 = vadd.xlane.f32.xlu0 %v10088_v15 }
0x2213   :  { %10112 = vrot.lane.b32.xlu1 %v15133_v39, %s12637_s12 }
0x2219   :  { %10107 = vrot.lane.b32.xlu0 %v15133_v39, %s12638_s13 }
0x228f   :  { %v10093_v53 = vpop.xlane.xlu1 %10092 }
0x2290   :  { %v10095_v33 = vmul.f32 0.25, %v10093_v53  ;;  %v10090_v38 = vpop.xlane.xlu0 %10089 }
0x2291   :  { %v10094_v55 = vmul.f32 0.25, %v10090_v38 }
0x2292   :  { %v10097_v41 = vadd.f32 1e-05, %v10095_v33 }
0x2293   :  { %v10096_v2 = vadd.f32 1e-05, %v10094_v55  ;;  %v10113_v28 = vpop.permute.xlu1 %10112 }
0x2294   :  { %12525 = vrsqrt.f32 %v10097_v41  ;;  %v10108_v6 = vpop.permute.xlu0 %10107 }
0x2295   :  { %12527 = vrsqrt.f32 %v10096_v2 }
0x229e   :  { %v12526_v37 = vpop.eup %12525 }
0x229f   :  { %v12528_v35 = vpop.eup %12527  ;;  %v10101_v29 = vmul.f32 %v12526_v37, %v10085_v27  ;;  %v10702_v37 = vrot.slane %v10124_v44, 4 }
0x22a0   :  { %v10100_v32 = vmul.f32 %v12528_v35, %v10084_v9  ;;  %v10122_v9 = vld [vmem:[#allocation5 + $0x300] sm:$0xf0] }
0x22a1   :  { %v10111_v3 = vmul.f32 %v10108_v6, %v10101_v29  ;;  %v10700_v53 = vrot.slane %v10122_v9, 4 }
0x22a2   :  { %v10110_v50 = vmul.f32 %v10108_v6, %v10100_v32 }
0x22a3   :  { %v15151_v10 = vadd.f32 %v10113_v28, %v10111_v3 }
0x22a4   :  { %v15143_v42 = vadd.f32 %v10113_v28, %v10110_v50 }
0x22a6   :  { %11930 = vmatmul.mubr.msk.f32.vlgmr.msra.gmra.mrb[110].mxu0 %vm51_vm1, %v15143_v42  ;;  %11934 = vmatmul.mubr.msk.f32.vlgmr.msra.gmra.mrb[110].mxu1 %vm51_vm1, %v15143_v42 }
0x22a7   :  { %11937 = vmatpush1.msk.msra.mxu0 %vm58_vm0, %v10329_v13  ;;  %11941 = vmatpush1.msk.msra.mxu1 %vm58_vm0, %v10331_v43 }
0x22a8   :  { %10237 = vmatprep.mubr.f32.mxu0 %v15313_v40  ;;  %10314 = vmatprep.mubr.f32.mxu1 %v15313_v40 }
0x22a9   :  { %10546 = vmatprep.subr.mxu0 %v10539_v20  ;;  %10621 = vmatprep.subr.mxu1 %v10541_v60 }
0x22aa   :  { %11931 = vmatmul.mubr.msk.f32.gmra.mrb[112].mxu0 %vm51_vm1, %v15151_v10  ;;  %11935 = vmatmul.mubr.msk.f32.gmra.mrb[112].mxu1 %vm51_vm1, %v15151_v10 }
0x22ab   :  { %10436 = vmatprep.mubr.f32.mxu0 %v15313_v40  ;;  %10513 = vmatprep.mubr.f32.mxu1 %v15313_v40 }
0x22ae   :  { %11938 = vmatmul.mubr.msk.f32.vlgmr.msra.gmra.mrb[114].mxu0 %vm51_vm1, %v15143_v42  ;;  %11942 = vmatmul.mubr.msk.f32.vlgmr.msra.gmra.mrb[114].mxu1 %vm51_vm1, %v15143_v42 }
0x22af   :  { %10442 = vmatprep.mubr.f32.mxu0 %v15313_v40  ;;  %10519 = vmatprep.mubr.f32.mxu1 %v15313_v40 }
0x22b0   :  { %10547 = vmatpush1.xpose.msra.mxu0 %v10538_v14  ;;  %10622 = vmatpush1.xpose.msra.mxu1 %v10540_v30 }
0x22b1   :  { %10708 = vmatprep.subr.mxu0 %v10701_v31  ;;  %10783 = vmatprep.subr.mxu1 %v10703_v8 }
0x22b2   :  { %11939 = vmatmul.mubr.msk.f32.gmra.mrb[116].mxu0 %vm51_vm1, %v15151_v10  ;;  %11943 = vmatmul.mubr.msk.f32.gmra.mrb[116].mxu1 %vm51_vm1, %v15151_v10 }
0x2379   :  { %v10233_v61 = vpop.f32.mrb[110].mxu0  ;;  %v10310_v47 = vpop.f32.mrb[110].mxu1 }
0x237a   :  { %v10235_v34 = vpop.f32.mrb[111].mxu0  ;;  %v10312_v36 = vpop.f32.mrb[111].mxu1  ;;  %v10234_v60 = vadd.f32 %v10233_v61, %v10132_v17  ;;  %v10311_v14 = vadd.f32 %v10310_v47, %v10140_v4 }
0x237b   :  { %v10236_v33 = vadd.f32 %v10235_v34, %v10136_v11  ;;  %v10313_v3 = vadd.f32 %v10312_v36, %v10144_v24 }
0x237c   :  { %v10321_v34 = vmax.f32 %v10234_v60, 0.0  ;;  %v10323_v36 = vmax.f32 %v10311_v14, 0.0 }
0x237d   :  { %v15171_v45 = vpop.f32.mrb[112].mxu0  ;;  %v15173_v18 = vpop.f32.mrb[112].mxu1  ;;  %v10322_v52 = vmax.f32 %v10236_v33, 0.0  ;;  %v10324_v16 = vmax.f32 %v10313_v3, 0.0 }
0x237e   :  { %v10241_v7 = vpop.f32.mrb[113].mxu0  ;;  %v10318_v21 = vpop.f32.mrb[113].mxu1  ;;  %v10240_v61 = vadd.f32 %v15171_v45, %v10132_v17  ;;  %v10317_v47 = vadd.f32 %v15173_v18, %v10140_v4  ;;  %v10863_v45 = vld [vmem:[#allocation5 + $0x348] sm:$0xf0]  ;;  %v10865_v18 = vld [vmem:[#allocation5 + $0x358] sm:$0xf0] }
0x237f   :  { %v10242_v31 = vadd.f32 %v10241_v7, %v10136_v11  ;;  %v10319_v8 = vadd.f32 %v10318_v21, %v10144_v24  ;;  %v11070_v11 = vrot.slane %v10865_v18, 4 }
0x2380   :  { %v10325_v7 = vmax.f32 %v10240_v61, 0.0  ;;  %v10327_v21 = vmax.f32 %v10317_v47, 0.0  ;;  %v11227_v47 = vld [vmem:[#allocation5 + $0x360] sm:$0xf] }
0x2381   :  { %v10438_v48 = vpop.f32.mrb[114].mxu0  ;;  %v10515_v27 = vpop.f32.mrb[114].mxu1 }
0x2382   :  { %v10439_v19 = vadd.f32 %v10438_v48, %v10343_v0  ;;  %v10516_v49 = vadd.f32 %v10515_v27, %v10351_v23  ;;  %v10440_v59 = vpop.f32.mrb[115].mxu0  ;;  %v10517_v15 = vpop.f32.mrb[115].mxu1  ;;  %v10864_v27 = vld [vmem:[#allocation5 + $0x350] sm:$0xf0] }
0x2383   :  { %v10441_v26 = vadd.f32 %v10440_v59, %v10347_v62  ;;  %v10518_v56 = vadd.f32 %v10517_v15, %v10355_v22  ;;  %v11069_v9 = vrot.slane %v10864_v27, 4 }
0x2384   :  { %v10526_v35 = vmax.f32 %v10439_v19, 0.0  ;;  %v10528_v6 = vmax.f32 %v10516_v49, 0.0  ;;  %v11228_v19 = vld [vmem:[#allocation5 + $0x368] sm:$0xf]  ;;  %v11230_v49 = vld [vmem:[#allocation5 + $0x378] sm:$0xf] }
0x2385   :  { %v10527_v38 = vmax.f32 %v10441_v26, 0.0  ;;  %v10529_v55 = vmax.f32 %v10518_v56, 0.0  ;;  %v10444_v41 = vpop.f32.mrb[116].mxu0  ;;  %v10521_v2 = vpop.f32.mrb[116].mxu1 }
0x2386   :  { %v10445_v32 = vadd.f32 %v10444_v41, %v10343_v0  ;;  %v10522_v29 = vadd.f32 %v10521_v2, %v10351_v23  ;;  %v10446_v28 = vpop.f32.mrb[117].mxu0  ;;  %v10523_v50 = vpop.f32.mrb[117].mxu1  ;;  %v10326_v0 = vmax.f32 %v10242_v31, 0.0  ;;  %v10328_v23 = vmax.f32 %v10319_v8, 0.0 }
0x2387   :  { %v10447_v13 = vadd.f32 %v10446_v28, %v10347_v62  ;;  %v10524_v43 = vadd.f32 %v10523_v50, %v10355_v22  ;;  %10610 = vmatprep.mubr.f32.mxu0 %v10527_v38  ;;  %10685 = vmatprep.mubr.f32.mxu1 %v10529_v55  ;;  %v10862_v62 = vld [vmem:[#allocation5 + $0x340] sm:$0xf0]  ;;  %v11068_v22 = vrot.slane %v10863_v45, 4  ;;  %v11229_v45 = vld [vmem:[#allocation5 + $0x370] sm:$0xf] }
0x2388   :  { %10611 = vmatmul.mubr.f32.vlgmr.msra.gmra.mrb[118].mxu0 %v10526_v35  ;;  %10686 = vmatmul.mubr.f32.vlgmr.msra.gmra.mrb[118].mxu1 %v10528_v6  ;;  %v10530_v51 = vmax.f32 %v10445_v32, 0.0  ;;  %v10532_v30 = vmax.f32 %v10522_v29, 0.0  ;;  %v11067_v48 = vrot.slane %v10862_v62, 4  ;;  %v10867_v35 = vld [vmem:[#allocation5 + $0x3c0] ss:$8 sm:$0xf] }
0x2389   :  { %v10531_v1 = vmax.f32 %v10447_v13, 0.0  ;;  %v10533_v20 = vmax.f32 %v10524_v43, 0.0  ;;  %10709 = vmatpush1.xpose.msra.mxu0 %v10700_v53  ;;  %10784 = vmatpush1.xpose.msra.mxu1 %v10702_v37  ;;  %v10872_v13 = vrot.slane %v10867_v35, %v15317_v54  ;;  %v10880_v43 = vrot.slane %v10867_v35, %v15318_v57 }
0x238a   :  { %11944 = vmatprep.subr.msk.mxu0 %vm58_vm0, %v10859_v46  ;;  %11948 = vmatprep.subr.msk.mxu1 %vm58_vm0, %v10861_v63  ;;  %v10876_v46 = vrot.slane %v10867_v35, %v15319_v12  ;;  %v10884_v63 = vrot.slane %v10867_v35, %v15320_v58 }
0x238b   :  { %10615 = vmatprep.mubr.f32.mxu0 %v10531_v1  ;;  %10690 = vmatprep.mubr.f32.mxu1 %v10533_v20 }
0x238c   :  { %10616 = vmatmul.mubr.f32.gmra.mrb[120].mxu0 %v10530_v51  ;;  %10691 = vmatmul.mubr.f32.gmra.mrb[120].mxu1 %v10532_v30 }
0x238d   :  { %10772 = vmatprep.mubr.f32.mxu0 %v10322_v52  ;;  %10847 = vmatprep.mubr.f32.mxu1 %v10324_v16 }
0x2390   :  { %10773 = vmatmul.mubr.f32.vlgmr.msra.gmra.mrb[122].mxu0 %v10321_v34  ;;  %10848 = vmatmul.mubr.f32.vlgmr.msra.gmra.mrb[122].mxu1 %v10323_v36 }
0x2391   :  { %11945 = vmatpush1.msk.msra.mxu0 %vm58_vm0, %v10858_v25  ;;  %11949 = vmatpush1.msk.msra.mxu1 %vm58_vm0, %v10860_v5 }
0x2392   :  { %10777 = vmatprep.mubr.f32.mxu0 %v10326_v0  ;;  %10852 = vmatprep.mubr.f32.mxu1 %v10328_v23 }
0x2393   :  { %11075 = vmatprep.subr.mxu0 %v11068_v22  ;;  %11150 = vmatprep.subr.mxu1 %v11070_v11 }
0x2394   :  { %10778 = vmatmul.mubr.f32.gmra.mrb[124].mxu0 %v10325_v7  ;;  %10853 = vmatmul.mubr.f32.gmra.mrb[124].mxu1 %v10327_v21 }
0x2395   :  { %10965 = vmatprep.mubr.f32.mxu0 %v15313_v40  ;;  %11042 = vmatprep.mubr.f32.mxu1 %v15313_v40 }
0x2398   :  { %11946 = vmatmul.mubr.msk.f32.vlgmr.msra.gmra.mrb[126].mxu0 %vm51_vm1, %v15143_v42  ;;  %11950 = vmatmul.mubr.msk.f32.vlgmr.msra.gmra.mrb[126].mxu1 %vm51_vm1, %v15143_v42 }
0x2399   :  { %10971 = vmatprep.mubr.f32.mxu0 %v15313_v40  ;;  %11048 = vmatprep.mubr.f32.mxu1 %v15313_v40 }
0x239a   :  { %11076 = vmatpush1.xpose.msra.mxu0 %v11067_v48  ;;  %11151 = vmatpush1.xpose.msra.mxu1 %v11069_v9  ;;  %v11232_v9 = vld [vmem:[#allocation5 + $0x368] sm:$0xf0] }
0x239b   :  { %11952 = vmatprep.subr.msk.mxu0 %vm58_vm0, %v11228_v19  ;;  %11956 = vmatprep.subr.msk.mxu1 %vm58_vm0, %v11230_v49  ;;  %v11234_v19 = vld [vmem:[#allocation5 + $0x378] sm:$0xf0]  ;;  %v11231_v49 = vld [vmem:[#allocation5 + $0x360] sm:$0xf0] }
0x239c   :  { %11947 = vmatmul.mubr.msk.f32.gmra.mrb[128].mxu0 %vm51_vm1, %v15151_v10  ;;  %11951 = vmatmul.mubr.msk.f32.gmra.mrb[128].mxu1 %vm51_vm1, %v15151_v10 }
0x245b   :  { %v10612_v59 = vpop.f32.mrb[118].mxu0  ;;  %v10687_v15 = vpop.f32.mrb[118].mxu1 }
0x245c   :  { %v10688_v44 = vadd.f32 %v10687_v15, %v10612_v59  ;;  %v10614_v24 = vpop.f32.mrb[119].mxu0  ;;  %v10689_v26 = vpop.f32.mrb[119].mxu1  ;;  %v11437_v59 = vrot.slane %v11232_v9, 4  ;;  %v11439_v15 = vrot.slane %v11234_v19, 4 }
0x245d   :  { %v11233_v24 = vld [vmem:[#allocation5 + $0x370] sm:$0xf0] }
0x245e   :  { %v11438_v26 = vrot.slane %v11233_v24, 4 }
0x245f   :  { %v10617_v56 = vpop.f32.mrb[120].mxu0  ;;  %v10692_v17 = vpop.f32.mrb[120].mxu1 }
0x2460   :  { %v10693_v4 = vadd.f32 %v10692_v17, %v10617_v56  ;;  %v10619_v53 = vpop.f32.mrb[121].mxu0  ;;  %v10694_v33 = vpop.f32.mrb[121].mxu1 }
0x2463   :  { %v10774_v38 = vpop.f32.mrb[122].mxu0  ;;  %v10849_v55 = vpop.f32.mrb[122].mxu1 }
0x2464   :  { %v10775_v41 = vadd.f32 %v10774_v38, %v10688_v44  ;;  %v10776_v2 = vpop.f32.mrb[123].mxu0  ;;  %v10851_v37 = vpop.f32.mrb[123].mxu1  ;;  %v11436_v44 = vrot.slane %v11231_v49, 4  ;;  %v11236_v38 = vld [vmem:[#allocation5 + $0x3e0] ss:$8 sm:$0xf] }
0x2466   :  { %v15203_v6 = vadd.f32 %v10849_v55, %v10775_v41 }
0x2467   :  { %v10779_v32 = vpop.f32.mrb[124].mxu0  ;;  %v10854_v29 = vpop.f32.mrb[124].mxu1 }
0x2468   :  { %v10780_v28 = vadd.f32 %v10779_v32, %v10693_v4  ;;  %v10781_v50 = vpop.f32.mrb[125].mxu0  ;;  %v10856_v3 = vpop.f32.mrb[125].mxu1 }
0x2469   :  { %v11245_v50 = vrot.slane %v11236_v38, %v15319_v12  ;;  %v11253_v3 = vrot.slane %v11236_v38, %v15320_v58 }
0x246a   :  { %v15209_v1 = vadd.f32 %v10854_v29, %v10780_v28  ;;  %v11241_v29 = vrot.slane %v11236_v38, %v15317_v54  ;;  %v11249_v28 = vrot.slane %v11236_v38, %v15318_v57 }
0x246b   :  { %v10967_v20 = vpop.f32.mrb[126].mxu0  ;;  %v11044_v60 = vpop.f32.mrb[126].mxu1 }
0x246c   :  { %v10968_v14 = vadd.f32 %v10967_v20, %v10872_v13  ;;  %v11045_v51 = vadd.f32 %v11044_v60, %v10880_v43  ;;  %v10969_v30 = vpop.f32.mrb[127].mxu0  ;;  %v11046_v52 = vpop.f32.mrb[127].mxu1 }
0x246d   :  { %v10970_v16 = vadd.f32 %v10969_v30, %v10876_v46  ;;  %v11047_v31 = vadd.f32 %v11046_v52, %v10884_v63 }
0x246e   :  { %v11055_v25 = vmax.f32 %v10968_v14, 0.0  ;;  %v11057_v5 = vmax.f32 %v11045_v51, 0.0 }
0x246f   :  { %v11056_v8 = vmax.f32 %v10970_v16, 0.0  ;;  %v11058_v34 = vmax.f32 %v11047_v31, 0.0  ;;  %v10973_v36 = vpop.f32.mrb[128].mxu0  ;;  %v11050_v61 = vpop.f32.mrb[128].mxu1 }
0x2470   :  { %v10974_v0 = vadd.f32 %v10973_v36, %v10872_v13  ;;  %v11051_v23 = vadd.f32 %v11050_v61, %v10880_v43  ;;  %v10975_v7 = vpop.f32.mrb[129].mxu0  ;;  %v11052_v21 = vpop.f32.mrb[129].mxu1 }
0x2471   :  { %v10976_v18 = vadd.f32 %v10975_v7, %v10876_v46  ;;  %v11053_v62 = vadd.f32 %v11052_v21, %v10884_v63  ;;  %11139 = vmatprep.mubr.f32.mxu0 %v11056_v8  ;;  %11214 = vmatprep.mubr.f32.mxu1 %v11058_v34 }
0x2472   :  { %11140 = vmatmul.mubr.f32.vlgmr.msra.gmra.mrb[130].mxu0 %v11055_v25  ;;  %11215 = vmatmul.mubr.f32.vlgmr.msra.gmra.mrb[130].mxu1 %v11057_v5  ;;  %v11059_v48 = vmax.f32 %v10974_v0, 0.0  ;;  %v11061_v27 = vmax.f32 %v11051_v23, 0.0 }
0x2473   :  { %v11060_v22 = vmax.f32 %v10976_v18, 0.0  ;;  %v11062_v11 = vmax.f32 %v11053_v62, 0.0  ;;  %11953 = vmatpush1.msk.msra.mxu0 %vm58_vm0, %v11227_v47  ;;  %11957 = vmatpush1.msk.msra.mxu1 %vm58_vm0, %v11229_v45  ;;  %v11596_v62 = vld [vmem:[#allocation5 + $0x381] ss:$0 sm:$0xff] }
0x2474   :  { %11444 = vmatprep.subr.mxu0 %v11437_v59  ;;  %11519 = vmatprep.subr.mxu1 %v11439_v15 }
0x2475   :  { %11144 = vmatprep.mubr.f32.mxu0 %v11060_v22  ;;  %11219 = vmatprep.mubr.f32.mxu1 %v11062_v11 }
0x2476   :  { %11145 = vmatmul.mubr.f32.gmra.mrb[132].mxu0 %v11059_v48  ;;  %11220 = vmatmul.mubr.f32.gmra.mrb[132].mxu1 %v11061_v27 }
0x2477   :  { %11334 = vmatprep.mubr.f32.mxu0 %v15313_v40  ;;  %11411 = vmatprep.mubr.f32.mxu1 %v15313_v40 }
0x247a   :  { %11954 = vmatmul.mubr.msk.f32.vlgmr.msra.gmra.mrb[134].mxu0 %vm51_vm1, %v15143_v42  ;;  %11958 = vmatmul.mubr.msk.f32.vlgmr.msra.gmra.mrb[134].mxu1 %vm51_vm1, %v15143_v42 }
0x247b   :  { %11340 = vmatprep.mubr.f32.mxu0 %v15313_v40  ;;  %11417 = vmatprep.mubr.f32.mxu1 %v15313_v40 }
0x247c   :  { %11445 = vmatpush1.xpose.msra.mxu0 %v11436_v44  ;;  %11520 = vmatpush1.xpose.msra.mxu1 %v11438_v26 }
0x247d   :  { %12076 = vmatprep.subr.mxu0 %v15313_v40 }
0x247e   :  { %11955 = vmatmul.mubr.msk.f32.gmra.mrb[136].mxu0 %vm51_vm1, %v15151_v10  ;;  %11959 = vmatmul.mubr.msk.f32.gmra.mrb[136].mxu1 %vm51_vm1, %v15151_v10 }
0x2545   :  { %v11141_v56 = vpop.f32.mrb[130].mxu0  ;;  %v11216_v17 = vpop.f32.mrb[130].mxu1 }
0x2546   :  { %v11217_v4 = vadd.f32 %v11216_v17, %v11141_v56  ;;  %v11143_v53 = vpop.f32.mrb[131].mxu0  ;;  %v11218_v33 = vpop.f32.mrb[131].mxu1 }
0x2548   :  { %v11225_v55 = vadd.f32 %v11217_v4, %v15203_v6 }
0x2549   :  { %v11146_v41 = vpop.f32.mrb[132].mxu0  ;;  %v11221_v2 = vpop.f32.mrb[132].mxu1 }
0x254a   :  { %v11222_v37 = vadd.f32 %v11221_v2, %v11146_v41  ;;  %v11148_v35 = vpop.f32.mrb[133].mxu0  ;;  %v11223_v32 = vpop.f32.mrb[133].mxu1 }
0x254b   :  { %v11639_v35 = vld [vmem:[#allocation2 + $0x3c] sm:$0x1] }
0x254c   :  { %v11226_v13 = vadd.f32 %v11222_v37, %v15209_v1  ;;  %v11643_v32 = vrot.slane %v11639_v35, %v15317_v54 }
0x254d   :  { %v11336_v43 = vpop.f32.mrb[134].mxu0  ;;  %v11413_v46 = vpop.f32.mrb[134].mxu1 }
0x254e   :  { %v11337_v63 = vadd.f32 %v11336_v43, %v11241_v29  ;;  %v11414_v20 = vadd.f32 %v11413_v46, %v11249_v28  ;;  %v11338_v6 = vpop.f32.mrb[135].mxu0  ;;  %v11415_v60 = vpop.f32.mrb[135].mxu1 }
0x254f   :  { %v11339_v14 = vadd.f32 %v11338_v6, %v11245_v50  ;;  %v11416_v51 = vadd.f32 %v11415_v60, %v11253_v3 }
0x2550   :  { %v11424_v8 = vmax.f32 %v11337_v63, 0.0  ;;  %v11426_v57 = vmax.f32 %v11414_v20, 0.0 }
0x2551   :  { %v11425_v30 = vmax.f32 %v11339_v14, 0.0  ;;  %v11427_v52 = vmax.f32 %v11416_v51, 0.0  ;;  %v11342_v16 = vpop.f32.mrb[136].mxu0  ;;  %v11419_v31 = vpop.f32.mrb[136].mxu1 }
0x2552   :  { %v11343_v34 = vadd.f32 %v11342_v16, %v11241_v29  ;;  %v11420_v12 = vadd.f32 %v11419_v31, %v11249_v28  ;;  %v11344_v36 = vpop.f32.mrb[137].mxu0  ;;  %v11421_v58 = vpop.f32.mrb[137].mxu1  ;;  %v11729_v29 = vadd.f32 1e-05, %v11639_v35 }
0x2553   :  { %v11345_v61 = vadd.f32 %v11344_v36, %v11245_v50  ;;  %v11422_v1 = vadd.f32 %v11421_v58, %v11253_v3  ;;  %11508 = vmatprep.mubr.f32.mxu0 %v11425_v30  ;;  %11583 = vmatprep.mubr.f32.mxu1 %v11427_v52 }
0x2554   :  { %11509 = vmatmul.mubr.f32.vlgmr.msra.gmra.mrb[138].mxu0 %v11424_v8  ;;  %11584 = vmatmul.mubr.f32.vlgmr.msra.gmra.mrb[138].mxu1 %v11426_v57  ;;  %v11428_v5 = vmax.f32 %v11343_v34, 0.0  ;;  %v11430_v0 = vmax.f32 %v11420_v12, 0.0  ;;  %12529 = vrsqrt.f32 %v11729_v29 }
0x2555   :  { %v11429_v47 = vmax.f32 %v11345_v61, 0.0  ;;  %v11431_v25 = vmax.f32 %v11422_v1, 0.0 }
0x2557   :  { %11513 = vmatprep.mubr.f32.mxu0 %v11429_v47  ;;  %11588 = vmatprep.mubr.f32.mxu1 %v11431_v25 }
0x2558   :  { %11514 = vmatmul.mubr.f32.gmra.mrb[140].mxu0 %v11428_v5  ;;  %11589 = vmatmul.mubr.f32.gmra.mrb[140].mxu1 %v11430_v0 }
0x2559   :  { %12078 = vmatprep.mubr.msk.f32.mxu0 %vm12641_vm9, %v15313_v40 }
0x255e   :  { %v12530_v28 = vpop.eup %12529 }
0x255f   :  { %v11734_v50 = vrot.slane %v12530_v28, %v15317_v54 }
0x2627   :  { %v11510_v23 = vpop.f32.mrb[138].mxu0  ;;  %v11585_v7 = vpop.f32.mrb[138].mxu1 }
0x2628   :  { %v11586_v21 = vadd.f32 %v11585_v7, %v11510_v23  ;;  %v11512_v45 = vpop.f32.mrb[139].mxu0  ;;  %v11587_v18 = vpop.f32.mrb[139].mxu1 }
0x262a   :  { %v11594_v22 = vadd.f32 %v11586_v21, %v11225_v55 }
0x262b   :  { %v11515_v11 = vpop.f32.mrb[140].mxu0  ;;  %v11590_v48 = vpop.f32.mrb[140].mxu1 }
0x262c   :  { %v11591_v27 = vadd.f32 %v11590_v48, %v11515_v11  ;;  %v11517_v9 = vpop.f32.mrb[141].mxu0  ;;  %v11592_v19 = vpop.f32.mrb[141].mxu1  ;;  %v11597_v49 = vadd.f32 %v11596_v62, %v11594_v22 }
0x262e   :  { %v11595_v59 = vadd.f32 %v11591_v27, %v11226_v13  ;;  %v11599_v15 = vadd.f32 %v11597_v49, %v15143_v42 }
0x2630   :  { %v11601_v44 = vsel %vm51_vm1, %v11599_v15, 0.0  ;;  %v11598_v24 = vadd.f32 %v11596_v62, %v11595_v59 }
0x2631   :  { %11602 = vadd.xlane.f32.xlu1 %v11601_v44 }
0x2632   :  { %v11600_v26 = vadd.f32 %v11598_v24, %v15151_v10  ;;  %v11638_v10 = vld [vmem:[#allocation2 + $0x38] sm:$0xf] }
0x2633   :  { %12077 = vmatpush3.msk.msra.mxu0 %vm58_vm0, %v11638_v10 }
0x2634   :  { %v11604_v56 = vsel %vm51_vm1, %v11600_v26, 0.0 }
0x2635   :  { %11605 = vadd.xlane.f32.xlu0 %v11604_v56 }
0x26be   :  { %v11603_v17 = vpop.xlane.xlu1 %11602 }
0x26bf   :  { %v11607_v4 = vmul.f32 0.25, %v11603_v17 }
0x26c1   :  { %v11609_v53 = vsub.f32 %v11599_v15, %v11607_v4 }
0x26c2   :  { %v11606_v33 = vpop.xlane.xlu0 %11605 }
0x26c3   :  { %v11608_v38 = vmul.f32 0.25, %v11606_v33  ;;  %v11611_v55 = vmul.f32 %v11609_v53, %v11609_v53 }
0x26c5   :  { %v11610_v41 = vsub.f32 %v11600_v26, %v11608_v38  ;;  %v11613_v2 = vsel %vm51_vm1, %v11611_v55, 0.0 }
0x26c6   :  { %11614 = vadd.xlane.f32.xlu0 %v11613_v2 }
0x26c7   :  { %v11612_v42 = vmul.f32 %v11610_v41, %v11610_v41 }
0x26c9   :  { %v11616_v37 = vsel %vm51_vm1, %v11612_v42, 0.0 }
0x26ca   :  { %11617 = vadd.xlane.f32.xlu1 %v11616_v37 }
0x26db   :  { %11632 = vrot.lane.b32.xlu1 %v15133_v39, %s12639_s14 }
0x26dc   :  { %11627 = vrot.lane.b32.xlu0 %v15133_v39, %s12640_s17 }
0x26df   :  { %11725 = vrot.lane.b32.xlu1 %v11643_v32, %s12622_s16 }
0x26e0   :  { %11736 = vrot.lane.b32.xlu0 %v11734_v50, %s12625_s21 }
0x26e3   :  { %11740 = vrot.lane.b32.xlu1 %v11643_v32, %s12621_s15 }
0x26e4   :  { %11744 = vrot.lane.b32.xlu0 %v11643_v32, %s12620_s2  ;;  %s12642_s2 = smov [#allocation7]  }
0x26e5   :  { %s11756_s15 = sshll.u32 %s12642_s2, 4  ;;  %s11757_s15 = int_to_ptr.vmem [resolvable:$true] %s11756_s15 }
0x26e6   :  { %s12587_s16 = scalar_lea.vmem %s11757_s15, 32  ;;  %p12592_p3 = scmp.lt.s32.totalorder %s11757_s15, %s11757_s15 }
0x26e7   :  { %p12588_p2 = scmp.ne.s32.totalorder %s11757_s15, %s12587_s16  ;;  %p12593_p4 = scmp.lt.s32.totalorder %s12587_s16, %s12587_s16 }
0x26e9   :  { %p12594_p5 = por %p12593_p4, %p12592_p3 }
0x26eb   :  { %p12595_p6 = pnand %p12594_p5, %p12588_p2 }
0x2753   :  { %v11615_v39 = vpop.xlane.xlu0 %11614 }
0x2754   :  { %v11619_v3 = vmul.f32 0.25, %v11615_v39 }
0x2756   :  { %v11621_v13 = vadd.f32 1e-05, %v11619_v3 }
0x2757   :  { %v11618_v40 = vpop.xlane.xlu1 %11617  ;;  %v11628_v20 = vpop.permute.xlu0 %11627 }
0x2758   :  { %12531 = vrsqrt.f32 %v11621_v13  ;;  %v11620_v43 = vmul.f32 0.25, %v11618_v40 }
0x275a   :  { %v11622_v46 = vadd.f32 1e-05, %v11620_v43 }
0x275b   :  { %v11633_v51 = vpop.permute.xlu1 %11632  ;;  %v11737_v36 = vpop.permute.xlu0 %11736 }
0x275c   :  { %12533 = vrsqrt.f32 %v11622_v46 }
0x275f   :  { %v11726_v34 = vpop.permute.xlu1 %11725  ;;  %v11745_v5 = vpop.permute.xlu0 %11744 }
0x2762   :  { %v12532_v63 = vpop.eup %12531 }
0x2763   :  { %v11625_v6 = vmul.f32 %v12532_v63, %v11609_v53  ;;  %v11741_v47 = vpop.permute.xlu1 %11740 }
0x2765   :  { %v11630_v60 = vmul.f32 %v11628_v20, %v11625_v6 }
0x2766   :  { %v12534_v14 = vpop.eup %12533 }
0x2767   :  { %v11626_v30 = vmul.f32 %v12534_v14, %v11610_v41  ;;  %v11635_v52 = vadd.f32 %v11633_v51, %v11630_v60 }
0x2769   :  { %v11631_v54 = vmul.f32 %v11628_v20, %v11626_v30  ;;  %v11646_v31 = vrot.slane %v11635_v52, 7 }
0x276b   :  { %v11636_v16 = vadd.f32 %v11633_v51, %v11631_v54 }
0x276d   :  { %v11647_v8 = vrot.slane %v11636_v16, 6 }
0x276f   :  { %v11648_v57 = vsel %vm793_vm2, %v11647_v8, %v11646_v31 }
0x2770   :  { %12079 = vmatmul.mubr.msk.f32.vlgmr.msra.gmra.mrb[142].mxu0 %vm51_vm1, %v11648_v57 }
0x2843   :  { %v11720_v12 = vpop.f32.mrb[142].mxu0 }
0x2844   :  { %v11721_v58 = vadd.f32 %v11720_v12, %v11643_v32  ;;  %v12080_v61 = vpop.f32.mrb[143].mxu0 }
0x2846   :  { %v11728_v1 = vsub.f32 %v11721_v58, %v11726_v34 }
0x2848   :  { %v11739_v25 = vmul.f32 %v11737_v36, %v11728_v1 }
0x284a   :  { %v11743_v0 = vmul.f32 %v11741_v47, %v11739_v25 }
0x284c   :  { %v11747_v23 = vadd.f32 %v11745_v5, %v11743_v0 }
0x284e   :  { %11749 = vst.msk [vmem:[#allocation7] sm:$0x3] %vm11748_vm10, %v11747_v23 }
0x284f   :  { %12598 = shalt.err (!%p12595_p6)
}
0x2850   :  { %s12599_s20 = scalar_lea.hbm %s15265_s3, 32 }
0x2851   :  { %p12600_p7 = scmp.ne.s32.totalorder %s15265_s3, %s12599_s20  ;;  %p12603_p8 = scmp.lt.u32.totalorder %s12599_s20, %s15265_s3 }
0x2853   :  { %p12605_p9 = pnand %p12603_p8, %p12600_p7 }
0x2855   :  { %12608 = shalt.err (!%p12605_p9)
}
0x2856   :  { %11759 = dma.vmem_to_hbm [thread:$0]  %s11757_s15, 32, %s15265_s3, [#allocation4]  }
0x2857   :  { %12613 = dma.done.wait [#allocation4], 32  }
0x2858   :  { %12614 = vsyncadd [#allocation4], 4294967264 }
0x2859   :  { %11763 = vsyncpa [#allocation3], 1 }
0x285a   :  { %11764 = vsyncpa [#allocation6], 1 }
0x285b   :  { %11765 = vsyncpa [#allocation4], 1 }

</bundles_post_ra>
